<compile_context>
chip_gen: v7x
topology: tpu7x:2x2x1
jax: 0.10.0
libtpu: 0.0.40
codegen_flags: <defaults>
</compile_context>

<pallas_src>
import functools
import math

import jax
import jax.numpy as jnp
from jax import lax
from jax.experimental import pallas as pl
from jax.experimental.pallas import tpu as pltpu

# ----------------------------- configuration -----------------------------
BATCH = 2                  # batch
T = 16                     # time frames
FEAT = 16                  # input feature dim (input_dim)
CHANNELS = [32, 32, 32, 32, 96]          # channels[-1] == 3 * channels[1]
SCALE = [16, 8, 8, 8, 8]
KERNELS = [5, 3, 3, 3, 1]
DILATIONS = [1, 2, 3, 4, 1]
RES2NET_SCALE = 2
SE_CHANNELS = 16
ATT_CH_BASE = 16           # base model's asp attention channels
EMB = 32                   # embedding_size
NUM_CLASSES = 10
LAYERS = 9
ADAPTER_RATE = [0.25] * LAYERS
STEP_RATIO = 1.0           # adapter_steps == 0  ->  step_ratio = 1

LANE = 128
BN_EPS = 1e-5
ASP_EPS = 1e-12
ACT_DTYPE = jnp.bfloat16   # MXU operands; all accumulation / epilogues stay f32

VMEM = pltpu.MemorySpace.VMEM


def mix_coeffs(rate, step_ratio=STEP_RATIO):
    """(alpha, beta) of `alpha*base + beta*adapter`, mirroring Adapter.parallel_forward."""
    if rate == 1:
        return 1.0, float(step_ratio)
    if rate > 0:
        return 1.0 - rate * step_ratio, rate * step_ratio
    return 1.0, 1.0


MIX = [mix_coeffs(r) for r in ADAPTER_RATE]   # static Python floats (eval mode)


def _act(y, name):
    if name == "relu":
        return jnp.maximum(y, 0.0)
    if name == "sigmoid":
        return jax.nn.sigmoid(y)
    if name == "tanh":
        return jnp.tanh(y)
    return y


# ----------------------------- weight packing (plain JAX, trace-time folds) -------------
def _bn_affine(bn, eps=BN_EPS):
    s = bn["gamma"] / jnp.sqrt(bn["var"] + eps)
    return s, bn["beta"] - bn["mean"] * s


class Packer:
    """Packs every weight into 128x128 K/N-zero-padded MXU tap blocks (one bf16 slab) and
    every bias / folded-BN scale / shift into 128-lane f32 rows (one f32 slab).  Because
    the pad rows/cols are zero, garbage lanes of resident activations never corrupt dots."""

    def __init__(self):
        self._taps = []
        self._rows = []

    def tap(self, mat, rin=0, cofs=0):
        r, c = mat.shape
        blk = jnp.zeros((LANE, LANE), jnp.float32)
        blk = blk.at[rin:rin + r, cofs:cofs + c].set(mat.astype(jnp.float32))
        self._taps.append(blk)
        return len(self._taps) - 1

    def row(self, vec, cofs=0):
        v = jnp.zeros((LANE,), jnp.float32)
        v = v.at[cofs:cofs + vec.shape[0]].set(vec.astype(jnp.float32))
        self._rows.append(v)
        return len(self._rows) - 1

    def finish(self):
        w_slab = jnp.stack(self._taps).astype(ACT_DTYPE)        # (n_taps, 128, 128) bf16
        aff_slab = jnp.stack(self._rows).astype(jnp.float32)    # (n_rows, 128) f32
        return w_slab, aff_slab


def _affine_rows(pk, bias, bn_p, cout, cofs):
    b = pk.row(bias, cofs)
    if bn_p is None:
        sc = pk.row(jnp.ones((cout,), jnp.float32), cofs)
        sh = pk.row(jnp.zeros((cout,), jnp.float32), cofs)
    else:
        s, t = _bn_affine(bn_p)
        sc, sh = pk.row(s, cofs), pk.row(t, cofs)
    return b, sc, sh


def pack_conv(pk, conv_p, bn_p=None, *, k=1, d=1, rin=0, cofs=0, act="relu",
              in_chunks=None):
    """Conv1d (torch (Cout,Cin,k) layout) + bias + activation + optional eval-BN fold.
    in_chunks: [(start,size)] splits of Cin for 1x1 units whose input arrives as separate
    128-lane activation chunks (mfa / asp tdnn / fc)."""
    w = conv_p["w"]
    cout = w.shape[0]
    if in_chunks is not None:
        taps = [pk.tap(jnp.transpose(w[:, s:s + z, 0]), 0, cofs) for s, z in in_chunks]
        k = 1
    else:
        taps = [pk.tap(jnp.transpose(w[:, :, j]), rin, cofs) for j in range(k)]
    b, sc, sh = _affine_rows(pk, conv_p["b"], bn_p, cout, cofs)
    return {"taps": taps, "k": k, "d": d, "b": b, "sc": sc, "sh": sh, "act": act}


def _lin2conv(lin_p):
    return {"w": jnp.transpose(lin_p["w"])[:, :, None], "b": lin_p["b"]}


def pack_seres(pk, bp, k, d, bneck):
    # TODO(synk): only res2net_scale == 2 (the configured value) is packed; larger scales
    # would chain y_i = block(x_i + y_{i-1}) across further lane strides.
    h = bneck // RES2NET_SCALE
    blk = bp["res2net"]["blocks"][0]
    u = {"h": h,
         "tdnn1": pack_conv(pk, bp["tdnn1"]["conv"], bp["tdnn1"]["bn"]),
         "res2": pack_conv(pk, blk["conv"], blk["bn"], k=k, d=d, rin=h, cofs=h),
         "tdnn2": pack_conv(pk, bp["tdnn2"]["conv"], bp["tdnn2"]["bn"]),
         "se1": pack_conv(pk, bp["se"]["conv1"], None, act="relu"),
         "se2": pack_conv(pk, bp["se"]["conv2"], None, act="sigmoid")}
    if "shortcut" in bp:
        u["short"] = pack_conv(pk, bp["shortcut"], None, act="none")
    return u


def pack_bottle(pk, bp, k, d, in_chunks=None):
    return {"t1": pack_conv(pk, bp["tdnn1"]["conv"], bp["tdnn1"]["bn"], in_chunks=in_chunks),
            "t2": pack_conv(pk, bp["tdnn2"]["conv"], bp["tdnn2"]["bn"], k=k, d=d),
            "t3": pack_conv(pk, bp["tdnn3"]["conv"], bp["tdnn3"]["bn"])}


def pack_asp(pk, asp_p, c):
    tw = asp_p["tdnn"]["conv"]["w"]                     # (att, 3c, 1) - split x/mean/std
    att = tw.shape[0]
    u = {"wx": pk.tap(jnp.transpose(tw[:, :c, 0])),
         "wm": pk.tap(jnp.transpose(tw[:, c:2 * c, 0])),
         "ws": pk.tap(jnp.transpose(tw[:, 2 * c:, 0])),
         "fw": pk.tap(jnp.transpose(asp_p["conv"]["w"][:, :, 0])),
         "fb": pk.row(asp_p["conv"]["b"])}
    u["b"], u["sc"], u["sh"] = _affine_rows(pk, asp_p["tdnn"]["conv"]["b"],
                                            asp_p["tdnn"]["bn"], att, 0)
    return u


def prepare(params):
    """Fold eval-mode BN, transpose and zero-pad every weight into the two slabs, and
    record the static tap / affine-row indices the fused kernel uses.
    NOTE: at deployment this packing would be hoisted out of the per-call path."""
    m, a = params["model"], params["adapter"]
    pk = Packer()
    P = {}
    # block 0: base TDNNBlock  /  adapter TDNNBottleBlock (parallel branch)
    P["b0"] = pack_conv(pk, m["blocks"][0]["conv"], m["blocks"][0]["bn"],
                        k=KERNELS[0], d=DILATIONS[0])
    P["a0"] = pack_bottle(pk, a["blocks"][0], KERNELS[0], DILATIONS[0])
    # blocks 1..3: base / adapter SERes2NetBottleblocks
    P["blocks"] = []
    for i in range(1, len(CHANNELS) - 1):
        P["blocks"].append(
            {"base": pack_seres(pk, m["blocks"][i], KERNELS[i], DILATIONS[i], CHANNELS[i]),
             "ada": pack_seres(pk, a["blocks"][i], KERNELS[i], DILATIONS[i], SCALE[1])})
    # mfa (input = concat of xl[1:], kept in-kernel as three separate 128-lane chunks)
    ch3, off = [], 0
    for c in CHANNELS[1:4]:
        ch3.append((off, c))
        off += c
    P["mfa"] = pack_conv(pk, m["mfa"]["conv"], m["mfa"]["bn"], in_chunks=ch3)
    P["mfa_a"] = pack_bottle(pk, a["mfa"], KERNELS[-1], DILATIONS[-1], in_chunks=ch3)
    # attentive statistics pooling (base + adapter)
    P["asp_m"] = pack_asp(pk, m["asp"], CHANNELS[-1])
    P["asp_a"] = pack_asp(pk, a["asp"], CHANNELS[-1])
    # asp_bn (eval) and its parallel-adapter mix collapse to one exact per-channel affine
    s_m, t_m = _bn_affine(m["asp_bn"])
    if LAYERS > 6:
        s_a, t_a = _bn_affine(a["asp_bn"])
        a6, b6 = MIX[6]
        s_m, t_m = a6 * s_m + b6 * s_a, a6 * t_m + b6 * t_a
    c = CHANNELS[-1]
    P["bn_sm"], P["bn_tm"] = pk.row(s_m[:c]), pk.row(t_m[:c])
    P["bn_ss"], P["bn_ts"] = pk.row(s_m[c:]), pk.row(t_m[c:])
    # fc / classifier (input = [mean, std] chunks)
    ch2 = [(0, c), (c, c)]
    P["fc_m"] = pack_conv(pk, _lin2conv(m["fc"]), None, act="none", in_chunks=ch2)
    P["fc_a1"] = pack_conv(pk, _lin2conv(a["fc"]["l1"]), None, act="relu", in_chunks=ch2)
    P["fc_a2"] = pack_conv(pk, _lin2conv(a["fc"]["l2"]), None, act="none")
    P["cls_m"] = pack_conv(pk, _lin2conv(m["classifier"]), None, act="none")
    P["cls_a"] = pack_conv(pk, _lin2conv(a["classifier"]), None, act="none")
    w_slab, aff_slab = pk.finish()
    return P, w_slab, aff_slab


# ----------------------------- the fused Pallas kernel -----------------------------
def ecapa_adapter_kernel(x_ref, w_ref, aff_ref, logits_ref, emb_ref, *, plan):
    bsz, t, _ = x_ref.shape
    bt = bsz * t
    x = x_ref[...].reshape(bt, LANE)                 # bf16, feature lanes [0:FEAT), rest 0

    lane_idx = lax.broadcasted_iota(jnp.int32, (1, LANE), 1)
    shift_cache = {}

    def arow(i):                                      # (1, 128) f32 affine row
        return aff_ref[pl.ds(i, 1), :]

    def mm(xv, ti):                                   # bf16 MXU dot, f32 accumulation
        return jnp.dot(xv.astype(ACT_DTYPE), w_ref[ti],
                       preferred_element_type=jnp.float32)

    def shift_rows(xv, off):
        """rows -> rows shifted by `off` within each length-t batch block, zero elsewhere."""
        if off not in shift_cache:
            r = lax.broadcasted_iota(jnp.int32, (bt, bt), 0)
            c = lax.broadcasted_iota(jnp.int32, (bt, bt), 1)
            t_of_r = lax.broadcasted_iota(jnp.int32, (bsz, t, bt), 1).reshape(bt, bt)
            ok = (c == r + off) & (t_of_r + off >= 0) & (t_of_r + off < t)
            shift_cache[off] = jnp.where(ok, 1.0, 0.0).astype(ACT_DTYPE)
        return jnp.dot(shift_cache[off], xv.astype(ACT_DTYPE),
                       preferred_element_type=jnp.float32)

    def epilogue(acc, u):                             # + bias -> act -> folded eval-BN
        y = _act(acc + arow(u["b"]), u["act"])
        return y * arow(u["sc"]) + arow(u["sh"])

    def conv(xv, u):
        """Same-padded dilated Conv1d over the time axis of the (B*T, 128) rows."""
        k, d = u["k"], u["d"]
        pad_l = d * (k - 1) // 2
        acc = None
        for j, ti in enumerate(u["taps"]):
            off = j * d - pad_l
            xs = xv if off == 0 else shift_rows(xv, off)
            part = mm(xs, ti)
            acc = part if acc is None else acc + part
        return epilogue(acc, u)

    def dense(xvs, u):
        """1x1 unit over one or more 128-lane input chunks."""
        acc = None
        for xv, ti in zip(xvs, u["taps"]):
            part = mm(xv, ti)
            acc = part if acc is None else acc + part
        return epilogue(acc, u)

    def se_block(y, res, u1, u2):
        y3 = y.reshape(bsz, t, LANE)
        m = jnp.mean(y3, axis=1)                      # (B, 128) time mean
        g = dense([dense([m], u1)], u2)               # relu fc -> sigmoid fc (gate)
        return (y3 * g.reshape(bsz, 1, LANE)
                + res.reshape(bsz, t, LANE)).reshape(bt, LANE)

    def seres(x_in, u):
        res = conv(x_in, u["short"]) if "short" in u else x_in
        t1 = conv(x_in, u["tdnn1"])
        # Res2Net (scale=2): chunk0 passthrough (lanes < h), chunk1 -> TDNNBlock whose
        # weights are placed on lanes [h, 2h) so no value slicing / concat is needed.
        y1 = conv(t1, u["res2"])
        keep0 = (lane_idx < u["h"]).astype(jnp.float32)
        r2 = t1 * keep0 + y1
        t2 = conv(r2, u["tdnn2"])
        return se_block(t2, res, u["se1"], u["se2"])

    def asp(y, u):
        """Attentive statistics pooling with fused global context -> (mean, std) (B,128)."""
        y3 = y.reshape(bsz, t, LANE)
        mu = jnp.mean(y3, axis=1)
        var = jnp.mean(jnp.square(y3 - mu.reshape(bsz, 1, LANE)), axis=1)
        sd = jnp.sqrt(jnp.maximum(var, ASP_EPS))
        ctx = mm(mu, u["wm"]) + mm(sd, u["ws"])                      # per-utterance bias
        a3 = (mm(y, u["wx"]).reshape(bsz, t, LANE)
              + ctx.reshape(bsz, 1, LANE) + arow(u["b"]))
        a3 = jnp.maximum(a3, 0.0) * arow(u["sc"]) + arow(u["sh"])    # relu -> eval BN
        attn = jnp.tanh(a3).reshape(bt, LANE)
        logit = (mm(attn, u["fw"]) + arow(u["fb"])).reshape(bsz, t, LANE)
        logit = logit - jnp.max(logit, axis=1, keepdims=True)
        e = jnp.exp(logit)
        wgt = e / jnp.sum(e, axis=1, keepdims=True)                  # softmax over time
        mean = jnp.sum(wgt * y3, axis=1)
        var2 = jnp.sum(wgt * jnp.square(y3 - mean.reshape(bsz, 1, LANE)), axis=1)
        std = jnp.sqrt(jnp.maximum(var2, ASP_EPS))
        return mean, std

    # ---- block 0: base TDNNBlock / adapter TDNNBottleBlock ----
    xb0 = conv(x, plan["b0"])
    if LAYERS > 1 and SCALE[0] > 0:
        a0 = plan["a0"]
        ya = conv(conv(conv(x, a0["t1"]), a0["t2"]), a0["t3"])
        al, be = MIX[0]
        xcur = al * xb0 + be * ya
    else:
        xcur = xb0
    xl = [xcur]

    # ---- blocks 1..3: base / adapter SERes2NetBottleblock pairs ----
    for i in range(1, len(CHANNELS) - 1):
        e = plan["blocks"][i - 1]
        base = seres(xcur, e["base"])
        if LAYERS > i + 1 and SCALE[i] > 0:
            al, be = MIX[i]
            xcur = al * base + be * seres(xcur, e["ada"])
        else:
            xcur = base
        xl.append(xcur)
    last_i = len(CHANNELS) - 2       # the leftover loop index used by the torch gate

    # ---- mfa (input chunks xl[1:], never materialized as a concat) ----
    chunks = xl[1:]
    xm = dense(chunks, plan["mfa"])
    if LAYERS > 4 and SCALE[last_i] > 0:
        am = plan["mfa_a"]
        ya = conv(conv(dense(chunks, am["t1"]), am["t2"]), am["t3"])
        al, be = MIX[4]
        xm = al * xm + be * ya

    # ---- attentive statistics pooling (+ adapter mix) ----
    mean, std = asp(xm, plan["asp_m"])
    if LAYERS > 5:
        mean_a, std_a = asp(xm, plan["asp_a"])
        al, be = MIX[5]
        mean = al * mean + be * mean_a
        std = al * std + be * std_a

    # ---- asp_bn: eval BN + its adapter mix folded to one affine in prepare() ----
    mean = mean * arow(plan["bn_sm"]) + arow(plan["bn_tm"])
    std = std * arow(plan["bn_ss"]) + arow(plan["bn_ts"])

    # ---- fc (+ adapter bottleneck fc) ----
    emb = dense([mean, std], plan["fc_m"])
    if LAYERS > 7:
        ya = dense([dense([mean, std], plan["fc_a1"])], plan["fc_a2"])
        al, be = MIX[7]
        emb = al * emb + be * ya

    # ---- classifier (+ adapter classifier) ----
    logits = dense([emb], plan["cls_m"])
    if LAYERS > 8:
        al, be = MIX[8]
        logits = al * logits + be * dense([emb], plan["cls_a"])

    emb_ref[...] = emb               # lane-dense (B, 128) stores; cropped once outside
    logits_ref[...] = logits


# ----------------------------- Adapter.forward (parallel adapter, eval) ------------------
def adapter_forward(params, x):
    # TODO(synk): self.model.input_mask definition not provided; treated as identity.
    if x.ndim == 4:
        x = x[:, 0]                                   # x.squeeze(1)
    bsz = x.shape[0]
    plan, w_slab, aff_slab = prepare(params)
    # channels-last (B, T, C) end-to-end: the torch transpose to (B, C, T) is unnecessary;
    # single lane-pad of the raw input to the canonical 128-lane activation format.
    x_in = jnp.pad(x.astype(ACT_DTYPE), ((0, 0), (0, 0), (0, LANE - x.shape[-1])))
    logits_p, emb_p = pl.pallas_call(
        functools.partial(ecapa_adapter_kernel, plan=plan),
        out_shape=(jax.ShapeDtypeStruct((bsz, LANE), jnp.float32),
                   jax.ShapeDtypeStruct((bsz, LANE), jnp.float32)),
        in_specs=[pl.BlockSpec(memory_space=VMEM)] * 3,
        out_specs=(pl.BlockSpec(memory_space=VMEM),
                   pl.BlockSpec(memory_space=VMEM)),
        compiler_params=pltpu.CompilerParams(vmem_limit_bytes=32 * 1024 * 1024),
    )(x_in, w_slab, aff_slab)
    # single crop at the very end
    return logits_p[:, :NUM_CLASSES], emb_p[:, :EMB]


# ----------------------------- parameter init (deterministic) -----------------------------
def _key_iter(key):
    while True:
        key, sub = jax.random.split(key)
        yield sub


def init_conv(nk, c_in, c_out, k):
    return {"w": jax.random.normal(next(nk), (c_out, c_in, k), jnp.float32) / math.sqrt(c_in * k),
            "b": 0.02 * jax.random.normal(next(nk), (c_out,), jnp.float32)}


def init_linear(nk, c_in, c_out):
    return {"w": jax.random.normal(next(nk), (c_in, c_out), jnp.float32) / math.sqrt(c_in),
            "b": 0.02 * jax.random.normal(next(nk), (c_out,), jnp.float32)}


def init_bn(nk, c):
    return {"gamma": 1.0 + 0.1 * jax.random.normal(next(nk), (c,), jnp.float32),
            "beta": 0.1 * jax.random.normal(next(nk), (c,), jnp.float32),
            "mean": jnp.zeros((c,), jnp.float32),
            "var": jnp.ones((c,), jnp.float32)}


def init_tdnn_block(nk, c_in, c_out, k):
    return {"conv": init_conv(nk, c_in, c_out, k), "bn": init_bn(nk, c_out)}


def init_res2net(nk, c_in, c_out, r2_scale, k):
    return {"blocks": [init_tdnn_block(nk, c_in // r2_scale, c_out // r2_scale, k)
                       for _ in range(r2_scale - 1)]}


def init_se(nk, c_in, se_c, c_out):
    return {"conv1": init_conv(nk, c_in, se_c, 1), "conv2": init_conv(nk, se_c, c_out, 1)}


def init_seres2net(nk, c_in, bneck, c_out, r2_scale, se_c, k):
    p = {"tdnn1": init_tdnn_block(nk, c_in, bneck, 1),
         "res2net": init_res2net(nk, bneck, bneck, r2_scale, k),
         "tdnn2": init_tdnn_block(nk, bneck, c_out, 1),
         "se": init_se(nk, c_out, se_c, c_out)}
    if c_in != c_out:
        p["shortcut"] = init_conv(nk, c_in, c_out, 1)
    return p


def init_tdnn_bottle(nk, c_in, bneck, c_out, k):
    return {"tdnn1": init_tdnn_block(nk, c_in, bneck, 1),
            "tdnn2": init_tdnn_block(nk, bneck, bneck, k),
            "tdnn3": init_tdnn_block(nk, bneck, c_out, 1)}


def init_asp(nk, c, att_c):
    return {"tdnn": init_tdnn_block(nk, 3 * c, att_c, 1), "conv": init_conv(nk, att_c, c, 1)}


def init_params(key):
    nk = _key_iter(key)
    model = {
        "blocks": [init_tdnn_block(nk, FEAT, CHANNELS[0], KERNELS[0])] +
                  [init_seres2net(nk, CHANNELS[i - 1], CHANNELS[i], CHANNELS[i],
                                  RES2NET_SCALE, SE_CHANNELS, KERNELS[i])
                   for i in range(1, len(CHANNELS) - 1)],
        "mfa": init_tdnn_block(nk, CHANNELS[1] + CHANNELS[2] + CHANNELS[3],
                               CHANNELS[-1], KERNELS[-1]),
        "asp": init_asp(nk, CHANNELS[-1], ATT_CH_BASE),
        "asp_bn": init_bn(nk, 2 * CHANNELS[-1]),
        "fc": init_linear(nk, 2 * CHANNELS[-1], EMB),
        "classifier": init_linear(nk, EMB, NUM_CLASSES),
    }
    adapter = {
        "blocks": [init_tdnn_bottle(nk, FEAT, SCALE[0], CHANNELS[0], KERNELS[0])] +
                  [init_seres2net(nk, CHANNELS[i - 1], SCALE[1], CHANNELS[i],
                                  RES2NET_SCALE, SE_CHANNELS, KERNELS[i])
                   for i in range(1, len(CHANNELS) - 1)],
        "mfa": init_tdnn_bottle(nk, CHANNELS[-1], SCALE[2], CHANNELS[-1], KERNELS[-1]),
        "asp": init_asp(nk, CHANNELS[-1], SCALE[3]),
        "asp_bn": init_bn(nk, 2 * CHANNELS[-1]),
        "fc": {"l1": init_linear(nk, 2 * CHANNELS[-1], SCALE[4]),
               "l2": init_linear(nk, SCALE[4], EMB)},
        # self.classifier = copy.deepcopy(model.classifier)
        "classifier": jax.tree_util.tree_map(lambda a: a, model["classifier"]),
    }
    return {"model": model, "adapter": adapter}


# ----------------------------- main -----------------------------
if __name__ == "__main__":
    key = jax.random.PRNGKey(0)
    kp, kx = jax.random.split(key)
    params = init_params(kp)
    x = jax.random.normal(kx, (BATCH, 1, T, FEAT), jnp.float32)   # NCHW-style (B, 1, T, F)

    fwd = jax.jit(adapter_forward)
    logits, emb = jax.block_until_ready(fwd(params, x))

    assert logits.shape == (BATCH, NUM_CLASSES), logits.shape
    assert emb.shape == (BATCH, EMB), emb.shape
    assert bool(jnp.all(jnp.isfinite(logits))) and bool(jnp.all(jnp.isfinite(emb)))
    print("KERNEL_OK")
</pallas_src>

<mosaic_0001>
module attributes {stable_mosaic.version = 11 : i64} {
  func.func @ecapa_adapter_kernel(%arg0: memref<2x16x128xbf16, #tpu.memory_space<vmem>>, %arg1: memref<77x128x128xbf16, #tpu.memory_space<vmem>>, %arg2: memref<141x128xf32, #tpu.memory_space<vmem>>, %arg3: memref<2x128xf32, #tpu.memory_space<vmem>>, %arg4: memref<2x128xf32, #tpu.memory_space<vmem>>) attributes {dimension_semantics = [], scalar_prefetch = 0 : i64, scratch_operands = 0 : i64, tpu.core_type = #tpu.core_type<tc>} {
    %c0 = arith.constant 0 : index
    %c0_0 = arith.constant 0 : index
    %c0_1 = arith.constant 0 : index
    %0 = vector.load %arg0[%c0, %c0_0, %c0_1] : memref<2x16x128xbf16, #tpu.memory_space<vmem>>, vector<2x16x128xbf16>
    %1 = vector.shape_cast %0 : vector<2x16x128xbf16> to vector<32x128xbf16>
    %2 = tpu.iota {dimensions = array<i32: 1>} : vector<1x128xi32>
    %3 = tpu.iota {dimensions = array<i32: 0>} : vector<32x32xi32>
    %4 = tpu.iota {dimensions = array<i32: 1>} : vector<32x32xi32>
    %5 = tpu.iota {dimensions = array<i32: 1>} : vector<2x16x32xi32>
    %6 = vector.shape_cast %5 : vector<2x16x32xi32> to vector<32x32xi32>
    %c-2_i32 = arith.constant -2 : i32
    %7 = vector.broadcast %c-2_i32 : i32 to vector<32x32xi32>
    %8 = arith.addi %3, %7 : vector<32x32xi32>
    %9 = arith.cmpi eq, %4, %8 : vector<32x32xi32>
    %c-2_i32_2 = arith.constant -2 : i32
    %10 = vector.broadcast %c-2_i32_2 : i32 to vector<32x32xi32>
    %11 = arith.addi %6, %10 : vector<32x32xi32>
    %c0_i32 = arith.constant 0 : i32
    %12 = vector.broadcast %c0_i32 : i32 to vector<32x32xi32>
    %13 = arith.cmpi sge, %11, %12 : vector<32x32xi32>
    %14 = arith.andi %9, %13 : vector<32x32xi1>
    %c-2_i32_3 = arith.constant -2 : i32
    %15 = vector.broadcast %c-2_i32_3 : i32 to vector<32x32xi32>
    %16 = arith.addi %6, %15 : vector<32x32xi32>
    %c16_i32 = arith.constant 16 : i32
    %17 = vector.broadcast %c16_i32 : i32 to vector<32x32xi32>
    %18 = arith.cmpi slt, %16, %17 : vector<32x32xi32>
    %19 = arith.andi %14, %18 : vector<32x32xi1>
    %cst = arith.constant 1.000000e+00 : f32
    %cst_4 = arith.constant 0.000000e+00 : f32
    %20 = vector.broadcast %cst : f32 to vector<32x32xf32>
    %21 = vector.broadcast %cst_4 : f32 to vector<32x32xf32>
    %22 = arith.select %19, %20, %21 : vector<32x32xi1>, vector<32x32xf32>
    %23 = arith.truncf %22 : vector<32x32xf32> to vector<32x32xbf16>
    %cst_5 = arith.constant dense<0.000000e+00> : vector<32x128xf32>
    %24 = tpu.matmul %23, %1, %cst_5 {dimension_numbers = #tpu.dot_dimension_numbers<[1], [0], [0], [1], [0, 0, 1, 1], [], []>} : vector<32x32xbf16>, vector<32x128xbf16>, vector<32x128xf32> -> vector<32x128xf32>
    %25 = arith.truncf %24 : vector<32x128xf32> to vector<32x128xbf16>
    %c0_6 = arith.constant 0 : index
    %c0_7 = arith.constant 0 : index
    %c0_8 = arith.constant 0 : index
    %26 = vector.load %arg1[%c0_6, %c0_7, %c0_8] : memref<77x128x128xbf16, #tpu.memory_space<vmem>>, vector<1x128x128xbf16>
    %27 = vector.shape_cast %26 : vector<1x128x128xbf16> to vector<128x128xbf16>
    %cst_9 = arith.constant dense<0.000000e+00> : vector<32x128xf32>
    %28 = tpu.matmul %25, %27, %cst_9 {dimension_numbers = #tpu.dot_dimension_numbers<[1], [0], [0], [1], [0, 0, 1, 1], [], []>} : vector<32x128xbf16>, vector<128x128xbf16>, vector<32x128xf32> -> vector<32x128xf32>
    %29 = tpu.iota {dimensions = array<i32: 0>} : vector<32x32xi32>
    %30 = tpu.iota {dimensions = array<i32: 1>} : vector<32x32xi32>
    %31 = tpu.iota {dimensions = array<i32: 1>} : vector<2x16x32xi32>
    %32 = vector.shape_cast %31 : vector<2x16x32xi32> to vector<32x32xi32>
    %c-1_i32 = arith.constant -1 : i32
    %33 = vector.broadcast %c-1_i32 : i32 to vector<32x32xi32>
    %34 = arith.addi %29, %33 : vector<32x32xi32>
    %35 = arith.cmpi eq, %30, %34 : vector<32x32xi32>
    %c-1_i32_10 = arith.constant -1 : i32
    %36 = vector.broadcast %c-1_i32_10 : i32 to vector<32x32xi32>
    %37 = arith.addi %32, %36 : vector<32x32xi32>
    %c0_i32_11 = arith.constant 0 : i32
    %38 = vector.broadcast %c0_i32_11 : i32 to vector<32x32xi32>
    %39 = arith.cmpi sge, %37, %38 : vector<32x32xi32>
    %40 = arith.andi %35, %39 : vector<32x32xi1>
    %c-1_i32_12 = arith.constant -1 : i32
    %41 = vector.broadcast %c-1_i32_12 : i32 to vector<32x32xi32>
    %42 = arith.addi %32, %41 : vector<32x32xi32>
    %c16_i32_13 = arith.constant 16 : i32
    %43 = vector.broadcast %c16_i32_13 : i32 to vector<32x32xi32>
    %44 = arith.cmpi slt, %42, %43 : vector<32x32xi32>
    %45 = arith.andi %40, %44 : vector<32x32xi1>
    %cst_14 = arith.constant 1.000000e+00 : f32
    %cst_15 = arith.constant 0.000000e+00 : f32
    %46 = vector.broadcast %cst_14 : f32 to vector<32x32xf32>
    %47 = vector.broadcast %cst_15 : f32 to vector<32x32xf32>
    %48 = arith.select %45, %46, %47 : vector<32x32xi1>, vector<32x32xf32>
    %49 = arith.truncf %48 : vector<32x32xf32> to vector<32x32xbf16>
    %cst_16 = arith.constant dense<0.000000e+00> : vector<32x128xf32>
    %50 = tpu.matmul %49, %1, %cst_16 {dimension_numbers = #tpu.dot_dimension_numbers<[1], [0], [0], [1], [0, 0, 1, 1], [], []>} : vector<32x32xbf16>, vector<32x128xbf16>, vector<32x128xf32> -> vector<32x128xf32>
    %51 = arith.truncf %50 : vector<32x128xf32> to vector<32x128xbf16>
    %c1 = arith.constant 1 : index
    %c0_17 = arith.constant 0 : index
    %c0_18 = arith.constant 0 : index
    %52 = vector.load %arg1[%c1, %c0_17, %c0_18] : memref<77x128x128xbf16, #tpu.memory_space<vmem>>, vector<1x128x128xbf16>
    %53 = vector.shape_cast %52 : vector<1x128x128xbf16> to vector<128x128xbf16>
    %cst_19 = arith.constant dense<0.000000e+00> : vector<32x128xf32>
    %54 = tpu.matmul %51, %53, %cst_19 {dimension_numbers = #tpu.dot_dimension_numbers<[1], [0], [0], [1], [0, 0, 1, 1], [], []>} : vector<32x128xbf16>, vector<128x128xbf16>, vector<32x128xf32> -> vector<32x128xf32>
    %55 = arith.addf %28, %54 : vector<32x128xf32>
    %c2 = arith.constant 2 : index
    %c0_20 = arith.constant 0 : index
    %c0_21 = arith.constant 0 : index
    %56 = vector.load %arg1[%c2, %c0_20, %c0_21] : memref<77x128x128xbf16, #tpu.memory_space<vmem>>, vector<1x128x128xbf16>
    %57 = vector.shape_cast %56 : vector<1x128x128xbf16> to vector<128x128xbf16>
    %cst_22 = arith.constant dense<0.000000e+00> : vector<32x128xf32>
    %58 = tpu.matmul %1, %57, %cst_22 {dimension_numbers = #tpu.dot_dimension_numbers<[1], [0], [0], [1], [0, 0, 1, 1], [], []>} : vector<32x128xbf16>, vector<128x128xbf16>, vector<32x128xf32> -> vector<32x128xf32>
    %59 = arith.addf %55, %58 : vector<32x128xf32>
    %60 = tpu.iota {dimensions = array<i32: 0>} : vector<32x32xi32>
    %61 = tpu.iota {dimensions = array<i32: 1>} : vector<32x32xi32>
    %62 = tpu.iota {dimensions = array<i32: 1>} : vector<2x16x32xi32>
    %63 = vector.shape_cast %62 : vector<2x16x32xi32> to vector<32x32xi32>
    %c1_i32 = arith.constant 1 : i32
    %64 = vector.broadcast %c1_i32 : i32 to vector<32x32xi32>
    %65 = arith.addi %60, %64 : vector<32x32xi32>
    %66 = arith.cmpi eq, %61, %65 : vector<32x32xi32>
    %c1_i32_23 = arith.constant 1 : i32
    %67 = vector.broadcast %c1_i32_23 : i32 to vector<32x32xi32>
    %68 = arith.addi %63, %67 : vector<32x32xi32>
    %c0_i32_24 = arith.constant 0 : i32
    %69 = vector.broadcast %c0_i32_24 : i32 to vector<32x32xi32>
    %70 = arith.cmpi sge, %68, %69 : vector<32x32xi32>
    %71 = arith.andi %66, %70 : vector<32x32xi1>
    %c1_i32_25 = arith.constant 1 : i32
    %72 = vector.broadcast %c1_i32_25 : i32 to vector<32x32xi32>
    %73 = arith.addi %63, %72 : vector<32x32xi32>
    %c16_i32_26 = arith.constant 16 : i32
    %74 = vector.broadcast %c16_i32_26 : i32 to vector<32x32xi32>
    %75 = arith.cmpi slt, %73, %74 : vector<32x32xi32>
    %76 = arith.andi %71, %75 : vector<32x32xi1>
    %cst_27 = arith.constant 1.000000e+00 : f32
    %cst_28 = arith.constant 0.000000e+00 : f32
    %77 = vector.broadcast %cst_27 : f32 to vector<32x32xf32>
    %78 = vector.broadcast %cst_28 : f32 to vector<32x32xf32>
    %79 = arith.select %76, %77, %78 : vector<32x32xi1>, vector<32x32xf32>
    %80 = arith.truncf %79 : vector<32x32xf32> to vector<32x32xbf16>
    %cst_29 = arith.constant dense<0.000000e+00> : vector<32x128xf32>
    %81 = tpu.matmul %80, %1, %cst_29 {dimension_numbers = #tpu.dot_dimension_numbers<[1], [0], [0], [1], [0, 0, 1, 1], [], []>} : vector<32x32xbf16>, vector<32x128xbf16>, vector<32x128xf32> -> vector<32x128xf32>
    %82 = arith.truncf %81 : vector<32x128xf32> to vector<32x128xbf16>
    %c3 = arith.constant 3 : index
    %c0_30 = arith.constant 0 : index
    %c0_31 = arith.constant 0 : index
    %83 = vector.load %arg1[%c3, %c0_30, %c0_31] : memref<77x128x128xbf16, #tpu.memory_space<vmem>>, vector<1x128x128xbf16>
    %84 = vector.shape_cast %83 : vector<1x128x128xbf16> to vector<128x128xbf16>
    %cst_32 = arith.constant dense<0.000000e+00> : vector<32x128xf32>
    %85 = tpu.matmul %82, %84, %cst_32 {dimension_numbers = #tpu.dot_dimension_numbers<[1], [0], [0], [1], [0, 0, 1, 1], [], []>} : vector<32x128xbf16>, vector<128x128xbf16>, vector<32x128xf32> -> vector<32x128xf32>
    %86 = arith.addf %59, %85 : vector<32x128xf32>
    %87 = tpu.iota {dimensions = array<i32: 0>} : vector<32x32xi32>
    %88 = tpu.iota {dimensions = array<i32: 1>} : vector<32x32xi32>
    %89 = tpu.iota {dimensions = array<i32: 1>} : vector<2x16x32xi32>
    %90 = vector.shape_cast %89 : vector<2x16x32xi32> to vector<32x32xi32>
    %c2_i32 = arith.constant 2 : i32
    %91 = vector.broadcast %c2_i32 : i32 to vector<32x32xi32>
    %92 = arith.addi %87, %91 : vector<32x32xi32>
    %93 = arith.cmpi eq, %88, %92 : vector<32x32xi32>
    %c2_i32_33 = arith.constant 2 : i32
    %94 = vector.broadcast %c2_i32_33 : i32 to vector<32x32xi32>
    %95 = arith.addi %90, %94 : vector<32x32xi32>
    %c0_i32_34 = arith.constant 0 : i32
    %96 = vector.broadcast %c0_i32_34 : i32 to vector<32x32xi32>
    %97 = arith.cmpi sge, %95, %96 : vector<32x32xi32>
    %98 = arith.andi %93, %97 : vector<32x32xi1>
    %c2_i32_35 = arith.constant 2 : i32
    %99 = vector.broadcast %c2_i32_35 : i32 to vector<32x32xi32>
    %100 = arith.addi %90, %99 : vector<32x32xi32>
    %c16_i32_36 = arith.constant 16 : i32
    %101 = vector.broadcast %c16_i32_36 : i32 to vector<32x32xi32>
    %102 = arith.cmpi slt, %100, %101 : vector<32x32xi32>
    %103 = arith.andi %98, %102 : vector<32x32xi1>
    %cst_37 = arith.constant 1.000000e+00 : f32
    %cst_38 = arith.constant 0.000000e+00 : f32
    %104 = vector.broadcast %cst_37 : f32 to vector<32x32xf32>
    %105 = vector.broadcast %cst_38 : f32 to vector<32x32xf32>
    %106 = arith.select %103, %104, %105 : vector<32x32xi1>, vector<32x32xf32>
    %107 = arith.truncf %106 : vector<32x32xf32> to vector<32x32xbf16>
    %cst_39 = arith.constant dense<0.000000e+00> : vector<32x128xf32>
    %108 = tpu.matmul %107, %1, %cst_39 {dimension_numbers = #tpu.dot_dimension_numbers<[1], [0], [0], [1], [0, 0, 1, 1], [], []>} : vector<32x32xbf16>, vector<32x128xbf16>, vector<32x128xf32> -> vector<32x128xf32>
    %109 = arith.truncf %108 : vector<32x128xf32> to vector<32x128xbf16>
    %c4 = arith.constant 4 : index
    %c0_40 = arith.constant 0 : index
    %c0_41 = arith.constant 0 : index
    %110 = vector.load %arg1[%c4, %c0_40, %c0_41] : memref<77x128x128xbf16, #tpu.memory_space<vmem>>, vector<1x128x128xbf16>
    %111 = vector.shape_cast %110 : vector<1x128x128xbf16> to vector<128x128xbf16>
    %cst_42 = arith.constant dense<0.000000e+00> : vector<32x128xf32>
    %112 = tpu.matmul %109, %111, %cst_42 {dimension_numbers = #tpu.dot_dimension_numbers<[1], [0], [0], [1], [0, 0, 1, 1], [], []>} : vector<32x128xbf16>, vector<128x128xbf16>, vector<32x128xf32> -> vector<32x128xf32>
    %113 = arith.addf %86, %112 : vector<32x128xf32>
    %c0_43 = arith.constant 0 : index
    %c0_44 = arith.constant 0 : index
    %114 = vector.load %arg2[%c0_43, %c0_44] : memref<141x128xf32, #tpu.memory_space<vmem>>, vector<1x128xf32>
    %115 = vector.broadcast %114 : vector<1x128xf32> to vector<32x128xf32>
    %116 = arith.addf %113, %115 : vector<32x128xf32>
    %cst_45 = arith.constant 0.000000e+00 : f32
    %117 = vector.broadcast %cst_45 : f32 to vector<32x128xf32>
    %118 = arith.maximumf %116, %117 : vector<32x128xf32>
    %c1_46 = arith.constant 1 : index
    %c0_47 = arith.constant 0 : index
    %119 = vector.load %arg2[%c1_46, %c0_47] : memref<141x128xf32, #tpu.memory_space<vmem>>, vector<1x128xf32>
    %120 = vector.broadcast %119 : vector<1x128xf32> to vector<32x128xf32>
    %121 = arith.mulf %118, %120 : vector<32x128xf32>
    %c2_48 = arith.constant 2 : index
    %c0_49 = arith.constant 0 : index
    %122 = vector.load %arg2[%c2_48, %c0_49] : memref<141x128xf32, #tpu.memory_space<vmem>>, vector<1x128xf32>
    %123 = vector.broadcast %122 : vector<1x128xf32> to vector<32x128xf32>
    %124 = arith.addf %121, %123 : vector<32x128xf32>
    %c5 = arith.constant 5 : index
    %c0_50 = arith.constant 0 : index
    %c0_51 = arith.constant 0 : index
    %125 = vector.load %arg1[%c5, %c0_50, %c0_51] : memref<77x128x128xbf16, #tpu.memory_space<vmem>>, vector<1x128x128xbf16>
    %126 = vector.shape_cast %125 : vector<1x128x128xbf16> to vector<128x128xbf16>
    %cst_52 = arith.constant dense<0.000000e+00> : vector<32x128xf32>
    %127 = tpu.matmul %1, %126, %cst_52 {dimension_numbers = #tpu.dot_dimension_numbers<[1], [0], [0], [1], [0, 0, 1, 1], [], []>} : vector<32x128xbf16>, vector<128x128xbf16>, vector<32x128xf32> -> vector<32x128xf32>
    %c3_53 = arith.constant 3 : index
    %c0_54 = arith.constant 0 : index
    %128 = vector.load %arg2[%c3_53, %c0_54] : memref<141x128xf32, #tpu.memory_space<vmem>>, vector<1x128xf32>
    %129 = vector.broadcast %128 : vector<1x128xf32> to vector<32x128xf32>
    %130 = arith.addf %127, %129 : vector<32x128xf32>
    %cst_55 = arith.constant 0.000000e+00 : f32
    %131 = vector.broadcast %cst_55 : f32 to vector<32x128xf32>
    %132 = arith.maximumf %130, %131 : vector<32x128xf32>
    %c4_56 = arith.constant 4 : index
    %c0_57 = arith.constant 0 : index
    %133 = vector.load %arg2[%c4_56, %c0_57] : memref<141x128xf32, #tpu.memory_space<vmem>>, vector<1x128xf32>
    %134 = vector.broadcast %133 : vector<1x128xf32> to vector<32x128xf32>
    %135 = arith.mulf %132, %134 : vector<32x128xf32>
    %c5_58 = arith.constant 5 : index
    %c0_59 = arith.constant 0 : index
    %136 = vector.load %arg2[%c5_58, %c0_59] : memref<141x128xf32, #tpu.memory_space<vmem>>, vector<1x128xf32>
    %137 = vector.broadcast %136 : vector<1x128xf32> to vector<32x128xf32>
    %138 = arith.addf %135, %137 : vector<32x128xf32>
    %139 = arith.truncf %138 : vector<32x128xf32> to vector<32x128xbf16>
    %cst_60 = arith.constant dense<0.000000e+00> : vector<32x128xf32>
    %140 = tpu.matmul %23, %139, %cst_60 {dimension_numbers = #tpu.dot_dimension_numbers<[1], [0], [0], [1], [0, 0, 1, 1], [], []>} : vector<32x32xbf16>, vector<32x128xbf16>, vector<32x128xf32> -> vector<32x128xf32>
    %141 = arith.truncf %140 : vector<32x128xf32> to vector<32x128xbf16>
    %c6 = arith.constant 6 : index
    %c0_61 = arith.constant 0 : index
    %c0_62 = arith.constant 0 : index
    %142 = vector.load %arg1[%c6, %c0_61, %c0_62] : memref<77x128x128xbf16, #tpu.memory_space<vmem>>, vector<1x128x128xbf16>
    %143 = vector.shape_cast %142 : vector<1x128x128xbf16> to vector<128x128xbf16>
    %cst_63 = arith.constant dense<0.000000e+00> : vector<32x128xf32>
    %144 = tpu.matmul %141, %143, %cst_63 {dimension_numbers = #tpu.dot_dimension_numbers<[1], [0], [0], [1], [0, 0, 1, 1], [], []>} : vector<32x128xbf16>, vector<128x128xbf16>, vector<32x128xf32> -> vector<32x128xf32>
    %145 = arith.truncf %138 : vector<32x128xf32> to vector<32x128xbf16>
    %cst_64 = arith.constant dense<0.000000e+00> : vector<32x128xf32>
    %146 = tpu.matmul %49, %145, %cst_64 {dimension_numbers = #tpu.dot_dimension_numbers<[1], [0], [0], [1], [0, 0, 1, 1], [], []>} : vector<32x32xbf16>, vector<32x128xbf16>, vector<32x128xf32> -> vector<32x128xf32>
    %147 = arith.truncf %146 : vector<32x128xf32> to vector<32x128xbf16>
    %c7 = arith.constant 7 : index
    %c0_65 = arith.constant 0 : index
    %c0_66 = arith.constant 0 : index
    %148 = vector.load %arg1[%c7, %c0_65, %c0_66] : memref<77x128x128xbf16, #tpu.memory_space<vmem>>, vector<1x128x128xbf16>
    %149 = vector.shape_cast %148 : vector<1x128x128xbf16> to vector<128x128xbf16>
    %cst_67 = arith.constant dense<0.000000e+00> : vector<32x128xf32>
    %150 = tpu.matmul %147, %149, %cst_67 {dimension_numbers = #tpu.dot_dimension_numbers<[1], [0], [0], [1], [0, 0, 1, 1], [], []>} : vector<32x128xbf16>, vector<128x128xbf16>, vector<32x128xf32> -> vector<32x128xf32>
    %151 = arith.addf %144, %150 : vector<32x128xf32>
    %152 = arith.truncf %138 : vector<32x128xf32> to vector<32x128xbf16>
    %c8 = arith.constant 8 : index
    %c0_68 = arith.constant 0 : index
    %c0_69 = arith.constant 0 : index
    %153 = vector.load %arg1[%c8, %c0_68, %c0_69] : memref<77x128x128xbf16, #tpu.memory_space<vmem>>, vector<1x128x128xbf16>
    %154 = vector.shape_cast %153 : vector<1x128x128xbf16> to vector<128x128xbf16>
    %cst_70 = arith.constant dense<0.000000e+00> : vector<32x128xf32>
    %155 = tpu.matmul %152, %154, %cst_70 {dimension_numbers = #tpu.dot_dimension_numbers<[1], [0], [0], [1], [0, 0, 1, 1], [], []>} : vector<32x128xbf16>, vector<128x128xbf16>, vector<32x128xf32> -> vector<32x128xf32>
    %156 = arith.addf %151, %155 : vector<32x128xf32>
    %157 = arith.truncf %138 : vector<32x128xf32> to vector<32x128xbf16>
    %cst_71 = arith.constant dense<0.000000e+00> : vector<32x128xf32>
    %158 = tpu.matmul %80, %157, %cst_71 {dimension_numbers = #tpu.dot_dimension_numbers<[1], [0], [0], [1], [0, 0, 1, 1], [], []>} : vector<32x32xbf16>, vector<32x128xbf16>, vector<32x128xf32> -> vector<32x128xf32>
    %159 = arith.truncf %158 : vector<32x128xf32> to vector<32x128xbf16>
    %c9 = arith.constant 9 : index
    %c0_72 = arith.constant 0 : index
    %c0_73 = arith.constant 0 : index
    %160 = vector.load %arg1[%c9, %c0_72, %c0_73] : memref<77x128x128xbf16, #tpu.memory_space<vmem>>, vector<1x128x128xbf16>
    %161 = vector.shape_cast %160 : vector<1x128x128xbf16> to vector<128x128xbf16>
    %cst_74 = arith.constant dense<0.000000e+00> : vector<32x128xf32>
    %162 = tpu.matmul %159, %161, %cst_74 {dimension_numbers = #tpu.dot_dimension_numbers<[1], [0], [0], [1], [0, 0, 1, 1], [], []>} : vector<32x128xbf16>, vector<128x128xbf16>, vector<32x128xf32> -> vector<32x128xf32>
    %163 = arith.addf %156, %162 : vector<32x128xf32>
    %164 = arith.truncf %138 : vector<32x128xf32> to vector<32x128xbf16>
    %cst_75 = arith.constant dense<0.000000e+00> : vector<32x128xf32>
    %165 = tpu.matmul %107, %164, %cst_75 {dimension_numbers = #tpu.dot_dimension_numbers<[1], [0], [0], [1], [0, 0, 1, 1], [], []>} : vector<32x32xbf16>, vector<32x128xbf16>, vector<32x128xf32> -> vector<32x128xf32>
    %166 = arith.truncf %165 : vector<32x128xf32> to vector<32x128xbf16>
    %c10 = arith.constant 10 : index
    %c0_76 = arith.constant 0 : index
    %c0_77 = arith.constant 0 : index
    %167 = vector.load %arg1[%c10, %c0_76, %c0_77] : memref<77x128x128xbf16, #tpu.memory_space<vmem>>, vector<1x128x128xbf16>
    %168 = vector.shape_cast %167 : vector<1x128x128xbf16> to vector<128x128xbf16>
    %cst_78 = arith.constant dense<0.000000e+00> : vector<32x128xf32>
    %169 = tpu.matmul %166, %168, %cst_78 {dimension_numbers = #tpu.dot_dimension_numbers<[1], [0], [0], [1], [0, 0, 1, 1], [], []>} : vector<32x128xbf16>, vector<128x128xbf16>, vector<32x128xf32> -> vector<32x128xf32>
    %170 = arith.addf %163, %169 : vector<32x128xf32>
    %c6_79 = arith.constant 6 : index
    %c0_80 = arith.constant 0 : index
    %171 = vector.load %arg2[%c6_79, %c0_80] : memref<141x128xf32, #tpu.memory_space<vmem>>, vector<1x128xf32>
    %172 = vector.broadcast %171 : vector<1x128xf32> to vector<32x128xf32>
    %173 = arith.addf %170, %172 : vector<32x128xf32>
    %cst_81 = arith.constant 0.000000e+00 : f32
    %174 = vector.broadcast %cst_81 : f32 to vector<32x128xf32>
    %175 = arith.maximumf %173, %174 : vector<32x128xf32>
    %c7_82 = arith.constant 7 : index
    %c0_83 = arith.constant 0 : index
    %176 = vector.load %arg2[%c7_82, %c0_83] : memref<141x128xf32, #tpu.memory_space<vmem>>, vector<1x128xf32>
    %177 = vector.broadcast %176 : vector<1x128xf32> to vector<32x128xf32>
    %178 = arith.mulf %175, %177 : vector<32x128xf32>
    %c8_84 = arith.constant 8 : index
    %c0_85 = arith.constant 0 : index
    %179 = vector.load %arg2[%c8_84, %c0_85] : memref<141x128xf32, #tpu.memory_space<vmem>>, vector<1x128xf32>
    %180 = vector.broadcast %179 : vector<1x128xf32> to vector<32x128xf32>
    %181 = arith.addf %178, %180 : vector<32x128xf32>
    %182 = arith.truncf %181 : vector<32x128xf32> to vector<32x128xbf16>
    %c11 = arith.constant 11 : index
    %c0_86 = arith.constant 0 : index
    %c0_87 = arith.constant 0 : index
    %183 = vector.load %arg1[%c11, %c0_86, %c0_87] : memref<77x128x128xbf16, #tpu.memory_space<vmem>>, vector<1x128x128xbf16>
    %184 = vector.shape_cast %183 : vector<1x128x128xbf16> to vector<128x128xbf16>
    %cst_88 = arith.constant dense<0.000000e+00> : vector<32x128xf32>
    %185 = tpu.matmul %182, %184, %cst_88 {dimension_numbers = #tpu.dot_dimension_numbers<[1], [0], [0], [1], [0, 0, 1, 1], [], []>} : vector<32x128xbf16>, vector<128x128xbf16>, vector<32x128xf32> -> vector<32x128xf32>
    %c9_89 = arith.constant 9 : index
    %c0_90 = arith.constant 0 : index
    %186 = vector.load %arg2[%c9_89, %c0_90] : memref<141x128xf32, #tpu.memory_space<vmem>>, vector<1x128xf32>
    %187 = vector.broadcast %186 : vector<1x128xf32> to vector<32x128xf32>
    %188 = arith.addf %185, %187 : vector<32x128xf32>
    %cst_91 = arith.constant 0.000000e+00 : f32
    %189 = vector.broadcast %cst_91 : f32 to vector<32x128xf32>
    %190 = arith.maximumf %188, %189 : vector<32x128xf32>
    %c10_92 = arith.constant 10 : index
    %c0_93 = arith.constant 0 : index
    %191 = vector.load %arg2[%c10_92, %c0_93] : memref<141x128xf32, #tpu.memory_space<vmem>>, vector<1x128xf32>
    %192 = vector.broadcast %191 : vector<1x128xf32> to vector<32x128xf32>
    %193 = arith.mulf %190, %192 : vector<32x128xf32>
    %c11_94 = arith.constant 11 : index
    %c0_95 = arith.constant 0 : index
    %194 = vector.load %arg2[%c11_94, %c0_95] : memref<141x128xf32, #tpu.memory_space<vmem>>, vector<1x128xf32>
    %195 = vector.broadcast %194 : vector<1x128xf32> to vector<32x128xf32>
    %196 = arith.addf %193, %195 : vector<32x128xf32>
    %cst_96 = arith.constant 7.500000e-01 : f32
    %197 = vector.broadcast %cst_96 : f32 to vector<32x128xf32>
    %198 = arith.mulf %197, %124 : vector<32x128xf32>
    %cst_97 = arith.constant 2.500000e-01 : f32
    %199 = vector.broadcast %cst_97 : f32 to vector<32x128xf32>
    %200 = arith.mulf %199, %196 : vector<32x128xf32>
    %201 = arith.addf %198, %200 : vector<32x128xf32>
    %202 = arith.truncf %201 : vector<32x128xf32> to vector<32x128xbf16>
    %c12 = arith.constant 12 : index
    %c0_98 = arith.constant 0 : index
    %c0_99 = arith.constant 0 : index
    %203 = vector.load %arg1[%c12, %c0_98, %c0_99] : memref<77x128x128xbf16, #tpu.memory_space<vmem>>, vector<1x128x128xbf16>
    %204 = vector.shape_cast %203 : vector<1x128x128xbf16> to vector<128x128xbf16>
    %cst_100 = arith.constant dense<0.000000e+00> : vector<32x128xf32>
    %205 = tpu.matmul %202, %204, %cst_100 {dimension_numbers = #tpu.dot_dimension_numbers<[1], [0], [0], [1], [0, 0, 1, 1], [], []>} : vector<32x128xbf16>, vector<128x128xbf16>, vector<32x128xf32> -> vector<32x128xf32>
    %c12_101 = arith.constant 12 : index
    %c0_102 = arith.constant 0 : index
    %206 = vector.load %arg2[%c12_101, %c0_102] : memref<141x128xf32, #tpu.memory_space<vmem>>, vector<1x128xf32>
    %207 = vector.broadcast %206 : vector<1x128xf32> to vector<32x128xf32>
    %208 = arith.addf %205, %207 : vector<32x128xf32>
    %cst_103 = arith.constant 0.000000e+00 : f32
    %209 = vector.broadcast %cst_103 : f32 to vector<32x128xf32>
    %210 = arith.maximumf %208, %209 : vector<32x128xf32>
    %c13 = arith.constant 13 : index
    %c0_104 = arith.constant 0 : index
    %211 = vector.load %arg2[%c13, %c0_104] : memref<141x128xf32, #tpu.memory_space<vmem>>, vector<1x128xf32>
    %212 = vector.broadcast %211 : vector<1x128xf32> to vector<32x128xf32>
    %213 = arith.mulf %210, %212 : vector<32x128xf32>
    %c14 = arith.constant 14 : index
    %c0_105 = arith.constant 0 : index
    %214 = vector.load %arg2[%c14, %c0_105] : memref<141x128xf32, #tpu.memory_space<vmem>>, vector<1x128xf32>
    %215 = vector.broadcast %214 : vector<1x128xf32> to vector<32x128xf32>
    %216 = arith.addf %213, %215 : vector<32x128xf32>
    %217 = arith.truncf %216 : vector<32x128xf32> to vector<32x128xbf16>
    %cst_106 = arith.constant dense<0.000000e+00> : vector<32x128xf32>
    %218 = tpu.matmul %23, %217, %cst_106 {dimension_numbers = #tpu.dot_dimension_numbers<[1], [0], [0], [1], [0, 0, 1, 1], [], []>} : vector<32x32xbf16>, vector<32x128xbf16>, vector<32x128xf32> -> vector<32x128xf32>
    %219 = arith.truncf %218 : vector<32x128xf32> to vector<32x128xbf16>
    %c13_107 = arith.constant 13 : index
    %c0_108 = arith.constant 0 : index
    %c0_109 = arith.constant 0 : index
    %220 = vector.load %arg1[%c13_107, %c0_108, %c0_109] : memref<77x128x128xbf16, #tpu.memory_space<vmem>>, vector<1x128x128xbf16>
    %221 = vector.shape_cast %220 : vector<1x128x128xbf16> to vector<128x128xbf16>
    %cst_110 = arith.constant dense<0.000000e+00> : vector<32x128xf32>
    %222 = tpu.matmul %219, %221, %cst_110 {dimension_numbers = #tpu.dot_dimension_numbers<[1], [0], [0], [1], [0, 0, 1, 1], [], []>} : vector<32x128xbf16>, vector<128x128xbf16>, vector<32x128xf32> -> vector<32x128xf32>
    %223 = arith.truncf %216 : vector<32x128xf32> to vector<32x128xbf16>
    %c14_111 = arith.constant 14 : index
    %c0_112 = arith.constant 0 : index
    %c0_113 = arith.constant 0 : index
    %224 = vector.load %arg1[%c14_111, %c0_112, %c0_113] : memref<77x128x128xbf16, #tpu.memory_space<vmem>>, vector<1x128x128xbf16>
    %225 = vector.shape_cast %224 : vector<1x128x128xbf16> to vector<128x128xbf16>
    %cst_114 = arith.constant dense<0.000000e+00> : vector<32x128xf32>
    %226 = tpu.matmul %223, %225, %cst_114 {dimension_numbers = #tpu.dot_dimension_numbers<[1], [0], [0], [1], [0, 0, 1, 1], [], []>} : vector<32x128xbf16>, vector<128x128xbf16>, vector<32x128xf32> -> vector<32x128xf32>
    %227 = arith.addf %222, %226 : vector<32x128xf32>
    %228 = arith.truncf %216 : vector<32x128xf32> to vector<32x128xbf16>
    %cst_115 = arith.constant dense<0.000000e+00> : vector<32x128xf32>
    %229 = tpu.matmul %107, %228, %cst_115 {dimension_numbers = #tpu.dot_dimension_numbers<[1], [0], [0], [1], [0, 0, 1, 1], [], []>} : vector<32x32xbf16>, vector<32x128xbf16>, vector<32x128xf32> -> vector<32x128xf32>
    %230 = arith.truncf %229 : vector<32x128xf32> to vector<32x128xbf16>
    %c15 = arith.constant 15 : index
    %c0_116 = arith.constant 0 : index
    %c0_117 = arith.constant 0 : index
    %231 = vector.load %arg1[%c15, %c0_116, %c0_117] : memref<77x128x128xbf16, #tpu.memory_space<vmem>>, vector<1x128x128xbf16>
    %232 = vector.shape_cast %231 : vector<1x128x128xbf16> to vector<128x128xbf16>
    %cst_118 = arith.constant dense<0.000000e+00> : vector<32x128xf32>
    %233 = tpu.matmul %230, %232, %cst_118 {dimension_numbers = #tpu.dot_dimension_numbers<[1], [0], [0], [1], [0, 0, 1, 1], [], []>} : vector<32x128xbf16>, vector<128x128xbf16>, vector<32x128xf32> -> vector<32x128xf32>
    %234 = arith.addf %227, %233 : vector<32x128xf32>
    %c15_119 = arith.constant 15 : index
    %c0_120 = arith.constant 0 : index
    %235 = vector.load %arg2[%c15_119, %c0_120] : memref<141x128xf32, #tpu.memory_space<vmem>>, vector<1x128xf32>
    %236 = vector.broadcast %235 : vector<1x128xf32> to vector<32x128xf32>
    %237 = arith.addf %234, %236 : vector<32x128xf32>
    %cst_121 = arith.constant 0.000000e+00 : f32
    %238 = vector.broadcast %cst_121 : f32 to vector<32x128xf32>
    %239 = arith.maximumf %237, %238 : vector<32x128xf32>
    %c16 = arith.constant 16 : index
    %c0_122 = arith.constant 0 : index
    %240 = vector.load %arg2[%c16, %c0_122] : memref<141x128xf32, #tpu.memory_space<vmem>>, vector<1x128xf32>
    %241 = vector.broadcast %240 : vector<1x128xf32> to vector<32x128xf32>
    %242 = arith.mulf %239, %241 : vector<32x128xf32>
    %c17 = arith.constant 17 : index
    %c0_123 = arith.constant 0 : index
    %243 = vector.load %arg2[%c17, %c0_123] : memref<141x128xf32, #tpu.memory_space<vmem>>, vector<1x128xf32>
    %244 = vector.broadcast %243 : vector<1x128xf32> to vector<32x128xf32>
    %245 = arith.addf %242, %244 : vector<32x128xf32>
    %c16_i32_124 = arith.constant 16 : i32
    %246 = vector.broadcast %c16_i32_124 : i32 to vector<1x128xi32>
    %247 = arith.cmpi slt, %2, %246 : vector<1x128xi32>
    %248 = arith.extui %247 : vector<1x128xi1> to vector<1x128xi32>
    %249 = arith.sitofp %248 : vector<1x128xi32> to vector<1x128xf32>
    %250 = vector.broadcast %249 : vector<1x128xf32> to vector<32x128xf32>
    %251 = arith.mulf %216, %250 : vector<32x128xf32>
    %252 = arith.addf %251, %245 : vector<32x128xf32>
    %253 = arith.truncf %252 : vector<32x128xf32> to vector<32x128xbf16>
    %c16_125 = arith.constant 16 : index
    %c0_126 = arith.constant 0 : index
    %c0_127 = arith.constant 0 : index
    %254 = vector.load %arg1[%c16_125, %c0_126, %c0_127] : memref<77x128x128xbf16, #tpu.memory_space<vmem>>, vector<1x128x128xbf16>
    %255 = vector.shape_cast %254 : vector<1x128x128xbf16> to vector<128x128xbf16>
    %cst_128 = arith.constant dense<0.000000e+00> : vector<32x128xf32>
    %256 = tpu.matmul %253, %255, %cst_128 {dimension_numbers = #tpu.dot_dimension_numbers<[1], [0], [0], [1], [0, 0, 1, 1], [], []>} : vector<32x128xbf16>, vector<128x128xbf16>, vector<32x128xf32> -> vector<32x128xf32>
    %c18 = arith.constant 18 : index
    %c0_129 = arith.constant 0 : index
    %257 = vector.load %arg2[%c18, %c0_129] : memref<141x128xf32, #tpu.memory_space<vmem>>, vector<1x128xf32>
    %258 = vector.broadcast %257 : vector<1x128xf32> to vector<32x128xf32>
    %259 = arith.addf %256, %258 : vector<32x128xf32>
    %cst_130 = arith.constant 0.000000e+00 : f32
    %260 = vector.broadcast %cst_130 : f32 to vector<32x128xf32>
    %261 = arith.maximumf %259, %260 : vector<32x128xf32>
    %c19 = arith.constant 19 : index
    %c0_131 = arith.constant 0 : index
    %262 = vector.load %arg2[%c19, %c0_131] : memref<141x128xf32, #tpu.memory_space<vmem>>, vector<1x128xf32>
    %263 = vector.broadcast %262 : vector<1x128xf32> to vector<32x128xf32>
    %264 = arith.mulf %261, %263 : vector<32x128xf32>
    %c20 = arith.constant 20 : index
    %c0_132 = arith.constant 0 : index
    %265 = vector.load %arg2[%c20, %c0_132] : memref<141x128xf32, #tpu.memory_space<vmem>>, vector<1x128xf32>
    %266 = vector.broadcast %265 : vector<1x128xf32> to vector<32x128xf32>
    %267 = arith.addf %264, %266 : vector<32x128xf32>
    %268 = vector.shape_cast %267 : vector<32x128xf32> to vector<2x16x128xf32>
    %cst_133 = arith.constant dense<0.000000e+00> : vector<2x128xf32>
    %269 = vector.multi_reduction <add>, %268, %cst_133 [1] : vector<2x16x128xf32> to vector<2x128xf32>
    %cst_134 = arith.constant 1.600000e+01 : f32
    %270 = vector.broadcast %cst_134 : f32 to vector<2x128xf32>
    %271 = arith.divf %269, %270 : vector<2x128xf32>
    %272 = arith.truncf %271 : vector<2x128xf32> to vector<2x128xbf16>
    %c17_135 = arith.constant 17 : index
    %c0_136 = arith.constant 0 : index
    %c0_137 = arith.constant 0 : index
    %273 = vector.load %arg1[%c17_135, %c0_136, %c0_137] : memref<77x128x128xbf16, #tpu.memory_space<vmem>>, vector<1x128x128xbf16>
    %274 = vector.shape_cast %273 : vector<1x128x128xbf16> to vector<128x128xbf16>
    %cst_138 = arith.constant dense<0.000000e+00> : vector<2x128xf32>
    %275 = tpu.matmul %272, %274, %cst_138 {dimension_numbers = #tpu.dot_dimension_numbers<[1], [0], [0], [1], [0, 0, 1, 1], [], []>} : vector<2x128xbf16>, vector<128x128xbf16>, vector<2x128xf32> -> vector<2x128xf32>
    %c21 = arith.constant 21 : index
    %c0_139 = arith.constant 0 : index
    %276 = vector.load %arg2[%c21, %c0_139] : memref<141x128xf32, #tpu.memory_space<vmem>>, vector<1x128xf32>
    %277 = vector.broadcast %276 : vector<1x128xf32> to vector<2x128xf32>
    %278 = arith.addf %275, %277 : vector<2x128xf32>
    %cst_140 = arith.constant 0.000000e+00 : f32
    %279 = vector.broadcast %cst_140 : f32 to vector<2x128xf32>
    %280 = arith.maximumf %278, %279 : vector<2x128xf32>
    %c22 = arith.constant 22 : index
    %c0_141 = arith.constant 0 : index
    %281 = vector.load %arg2[%c22, %c0_141] : memref<141x128xf32, #tpu.memory_space<vmem>>, vector<1x128xf32>
    %282 = vector.broadcast %281 : vector<1x128xf32> to vector<2x128xf32>
    %283 = arith.mulf %280, %282 : vector<2x128xf32>
    %c23 = arith.constant 23 : index
    %c0_142 = arith.constant 0 : index
    %284 = vector.load %arg2[%c23, %c0_142] : memref<141x128xf32, #tpu.memory_space<vmem>>, vector<1x128xf32>
    %285 = vector.broadcast %284 : vector<1x128xf32> to vector<2x128xf32>
    %286 = arith.addf %283, %285 : vector<2x128xf32>
    %287 = arith.truncf %286 : vector<2x128xf32> to vector<2x128xbf16>
    %c18_143 = arith.constant 18 : index
    %c0_144 = arith.constant 0 : index
    %c0_145 = arith.constant 0 : index
    %288 = vector.load %arg1[%c18_143, %c0_144, %c0_145] : memref<77x128x128xbf16, #tpu.memory_space<vmem>>, vector<1x128x128xbf16>
    %289 = vector.shape_cast %288 : vector<1x128x128xbf16> to vector<128x128xbf16>
    %cst_146 = arith.constant dense<0.000000e+00> : vector<2x128xf32>
    %290 = tpu.matmul %287, %289, %cst_146 {dimension_numbers = #tpu.dot_dimension_numbers<[1], [0], [0], [1], [0, 0, 1, 1], [], []>} : vector<2x128xbf16>, vector<128x128xbf16>, vector<2x128xf32> -> vector<2x128xf32>
    %c24 = arith.constant 24 : index
    %c0_147 = arith.constant 0 : index
    %291 = vector.load %arg2[%c24, %c0_147] : memref<141x128xf32, #tpu.memory_space<vmem>>, vector<1x128xf32>
    %292 = vector.broadcast %291 : vector<1x128xf32> to vector<2x128xf32>
    %293 = arith.addf %290, %292 : vector<2x128xf32>
    %294 = arith.negf %293 : vector<2x128xf32>
    %295 = math.exp %294 : vector<2x128xf32>
    %cst_148 = arith.constant 1.000000e+00 : f32
    %296 = vector.broadcast %cst_148 : f32 to vector<2x128xf32>
    %297 = arith.addf %296, %295 : vector<2x128xf32>
    %298 = arith.divf %296, %297 : vector<2x128xf32>
    %c25 = arith.constant 25 : index
    %c0_149 = arith.constant 0 : index
    %299 = vector.load %arg2[%c25, %c0_149] : memref<141x128xf32, #tpu.memory_space<vmem>>, vector<1x128xf32>
    %300 = vector.broadcast %299 : vector<1x128xf32> to vector<2x128xf32>
    %301 = arith.mulf %298, %300 : vector<2x128xf32>
    %c26 = arith.constant 26 : index
    %c0_150 = arith.constant 0 : index
    %302 = vector.load %arg2[%c26, %c0_150] : memref<141x128xf32, #tpu.memory_space<vmem>>, vector<1x128xf32>
    %303 = vector.broadcast %302 : vector<1x128xf32> to vector<2x128xf32>
    %304 = arith.addf %301, %303 : vector<2x128xf32>
    %305 = vector.shape_cast %304 : vector<2x128xf32> to vector<2x1x128xf32>
    %306 = vector.broadcast %305 : vector<2x1x128xf32> to vector<2x16x128xf32>
    %307 = arith.mulf %268, %306 : vector<2x16x128xf32>
    %308 = vector.shape_cast %201 : vector<32x128xf32> to vector<2x16x128xf32>
    %309 = arith.addf %307, %308 : vector<2x16x128xf32>
    %310 = vector.shape_cast %309 : vector<2x16x128xf32> to vector<32x128xf32>
    %cst_151 = arith.constant 7.500000e-01 : f32
    %311 = vector.broadcast %cst_151 : f32 to vector<32x128xf32>
    %312 = arith.mulf %311, %310 : vector<32x128xf32>
    %313 = arith.truncf %201 : vector<32x128xf32> to vector<32x128xbf16>
    %c19_152 = arith.constant 19 : index
    %c0_153 = arith.constant 0 : index
    %c0_154 = arith.constant 0 : index
    %314 = vector.load %arg1[%c19_152, %c0_153, %c0_154] : memref<77x128x128xbf16, #tpu.memory_space<vmem>>, vector<1x128x128xbf16>
    %315 = vector.shape_cast %314 : vector<1x128x128xbf16> to vector<128x128xbf16>
    %cst_155 = arith.constant dense<0.000000e+00> : vector<32x128xf32>
    %316 = tpu.matmul %313, %315, %cst_155 {dimension_numbers = #tpu.dot_dimension_numbers<[1], [0], [0], [1], [0, 0, 1, 1], [], []>} : vector<32x128xbf16>, vector<128x128xbf16>, vector<32x128xf32> -> vector<32x128xf32>
    %c27 = arith.constant 27 : index
    %c0_156 = arith.constant 0 : index
    %317 = vector.load %arg2[%c27, %c0_156] : memref<141x128xf32, #tpu.memory_space<vmem>>, vector<1x128xf32>
    %318 = vector.broadcast %317 : vector<1x128xf32> to vector<32x128xf32>
    %319 = arith.addf %316, %318 : vector<32x128xf32>
    %cst_157 = arith.constant 0.000000e+00 : f32
    %320 = vector.broadcast %cst_157 : f32 to vector<32x128xf32>
    %321 = arith.maximumf %319, %320 : vector<32x128xf32>
    %c28 = arith.constant 28 : index
    %c0_158 = arith.constant 0 : index
    %322 = vector.load %arg2[%c28, %c0_158] : memref<141x128xf32, #tpu.memory_space<vmem>>, vector<1x128xf32>
    %323 = vector.broadcast %322 : vector<1x128xf32> to vector<32x128xf32>
    %324 = arith.mulf %321, %323 : vector<32x128xf32>
    %c29 = arith.constant 29 : index
    %c0_159 = arith.constant 0 : index
    %325 = vector.load %arg2[%c29, %c0_159] : memref<141x128xf32, #tpu.memory_space<vmem>>, vector<1x128xf32>
    %326 = vector.broadcast %325 : vector<1x128xf32> to vector<32x128xf32>
    %327 = arith.addf %324, %326 : vector<32x128xf32>
    %328 = arith.truncf %327 : vector<32x128xf32> to vector<32x128xbf16>
    %cst_160 = arith.constant dense<0.000000e+00> : vector<32x128xf32>
    %329 = tpu.matmul %23, %328, %cst_160 {dimension_numbers = #tpu.dot_dimension_numbers<[1], [0], [0], [1], [0, 0, 1, 1], [], []>} : vector<32x32xbf16>, vector<32x128xbf16>, vector<32x128xf32> -> vector<32x128xf32>
    %330 = arith.truncf %329 : vector<32x128xf32> to vector<32x128xbf16>
    %c20_161 = arith.constant 20 : index
    %c0_162 = arith.constant 0 : index
    %c0_163 = arith.constant 0 : index
    %331 = vector.load %arg1[%c20_161, %c0_162, %c0_163] : memref<77x128x128xbf16, #tpu.memory_space<vmem>>, vector<1x128x128xbf16>
    %332 = vector.shape_cast %331 : vector<1x128x128xbf16> to vector<128x128xbf16>
    %cst_164 = arith.constant dense<0.000000e+00> : vector<32x128xf32>
    %333 = tpu.matmul %330, %332, %cst_164 {dimension_numbers = #tpu.dot_dimension_numbers<[1], [0], [0], [1], [0, 0, 1, 1], [], []>} : vector<32x128xbf16>, vector<128x128xbf16>, vector<32x128xf32> -> vector<32x128xf32>
    %334 = arith.truncf %327 : vector<32x128xf32> to vector<32x128xbf16>
    %c21_165 = arith.constant 21 : index
    %c0_166 = arith.constant 0 : index
    %c0_167 = arith.constant 0 : index
    %335 = vector.load %arg1[%c21_165, %c0_166, %c0_167] : memref<77x128x128xbf16, #tpu.memory_space<vmem>>, vector<1x128x128xbf16>
    %336 = vector.shape_cast %335 : vector<1x128x128xbf16> to vector<128x128xbf16>
    %cst_168 = arith.constant dense<0.000000e+00> : vector<32x128xf32>
    %337 = tpu.matmul %334, %336, %cst_168 {dimension_numbers = #tpu.dot_dimension_numbers<[1], [0], [0], [1], [0, 0, 1, 1], [], []>} : vector<32x128xbf16>, vector<128x128xbf16>, vector<32x128xf32> -> vector<32x128xf32>
    %338 = arith.addf %333, %337 : vector<32x128xf32>
    %339 = arith.truncf %327 : vector<32x128xf32> to vector<32x128xbf16>
    %cst_169 = arith.constant dense<0.000000e+00> : vector<32x128xf32>
    %340 = tpu.matmul %107, %339, %cst_169 {dimension_numbers = #tpu.dot_dimension_numbers<[1], [0], [0], [1], [0, 0, 1, 1], [], []>} : vector<32x32xbf16>, vector<32x128xbf16>, vector<32x128xf32> -> vector<32x128xf32>
    %341 = arith.truncf %340 : vector<32x128xf32> to vector<32x128xbf16>
    %c22_170 = arith.constant 22 : index
    %c0_171 = arith.constant 0 : index
    %c0_172 = arith.constant 0 : index
    %342 = vector.load %arg1[%c22_170, %c0_171, %c0_172] : memref<77x128x128xbf16, #tpu.memory_space<vmem>>, vector<1x128x128xbf16>
    %343 = vector.shape_cast %342 : vector<1x128x128xbf16> to vector<128x128xbf16>
    %cst_173 = arith.constant dense<0.000000e+00> : vector<32x128xf32>
    %344 = tpu.matmul %341, %343, %cst_173 {dimension_numbers = #tpu.dot_dimension_numbers<[1], [0], [0], [1], [0, 0, 1, 1], [], []>} : vector<32x128xbf16>, vector<128x128xbf16>, vector<32x128xf32> -> vector<32x128xf32>
    %345 = arith.addf %338, %344 : vector<32x128xf32>
    %c30 = arith.constant 30 : index
    %c0_174 = arith.constant 0 : index
    %346 = vector.load %arg2[%c30, %c0_174] : memref<141x128xf32, #tpu.memory_space<vmem>>, vector<1x128xf32>
    %347 = vector.broadcast %346 : vector<1x128xf32> to vector<32x128xf32>
    %348 = arith.addf %345, %347 : vector<32x128xf32>
    %cst_175 = arith.constant 0.000000e+00 : f32
    %349 = vector.broadcast %cst_175 : f32 to vector<32x128xf32>
    %350 = arith.maximumf %348, %349 : vector<32x128xf32>
    %c31 = arith.constant 31 : index
    %c0_176 = arith.constant 0 : index
    %351 = vector.load %arg2[%c31, %c0_176] : memref<141x128xf32, #tpu.memory_space<vmem>>, vector<1x128xf32>
    %352 = vector.broadcast %351 : vector<1x128xf32> to vector<32x128xf32>
    %353 = arith.mulf %350, %352 : vector<32x128xf32>
    %c32 = arith.constant 32 : index
    %c0_177 = arith.constant 0 : index
    %354 = vector.load %arg2[%c32, %c0_177] : memref<141x128xf32, #tpu.memory_space<vmem>>, vector<1x128xf32>
    %355 = vector.broadcast %354 : vector<1x128xf32> to vector<32x128xf32>
    %356 = arith.addf %353, %355 : vector<32x128xf32>
    %c4_i32 = arith.constant 4 : i32
    %357 = vector.broadcast %c4_i32 : i32 to vector<1x128xi32>
    %358 = arith.cmpi slt, %2, %357 : vector<1x128xi32>
    %359 = arith.extui %358 : vector<1x128xi1> to vector<1x128xi32>
    %360 = arith.sitofp %359 : vector<1x128xi32> to vector<1x128xf32>
    %361 = vector.broadcast %360 : vector<1x128xf32> to vector<32x128xf32>
    %362 = arith.mulf %327, %361 : vector<32x128xf32>
    %363 = arith.addf %362, %356 : vector<32x128xf32>
    %364 = arith.truncf %363 : vector<32x128xf32> to vector<32x128xbf16>
    %c23_178 = arith.constant 23 : index
    %c0_179 = arith.constant 0 : index
    %c0_180 = arith.constant 0 : index
    %365 = vector.load %arg1[%c23_178, %c0_179, %c0_180] : memref<77x128x128xbf16, #tpu.memory_space<vmem>>, vector<1x128x128xbf16>
    %366 = vector.shape_cast %365 : vector<1x128x128xbf16> to vector<128x128xbf16>
    %cst_181 = arith.constant dense<0.000000e+00> : vector<32x128xf32>
    %367 = tpu.matmul %364, %366, %cst_181 {dimension_numbers = #tpu.dot_dimension_numbers<[1], [0], [0], [1], [0, 0, 1, 1], [], []>} : vector<32x128xbf16>, vector<128x128xbf16>, vector<32x128xf32> -> vector<32x128xf32>
    %c33 = arith.constant 33 : index
    %c0_182 = arith.constant 0 : index
    %368 = vector.load %arg2[%c33, %c0_182] : memref<141x128xf32, #tpu.memory_space<vmem>>, vector<1x128xf32>
    %369 = vector.broadcast %368 : vector<1x128xf32> to vector<32x128xf32>
    %370 = arith.addf %367, %369 : vector<32x128xf32>
    %cst_183 = arith.constant 0.000000e+00 : f32
    %371 = vector.broadcast %cst_183 : f32 to vector<32x128xf32>
    %372 = arith.maximumf %370, %371 : vector<32x128xf32>
    %c34 = arith.constant 34 : index
    %c0_184 = arith.constant 0 : index
    %373 = vector.load %arg2[%c34, %c0_184] : memref<141x128xf32, #tpu.memory_space<vmem>>, vector<1x128xf32>
    %374 = vector.broadcast %373 : vector<1x128xf32> to vector<32x128xf32>
    %375 = arith.mulf %372, %374 : vector<32x128xf32>
    %c35 = arith.constant 35 : index
    %c0_185 = arith.constant 0 : index
    %376 = vector.load %arg2[%c35, %c0_185] : memref<141x128xf32, #tpu.memory_space<vmem>>, vector<1x128xf32>
    %377 = vector.broadcast %376 : vector<1x128xf32> to vector<32x128xf32>
    %378 = arith.addf %375, %377 : vector<32x128xf32>
    %379 = vector.shape_cast %378 : vector<32x128xf32> to vector<2x16x128xf32>
    %cst_186 = arith.constant dense<0.000000e+00> : vector<2x128xf32>
    %380 = vector.multi_reduction <add>, %379, %cst_186 [1] : vector<2x16x128xf32> to vector<2x128xf32>
    %cst_187 = arith.constant 1.600000e+01 : f32
    %381 = vector.broadcast %cst_187 : f32 to vector<2x128xf32>
    %382 = arith.divf %380, %381 : vector<2x128xf32>
    %383 = arith.truncf %382 : vector<2x128xf32> to vector<2x128xbf16>
    %c24_188 = arith.constant 24 : index
    %c0_189 = arith.constant 0 : index
    %c0_190 = arith.constant 0 : index
    %384 = vector.load %arg1[%c24_188, %c0_189, %c0_190] : memref<77x128x128xbf16, #tpu.memory_space<vmem>>, vector<1x128x128xbf16>
    %385 = vector.shape_cast %384 : vector<1x128x128xbf16> to vector<128x128xbf16>
    %cst_191 = arith.constant dense<0.000000e+00> : vector<2x128xf32>
    %386 = tpu.matmul %383, %385, %cst_191 {dimension_numbers = #tpu.dot_dimension_numbers<[1], [0], [0], [1], [0, 0, 1, 1], [], []>} : vector<2x128xbf16>, vector<128x128xbf16>, vector<2x128xf32> -> vector<2x128xf32>
    %c36 = arith.constant 36 : index
    %c0_192 = arith.constant 0 : index
    %387 = vector.load %arg2[%c36, %c0_192] : memref<141x128xf32, #tpu.memory_space<vmem>>, vector<1x128xf32>
    %388 = vector.broadcast %387 : vector<1x128xf32> to vector<2x128xf32>
    %389 = arith.addf %386, %388 : vector<2x128xf32>
    %cst_193 = arith.constant 0.000000e+00 : f32
    %390 = vector.broadcast %cst_193 : f32 to vector<2x128xf32>
    %391 = arith.maximumf %389, %390 : vector<2x128xf32>
    %c37 = arith.constant 37 : index
    %c0_194 = arith.constant 0 : index
    %392 = vector.load %arg2[%c37, %c0_194] : memref<141x128xf32, #tpu.memory_space<vmem>>, vector<1x128xf32>
    %393 = vector.broadcast %392 : vector<1x128xf32> to vector<2x128xf32>
    %394 = arith.mulf %391, %393 : vector<2x128xf32>
    %c38 = arith.constant 38 : index
    %c0_195 = arith.constant 0 : index
    %395 = vector.load %arg2[%c38, %c0_195] : memref<141x128xf32, #tpu.memory_space<vmem>>, vector<1x128xf32>
    %396 = vector.broadcast %395 : vector<1x128xf32> to vector<2x128xf32>
    %397 = arith.addf %394, %396 : vector<2x128xf32>
    %398 = arith.truncf %397 : vector<2x128xf32> to vector<2x128xbf16>
    %c25_196 = arith.constant 25 : index
    %c0_197 = arith.constant 0 : index
    %c0_198 = arith.constant 0 : index
    %399 = vector.load %arg1[%c25_196, %c0_197, %c0_198] : memref<77x128x128xbf16, #tpu.memory_space<vmem>>, vector<1x128x128xbf16>
    %400 = vector.shape_cast %399 : vector<1x128x128xbf16> to vector<128x128xbf16>
    %cst_199 = arith.constant dense<0.000000e+00> : vector<2x128xf32>
    %401 = tpu.matmul %398, %400, %cst_199 {dimension_numbers = #tpu.dot_dimension_numbers<[1], [0], [0], [1], [0, 0, 1, 1], [], []>} : vector<2x128xbf16>, vector<128x128xbf16>, vector<2x128xf32> -> vector<2x128xf32>
    %c39 = arith.constant 39 : index
    %c0_200 = arith.constant 0 : index
    %402 = vector.load %arg2[%c39, %c0_200] : memref<141x128xf32, #tpu.memory_space<vmem>>, vector<1x128xf32>
    %403 = vector.broadcast %402 : vector<1x128xf32> to vector<2x128xf32>
    %404 = arith.addf %401, %403 : vector<2x128xf32>
    %405 = arith.negf %404 : vector<2x128xf32>
    %406 = math.exp %405 : vector<2x128xf32>
    %cst_201 = arith.constant 1.000000e+00 : f32
    %407 = vector.broadcast %cst_201 : f32 to vector<2x128xf32>
    %408 = arith.addf %407, %406 : vector<2x128xf32>
    %409 = arith.divf %407, %408 : vector<2x128xf32>
    %c40 = arith.constant 40 : index
    %c0_202 = arith.constant 0 : index
    %410 = vector.load %arg2[%c40, %c0_202] : memref<141x128xf32, #tpu.memory_space<vmem>>, vector<1x128xf32>
    %411 = vector.broadcast %410 : vector<1x128xf32> to vector<2x128xf32>
    %412 = arith.mulf %409, %411 : vector<2x128xf32>
    %c41 = arith.constant 41 : index
    %c0_203 = arith.constant 0 : index
    %413 = vector.load %arg2[%c41, %c0_203] : memref<141x128xf32, #tpu.memory_space<vmem>>, vector<1x128xf32>
    %414 = vector.broadcast %413 : vector<1x128xf32> to vector<2x128xf32>
    %415 = arith.addf %412, %414 : vector<2x128xf32>
    %416 = vector.shape_cast %415 : vector<2x128xf32> to vector<2x1x128xf32>
    %417 = vector.broadcast %416 : vector<2x1x128xf32> to vector<2x16x128xf32>
    %418 = arith.mulf %379, %417 : vector<2x16x128xf32>
    %419 = vector.shape_cast %201 : vector<32x128xf32> to vector<2x16x128xf32>
    %420 = arith.addf %418, %419 : vector<2x16x128xf32>
    %421 = vector.shape_cast %420 : vector<2x16x128xf32> to vector<32x128xf32>
    %cst_204 = arith.constant 2.500000e-01 : f32
    %422 = vector.broadcast %cst_204 : f32 to vector<32x128xf32>
    %423 = arith.mulf %422, %421 : vector<32x128xf32>
    %424 = arith.addf %312, %423 : vector<32x128xf32>
    %425 = arith.truncf %424 : vector<32x128xf32> to vector<32x128xbf16>
    %c26_205 = arith.constant 26 : index
    %c0_206 = arith.constant 0 : index
    %c0_207 = arith.constant 0 : index
    %426 = vector.load %arg1[%c26_205, %c0_206, %c0_207] : memref<77x128x128xbf16, #tpu.memory_space<vmem>>, vector<1x128x128xbf16>
    %427 = vector.shape_cast %426 : vector<1x128x128xbf16> to vector<128x128xbf16>
    %cst_208 = arith.constant dense<0.000000e+00> : vector<32x128xf32>
    %428 = tpu.matmul %425, %427, %cst_208 {dimension_numbers = #tpu.dot_dimension_numbers<[1], [0], [0], [1], [0, 0, 1, 1], [], []>} : vector<32x128xbf16>, vector<128x128xbf16>, vector<32x128xf32> -> vector<32x128xf32>
    %c42 = arith.constant 42 : index
    %c0_209 = arith.constant 0 : index
    %429 = vector.load %arg2[%c42, %c0_209] : memref<141x128xf32, #tpu.memory_space<vmem>>, vector<1x128xf32>
    %430 = vector.broadcast %429 : vector<1x128xf32> to vector<32x128xf32>
    %431 = arith.addf %428, %430 : vector<32x128xf32>
    %cst_210 = arith.constant 0.000000e+00 : f32
    %432 = vector.broadcast %cst_210 : f32 to vector<32x128xf32>
    %433 = arith.maximumf %431, %432 : vector<32x128xf32>
    %c43 = arith.constant 43 : index
    %c0_211 = arith.constant 0 : index
    %434 = vector.load %arg2[%c43, %c0_211] : memref<141x128xf32, #tpu.memory_space<vmem>>, vector<1x128xf32>
    %435 = vector.broadcast %434 : vector<1x128xf32> to vector<32x128xf32>
    %436 = arith.mulf %433, %435 : vector<32x128xf32>
    %c44 = arith.constant 44 : index
    %c0_212 = arith.constant 0 : index
    %437 = vector.load %arg2[%c44, %c0_212] : memref<141x128xf32, #tpu.memory_space<vmem>>, vector<1x128xf32>
    %438 = vector.broadcast %437 : vector<1x128xf32> to vector<32x128xf32>
    %439 = arith.addf %436, %438 : vector<32x128xf32>
    %440 = tpu.iota {dimensions = array<i32: 0>} : vector<32x32xi32>
    %441 = tpu.iota {dimensions = array<i32: 1>} : vector<32x32xi32>
    %442 = tpu.iota {dimensions = array<i32: 1>} : vector<2x16x32xi32>
    %443 = vector.shape_cast %442 : vector<2x16x32xi32> to vector<32x32xi32>
    %c-3_i32 = arith.constant -3 : i32
    %444 = vector.broadcast %c-3_i32 : i32 to vector<32x32xi32>
    %445 = arith.addi %440, %444 : vector<32x32xi32>
    %446 = arith.cmpi eq, %441, %445 : vector<32x32xi32>
    %c-3_i32_213 = arith.constant -3 : i32
    %447 = vector.broadcast %c-3_i32_213 : i32 to vector<32x32xi32>
    %448 = arith.addi %443, %447 : vector<32x32xi32>
    %c0_i32_214 = arith.constant 0 : i32
    %449 = vector.broadcast %c0_i32_214 : i32 to vector<32x32xi32>
    %450 = arith.cmpi sge, %448, %449 : vector<32x32xi32>
    %451 = arith.andi %446, %450 : vector<32x32xi1>
    %c-3_i32_215 = arith.constant -3 : i32
    %452 = vector.broadcast %c-3_i32_215 : i32 to vector<32x32xi32>
    %453 = arith.addi %443, %452 : vector<32x32xi32>
    %c16_i32_216 = arith.constant 16 : i32
    %454 = vector.broadcast %c16_i32_216 : i32 to vector<32x32xi32>
    %455 = arith.cmpi slt, %453, %454 : vector<32x32xi32>
    %456 = arith.andi %451, %455 : vector<32x32xi1>
    %cst_217 = arith.constant 1.000000e+00 : f32
    %cst_218 = arith.constant 0.000000e+00 : f32
    %457 = vector.broadcast %cst_217 : f32 to vector<32x32xf32>
    %458 = vector.broadcast %cst_218 : f32 to vector<32x32xf32>
    %459 = arith.select %456, %457, %458 : vector<32x32xi1>, vector<32x32xf32>
    %460 = arith.truncf %459 : vector<32x32xf32> to vector<32x32xbf16>
    %461 = arith.truncf %439 : vector<32x128xf32> to vector<32x128xbf16>
    %cst_219 = arith.constant dense<0.000000e+00> : vector<32x128xf32>
    %462 = tpu.matmul %460, %461, %cst_219 {dimension_numbers = #tpu.dot_dimension_numbers<[1], [0], [0], [1], [0, 0, 1, 1], [], []>} : vector<32x32xbf16>, vector<32x128xbf16>, vector<32x128xf32> -> vector<32x128xf32>
    %463 = arith.truncf %462 : vector<32x128xf32> to vector<32x128xbf16>
    %c27_220 = arith.constant 27 : index
    %c0_221 = arith.constant 0 : index
    %c0_222 = arith.constant 0 : index
    %464 = vector.load %arg1[%c27_220, %c0_221, %c0_222] : memref<77x128x128xbf16, #tpu.memory_space<vmem>>, vector<1x128x128xbf16>
    %465 = vector.shape_cast %464 : vector<1x128x128xbf16> to vector<128x128xbf16>
    %cst_223 = arith.constant dense<0.000000e+00> : vector<32x128xf32>
    %466 = tpu.matmul %463, %465, %cst_223 {dimension_numbers = #tpu.dot_dimension_numbers<[1], [0], [0], [1], [0, 0, 1, 1], [], []>} : vector<32x128xbf16>, vector<128x128xbf16>, vector<32x128xf32> -> vector<32x128xf32>
    %467 = arith.truncf %439 : vector<32x128xf32> to vector<32x128xbf16>
    %c28_224 = arith.constant 28 : index
    %c0_225 = arith.constant 0 : index
    %c0_226 = arith.constant 0 : index
    %468 = vector.load %arg1[%c28_224, %c0_225, %c0_226] : memref<77x128x128xbf16, #tpu.memory_space<vmem>>, vector<1x128x128xbf16>
    %469 = vector.shape_cast %468 : vector<1x128x128xbf16> to vector<128x128xbf16>
    %cst_227 = arith.constant dense<0.000000e+00> : vector<32x128xf32>
    %470 = tpu.matmul %467, %469, %cst_227 {dimension_numbers = #tpu.dot_dimension_numbers<[1], [0], [0], [1], [0, 0, 1, 1], [], []>} : vector<32x128xbf16>, vector<128x128xbf16>, vector<32x128xf32> -> vector<32x128xf32>
    %471 = arith.addf %466, %470 : vector<32x128xf32>
    %472 = tpu.iota {dimensions = array<i32: 0>} : vector<32x32xi32>
    %473 = tpu.iota {dimensions = array<i32: 1>} : vector<32x32xi32>
    %474 = tpu.iota {dimensions = array<i32: 1>} : vector<2x16x32xi32>
    %475 = vector.shape_cast %474 : vector<2x16x32xi32> to vector<32x32xi32>
    %c3_i32 = arith.constant 3 : i32
    %476 = vector.broadcast %c3_i32 : i32 to vector<32x32xi32>
    %477 = arith.addi %472, %476 : vector<32x32xi32>
    %478 = arith.cmpi eq, %473, %477 : vector<32x32xi32>
    %c3_i32_228 = arith.constant 3 : i32
    %479 = vector.broadcast %c3_i32_228 : i32 to vector<32x32xi32>
    %480 = arith.addi %475, %479 : vector<32x32xi32>
    %c0_i32_229 = arith.constant 0 : i32
    %481 = vector.broadcast %c0_i32_229 : i32 to vector<32x32xi32>
    %482 = arith.cmpi sge, %480, %481 : vector<32x32xi32>
    %483 = arith.andi %478, %482 : vector<32x32xi1>
    %c3_i32_230 = arith.constant 3 : i32
    %484 = vector.broadcast %c3_i32_230 : i32 to vector<32x32xi32>
    %485 = arith.addi %475, %484 : vector<32x32xi32>
    %c16_i32_231 = arith.constant 16 : i32
    %486 = vector.broadcast %c16_i32_231 : i32 to vector<32x32xi32>
    %487 = arith.cmpi slt, %485, %486 : vector<32x32xi32>
    %488 = arith.andi %483, %487 : vector<32x32xi1>
    %cst_232 = arith.constant 1.000000e+00 : f32
    %cst_233 = arith.constant 0.000000e+00 : f32
    %489 = vector.broadcast %cst_232 : f32 to vector<32x32xf32>
    %490 = vector.broadcast %cst_233 : f32 to vector<32x32xf32>
    %491 = arith.select %488, %489, %490 : vector<32x32xi1>, vector<32x32xf32>
    %492 = arith.truncf %491 : vector<32x32xf32> to vector<32x32xbf16>
    %493 = arith.truncf %439 : vector<32x128xf32> to vector<32x128xbf16>
    %cst_234 = arith.constant dense<0.000000e+00> : vector<32x128xf32>
    %494 = tpu.matmul %492, %493, %cst_234 {dimension_numbers = #tpu.dot_dimension_numbers<[1], [0], [0], [1], [0, 0, 1, 1], [], []>} : vector<32x32xbf16>, vector<32x128xbf16>, vector<32x128xf32> -> vector<32x128xf32>
    %495 = arith.truncf %494 : vector<32x128xf32> to vector<32x128xbf16>
    %c29_235 = arith.constant 29 : index
    %c0_236 = arith.constant 0 : index
    %c0_237 = arith.constant 0 : index
    %496 = vector.load %arg1[%c29_235, %c0_236, %c0_237] : memref<77x128x128xbf16, #tpu.memory_space<vmem>>, vector<1x128x128xbf16>
    %497 = vector.shape_cast %496 : vector<1x128x128xbf16> to vector<128x128xbf16>
    %cst_238 = arith.constant dense<0.000000e+00> : vector<32x128xf32>
    %498 = tpu.matmul %495, %497, %cst_238 {dimension_numbers = #tpu.dot_dimension_numbers<[1], [0], [0], [1], [0, 0, 1, 1], [], []>} : vector<32x128xbf16>, vector<128x128xbf16>, vector<32x128xf32> -> vector<32x128xf32>
    %499 = arith.addf %471, %498 : vector<32x128xf32>
    %c45 = arith.constant 45 : index
    %c0_239 = arith.constant 0 : index
    %500 = vector.load %arg2[%c45, %c0_239] : memref<141x128xf32, #tpu.memory_space<vmem>>, vector<1x128xf32>
    %501 = vector.broadcast %500 : vector<1x128xf32> to vector<32x128xf32>
    %502 = arith.addf %499, %501 : vector<32x128xf32>
    %cst_240 = arith.constant 0.000000e+00 : f32
    %503 = vector.broadcast %cst_240 : f32 to vector<32x128xf32>
    %504 = arith.maximumf %502, %503 : vector<32x128xf32>
    %c46 = arith.constant 46 : index
    %c0_241 = arith.constant 0 : index
    %505 = vector.load %arg2[%c46, %c0_241] : memref<141x128xf32, #tpu.memory_space<vmem>>, vector<1x128xf32>
    %506 = vector.broadcast %505 : vector<1x128xf32> to vector<32x128xf32>
    %507 = arith.mulf %504, %506 : vector<32x128xf32>
    %c47 = arith.constant 47 : index
    %c0_242 = arith.constant 0 : index
    %508 = vector.load %arg2[%c47, %c0_242] : memref<141x128xf32, #tpu.memory_space<vmem>>, vector<1x128xf32>
    %509 = vector.broadcast %508 : vector<1x128xf32> to vector<32x128xf32>
    %510 = arith.addf %507, %509 : vector<32x128xf32>
    %c16_i32_243 = arith.constant 16 : i32
    %511 = vector.broadcast %c16_i32_243 : i32 to vector<1x128xi32>
    %512 = arith.cmpi slt, %2, %511 : vector<1x128xi32>
    %513 = arith.extui %512 : vector<1x128xi1> to vector<1x128xi32>
    %514 = arith.sitofp %513 : vector<1x128xi32> to vector<1x128xf32>
    %515 = vector.broadcast %514 : vector<1x128xf32> to vector<32x128xf32>
    %516 = arith.mulf %439, %515 : vector<32x128xf32>
    %517 = arith.addf %516, %510 : vector<32x128xf32>
    %518 = arith.truncf %517 : vector<32x128xf32> to vector<32x128xbf16>
    %c30_244 = arith.constant 30 : index
    %c0_245 = arith.constant 0 : index
    %c0_246 = arith.constant 0 : index
    %519 = vector.load %arg1[%c30_244, %c0_245, %c0_246] : memref<77x128x128xbf16, #tpu.memory_space<vmem>>, vector<1x128x128xbf16>
    %520 = vector.shape_cast %519 : vector<1x128x128xbf16> to vector<128x128xbf16>
    %cst_247 = arith.constant dense<0.000000e+00> : vector<32x128xf32>
    %521 = tpu.matmul %518, %520, %cst_247 {dimension_numbers = #tpu.dot_dimension_numbers<[1], [0], [0], [1], [0, 0, 1, 1], [], []>} : vector<32x128xbf16>, vector<128x128xbf16>, vector<32x128xf32> -> vector<32x128xf32>
    %c48 = arith.constant 48 : index
    %c0_248 = arith.constant 0 : index
    %522 = vector.load %arg2[%c48, %c0_248] : memref<141x128xf32, #tpu.memory_space<vmem>>, vector<1x128xf32>
    %523 = vector.broadcast %522 : vector<1x128xf32> to vector<32x128xf32>
    %524 = arith.addf %521, %523 : vector<32x128xf32>
    %cst_249 = arith.constant 0.000000e+00 : f32
    %525 = vector.broadcast %cst_249 : f32 to vector<32x128xf32>
    %526 = arith.maximumf %524, %525 : vector<32x128xf32>
    %c49 = arith.constant 49 : index
    %c0_250 = arith.constant 0 : index
    %527 = vector.load %arg2[%c49, %c0_250] : memref<141x128xf32, #tpu.memory_space<vmem>>, vector<1x128xf32>
    %528 = vector.broadcast %527 : vector<1x128xf32> to vector<32x128xf32>
    %529 = arith.mulf %526, %528 : vector<32x128xf32>
    %c50 = arith.constant 50 : index
    %c0_251 = arith.constant 0 : index
    %530 = vector.load %arg2[%c50, %c0_251] : memref<141x128xf32, #tpu.memory_space<vmem>>, vector<1x128xf32>
    %531 = vector.broadcast %530 : vector<1x128xf32> to vector<32x128xf32>
    %532 = arith.addf %529, %531 : vector<32x128xf32>
    %533 = vector.shape_cast %532 : vector<32x128xf32> to vector<2x16x128xf32>
    %cst_252 = arith.constant dense<0.000000e+00> : vector<2x128xf32>
    %534 = vector.multi_reduction <add>, %533, %cst_252 [1] : vector<2x16x128xf32> to vector<2x128xf32>
    %cst_253 = arith.constant 1.600000e+01 : f32
    %535 = vector.broadcast %cst_253 : f32 to vector<2x128xf32>
    %536 = arith.divf %534, %535 : vector<2x128xf32>
    %537 = arith.truncf %536 : vector<2x128xf32> to vector<2x128xbf16>
    %c31_254 = arith.constant 31 : index
    %c0_255 = arith.constant 0 : index
    %c0_256 = arith.constant 0 : index
    %538 = vector.load %arg1[%c31_254, %c0_255, %c0_256] : memref<77x128x128xbf16, #tpu.memory_space<vmem>>, vector<1x128x128xbf16>
    %539 = vector.shape_cast %538 : vector<1x128x128xbf16> to vector<128x128xbf16>
    %cst_257 = arith.constant dense<0.000000e+00> : vector<2x128xf32>
    %540 = tpu.matmul %537, %539, %cst_257 {dimension_numbers = #tpu.dot_dimension_numbers<[1], [0], [0], [1], [0, 0, 1, 1], [], []>} : vector<2x128xbf16>, vector<128x128xbf16>, vector<2x128xf32> -> vector<2x128xf32>
    %c51 = arith.constant 51 : index
    %c0_258 = arith.constant 0 : index
    %541 = vector.load %arg2[%c51, %c0_258] : memref<141x128xf32, #tpu.memory_space<vmem>>, vector<1x128xf32>
    %542 = vector.broadcast %541 : vector<1x128xf32> to vector<2x128xf32>
    %543 = arith.addf %540, %542 : vector<2x128xf32>
    %cst_259 = arith.constant 0.000000e+00 : f32
    %544 = vector.broadcast %cst_259 : f32 to vector<2x128xf32>
    %545 = arith.maximumf %543, %544 : vector<2x128xf32>
    %c52 = arith.constant 52 : index
    %c0_260 = arith.constant 0 : index
    %546 = vector.load %arg2[%c52, %c0_260] : memref<141x128xf32, #tpu.memory_space<vmem>>, vector<1x128xf32>
    %547 = vector.broadcast %546 : vector<1x128xf32> to vector<2x128xf32>
    %548 = arith.mulf %545, %547 : vector<2x128xf32>
    %c53 = arith.constant 53 : index
    %c0_261 = arith.constant 0 : index
    %549 = vector.load %arg2[%c53, %c0_261] : memref<141x128xf32, #tpu.memory_space<vmem>>, vector<1x128xf32>
    %550 = vector.broadcast %549 : vector<1x128xf32> to vector<2x128xf32>
    %551 = arith.addf %548, %550 : vector<2x128xf32>
    %552 = arith.truncf %551 : vector<2x128xf32> to vector<2x128xbf16>
    %c32_262 = arith.constant 32 : index
    %c0_263 = arith.constant 0 : index
    %c0_264 = arith.constant 0 : index
    %553 = vector.load %arg1[%c32_262, %c0_263, %c0_264] : memref<77x128x128xbf16, #tpu.memory_space<vmem>>, vector<1x128x128xbf16>
    %554 = vector.shape_cast %553 : vector<1x128x128xbf16> to vector<128x128xbf16>
    %cst_265 = arith.constant dense<0.000000e+00> : vector<2x128xf32>
    %555 = tpu.matmul %552, %554, %cst_265 {dimension_numbers = #tpu.dot_dimension_numbers<[1], [0], [0], [1], [0, 0, 1, 1], [], []>} : vector<2x128xbf16>, vector<128x128xbf16>, vector<2x128xf32> -> vector<2x128xf32>
    %c54 = arith.constant 54 : index
    %c0_266 = arith.constant 0 : index
    %556 = vector.load %arg2[%c54, %c0_266] : memref<141x128xf32, #tpu.memory_space<vmem>>, vector<1x128xf32>
    %557 = vector.broadcast %556 : vector<1x128xf32> to vector<2x128xf32>
    %558 = arith.addf %555, %557 : vector<2x128xf32>
    %559 = arith.negf %558 : vector<2x128xf32>
    %560 = math.exp %559 : vector<2x128xf32>
    %cst_267 = arith.constant 1.000000e+00 : f32
    %561 = vector.broadcast %cst_267 : f32 to vector<2x128xf32>
    %562 = arith.addf %561, %560 : vector<2x128xf32>
    %563 = arith.divf %561, %562 : vector<2x128xf32>
    %c55 = arith.constant 55 : index
    %c0_268 = arith.constant 0 : index
    %564 = vector.load %arg2[%c55, %c0_268] : memref<141x128xf32, #tpu.memory_space<vmem>>, vector<1x128xf32>
    %565 = vector.broadcast %564 : vector<1x128xf32> to vector<2x128xf32>
    %566 = arith.mulf %563, %565 : vector<2x128xf32>
    %c56 = arith.constant 56 : index
    %c0_269 = arith.constant 0 : index
    %567 = vector.load %arg2[%c56, %c0_269] : memref<141x128xf32, #tpu.memory_space<vmem>>, vector<1x128xf32>
    %568 = vector.broadcast %567 : vector<1x128xf32> to vector<2x128xf32>
    %569 = arith.addf %566, %568 : vector<2x128xf32>
    %570 = vector.shape_cast %569 : vector<2x128xf32> to vector<2x1x128xf32>
    %571 = vector.broadcast %570 : vector<2x1x128xf32> to vector<2x16x128xf32>
    %572 = arith.mulf %533, %571 : vector<2x16x128xf32>
    %573 = vector.shape_cast %424 : vector<32x128xf32> to vector<2x16x128xf32>
    %574 = arith.addf %572, %573 : vector<2x16x128xf32>
    %575 = vector.shape_cast %574 : vector<2x16x128xf32> to vector<32x128xf32>
    %cst_270 = arith.constant 7.500000e-01 : f32
    %576 = vector.broadcast %cst_270 : f32 to vector<32x128xf32>
    %577 = arith.mulf %576, %575 : vector<32x128xf32>
    %578 = arith.truncf %424 : vector<32x128xf32> to vector<32x128xbf16>
    %c33_271 = arith.constant 33 : index
    %c0_272 = arith.constant 0 : index
    %c0_273 = arith.constant 0 : index
    %579 = vector.load %arg1[%c33_271, %c0_272, %c0_273] : memref<77x128x128xbf16, #tpu.memory_space<vmem>>, vector<1x128x128xbf16>
    %580 = vector.shape_cast %579 : vector<1x128x128xbf16> to vector<128x128xbf16>
    %cst_274 = arith.constant dense<0.000000e+00> : vector<32x128xf32>
    %581 = tpu.matmul %578, %580, %cst_274 {dimension_numbers = #tpu.dot_dimension_numbers<[1], [0], [0], [1], [0, 0, 1, 1], [], []>} : vector<32x128xbf16>, vector<128x128xbf16>, vector<32x128xf32> -> vector<32x128xf32>
    %c57 = arith.constant 57 : index
    %c0_275 = arith.constant 0 : index
    %582 = vector.load %arg2[%c57, %c0_275] : memref<141x128xf32, #tpu.memory_space<vmem>>, vector<1x128xf32>
    %583 = vector.broadcast %582 : vector<1x128xf32> to vector<32x128xf32>
    %584 = arith.addf %581, %583 : vector<32x128xf32>
    %cst_276 = arith.constant 0.000000e+00 : f32
    %585 = vector.broadcast %cst_276 : f32 to vector<32x128xf32>
    %586 = arith.maximumf %584, %585 : vector<32x128xf32>
    %c58 = arith.constant 58 : index
    %c0_277 = arith.constant 0 : index
    %587 = vector.load %arg2[%c58, %c0_277] : memref<141x128xf32, #tpu.memory_space<vmem>>, vector<1x128xf32>
    %588 = vector.broadcast %587 : vector<1x128xf32> to vector<32x128xf32>
    %589 = arith.mulf %586, %588 : vector<32x128xf32>
    %c59 = arith.constant 59 : index
    %c0_278 = arith.constant 0 : index
    %590 = vector.load %arg2[%c59, %c0_278] : memref<141x128xf32, #tpu.memory_space<vmem>>, vector<1x128xf32>
    %591 = vector.broadcast %590 : vector<1x128xf32> to vector<32x128xf32>
    %592 = arith.addf %589, %591 : vector<32x128xf32>
    %593 = arith.truncf %592 : vector<32x128xf32> to vector<32x128xbf16>
    %cst_279 = arith.constant dense<0.000000e+00> : vector<32x128xf32>
    %594 = tpu.matmul %460, %593, %cst_279 {dimension_numbers = #tpu.dot_dimension_numbers<[1], [0], [0], [1], [0, 0, 1, 1], [], []>} : vector<32x32xbf16>, vector<32x128xbf16>, vector<32x128xf32> -> vector<32x128xf32>
    %595 = arith.truncf %594 : vector<32x128xf32> to vector<32x128xbf16>
    %c34_280 = arith.constant 34 : index
    %c0_281 = arith.constant 0 : index
    %c0_282 = arith.constant 0 : index
    %596 = vector.load %arg1[%c34_280, %c0_281, %c0_282] : memref<77x128x128xbf16, #tpu.memory_space<vmem>>, vector<1x128x128xbf16>
    %597 = vector.shape_cast %596 : vector<1x128x128xbf16> to vector<128x128xbf16>
    %cst_283 = arith.constant dense<0.000000e+00> : vector<32x128xf32>
    %598 = tpu.matmul %595, %597, %cst_283 {dimension_numbers = #tpu.dot_dimension_numbers<[1], [0], [0], [1], [0, 0, 1, 1], [], []>} : vector<32x128xbf16>, vector<128x128xbf16>, vector<32x128xf32> -> vector<32x128xf32>
    %599 = arith.truncf %592 : vector<32x128xf32> to vector<32x128xbf16>
    %c35_284 = arith.constant 35 : index
    %c0_285 = arith.constant 0 : index
    %c0_286 = arith.constant 0 : index
    %600 = vector.load %arg1[%c35_284, %c0_285, %c0_286] : memref<77x128x128xbf16, #tpu.memory_space<vmem>>, vector<1x128x128xbf16>
    %601 = vector.shape_cast %600 : vector<1x128x128xbf16> to vector<128x128xbf16>
    %cst_287 = arith.constant dense<0.000000e+00> : vector<32x128xf32>
    %602 = tpu.matmul %599, %601, %cst_287 {dimension_numbers = #tpu.dot_dimension_numbers<[1], [0], [0], [1], [0, 0, 1, 1], [], []>} : vector<32x128xbf16>, vector<128x128xbf16>, vector<32x128xf32> -> vector<32x128xf32>
    %603 = arith.addf %598, %602 : vector<32x128xf32>
    %604 = arith.truncf %592 : vector<32x128xf32> to vector<32x128xbf16>
    %cst_288 = arith.constant dense<0.000000e+00> : vector<32x128xf32>
    %605 = tpu.matmul %492, %604, %cst_288 {dimension_numbers = #tpu.dot_dimension_numbers<[1], [0], [0], [1], [0, 0, 1, 1], [], []>} : vector<32x32xbf16>, vector<32x128xbf16>, vector<32x128xf32> -> vector<32x128xf32>
    %606 = arith.truncf %605 : vector<32x128xf32> to vector<32x128xbf16>
    %c36_289 = arith.constant 36 : index
    %c0_290 = arith.constant 0 : index
    %c0_291 = arith.constant 0 : index
    %607 = vector.load %arg1[%c36_289, %c0_290, %c0_291] : memref<77x128x128xbf16, #tpu.memory_space<vmem>>, vector<1x128x128xbf16>
    %608 = vector.shape_cast %607 : vector<1x128x128xbf16> to vector<128x128xbf16>
    %cst_292 = arith.constant dense<0.000000e+00> : vector<32x128xf32>
    %609 = tpu.matmul %606, %608, %cst_292 {dimension_numbers = #tpu.dot_dimension_numbers<[1], [0], [0], [1], [0, 0, 1, 1], [], []>} : vector<32x128xbf16>, vector<128x128xbf16>, vector<32x128xf32> -> vector<32x128xf32>
    %610 = arith.addf %603, %609 : vector<32x128xf32>
    %c60 = arith.constant 60 : index
    %c0_293 = arith.constant 0 : index
    %611 = vector.load %arg2[%c60, %c0_293] : memref<141x128xf32, #tpu.memory_space<vmem>>, vector<1x128xf32>
    %612 = vector.broadcast %611 : vector<1x128xf32> to vector<32x128xf32>
    %613 = arith.addf %610, %612 : vector<32x128xf32>
    %cst_294 = arith.constant 0.000000e+00 : f32
    %614 = vector.broadcast %cst_294 : f32 to vector<32x128xf32>
    %615 = arith.maximumf %613, %614 : vector<32x128xf32>
    %c61 = arith.constant 61 : index
    %c0_295 = arith.constant 0 : index
    %616 = vector.load %arg2[%c61, %c0_295] : memref<141x128xf32, #tpu.memory_space<vmem>>, vector<1x128xf32>
    %617 = vector.broadcast %616 : vector<1x128xf32> to vector<32x128xf32>
    %618 = arith.mulf %615, %617 : vector<32x128xf32>
    %c62 = arith.constant 62 : index
    %c0_296 = arith.constant 0 : index
    %619 = vector.load %arg2[%c62, %c0_296] : memref<141x128xf32, #tpu.memory_space<vmem>>, vector<1x128xf32>
    %620 = vector.broadcast %619 : vector<1x128xf32> to vector<32x128xf32>
    %621 = arith.addf %618, %620 : vector<32x128xf32>
    %c4_i32_297 = arith.constant 4 : i32
    %622 = vector.broadcast %c4_i32_297 : i32 to vector<1x128xi32>
    %623 = arith.cmpi slt, %2, %622 : vector<1x128xi32>
    %624 = arith.extui %623 : vector<1x128xi1> to vector<1x128xi32>
    %625 = arith.sitofp %624 : vector<1x128xi32> to vector<1x128xf32>
    %626 = vector.broadcast %625 : vector<1x128xf32> to vector<32x128xf32>
    %627 = arith.mulf %592, %626 : vector<32x128xf32>
    %628 = arith.addf %627, %621 : vector<32x128xf32>
    %629 = arith.truncf %628 : vector<32x128xf32> to vector<32x128xbf16>
    %c37_298 = arith.constant 37 : index
    %c0_299 = arith.constant 0 : index
    %c0_300 = arith.constant 0 : index
    %630 = vector.load %arg1[%c37_298, %c0_299, %c0_300] : memref<77x128x128xbf16, #tpu.memory_space<vmem>>, vector<1x128x128xbf16>
    %631 = vector.shape_cast %630 : vector<1x128x128xbf16> to vector<128x128xbf16>
    %cst_301 = arith.constant dense<0.000000e+00> : vector<32x128xf32>
    %632 = tpu.matmul %629, %631, %cst_301 {dimension_numbers = #tpu.dot_dimension_numbers<[1], [0], [0], [1], [0, 0, 1, 1], [], []>} : vector<32x128xbf16>, vector<128x128xbf16>, vector<32x128xf32> -> vector<32x128xf32>
    %c63 = arith.constant 63 : index
    %c0_302 = arith.constant 0 : index
    %633 = vector.load %arg2[%c63, %c0_302] : memref<141x128xf32, #tpu.memory_space<vmem>>, vector<1x128xf32>
    %634 = vector.broadcast %633 : vector<1x128xf32> to vector<32x128xf32>
    %635 = arith.addf %632, %634 : vector<32x128xf32>
    %cst_303 = arith.constant 0.000000e+00 : f32
    %636 = vector.broadcast %cst_303 : f32 to vector<32x128xf32>
    %637 = arith.maximumf %635, %636 : vector<32x128xf32>
    %c64 = arith.constant 64 : index
    %c0_304 = arith.constant 0 : index
    %638 = vector.load %arg2[%c64, %c0_304] : memref<141x128xf32, #tpu.memory_space<vmem>>, vector<1x128xf32>
    %639 = vector.broadcast %638 : vector<1x128xf32> to vector<32x128xf32>
    %640 = arith.mulf %637, %639 : vector<32x128xf32>
    %c65 = arith.constant 65 : index
    %c0_305 = arith.constant 0 : index
    %641 = vector.load %arg2[%c65, %c0_305] : memref<141x128xf32, #tpu.memory_space<vmem>>, vector<1x128xf32>
    %642 = vector.broadcast %641 : vector<1x128xf32> to vector<32x128xf32>
    %643 = arith.addf %640, %642 : vector<32x128xf32>
    %644 = vector.shape_cast %643 : vector<32x128xf32> to vector<2x16x128xf32>
    %cst_306 = arith.constant dense<0.000000e+00> : vector<2x128xf32>
    %645 = vector.multi_reduction <add>, %644, %cst_306 [1] : vector<2x16x128xf32> to vector<2x128xf32>
    %cst_307 = arith.constant 1.600000e+01 : f32
    %646 = vector.broadcast %cst_307 : f32 to vector<2x128xf32>
    %647 = arith.divf %645, %646 : vector<2x128xf32>
    %648 = arith.truncf %647 : vector<2x128xf32> to vector<2x128xbf16>
    %c38_308 = arith.constant 38 : index
    %c0_309 = arith.constant 0 : index
    %c0_310 = arith.constant 0 : index
    %649 = vector.load %arg1[%c38_308, %c0_309, %c0_310] : memref<77x128x128xbf16, #tpu.memory_space<vmem>>, vector<1x128x128xbf16>
    %650 = vector.shape_cast %649 : vector<1x128x128xbf16> to vector<128x128xbf16>
    %cst_311 = arith.constant dense<0.000000e+00> : vector<2x128xf32>
    %651 = tpu.matmul %648, %650, %cst_311 {dimension_numbers = #tpu.dot_dimension_numbers<[1], [0], [0], [1], [0, 0, 1, 1], [], []>} : vector<2x128xbf16>, vector<128x128xbf16>, vector<2x128xf32> -> vector<2x128xf32>
    %c66 = arith.constant 66 : index
    %c0_312 = arith.constant 0 : index
    %652 = vector.load %arg2[%c66, %c0_312] : memref<141x128xf32, #tpu.memory_space<vmem>>, vector<1x128xf32>
    %653 = vector.broadcast %652 : vector<1x128xf32> to vector<2x128xf32>
    %654 = arith.addf %651, %653 : vector<2x128xf32>
    %cst_313 = arith.constant 0.000000e+00 : f32
    %655 = vector.broadcast %cst_313 : f32 to vector<2x128xf32>
    %656 = arith.maximumf %654, %655 : vector<2x128xf32>
    %c67 = arith.constant 67 : index
    %c0_314 = arith.constant 0 : index
    %657 = vector.load %arg2[%c67, %c0_314] : memref<141x128xf32, #tpu.memory_space<vmem>>, vector<1x128xf32>
    %658 = vector.broadcast %657 : vector<1x128xf32> to vector<2x128xf32>
    %659 = arith.mulf %656, %658 : vector<2x128xf32>
    %c68 = arith.constant 68 : index
    %c0_315 = arith.constant 0 : index
    %660 = vector.load %arg2[%c68, %c0_315] : memref<141x128xf32, #tpu.memory_space<vmem>>, vector<1x128xf32>
    %661 = vector.broadcast %660 : vector<1x128xf32> to vector<2x128xf32>
    %662 = arith.addf %659, %661 : vector<2x128xf32>
    %663 = arith.truncf %662 : vector<2x128xf32> to vector<2x128xbf16>
    %c39_316 = arith.constant 39 : index
    %c0_317 = arith.constant 0 : index
    %c0_318 = arith.constant 0 : index
    %664 = vector.load %arg1[%c39_316, %c0_317, %c0_318] : memref<77x128x128xbf16, #tpu.memory_space<vmem>>, vector<1x128x128xbf16>
    %665 = vector.shape_cast %664 : vector<1x128x128xbf16> to vector<128x128xbf16>
    %cst_319 = arith.constant dense<0.000000e+00> : vector<2x128xf32>
    %666 = tpu.matmul %663, %665, %cst_319 {dimension_numbers = #tpu.dot_dimension_numbers<[1], [0], [0], [1], [0, 0, 1, 1], [], []>} : vector<2x128xbf16>, vector<128x128xbf16>, vector<2x128xf32> -> vector<2x128xf32>
    %c69 = arith.constant 69 : index
    %c0_320 = arith.constant 0 : index
    %667 = vector.load %arg2[%c69, %c0_320] : memref<141x128xf32, #tpu.memory_space<vmem>>, vector<1x128xf32>
    %668 = vector.broadcast %667 : vector<1x128xf32> to vector<2x128xf32>
    %669 = arith.addf %666, %668 : vector<2x128xf32>
    %670 = arith.negf %669 : vector<2x128xf32>
    %671 = math.exp %670 : vector<2x128xf32>
    %cst_321 = arith.constant 1.000000e+00 : f32
    %672 = vector.broadcast %cst_321 : f32 to vector<2x128xf32>
    %673 = arith.addf %672, %671 : vector<2x128xf32>
    %674 = arith.divf %672, %673 : vector<2x128xf32>
    %c70 = arith.constant 70 : index
    %c0_322 = arith.constant 0 : index
    %675 = vector.load %arg2[%c70, %c0_322] : memref<141x128xf32, #tpu.memory_space<vmem>>, vector<1x128xf32>
    %676 = vector.broadcast %675 : vector<1x128xf32> to vector<2x128xf32>
    %677 = arith.mulf %674, %676 : vector<2x128xf32>
    %c71 = arith.constant 71 : index
    %c0_323 = arith.constant 0 : index
    %678 = vector.load %arg2[%c71, %c0_323] : memref<141x128xf32, #tpu.memory_space<vmem>>, vector<1x128xf32>
    %679 = vector.broadcast %678 : vector<1x128xf32> to vector<2x128xf32>
    %680 = arith.addf %677, %679 : vector<2x128xf32>
    %681 = vector.shape_cast %680 : vector<2x128xf32> to vector<2x1x128xf32>
    %682 = vector.broadcast %681 : vector<2x1x128xf32> to vector<2x16x128xf32>
    %683 = arith.mulf %644, %682 : vector<2x16x128xf32>
    %684 = vector.shape_cast %424 : vector<32x128xf32> to vector<2x16x128xf32>
    %685 = arith.addf %683, %684 : vector<2x16x128xf32>
    %686 = vector.shape_cast %685 : vector<2x16x128xf32> to vector<32x128xf32>
    %cst_324 = arith.constant 2.500000e-01 : f32
    %687 = vector.broadcast %cst_324 : f32 to vector<32x128xf32>
    %688 = arith.mulf %687, %686 : vector<32x128xf32>
    %689 = arith.addf %577, %688 : vector<32x128xf32>
    %690 = arith.truncf %689 : vector<32x128xf32> to vector<32x128xbf16>
    %c40_325 = arith.constant 40 : index
    %c0_326 = arith.constant 0 : index
    %c0_327 = arith.constant 0 : index
    %691 = vector.load %arg1[%c40_325, %c0_326, %c0_327] : memref<77x128x128xbf16, #tpu.memory_space<vmem>>, vector<1x128x128xbf16>
    %692 = vector.shape_cast %691 : vector<1x128x128xbf16> to vector<128x128xbf16>
    %cst_328 = arith.constant dense<0.000000e+00> : vector<32x128xf32>
    %693 = tpu.matmul %690, %692, %cst_328 {dimension_numbers = #tpu.dot_dimension_numbers<[1], [0], [0], [1], [0, 0, 1, 1], [], []>} : vector<32x128xbf16>, vector<128x128xbf16>, vector<32x128xf32> -> vector<32x128xf32>
    %c72 = arith.constant 72 : index
    %c0_329 = arith.constant 0 : index
    %694 = vector.load %arg2[%c72, %c0_329] : memref<141x128xf32, #tpu.memory_space<vmem>>, vector<1x128xf32>
    %695 = vector.broadcast %694 : vector<1x128xf32> to vector<32x128xf32>
    %696 = arith.addf %693, %695 : vector<32x128xf32>
    %cst_330 = arith.constant 0.000000e+00 : f32
    %697 = vector.broadcast %cst_330 : f32 to vector<32x128xf32>
    %698 = arith.maximumf %696, %697 : vector<32x128xf32>
    %c73 = arith.constant 73 : index
    %c0_331 = arith.constant 0 : index
    %699 = vector.load %arg2[%c73, %c0_331] : memref<141x128xf32, #tpu.memory_space<vmem>>, vector<1x128xf32>
    %700 = vector.broadcast %699 : vector<1x128xf32> to vector<32x128xf32>
    %701 = arith.mulf %698, %700 : vector<32x128xf32>
    %c74 = arith.constant 74 : index
    %c0_332 = arith.constant 0 : index
    %702 = vector.load %arg2[%c74, %c0_332] : memref<141x128xf32, #tpu.memory_space<vmem>>, vector<1x128xf32>
    %703 = vector.broadcast %702 : vector<1x128xf32> to vector<32x128xf32>
    %704 = arith.addf %701, %703 : vector<32x128xf32>
    %705 = tpu.iota {dimensions = array<i32: 0>} : vector<32x32xi32>
    %706 = tpu.iota {dimensions = array<i32: 1>} : vector<32x32xi32>
    %707 = tpu.iota {dimensions = array<i32: 1>} : vector<2x16x32xi32>
    %708 = vector.shape_cast %707 : vector<2x16x32xi32> to vector<32x32xi32>
    %c-4_i32 = arith.constant -4 : i32
    %709 = vector.broadcast %c-4_i32 : i32 to vector<32x32xi32>
    %710 = arith.addi %705, %709 : vector<32x32xi32>
    %711 = arith.cmpi eq, %706, %710 : vector<32x32xi32>
    %c-4_i32_333 = arith.constant -4 : i32
    %712 = vector.broadcast %c-4_i32_333 : i32 to vector<32x32xi32>
    %713 = arith.addi %708, %712 : vector<32x32xi32>
    %c0_i32_334 = arith.constant 0 : i32
    %714 = vector.broadcast %c0_i32_334 : i32 to vector<32x32xi32>
    %715 = arith.cmpi sge, %713, %714 : vector<32x32xi32>
    %716 = arith.andi %711, %715 : vector<32x32xi1>
    %c-4_i32_335 = arith.constant -4 : i32
    %717 = vector.broadcast %c-4_i32_335 : i32 to vector<32x32xi32>
    %718 = arith.addi %708, %717 : vector<32x32xi32>
    %c16_i32_336 = arith.constant 16 : i32
    %719 = vector.broadcast %c16_i32_336 : i32 to vector<32x32xi32>
    %720 = arith.cmpi slt, %718, %719 : vector<32x32xi32>
    %721 = arith.andi %716, %720 : vector<32x32xi1>
    %cst_337 = arith.constant 1.000000e+00 : f32
    %cst_338 = arith.constant 0.000000e+00 : f32
    %722 = vector.broadcast %cst_337 : f32 to vector<32x32xf32>
    %723 = vector.broadcast %cst_338 : f32 to vector<32x32xf32>
    %724 = arith.select %721, %722, %723 : vector<32x32xi1>, vector<32x32xf32>
    %725 = arith.truncf %724 : vector<32x32xf32> to vector<32x32xbf16>
    %726 = arith.truncf %704 : vector<32x128xf32> to vector<32x128xbf16>
    %cst_339 = arith.constant dense<0.000000e+00> : vector<32x128xf32>
    %727 = tpu.matmul %725, %726, %cst_339 {dimension_numbers = #tpu.dot_dimension_numbers<[1], [0], [0], [1], [0, 0, 1, 1], [], []>} : vector<32x32xbf16>, vector<32x128xbf16>, vector<32x128xf32> -> vector<32x128xf32>
    %728 = arith.truncf %727 : vector<32x128xf32> to vector<32x128xbf16>
    %c41_340 = arith.constant 41 : index
    %c0_341 = arith.constant 0 : index
    %c0_342 = arith.constant 0 : index
    %729 = vector.load %arg1[%c41_340, %c0_341, %c0_342] : memref<77x128x128xbf16, #tpu.memory_space<vmem>>, vector<1x128x128xbf16>
    %730 = vector.shape_cast %729 : vector<1x128x128xbf16> to vector<128x128xbf16>
    %cst_343 = arith.constant dense<0.000000e+00> : vector<32x128xf32>
    %731 = tpu.matmul %728, %730, %cst_343 {dimension_numbers = #tpu.dot_dimension_numbers<[1], [0], [0], [1], [0, 0, 1, 1], [], []>} : vector<32x128xbf16>, vector<128x128xbf16>, vector<32x128xf32> -> vector<32x128xf32>
    %732 = arith.truncf %704 : vector<32x128xf32> to vector<32x128xbf16>
    %c42_344 = arith.constant 42 : index
    %c0_345 = arith.constant 0 : index
    %c0_346 = arith.constant 0 : index
    %733 = vector.load %arg1[%c42_344, %c0_345, %c0_346] : memref<77x128x128xbf16, #tpu.memory_space<vmem>>, vector<1x128x128xbf16>
    %734 = vector.shape_cast %733 : vector<1x128x128xbf16> to vector<128x128xbf16>
    %cst_347 = arith.constant dense<0.000000e+00> : vector<32x128xf32>
    %735 = tpu.matmul %732, %734, %cst_347 {dimension_numbers = #tpu.dot_dimension_numbers<[1], [0], [0], [1], [0, 0, 1, 1], [], []>} : vector<32x128xbf16>, vector<128x128xbf16>, vector<32x128xf32> -> vector<32x128xf32>
    %736 = arith.addf %731, %735 : vector<32x128xf32>
    %737 = tpu.iota {dimensions = array<i32: 0>} : vector<32x32xi32>
    %738 = tpu.iota {dimensions = array<i32: 1>} : vector<32x32xi32>
    %739 = tpu.iota {dimensions = array<i32: 1>} : vector<2x16x32xi32>
    %740 = vector.shape_cast %739 : vector<2x16x32xi32> to vector<32x32xi32>
    %c4_i32_348 = arith.constant 4 : i32
    %741 = vector.broadcast %c4_i32_348 : i32 to vector<32x32xi32>
    %742 = arith.addi %737, %741 : vector<32x32xi32>
    %743 = arith.cmpi eq, %738, %742 : vector<32x32xi32>
    %c4_i32_349 = arith.constant 4 : i32
    %744 = vector.broadcast %c4_i32_349 : i32 to vector<32x32xi32>
    %745 = arith.addi %740, %744 : vector<32x32xi32>
    %c0_i32_350 = arith.constant 0 : i32
    %746 = vector.broadcast %c0_i32_350 : i32 to vector<32x32xi32>
    %747 = arith.cmpi sge, %745, %746 : vector<32x32xi32>
    %748 = arith.andi %743, %747 : vector<32x32xi1>
    %c4_i32_351 = arith.constant 4 : i32
    %749 = vector.broadcast %c4_i32_351 : i32 to vector<32x32xi32>
    %750 = arith.addi %740, %749 : vector<32x32xi32>
    %c16_i32_352 = arith.constant 16 : i32
    %751 = vector.broadcast %c16_i32_352 : i32 to vector<32x32xi32>
    %752 = arith.cmpi slt, %750, %751 : vector<32x32xi32>
    %753 = arith.andi %748, %752 : vector<32x32xi1>
    %cst_353 = arith.constant 1.000000e+00 : f32
    %cst_354 = arith.constant 0.000000e+00 : f32
    %754 = vector.broadcast %cst_353 : f32 to vector<32x32xf32>
    %755 = vector.broadcast %cst_354 : f32 to vector<32x32xf32>
    %756 = arith.select %753, %754, %755 : vector<32x32xi1>, vector<32x32xf32>
    %757 = arith.truncf %756 : vector<32x32xf32> to vector<32x32xbf16>
    %758 = arith.truncf %704 : vector<32x128xf32> to vector<32x128xbf16>
    %cst_355 = arith.constant dense<0.000000e+00> : vector<32x128xf32>
    %759 = tpu.matmul %757, %758, %cst_355 {dimension_numbers = #tpu.dot_dimension_numbers<[1], [0], [0], [1], [0, 0, 1, 1], [], []>} : vector<32x32xbf16>, vector<32x128xbf16>, vector<32x128xf32> -> vector<32x128xf32>
    %760 = arith.truncf %759 : vector<32x128xf32> to vector<32x128xbf16>
    %c43_356 = arith.constant 43 : index
    %c0_357 = arith.constant 0 : index
    %c0_358 = arith.constant 0 : index
    %761 = vector.load %arg1[%c43_356, %c0_357, %c0_358] : memref<77x128x128xbf16, #tpu.memory_space<vmem>>, vector<1x128x128xbf16>
    %762 = vector.shape_cast %761 : vector<1x128x128xbf16> to vector<128x128xbf16>
    %cst_359 = arith.constant dense<0.000000e+00> : vector<32x128xf32>
    %763 = tpu.matmul %760, %762, %cst_359 {dimension_numbers = #tpu.dot_dimension_numbers<[1], [0], [0], [1], [0, 0, 1, 1], [], []>} : vector<32x128xbf16>, vector<128x128xbf16>, vector<32x128xf32> -> vector<32x128xf32>
    %764 = arith.addf %736, %763 : vector<32x128xf32>
    %c75 = arith.constant 75 : index
    %c0_360 = arith.constant 0 : index
    %765 = vector.load %arg2[%c75, %c0_360] : memref<141x128xf32, #tpu.memory_space<vmem>>, vector<1x128xf32>
    %766 = vector.broadcast %765 : vector<1x128xf32> to vector<32x128xf32>
    %767 = arith.addf %764, %766 : vector<32x128xf32>
    %cst_361 = arith.constant 0.000000e+00 : f32
    %768 = vector.broadcast %cst_361 : f32 to vector<32x128xf32>
    %769 = arith.maximumf %767, %768 : vector<32x128xf32>
    %c76 = arith.constant 76 : index
    %c0_362 = arith.constant 0 : index
    %770 = vector.load %arg2[%c76, %c0_362] : memref<141x128xf32, #tpu.memory_space<vmem>>, vector<1x128xf32>
    %771 = vector.broadcast %770 : vector<1x128xf32> to vector<32x128xf32>
    %772 = arith.mulf %769, %771 : vector<32x128xf32>
    %c77 = arith.constant 77 : index
    %c0_363 = arith.constant 0 : index
    %773 = vector.load %arg2[%c77, %c0_363] : memref<141x128xf32, #tpu.memory_space<vmem>>, vector<1x128xf32>
    %774 = vector.broadcast %773 : vector<1x128xf32> to vector<32x128xf32>
    %775 = arith.addf %772, %774 : vector<32x128xf32>
    %c16_i32_364 = arith.constant 16 : i32
    %776 = vector.broadcast %c16_i32_364 : i32 to vector<1x128xi32>
    %777 = arith.cmpi slt, %2, %776 : vector<1x128xi32>
    %778 = arith.extui %777 : vector<1x128xi1> to vector<1x128xi32>
    %779 = arith.sitofp %778 : vector<1x128xi32> to vector<1x128xf32>
    %780 = vector.broadcast %779 : vector<1x128xf32> to vector<32x128xf32>
    %781 = arith.mulf %704, %780 : vector<32x128xf32>
    %782 = arith.addf %781, %775 : vector<32x128xf32>
    %783 = arith.truncf %782 : vector<32x128xf32> to vector<32x128xbf16>
    %c44_365 = arith.constant 44 : index
    %c0_366 = arith.constant 0 : index
    %c0_367 = arith.constant 0 : index
    %784 = vector.load %arg1[%c44_365, %c0_366, %c0_367] : memref<77x128x128xbf16, #tpu.memory_space<vmem>>, vector<1x128x128xbf16>
    %785 = vector.shape_cast %784 : vector<1x128x128xbf16> to vector<128x128xbf16>
    %cst_368 = arith.constant dense<0.000000e+00> : vector<32x128xf32>
    %786 = tpu.matmul %783, %785, %cst_368 {dimension_numbers = #tpu.dot_dimension_numbers<[1], [0], [0], [1], [0, 0, 1, 1], [], []>} : vector<32x128xbf16>, vector<128x128xbf16>, vector<32x128xf32> -> vector<32x128xf32>
    %c78 = arith.constant 78 : index
    %c0_369 = arith.constant 0 : index
    %787 = vector.load %arg2[%c78, %c0_369] : memref<141x128xf32, #tpu.memory_space<vmem>>, vector<1x128xf32>
    %788 = vector.broadcast %787 : vector<1x128xf32> to vector<32x128xf32>
    %789 = arith.addf %786, %788 : vector<32x128xf32>
    %cst_370 = arith.constant 0.000000e+00 : f32
    %790 = vector.broadcast %cst_370 : f32 to vector<32x128xf32>
    %791 = arith.maximumf %789, %790 : vector<32x128xf32>
    %c79 = arith.constant 79 : index
    %c0_371 = arith.constant 0 : index
    %792 = vector.load %arg2[%c79, %c0_371] : memref<141x128xf32, #tpu.memory_space<vmem>>, vector<1x128xf32>
    %793 = vector.broadcast %792 : vector<1x128xf32> to vector<32x128xf32>
    %794 = arith.mulf %791, %793 : vector<32x128xf32>
    %c80 = arith.constant 80 : index
    %c0_372 = arith.constant 0 : index
    %795 = vector.load %arg2[%c80, %c0_372] : memref<141x128xf32, #tpu.memory_space<vmem>>, vector<1x128xf32>
    %796 = vector.broadcast %795 : vector<1x128xf32> to vector<32x128xf32>
    %797 = arith.addf %794, %796 : vector<32x128xf32>
    %798 = vector.shape_cast %797 : vector<32x128xf32> to vector<2x16x128xf32>
    %cst_373 = arith.constant dense<0.000000e+00> : vector<2x128xf32>
    %799 = vector.multi_reduction <add>, %798, %cst_373 [1] : vector<2x16x128xf32> to vector<2x128xf32>
    %cst_374 = arith.constant 1.600000e+01 : f32
    %800 = vector.broadcast %cst_374 : f32 to vector<2x128xf32>
    %801 = arith.divf %799, %800 : vector<2x128xf32>
    %802 = arith.truncf %801 : vector<2x128xf32> to vector<2x128xbf16>
    %c45_375 = arith.constant 45 : index
    %c0_376 = arith.constant 0 : index
    %c0_377 = arith.constant 0 : index
    %803 = vector.load %arg1[%c45_375, %c0_376, %c0_377] : memref<77x128x128xbf16, #tpu.memory_space<vmem>>, vector<1x128x128xbf16>
    %804 = vector.shape_cast %803 : vector<1x128x128xbf16> to vector<128x128xbf16>
    %cst_378 = arith.constant dense<0.000000e+00> : vector<2x128xf32>
    %805 = tpu.matmul %802, %804, %cst_378 {dimension_numbers = #tpu.dot_dimension_numbers<[1], [0], [0], [1], [0, 0, 1, 1], [], []>} : vector<2x128xbf16>, vector<128x128xbf16>, vector<2x128xf32> -> vector<2x128xf32>
    %c81 = arith.constant 81 : index
    %c0_379 = arith.constant 0 : index
    %806 = vector.load %arg2[%c81, %c0_379] : memref<141x128xf32, #tpu.memory_space<vmem>>, vector<1x128xf32>
    %807 = vector.broadcast %806 : vector<1x128xf32> to vector<2x128xf32>
    %808 = arith.addf %805, %807 : vector<2x128xf32>
    %cst_380 = arith.constant 0.000000e+00 : f32
    %809 = vector.broadcast %cst_380 : f32 to vector<2x128xf32>
    %810 = arith.maximumf %808, %809 : vector<2x128xf32>
    %c82 = arith.constant 82 : index
    %c0_381 = arith.constant 0 : index
    %811 = vector.load %arg2[%c82, %c0_381] : memref<141x128xf32, #tpu.memory_space<vmem>>, vector<1x128xf32>
    %812 = vector.broadcast %811 : vector<1x128xf32> to vector<2x128xf32>
    %813 = arith.mulf %810, %812 : vector<2x128xf32>
    %c83 = arith.constant 83 : index
    %c0_382 = arith.constant 0 : index
    %814 = vector.load %arg2[%c83, %c0_382] : memref<141x128xf32, #tpu.memory_space<vmem>>, vector<1x128xf32>
    %815 = vector.broadcast %814 : vector<1x128xf32> to vector<2x128xf32>
    %816 = arith.addf %813, %815 : vector<2x128xf32>
    %817 = arith.truncf %816 : vector<2x128xf32> to vector<2x128xbf16>
    %c46_383 = arith.constant 46 : index
    %c0_384 = arith.constant 0 : index
    %c0_385 = arith.constant 0 : index
    %818 = vector.load %arg1[%c46_383, %c0_384, %c0_385] : memref<77x128x128xbf16, #tpu.memory_space<vmem>>, vector<1x128x128xbf16>
    %819 = vector.shape_cast %818 : vector<1x128x128xbf16> to vector<128x128xbf16>
    %cst_386 = arith.constant dense<0.000000e+00> : vector<2x128xf32>
    %820 = tpu.matmul %817, %819, %cst_386 {dimension_numbers = #tpu.dot_dimension_numbers<[1], [0], [0], [1], [0, 0, 1, 1], [], []>} : vector<2x128xbf16>, vector<128x128xbf16>, vector<2x128xf32> -> vector<2x128xf32>
    %c84 = arith.constant 84 : index
    %c0_387 = arith.constant 0 : index
    %821 = vector.load %arg2[%c84, %c0_387] : memref<141x128xf32, #tpu.memory_space<vmem>>, vector<1x128xf32>
    %822 = vector.broadcast %821 : vector<1x128xf32> to vector<2x128xf32>
    %823 = arith.addf %820, %822 : vector<2x128xf32>
    %824 = arith.negf %823 : vector<2x128xf32>
    %825 = math.exp %824 : vector<2x128xf32>
    %cst_388 = arith.constant 1.000000e+00 : f32
    %826 = vector.broadcast %cst_388 : f32 to vector<2x128xf32>
    %827 = arith.addf %826, %825 : vector<2x128xf32>
    %828 = arith.divf %826, %827 : vector<2x128xf32>
    %c85 = arith.constant 85 : index
    %c0_389 = arith.constant 0 : index
    %829 = vector.load %arg2[%c85, %c0_389] : memref<141x128xf32, #tpu.memory_space<vmem>>, vector<1x128xf32>
    %830 = vector.broadcast %829 : vector<1x128xf32> to vector<2x128xf32>
    %831 = arith.mulf %828, %830 : vector<2x128xf32>
    %c86 = arith.constant 86 : index
    %c0_390 = arith.constant 0 : index
    %832 = vector.load %arg2[%c86, %c0_390] : memref<141x128xf32, #tpu.memory_space<vmem>>, vector<1x128xf32>
    %833 = vector.broadcast %832 : vector<1x128xf32> to vector<2x128xf32>
    %834 = arith.addf %831, %833 : vector<2x128xf32>
    %835 = vector.shape_cast %834 : vector<2x128xf32> to vector<2x1x128xf32>
    %836 = vector.broadcast %835 : vector<2x1x128xf32> to vector<2x16x128xf32>
    %837 = arith.mulf %798, %836 : vector<2x16x128xf32>
    %838 = vector.shape_cast %689 : vector<32x128xf32> to vector<2x16x128xf32>
    %839 = arith.addf %837, %838 : vector<2x16x128xf32>
    %840 = vector.shape_cast %839 : vector<2x16x128xf32> to vector<32x128xf32>
    %cst_391 = arith.constant 7.500000e-01 : f32
    %841 = vector.broadcast %cst_391 : f32 to vector<32x128xf32>
    %842 = arith.mulf %841, %840 : vector<32x128xf32>
    %843 = arith.truncf %689 : vector<32x128xf32> to vector<32x128xbf16>
    %c47_392 = arith.constant 47 : index
    %c0_393 = arith.constant 0 : index
    %c0_394 = arith.constant 0 : index
    %844 = vector.load %arg1[%c47_392, %c0_393, %c0_394] : memref<77x128x128xbf16, #tpu.memory_space<vmem>>, vector<1x128x128xbf16>
    %845 = vector.shape_cast %844 : vector<1x128x128xbf16> to vector<128x128xbf16>
    %cst_395 = arith.constant dense<0.000000e+00> : vector<32x128xf32>
    %846 = tpu.matmul %843, %845, %cst_395 {dimension_numbers = #tpu.dot_dimension_numbers<[1], [0], [0], [1], [0, 0, 1, 1], [], []>} : vector<32x128xbf16>, vector<128x128xbf16>, vector<32x128xf32> -> vector<32x128xf32>
    %c87 = arith.constant 87 : index
    %c0_396 = arith.constant 0 : index
    %847 = vector.load %arg2[%c87, %c0_396] : memref<141x128xf32, #tpu.memory_space<vmem>>, vector<1x128xf32>
    %848 = vector.broadcast %847 : vector<1x128xf32> to vector<32x128xf32>
    %849 = arith.addf %846, %848 : vector<32x128xf32>
    %cst_397 = arith.constant 0.000000e+00 : f32
    %850 = vector.broadcast %cst_397 : f32 to vector<32x128xf32>
    %851 = arith.maximumf %849, %850 : vector<32x128xf32>
    %c88 = arith.constant 88 : index
    %c0_398 = arith.constant 0 : index
    %852 = vector.load %arg2[%c88, %c0_398] : memref<141x128xf32, #tpu.memory_space<vmem>>, vector<1x128xf32>
    %853 = vector.broadcast %852 : vector<1x128xf32> to vector<32x128xf32>
    %854 = arith.mulf %851, %853 : vector<32x128xf32>
    %c89 = arith.constant 89 : index
    %c0_399 = arith.constant 0 : index
    %855 = vector.load %arg2[%c89, %c0_399] : memref<141x128xf32, #tpu.memory_space<vmem>>, vector<1x128xf32>
    %856 = vector.broadcast %855 : vector<1x128xf32> to vector<32x128xf32>
    %857 = arith.addf %854, %856 : vector<32x128xf32>
    %858 = arith.truncf %857 : vector<32x128xf32> to vector<32x128xbf16>
    %cst_400 = arith.constant dense<0.000000e+00> : vector<32x128xf32>
    %859 = tpu.matmul %725, %858, %cst_400 {dimension_numbers = #tpu.dot_dimension_numbers<[1], [0], [0], [1], [0, 0, 1, 1], [], []>} : vector<32x32xbf16>, vector<32x128xbf16>, vector<32x128xf32> -> vector<32x128xf32>
    %860 = arith.truncf %859 : vector<32x128xf32> to vector<32x128xbf16>
    %c48_401 = arith.constant 48 : index
    %c0_402 = arith.constant 0 : index
    %c0_403 = arith.constant 0 : index
    %861 = vector.load %arg1[%c48_401, %c0_402, %c0_403] : memref<77x128x128xbf16, #tpu.memory_space<vmem>>, vector<1x128x128xbf16>
    %862 = vector.shape_cast %861 : vector<1x128x128xbf16> to vector<128x128xbf16>
    %cst_404 = arith.constant dense<0.000000e+00> : vector<32x128xf32>
    %863 = tpu.matmul %860, %862, %cst_404 {dimension_numbers = #tpu.dot_dimension_numbers<[1], [0], [0], [1], [0, 0, 1, 1], [], []>} : vector<32x128xbf16>, vector<128x128xbf16>, vector<32x128xf32> -> vector<32x128xf32>
    %864 = arith.truncf %857 : vector<32x128xf32> to vector<32x128xbf16>
    %c49_405 = arith.constant 49 : index
    %c0_406 = arith.constant 0 : index
    %c0_407 = arith.constant 0 : index
    %865 = vector.load %arg1[%c49_405, %c0_406, %c0_407] : memref<77x128x128xbf16, #tpu.memory_space<vmem>>, vector<1x128x128xbf16>
    %866 = vector.shape_cast %865 : vector<1x128x128xbf16> to vector<128x128xbf16>
    %cst_408 = arith.constant dense<0.000000e+00> : vector<32x128xf32>
    %867 = tpu.matmul %864, %866, %cst_408 {dimension_numbers = #tpu.dot_dimension_numbers<[1], [0], [0], [1], [0, 0, 1, 1], [], []>} : vector<32x128xbf16>, vector<128x128xbf16>, vector<32x128xf32> -> vector<32x128xf32>
    %868 = arith.addf %863, %867 : vector<32x128xf32>
    %869 = arith.truncf %857 : vector<32x128xf32> to vector<32x128xbf16>
    %cst_409 = arith.constant dense<0.000000e+00> : vector<32x128xf32>
    %870 = tpu.matmul %757, %869, %cst_409 {dimension_numbers = #tpu.dot_dimension_numbers<[1], [0], [0], [1], [0, 0, 1, 1], [], []>} : vector<32x32xbf16>, vector<32x128xbf16>, vector<32x128xf32> -> vector<32x128xf32>
    %871 = arith.truncf %870 : vector<32x128xf32> to vector<32x128xbf16>
    %c50_410 = arith.constant 50 : index
    %c0_411 = arith.constant 0 : index
    %c0_412 = arith.constant 0 : index
    %872 = vector.load %arg1[%c50_410, %c0_411, %c0_412] : memref<77x128x128xbf16, #tpu.memory_space<vmem>>, vector<1x128x128xbf16>
    %873 = vector.shape_cast %872 : vector<1x128x128xbf16> to vector<128x128xbf16>
    %cst_413 = arith.constant dense<0.000000e+00> : vector<32x128xf32>
    %874 = tpu.matmul %871, %873, %cst_413 {dimension_numbers = #tpu.dot_dimension_numbers<[1], [0], [0], [1], [0, 0, 1, 1], [], []>} : vector<32x128xbf16>, vector<128x128xbf16>, vector<32x128xf32> -> vector<32x128xf32>
    %875 = arith.addf %868, %874 : vector<32x128xf32>
    %c90 = arith.constant 90 : index
    %c0_414 = arith.constant 0 : index
    %876 = vector.load %arg2[%c90, %c0_414] : memref<141x128xf32, #tpu.memory_space<vmem>>, vector<1x128xf32>
    %877 = vector.broadcast %876 : vector<1x128xf32> to vector<32x128xf32>
    %878 = arith.addf %875, %877 : vector<32x128xf32>
    %cst_415 = arith.constant 0.000000e+00 : f32
    %879 = vector.broadcast %cst_415 : f32 to vector<32x128xf32>
    %880 = arith.maximumf %878, %879 : vector<32x128xf32>
    %c91 = arith.constant 91 : index
    %c0_416 = arith.constant 0 : index
    %881 = vector.load %arg2[%c91, %c0_416] : memref<141x128xf32, #tpu.memory_space<vmem>>, vector<1x128xf32>
    %882 = vector.broadcast %881 : vector<1x128xf32> to vector<32x128xf32>
    %883 = arith.mulf %880, %882 : vector<32x128xf32>
    %c92 = arith.constant 92 : index
    %c0_417 = arith.constant 0 : index
    %884 = vector.load %arg2[%c92, %c0_417] : memref<141x128xf32, #tpu.memory_space<vmem>>, vector<1x128xf32>
    %885 = vector.broadcast %884 : vector<1x128xf32> to vector<32x128xf32>
    %886 = arith.addf %883, %885 : vector<32x128xf32>
    %c4_i32_418 = arith.constant 4 : i32
    %887 = vector.broadcast %c4_i32_418 : i32 to vector<1x128xi32>
    %888 = arith.cmpi slt, %2, %887 : vector<1x128xi32>
    %889 = arith.extui %888 : vector<1x128xi1> to vector<1x128xi32>
    %890 = arith.sitofp %889 : vector<1x128xi32> to vector<1x128xf32>
    %891 = vector.broadcast %890 : vector<1x128xf32> to vector<32x128xf32>
    %892 = arith.mulf %857, %891 : vector<32x128xf32>
    %893 = arith.addf %892, %886 : vector<32x128xf32>
    %894 = arith.truncf %893 : vector<32x128xf32> to vector<32x128xbf16>
    %c51_419 = arith.constant 51 : index
    %c0_420 = arith.constant 0 : index
    %c0_421 = arith.constant 0 : index
    %895 = vector.load %arg1[%c51_419, %c0_420, %c0_421] : memref<77x128x128xbf16, #tpu.memory_space<vmem>>, vector<1x128x128xbf16>
    %896 = vector.shape_cast %895 : vector<1x128x128xbf16> to vector<128x128xbf16>
    %cst_422 = arith.constant dense<0.000000e+00> : vector<32x128xf32>
    %897 = tpu.matmul %894, %896, %cst_422 {dimension_numbers = #tpu.dot_dimension_numbers<[1], [0], [0], [1], [0, 0, 1, 1], [], []>} : vector<32x128xbf16>, vector<128x128xbf16>, vector<32x128xf32> -> vector<32x128xf32>
    %c93 = arith.constant 93 : index
    %c0_423 = arith.constant 0 : index
    %898 = vector.load %arg2[%c93, %c0_423] : memref<141x128xf32, #tpu.memory_space<vmem>>, vector<1x128xf32>
    %899 = vector.broadcast %898 : vector<1x128xf32> to vector<32x128xf32>
    %900 = arith.addf %897, %899 : vector<32x128xf32>
    %cst_424 = arith.constant 0.000000e+00 : f32
    %901 = vector.broadcast %cst_424 : f32 to vector<32x128xf32>
    %902 = arith.maximumf %900, %901 : vector<32x128xf32>
    %c94 = arith.constant 94 : index
    %c0_425 = arith.constant 0 : index
    %903 = vector.load %arg2[%c94, %c0_425] : memref<141x128xf32, #tpu.memory_space<vmem>>, vector<1x128xf32>
    %904 = vector.broadcast %903 : vector<1x128xf32> to vector<32x128xf32>
    %905 = arith.mulf %902, %904 : vector<32x128xf32>
    %c95 = arith.constant 95 : index
    %c0_426 = arith.constant 0 : index
    %906 = vector.load %arg2[%c95, %c0_426] : memref<141x128xf32, #tpu.memory_space<vmem>>, vector<1x128xf32>
    %907 = vector.broadcast %906 : vector<1x128xf32> to vector<32x128xf32>
    %908 = arith.addf %905, %907 : vector<32x128xf32>
    %909 = vector.shape_cast %908 : vector<32x128xf32> to vector<2x16x128xf32>
    %cst_427 = arith.constant dense<0.000000e+00> : vector<2x128xf32>
    %910 = vector.multi_reduction <add>, %909, %cst_427 [1] : vector<2x16x128xf32> to vector<2x128xf32>
    %cst_428 = arith.constant 1.600000e+01 : f32
    %911 = vector.broadcast %cst_428 : f32 to vector<2x128xf32>
    %912 = arith.divf %910, %911 : vector<2x128xf32>
    %913 = arith.truncf %912 : vector<2x128xf32> to vector<2x128xbf16>
    %c52_429 = arith.constant 52 : index
    %c0_430 = arith.constant 0 : index
    %c0_431 = arith.constant 0 : index
    %914 = vector.load %arg1[%c52_429, %c0_430, %c0_431] : memref<77x128x128xbf16, #tpu.memory_space<vmem>>, vector<1x128x128xbf16>
    %915 = vector.shape_cast %914 : vector<1x128x128xbf16> to vector<128x128xbf16>
    %cst_432 = arith.constant dense<0.000000e+00> : vector<2x128xf32>
    %916 = tpu.matmul %913, %915, %cst_432 {dimension_numbers = #tpu.dot_dimension_numbers<[1], [0], [0], [1], [0, 0, 1, 1], [], []>} : vector<2x128xbf16>, vector<128x128xbf16>, vector<2x128xf32> -> vector<2x128xf32>
    %c96 = arith.constant 96 : index
    %c0_433 = arith.constant 0 : index
    %917 = vector.load %arg2[%c96, %c0_433] : memref<141x128xf32, #tpu.memory_space<vmem>>, vector<1x128xf32>
    %918 = vector.broadcast %917 : vector<1x128xf32> to vector<2x128xf32>
    %919 = arith.addf %916, %918 : vector<2x128xf32>
    %cst_434 = arith.constant 0.000000e+00 : f32
    %920 = vector.broadcast %cst_434 : f32 to vector<2x128xf32>
    %921 = arith.maximumf %919, %920 : vector<2x128xf32>
    %c97 = arith.constant 97 : index
    %c0_435 = arith.constant 0 : index
    %922 = vector.load %arg2[%c97, %c0_435] : memref<141x128xf32, #tpu.memory_space<vmem>>, vector<1x128xf32>
    %923 = vector.broadcast %922 : vector<1x128xf32> to vector<2x128xf32>
    %924 = arith.mulf %921, %923 : vector<2x128xf32>
    %c98 = arith.constant 98 : index
    %c0_436 = arith.constant 0 : index
    %925 = vector.load %arg2[%c98, %c0_436] : memref<141x128xf32, #tpu.memory_space<vmem>>, vector<1x128xf32>
    %926 = vector.broadcast %925 : vector<1x128xf32> to vector<2x128xf32>
    %927 = arith.addf %924, %926 : vector<2x128xf32>
    %928 = arith.truncf %927 : vector<2x128xf32> to vector<2x128xbf16>
    %c53_437 = arith.constant 53 : index
    %c0_438 = arith.constant 0 : index
    %c0_439 = arith.constant 0 : index
    %929 = vector.load %arg1[%c53_437, %c0_438, %c0_439] : memref<77x128x128xbf16, #tpu.memory_space<vmem>>, vector<1x128x128xbf16>
    %930 = vector.shape_cast %929 : vector<1x128x128xbf16> to vector<128x128xbf16>
    %cst_440 = arith.constant dense<0.000000e+00> : vector<2x128xf32>
    %931 = tpu.matmul %928, %930, %cst_440 {dimension_numbers = #tpu.dot_dimension_numbers<[1], [0], [0], [1], [0, 0, 1, 1], [], []>} : vector<2x128xbf16>, vector<128x128xbf16>, vector<2x128xf32> -> vector<2x128xf32>
    %c99 = arith.constant 99 : index
    %c0_441 = arith.constant 0 : index
    %932 = vector.load %arg2[%c99, %c0_441] : memref<141x128xf32, #tpu.memory_space<vmem>>, vector<1x128xf32>
    %933 = vector.broadcast %932 : vector<1x128xf32> to vector<2x128xf32>
    %934 = arith.addf %931, %933 : vector<2x128xf32>
    %935 = arith.negf %934 : vector<2x128xf32>
    %936 = math.exp %935 : vector<2x128xf32>
    %cst_442 = arith.constant 1.000000e+00 : f32
    %937 = vector.broadcast %cst_442 : f32 to vector<2x128xf32>
    %938 = arith.addf %937, %936 : vector<2x128xf32>
    %939 = arith.divf %937, %938 : vector<2x128xf32>
    %c100 = arith.constant 100 : index
    %c0_443 = arith.constant 0 : index
    %940 = vector.load %arg2[%c100, %c0_443] : memref<141x128xf32, #tpu.memory_space<vmem>>, vector<1x128xf32>
    %941 = vector.broadcast %940 : vector<1x128xf32> to vector<2x128xf32>
    %942 = arith.mulf %939, %941 : vector<2x128xf32>
    %c101 = arith.constant 101 : index
    %c0_444 = arith.constant 0 : index
    %943 = vector.load %arg2[%c101, %c0_444] : memref<141x128xf32, #tpu.memory_space<vmem>>, vector<1x128xf32>
    %944 = vector.broadcast %943 : vector<1x128xf32> to vector<2x128xf32>
    %945 = arith.addf %942, %944 : vector<2x128xf32>
    %946 = vector.shape_cast %945 : vector<2x128xf32> to vector<2x1x128xf32>
    %947 = vector.broadcast %946 : vector<2x1x128xf32> to vector<2x16x128xf32>
    %948 = arith.mulf %909, %947 : vector<2x16x128xf32>
    %949 = vector.shape_cast %689 : vector<32x128xf32> to vector<2x16x128xf32>
    %950 = arith.addf %948, %949 : vector<2x16x128xf32>
    %951 = vector.shape_cast %950 : vector<2x16x128xf32> to vector<32x128xf32>
    %cst_445 = arith.constant 2.500000e-01 : f32
    %952 = vector.broadcast %cst_445 : f32 to vector<32x128xf32>
    %953 = arith.mulf %952, %951 : vector<32x128xf32>
    %954 = arith.addf %842, %953 : vector<32x128xf32>
    %955 = arith.truncf %424 : vector<32x128xf32> to vector<32x128xbf16>
    %c54_446 = arith.constant 54 : index
    %c0_447 = arith.constant 0 : index
    %c0_448 = arith.constant 0 : index
    %956 = vector.load %arg1[%c54_446, %c0_447, %c0_448] : memref<77x128x128xbf16, #tpu.memory_space<vmem>>, vector<1x128x128xbf16>
    %957 = vector.shape_cast %956 : vector<1x128x128xbf16> to vector<128x128xbf16>
    %cst_449 = arith.constant dense<0.000000e+00> : vector<32x128xf32>
    %958 = tpu.matmul %955, %957, %cst_449 {dimension_numbers = #tpu.dot_dimension_numbers<[1], [0], [0], [1], [0, 0, 1, 1], [], []>} : vector<32x128xbf16>, vector<128x128xbf16>, vector<32x128xf32> -> vector<32x128xf32>
    %959 = arith.truncf %689 : vector<32x128xf32> to vector<32x128xbf16>
    %c55_450 = arith.constant 55 : index
    %c0_451 = arith.constant 0 : index
    %c0_452 = arith.constant 0 : index
    %960 = vector.load %arg1[%c55_450, %c0_451, %c0_452] : memref<77x128x128xbf16, #tpu.memory_space<vmem>>, vector<1x128x128xbf16>
    %961 = vector.shape_cast %960 : vector<1x128x128xbf16> to vector<128x128xbf16>
    %cst_453 = arith.constant dense<0.000000e+00> : vector<32x128xf32>
    %962 = tpu.matmul %959, %961, %cst_453 {dimension_numbers = #tpu.dot_dimension_numbers<[1], [0], [0], [1], [0, 0, 1, 1], [], []>} : vector<32x128xbf16>, vector<128x128xbf16>, vector<32x128xf32> -> vector<32x128xf32>
    %963 = arith.addf %958, %962 : vector<32x128xf32>
    %964 = arith.truncf %954 : vector<32x128xf32> to vector<32x128xbf16>
    %c56_454 = arith.constant 56 : index
    %c0_455 = arith.constant 0 : index
    %c0_456 = arith.constant 0 : index
    %965 = vector.load %arg1[%c56_454, %c0_455, %c0_456] : memref<77x128x128xbf16, #tpu.memory_space<vmem>>, vector<1x128x128xbf16>
    %966 = vector.shape_cast %965 : vector<1x128x128xbf16> to vector<128x128xbf16>
    %cst_457 = arith.constant dense<0.000000e+00> : vector<32x128xf32>
    %967 = tpu.matmul %964, %966, %cst_457 {dimension_numbers = #tpu.dot_dimension_numbers<[1], [0], [0], [1], [0, 0, 1, 1], [], []>} : vector<32x128xbf16>, vector<128x128xbf16>, vector<32x128xf32> -> vector<32x128xf32>
    %968 = arith.addf %963, %967 : vector<32x128xf32>
    %c102 = arith.constant 102 : index
    %c0_458 = arith.constant 0 : index
    %969 = vector.load %arg2[%c102, %c0_458] : memref<141x128xf32, #tpu.memory_space<vmem>>, vector<1x128xf32>
    %970 = vector.broadcast %969 : vector<1x128xf32> to vector<32x128xf32>
    %971 = arith.addf %968, %970 : vector<32x128xf32>
    %cst_459 = arith.constant 0.000000e+00 : f32
    %972 = vector.broadcast %cst_459 : f32 to vector<32x128xf32>
    %973 = arith.maximumf %971, %972 : vector<32x128xf32>
    %c103 = arith.constant 103 : index
    %c0_460 = arith.constant 0 : index
    %974 = vector.load %arg2[%c103, %c0_460] : memref<141x128xf32, #tpu.memory_space<vmem>>, vector<1x128xf32>
    %975 = vector.broadcast %974 : vector<1x128xf32> to vector<32x128xf32>
    %976 = arith.mulf %973, %975 : vector<32x128xf32>
    %c104 = arith.constant 104 : index
    %c0_461 = arith.constant 0 : index
    %977 = vector.load %arg2[%c104, %c0_461] : memref<141x128xf32, #tpu.memory_space<vmem>>, vector<1x128xf32>
    %978 = vector.broadcast %977 : vector<1x128xf32> to vector<32x128xf32>
    %979 = arith.addf %976, %978 : vector<32x128xf32>
    %980 = arith.truncf %424 : vector<32x128xf32> to vector<32x128xbf16>
    %c57_462 = arith.constant 57 : index
    %c0_463 = arith.constant 0 : index
    %c0_464 = arith.constant 0 : index
    %981 = vector.load %arg1[%c57_462, %c0_463, %c0_464] : memref<77x128x128xbf16, #tpu.memory_space<vmem>>, vector<1x128x128xbf16>
    %982 = vector.shape_cast %981 : vector<1x128x128xbf16> to vector<128x128xbf16>
    %cst_465 = arith.constant dense<0.000000e+00> : vector<32x128xf32>
    %983 = tpu.matmul %980, %982, %cst_465 {dimension_numbers = #tpu.dot_dimension_numbers<[1], [0], [0], [1], [0, 0, 1, 1], [], []>} : vector<32x128xbf16>, vector<128x128xbf16>, vector<32x128xf32> -> vector<32x128xf32>
    %984 = arith.truncf %689 : vector<32x128xf32> to vector<32x128xbf16>
    %c58_466 = arith.constant 58 : index
    %c0_467 = arith.constant 0 : index
    %c0_468 = arith.constant 0 : index
    %985 = vector.load %arg1[%c58_466, %c0_467, %c0_468] : memref<77x128x128xbf16, #tpu.memory_space<vmem>>, vector<1x128x128xbf16>
    %986 = vector.shape_cast %985 : vector<1x128x128xbf16> to vector<128x128xbf16>
    %cst_469 = arith.constant dense<0.000000e+00> : vector<32x128xf32>
    %987 = tpu.matmul %984, %986, %cst_469 {dimension_numbers = #tpu.dot_dimension_numbers<[1], [0], [0], [1], [0, 0, 1, 1], [], []>} : vector<32x128xbf16>, vector<128x128xbf16>, vector<32x128xf32> -> vector<32x128xf32>
    %988 = arith.addf %983, %987 : vector<32x128xf32>
    %989 = arith.truncf %954 : vector<32x128xf32> to vector<32x128xbf16>
    %c59_470 = arith.constant 59 : index
    %c0_471 = arith.constant 0 : index
    %c0_472 = arith.constant 0 : index
    %990 = vector.load %arg1[%c59_470, %c0_471, %c0_472] : memref<77x128x128xbf16, #tpu.memory_space<vmem>>, vector<1x128x128xbf16>
    %991 = vector.shape_cast %990 : vector<1x128x128xbf16> to vector<128x128xbf16>
    %cst_473 = arith.constant dense<0.000000e+00> : vector<32x128xf32>
    %992 = tpu.matmul %989, %991, %cst_473 {dimension_numbers = #tpu.dot_dimension_numbers<[1], [0], [0], [1], [0, 0, 1, 1], [], []>} : vector<32x128xbf16>, vector<128x128xbf16>, vector<32x128xf32> -> vector<32x128xf32>
    %993 = arith.addf %988, %992 : vector<32x128xf32>
    %c105 = arith.constant 105 : index
    %c0_474 = arith.constant 0 : index
    %994 = vector.load %arg2[%c105, %c0_474] : memref<141x128xf32, #tpu.memory_space<vmem>>, vector<1x128xf32>
    %995 = vector.broadcast %994 : vector<1x128xf32> to vector<32x128xf32>
    %996 = arith.addf %993, %995 : vector<32x128xf32>
    %cst_475 = arith.constant 0.000000e+00 : f32
    %997 = vector.broadcast %cst_475 : f32 to vector<32x128xf32>
    %998 = arith.maximumf %996, %997 : vector<32x128xf32>
    %c106 = arith.constant 106 : index
    %c0_476 = arith.constant 0 : index
    %999 = vector.load %arg2[%c106, %c0_476] : memref<141x128xf32, #tpu.memory_space<vmem>>, vector<1x128xf32>
    %1000 = vector.broadcast %999 : vector<1x128xf32> to vector<32x128xf32>
    %1001 = arith.mulf %998, %1000 : vector<32x128xf32>
    %c107 = arith.constant 107 : index
    %c0_477 = arith.constant 0 : index
    %1002 = vector.load %arg2[%c107, %c0_477] : memref<141x128xf32, #tpu.memory_space<vmem>>, vector<1x128xf32>
    %1003 = vector.broadcast %1002 : vector<1x128xf32> to vector<32x128xf32>
    %1004 = arith.addf %1001, %1003 : vector<32x128xf32>
    %1005 = arith.truncf %1004 : vector<32x128xf32> to vector<32x128xbf16>
    %c60_478 = arith.constant 60 : index
    %c0_479 = arith.constant 0 : index
    %c0_480 = arith.constant 0 : index
    %1006 = vector.load %arg1[%c60_478, %c0_479, %c0_480] : memref<77x128x128xbf16, #tpu.memory_space<vmem>>, vector<1x128x128xbf16>
    %1007 = vector.shape_cast %1006 : vector<1x128x128xbf16> to vector<128x128xbf16>
    %cst_481 = arith.constant dense<0.000000e+00> : vector<32x128xf32>
    %1008 = tpu.matmul %1005, %1007, %cst_481 {dimension_numbers = #tpu.dot_dimension_numbers<[1], [0], [0], [1], [0, 0, 1, 1], [], []>} : vector<32x128xbf16>, vector<128x128xbf16>, vector<32x128xf32> -> vector<32x128xf32>
    %c108 = arith.constant 108 : index
    %c0_482 = arith.constant 0 : index
    %1009 = vector.load %arg2[%c108, %c0_482] : memref<141x128xf32, #tpu.memory_space<vmem>>, vector<1x128xf32>
    %1010 = vector.broadcast %1009 : vector<1x128xf32> to vector<32x128xf32>
    %1011 = arith.addf %1008, %1010 : vector<32x128xf32>
    %cst_483 = arith.constant 0.000000e+00 : f32
    %1012 = vector.broadcast %cst_483 : f32 to vector<32x128xf32>
    %1013 = arith.maximumf %1011, %1012 : vector<32x128xf32>
    %c109 = arith.constant 109 : index
    %c0_484 = arith.constant 0 : index
    %1014 = vector.load %arg2[%c109, %c0_484] : memref<141x128xf32, #tpu.memory_space<vmem>>, vector<1x128xf32>
    %1015 = vector.broadcast %1014 : vector<1x128xf32> to vector<32x128xf32>
    %1016 = arith.mulf %1013, %1015 : vector<32x128xf32>
    %c110 = arith.constant 110 : index
    %c0_485 = arith.constant 0 : index
    %1017 = vector.load %arg2[%c110, %c0_485] : memref<141x128xf32, #tpu.memory_space<vmem>>, vector<1x128xf32>
    %1018 = vector.broadcast %1017 : vector<1x128xf32> to vector<32x128xf32>
    %1019 = arith.addf %1016, %1018 : vector<32x128xf32>
    %1020 = arith.truncf %1019 : vector<32x128xf32> to vector<32x128xbf16>
    %c61_486 = arith.constant 61 : index
    %c0_487 = arith.constant 0 : index
    %c0_488 = arith.constant 0 : index
    %1021 = vector.load %arg1[%c61_486, %c0_487, %c0_488] : memref<77x128x128xbf16, #tpu.memory_space<vmem>>, vector<1x128x128xbf16>
    %1022 = vector.shape_cast %1021 : vector<1x128x128xbf16> to vector<128x128xbf16>
    %cst_489 = arith.constant dense<0.000000e+00> : vector<32x128xf32>
    %1023 = tpu.matmul %1020, %1022, %cst_489 {dimension_numbers = #tpu.dot_dimension_numbers<[1], [0], [0], [1], [0, 0, 1, 1], [], []>} : vector<32x128xbf16>, vector<128x128xbf16>, vector<32x128xf32> -> vector<32x128xf32>
    %c111 = arith.constant 111 : index
    %c0_490 = arith.constant 0 : index
    %1024 = vector.load %arg2[%c111, %c0_490] : memref<141x128xf32, #tpu.memory_space<vmem>>, vector<1x128xf32>
    %1025 = vector.broadcast %1024 : vector<1x128xf32> to vector<32x128xf32>
    %1026 = arith.addf %1023, %1025 : vector<32x128xf32>
    %cst_491 = arith.constant 0.000000e+00 : f32
    %1027 = vector.broadcast %cst_491 : f32 to vector<32x128xf32>
    %1028 = arith.maximumf %1026, %1027 : vector<32x128xf32>
    %c112 = arith.constant 112 : index
    %c0_492 = arith.constant 0 : index
    %1029 = vector.load %arg2[%c112, %c0_492] : memref<141x128xf32, #tpu.memory_space<vmem>>, vector<1x128xf32>
    %1030 = vector.broadcast %1029 : vector<1x128xf32> to vector<32x128xf32>
    %1031 = arith.mulf %1028, %1030 : vector<32x128xf32>
    %c113 = arith.constant 113 : index
    %c0_493 = arith.constant 0 : index
    %1032 = vector.load %arg2[%c113, %c0_493] : memref<141x128xf32, #tpu.memory_space<vmem>>, vector<1x128xf32>
    %1033 = vector.broadcast %1032 : vector<1x128xf32> to vector<32x128xf32>
    %1034 = arith.addf %1031, %1033 : vector<32x128xf32>
    %cst_494 = arith.constant 7.500000e-01 : f32
    %1035 = vector.broadcast %cst_494 : f32 to vector<32x128xf32>
    %1036 = arith.mulf %1035, %979 : vector<32x128xf32>
    %cst_495 = arith.constant 2.500000e-01 : f32
    %1037 = vector.broadcast %cst_495 : f32 to vector<32x128xf32>
    %1038 = arith.mulf %1037, %1034 : vector<32x128xf32>
    %1039 = arith.addf %1036, %1038 : vector<32x128xf32>
    %1040 = vector.shape_cast %1039 : vector<32x128xf32> to vector<2x16x128xf32>
    %cst_496 = arith.constant dense<0.000000e+00> : vector<2x128xf32>
    %1041 = vector.multi_reduction <add>, %1040, %cst_496 [1] : vector<2x16x128xf32> to vector<2x128xf32>
    %cst_497 = arith.constant 1.600000e+01 : f32
    %1042 = vector.broadcast %cst_497 : f32 to vector<2x128xf32>
    %1043 = arith.divf %1041, %1042 : vector<2x128xf32>
    %1044 = vector.shape_cast %1043 : vector<2x128xf32> to vector<2x1x128xf32>
    %1045 = vector.broadcast %1044 : vector<2x1x128xf32> to vector<2x16x128xf32>
    %1046 = arith.subf %1040, %1045 : vector<2x16x128xf32>
    %1047 = arith.mulf %1046, %1046 : vector<2x16x128xf32>
    %cst_498 = arith.constant dense<0.000000e+00> : vector<2x128xf32>
    %1048 = vector.multi_reduction <add>, %1047, %cst_498 [1] : vector<2x16x128xf32> to vector<2x128xf32>
    %cst_499 = arith.constant 1.600000e+01 : f32
    %1049 = vector.broadcast %cst_499 : f32 to vector<2x128xf32>
    %1050 = arith.divf %1048, %1049 : vector<2x128xf32>
    %cst_500 = arith.constant 9.99999996E-13 : f32
    %1051 = vector.broadcast %cst_500 : f32 to vector<2x128xf32>
    %1052 = arith.maximumf %1050, %1051 : vector<2x128xf32>
    %1053 = math.sqrt %1052 : vector<2x128xf32>
    %1054 = arith.truncf %1043 : vector<2x128xf32> to vector<2x128xbf16>
    %c63_501 = arith.constant 63 : index
    %c0_502 = arith.constant 0 : index
    %c0_503 = arith.constant 0 : index
    %1055 = vector.load %arg1[%c63_501, %c0_502, %c0_503] : memref<77x128x128xbf16, #tpu.memory_space<vmem>>, vector<1x128x128xbf16>
    %1056 = vector.shape_cast %1055 : vector<1x128x128xbf16> to vector<128x128xbf16>
    %cst_504 = arith.constant dense<0.000000e+00> : vector<2x128xf32>
    %1057 = tpu.matmul %1054, %1056, %cst_504 {dimension_numbers = #tpu.dot_dimension_numbers<[1], [0], [0], [1], [0, 0, 1, 1], [], []>} : vector<2x128xbf16>, vector<128x128xbf16>, vector<2x128xf32> -> vector<2x128xf32>
    %1058 = arith.truncf %1053 : vector<2x128xf32> to vector<2x128xbf16>
    %c64_505 = arith.constant 64 : index
    %c0_506 = arith.constant 0 : index
    %c0_507 = arith.constant 0 : index
    %1059 = vector.load %arg1[%c64_505, %c0_506, %c0_507] : memref<77x128x128xbf16, #tpu.memory_space<vmem>>, vector<1x128x128xbf16>
    %1060 = vector.shape_cast %1059 : vector<1x128x128xbf16> to vector<128x128xbf16>
    %cst_508 = arith.constant dense<0.000000e+00> : vector<2x128xf32>
    %1061 = tpu.matmul %1058, %1060, %cst_508 {dimension_numbers = #tpu.dot_dimension_numbers<[1], [0], [0], [1], [0, 0, 1, 1], [], []>} : vector<2x128xbf16>, vector<128x128xbf16>, vector<2x128xf32> -> vector<2x128xf32>
    %1062 = arith.addf %1057, %1061 : vector<2x128xf32>
    %1063 = arith.truncf %1039 : vector<32x128xf32> to vector<32x128xbf16>
    %c62_509 = arith.constant 62 : index
    %c0_510 = arith.constant 0 : index
    %c0_511 = arith.constant 0 : index
    %1064 = vector.load %arg1[%c62_509, %c0_510, %c0_511] : memref<77x128x128xbf16, #tpu.memory_space<vmem>>, vector<1x128x128xbf16>
    %1065 = vector.shape_cast %1064 : vector<1x128x128xbf16> to vector<128x128xbf16>
    %cst_512 = arith.constant dense<0.000000e+00> : vector<32x128xf32>
    %1066 = tpu.matmul %1063, %1065, %cst_512 {dimension_numbers = #tpu.dot_dimension_numbers<[1], [0], [0], [1], [0, 0, 1, 1], [], []>} : vector<32x128xbf16>, vector<128x128xbf16>, vector<32x128xf32> -> vector<32x128xf32>
    %1067 = vector.shape_cast %1066 : vector<32x128xf32> to vector<2x16x128xf32>
    %1068 = vector.shape_cast %1062 : vector<2x128xf32> to vector<2x1x128xf32>
    %1069 = vector.broadcast %1068 : vector<2x1x128xf32> to vector<2x16x128xf32>
    %1070 = arith.addf %1067, %1069 : vector<2x16x128xf32>
    %c115 = arith.constant 115 : index
    %c0_513 = arith.constant 0 : index
    %1071 = vector.load %arg2[%c115, %c0_513] : memref<141x128xf32, #tpu.memory_space<vmem>>, vector<1x128xf32>
    %1072 = vector.shape_cast %1071 : vector<1x128xf32> to vector<1x1x128xf32>
    %1073 = vector.broadcast %1072 : vector<1x1x128xf32> to vector<2x16x128xf32>
    %1074 = arith.addf %1070, %1073 : vector<2x16x128xf32>
    %cst_514 = arith.constant 0.000000e+00 : f32
    %1075 = vector.broadcast %cst_514 : f32 to vector<2x16x128xf32>
    %1076 = arith.maximumf %1074, %1075 : vector<2x16x128xf32>
    %c116 = arith.constant 116 : index
    %c0_515 = arith.constant 0 : index
    %1077 = vector.load %arg2[%c116, %c0_515] : memref<141x128xf32, #tpu.memory_space<vmem>>, vector<1x128xf32>
    %1078 = vector.shape_cast %1077 : vector<1x128xf32> to vector<1x1x128xf32>
    %1079 = vector.broadcast %1078 : vector<1x1x128xf32> to vector<2x16x128xf32>
    %1080 = arith.mulf %1076, %1079 : vector<2x16x128xf32>
    %c117 = arith.constant 117 : index
    %c0_516 = arith.constant 0 : index
    %1081 = vector.load %arg2[%c117, %c0_516] : memref<141x128xf32, #tpu.memory_space<vmem>>, vector<1x128xf32>
    %1082 = vector.shape_cast %1081 : vector<1x128xf32> to vector<1x1x128xf32>
    %1083 = vector.broadcast %1082 : vector<1x1x128xf32> to vector<2x16x128xf32>
    %1084 = arith.addf %1080, %1083 : vector<2x16x128xf32>
    %1085 = math.tanh %1084 : vector<2x16x128xf32>
    %1086 = vector.shape_cast %1085 : vector<2x16x128xf32> to vector<32x128xf32>
    %1087 = arith.truncf %1086 : vector<32x128xf32> to vector<32x128xbf16>
    %c65_517 = arith.constant 65 : index
    %c0_518 = arith.constant 0 : index
    %c0_519 = arith.constant 0 : index
    %1088 = vector.load %arg1[%c65_517, %c0_518, %c0_519] : memref<77x128x128xbf16, #tpu.memory_space<vmem>>, vector<1x128x128xbf16>
    %1089 = vector.shape_cast %1088 : vector<1x128x128xbf16> to vector<128x128xbf16>
    %cst_520 = arith.constant dense<0.000000e+00> : vector<32x128xf32>
    %1090 = tpu.matmul %1087, %1089, %cst_520 {dimension_numbers = #tpu.dot_dimension_numbers<[1], [0], [0], [1], [0, 0, 1, 1], [], []>} : vector<32x128xbf16>, vector<128x128xbf16>, vector<32x128xf32> -> vector<32x128xf32>
    %c114 = arith.constant 114 : index
    %c0_521 = arith.constant 0 : index
    %1091 = vector.load %arg2[%c114, %c0_521] : memref<141x128xf32, #tpu.memory_space<vmem>>, vector<1x128xf32>
    %1092 = vector.broadcast %1091 : vector<1x128xf32> to vector<32x128xf32>
    %1093 = arith.addf %1090, %1092 : vector<32x128xf32>
    %1094 = vector.shape_cast %1093 : vector<32x128xf32> to vector<2x16x128xf32>
    %cst_522 = arith.constant dense<0xFF800000> : vector<2x128xf32>
    %1095 = vector.multi_reduction <maximumf>, %1094, %cst_522 [1] : vector<2x16x128xf32> to vector<2x128xf32>
    %1096 = vector.shape_cast %1095 : vector<2x128xf32> to vector<2x1x128xf32>
    %1097 = vector.broadcast %1096 : vector<2x1x128xf32> to vector<2x16x128xf32>
    %1098 = arith.subf %1094, %1097 : vector<2x16x128xf32>
    %1099 = math.exp %1098 : vector<2x16x128xf32>
    %cst_523 = arith.constant dense<0.000000e+00> : vector<2x128xf32>
    %1100 = vector.multi_reduction <add>, %1099, %cst_523 [1] : vector<2x16x128xf32> to vector<2x128xf32>
    %1101 = vector.shape_cast %1100 : vector<2x128xf32> to vector<2x1x128xf32>
    %1102 = vector.broadcast %1101 : vector<2x1x128xf32> to vector<2x16x128xf32>
    %1103 = arith.divf %1099, %1102 : vector<2x16x128xf32>
    %1104 = arith.mulf %1103, %1040 : vector<2x16x128xf32>
    %cst_524 = arith.constant dense<0.000000e+00> : vector<2x128xf32>
    %1105 = vector.multi_reduction <add>, %1104, %cst_524 [1] : vector<2x16x128xf32> to vector<2x128xf32>
    %1106 = vector.shape_cast %1105 : vector<2x128xf32> to vector<2x1x128xf32>
    %1107 = vector.broadcast %1106 : vector<2x1x128xf32> to vector<2x16x128xf32>
    %1108 = arith.subf %1040, %1107 : vector<2x16x128xf32>
    %1109 = arith.mulf %1108, %1108 : vector<2x16x128xf32>
    %1110 = arith.mulf %1103, %1109 : vector<2x16x128xf32>
    %cst_525 = arith.constant dense<0.000000e+00> : vector<2x128xf32>
    %1111 = vector.multi_reduction <add>, %1110, %cst_525 [1] : vector<2x16x128xf32> to vector<2x128xf32>
    %cst_526 = arith.constant 9.99999996E-13 : f32
    %1112 = vector.broadcast %cst_526 : f32 to vector<2x128xf32>
    %1113 = arith.maximumf %1111, %1112 : vector<2x128xf32>
    %1114 = math.sqrt %1113 : vector<2x128xf32>
    %1115 = vector.shape_cast %1039 : vector<32x128xf32> to vector<2x16x128xf32>
    %cst_527 = arith.constant dense<0.000000e+00> : vector<2x128xf32>
    %1116 = vector.multi_reduction <add>, %1115, %cst_527 [1] : vector<2x16x128xf32> to vector<2x128xf32>
    %cst_528 = arith.constant 1.600000e+01 : f32
    %1117 = vector.broadcast %cst_528 : f32 to vector<2x128xf32>
    %1118 = arith.divf %1116, %1117 : vector<2x128xf32>
    %1119 = vector.shape_cast %1118 : vector<2x128xf32> to vector<2x1x128xf32>
    %1120 = vector.broadcast %1119 : vector<2x1x128xf32> to vector<2x16x128xf32>
    %1121 = arith.subf %1115, %1120 : vector<2x16x128xf32>
    %1122 = arith.mulf %1121, %1121 : vector<2x16x128xf32>
    %cst_529 = arith.constant dense<0.000000e+00> : vector<2x128xf32>
    %1123 = vector.multi_reduction <add>, %1122, %cst_529 [1] : vector<2x16x128xf32> to vector<2x128xf32>
    %cst_530 = arith.constant 1.600000e+01 : f32
    %1124 = vector.broadcast %cst_530 : f32 to vector<2x128xf32>
    %1125 = arith.divf %1123, %1124 : vector<2x128xf32>
    %cst_531 = arith.constant 9.99999996E-13 : f32
    %1126 = vector.broadcast %cst_531 : f32 to vector<2x128xf32>
    %1127 = arith.maximumf %1125, %1126 : vector<2x128xf32>
    %1128 = math.sqrt %1127 : vector<2x128xf32>
    %1129 = arith.truncf %1118 : vector<2x128xf32> to vector<2x128xbf16>
    %c67_532 = arith.constant 67 : index
    %c0_533 = arith.constant 0 : index
    %c0_534 = arith.constant 0 : index
    %1130 = vector.load %arg1[%c67_532, %c0_533, %c0_534] : memref<77x128x128xbf16, #tpu.memory_space<vmem>>, vector<1x128x128xbf16>
    %1131 = vector.shape_cast %1130 : vector<1x128x128xbf16> to vector<128x128xbf16>
    %cst_535 = arith.constant dense<0.000000e+00> : vector<2x128xf32>
    %1132 = tpu.matmul %1129, %1131, %cst_535 {dimension_numbers = #tpu.dot_dimension_numbers<[1], [0], [0], [1], [0, 0, 1, 1], [], []>} : vector<2x128xbf16>, vector<128x128xbf16>, vector<2x128xf32> -> vector<2x128xf32>
    %1133 = arith.truncf %1128 : vector<2x128xf32> to vector<2x128xbf16>
    %c68_536 = arith.constant 68 : index
    %c0_537 = arith.constant 0 : index
    %c0_538 = arith.constant 0 : index
    %1134 = vector.load %arg1[%c68_536, %c0_537, %c0_538] : memref<77x128x128xbf16, #tpu.memory_space<vmem>>, vector<1x128x128xbf16>
    %1135 = vector.shape_cast %1134 : vector<1x128x128xbf16> to vector<128x128xbf16>
    %cst_539 = arith.constant dense<0.000000e+00> : vector<2x128xf32>
    %1136 = tpu.matmul %1133, %1135, %cst_539 {dimension_numbers = #tpu.dot_dimension_numbers<[1], [0], [0], [1], [0, 0, 1, 1], [], []>} : vector<2x128xbf16>, vector<128x128xbf16>, vector<2x128xf32> -> vector<2x128xf32>
    %1137 = arith.addf %1132, %1136 : vector<2x128xf32>
    %1138 = arith.truncf %1039 : vector<32x128xf32> to vector<32x128xbf16>
    %c66_540 = arith.constant 66 : index
    %c0_541 = arith.constant 0 : index
    %c0_542 = arith.constant 0 : index
    %1139 = vector.load %arg1[%c66_540, %c0_541, %c0_542] : memref<77x128x128xbf16, #tpu.memory_space<vmem>>, vector<1x128x128xbf16>
    %1140 = vector.shape_cast %1139 : vector<1x128x128xbf16> to vector<128x128xbf16>
    %cst_543 = arith.constant dense<0.000000e+00> : vector<32x128xf32>
    %1141 = tpu.matmul %1138, %1140, %cst_543 {dimension_numbers = #tpu.dot_dimension_numbers<[1], [0], [0], [1], [0, 0, 1, 1], [], []>} : vector<32x128xbf16>, vector<128x128xbf16>, vector<32x128xf32> -> vector<32x128xf32>
    %1142 = vector.shape_cast %1141 : vector<32x128xf32> to vector<2x16x128xf32>
    %1143 = vector.shape_cast %1137 : vector<2x128xf32> to vector<2x1x128xf32>
    %1144 = vector.broadcast %1143 : vector<2x1x128xf32> to vector<2x16x128xf32>
    %1145 = arith.addf %1142, %1144 : vector<2x16x128xf32>
    %c119 = arith.constant 119 : index
    %c0_544 = arith.constant 0 : index
    %1146 = vector.load %arg2[%c119, %c0_544] : memref<141x128xf32, #tpu.memory_space<vmem>>, vector<1x128xf32>
    %1147 = vector.shape_cast %1146 : vector<1x128xf32> to vector<1x1x128xf32>
    %1148 = vector.broadcast %1147 : vector<1x1x128xf32> to vector<2x16x128xf32>
    %1149 = arith.addf %1145, %1148 : vector<2x16x128xf32>
    %cst_545 = arith.constant 0.000000e+00 : f32
    %1150 = vector.broadcast %cst_545 : f32 to vector<2x16x128xf32>
    %1151 = arith.maximumf %1149, %1150 : vector<2x16x128xf32>
    %c120 = arith.constant 120 : index
    %c0_546 = arith.constant 0 : index
    %1152 = vector.load %arg2[%c120, %c0_546] : memref<141x128xf32, #tpu.memory_space<vmem>>, vector<1x128xf32>
    %1153 = vector.shape_cast %1152 : vector<1x128xf32> to vector<1x1x128xf32>
    %1154 = vector.broadcast %1153 : vector<1x1x128xf32> to vector<2x16x128xf32>
    %1155 = arith.mulf %1151, %1154 : vector<2x16x128xf32>
    %c121 = arith.constant 121 : index
    %c0_547 = arith.constant 0 : index
    %1156 = vector.load %arg2[%c121, %c0_547] : memref<141x128xf32, #tpu.memory_space<vmem>>, vector<1x128xf32>
    %1157 = vector.shape_cast %1156 : vector<1x128xf32> to vector<1x1x128xf32>
    %1158 = vector.broadcast %1157 : vector<1x1x128xf32> to vector<2x16x128xf32>
    %1159 = arith.addf %1155, %1158 : vector<2x16x128xf32>
    %1160 = math.tanh %1159 : vector<2x16x128xf32>
    %1161 = vector.shape_cast %1160 : vector<2x16x128xf32> to vector<32x128xf32>
    %1162 = arith.truncf %1161 : vector<32x128xf32> to vector<32x128xbf16>
    %c69_548 = arith.constant 69 : index
    %c0_549 = arith.constant 0 : index
    %c0_550 = arith.constant 0 : index
    %1163 = vector.load %arg1[%c69_548, %c0_549, %c0_550] : memref<77x128x128xbf16, #tpu.memory_space<vmem>>, vector<1x128x128xbf16>
    %1164 = vector.shape_cast %1163 : vector<1x128x128xbf16> to vector<128x128xbf16>
    %cst_551 = arith.constant dense<0.000000e+00> : vector<32x128xf32>
    %1165 = tpu.matmul %1162, %1164, %cst_551 {dimension_numbers = #tpu.dot_dimension_numbers<[1], [0], [0], [1], [0, 0, 1, 1], [], []>} : vector<32x128xbf16>, vector<128x128xbf16>, vector<32x128xf32> -> vector<32x128xf32>
    %c118 = arith.constant 118 : index
    %c0_552 = arith.constant 0 : index
    %1166 = vector.load %arg2[%c118, %c0_552] : memref<141x128xf32, #tpu.memory_space<vmem>>, vector<1x128xf32>
    %1167 = vector.broadcast %1166 : vector<1x128xf32> to vector<32x128xf32>
    %1168 = arith.addf %1165, %1167 : vector<32x128xf32>
    %1169 = vector.shape_cast %1168 : vector<32x128xf32> to vector<2x16x128xf32>
    %cst_553 = arith.constant dense<0xFF800000> : vector<2x128xf32>
    %1170 = vector.multi_reduction <maximumf>, %1169, %cst_553 [1] : vector<2x16x128xf32> to vector<2x128xf32>
    %1171 = vector.shape_cast %1170 : vector<2x128xf32> to vector<2x1x128xf32>
    %1172 = vector.broadcast %1171 : vector<2x1x128xf32> to vector<2x16x128xf32>
    %1173 = arith.subf %1169, %1172 : vector<2x16x128xf32>
    %1174 = math.exp %1173 : vector<2x16x128xf32>
    %cst_554 = arith.constant dense<0.000000e+00> : vector<2x128xf32>
    %1175 = vector.multi_reduction <add>, %1174, %cst_554 [1] : vector<2x16x128xf32> to vector<2x128xf32>
    %1176 = vector.shape_cast %1175 : vector<2x128xf32> to vector<2x1x128xf32>
    %1177 = vector.broadcast %1176 : vector<2x1x128xf32> to vector<2x16x128xf32>
    %1178 = arith.divf %1174, %1177 : vector<2x16x128xf32>
    %1179 = arith.mulf %1178, %1115 : vector<2x16x128xf32>
    %cst_555 = arith.constant dense<0.000000e+00> : vector<2x128xf32>
    %1180 = vector.multi_reduction <add>, %1179, %cst_555 [1] : vector<2x16x128xf32> to vector<2x128xf32>
    %1181 = vector.shape_cast %1180 : vector<2x128xf32> to vector<2x1x128xf32>
    %1182 = vector.broadcast %1181 : vector<2x1x128xf32> to vector<2x16x128xf32>
    %1183 = arith.subf %1115, %1182 : vector<2x16x128xf32>
    %1184 = arith.mulf %1183, %1183 : vector<2x16x128xf32>
    %1185 = arith.mulf %1178, %1184 : vector<2x16x128xf32>
    %cst_556 = arith.constant dense<0.000000e+00> : vector<2x128xf32>
    %1186 = vector.multi_reduction <add>, %1185, %cst_556 [1] : vector<2x16x128xf32> to vector<2x128xf32>
    %cst_557 = arith.constant 9.99999996E-13 : f32
    %1187 = vector.broadcast %cst_557 : f32 to vector<2x128xf32>
    %1188 = arith.maximumf %1186, %1187 : vector<2x128xf32>
    %1189 = math.sqrt %1188 : vector<2x128xf32>
    %cst_558 = arith.constant 7.500000e-01 : f32
    %1190 = vector.broadcast %cst_558 : f32 to vector<2x128xf32>
    %1191 = arith.mulf %1190, %1105 : vector<2x128xf32>
    %cst_559 = arith.constant 2.500000e-01 : f32
    %1192 = vector.broadcast %cst_559 : f32 to vector<2x128xf32>
    %1193 = arith.mulf %1192, %1180 : vector<2x128xf32>
    %1194 = arith.addf %1191, %1193 : vector<2x128xf32>
    %cst_560 = arith.constant 7.500000e-01 : f32
    %1195 = vector.broadcast %cst_560 : f32 to vector<2x128xf32>
    %1196 = arith.mulf %1195, %1114 : vector<2x128xf32>
    %cst_561 = arith.constant 2.500000e-01 : f32
    %1197 = vector.broadcast %cst_561 : f32 to vector<2x128xf32>
    %1198 = arith.mulf %1197, %1189 : vector<2x128xf32>
    %1199 = arith.addf %1196, %1198 : vector<2x128xf32>
    %c122 = arith.constant 122 : index
    %c0_562 = arith.constant 0 : index
    %1200 = vector.load %arg2[%c122, %c0_562] : memref<141x128xf32, #tpu.memory_space<vmem>>, vector<1x128xf32>
    %1201 = vector.broadcast %1200 : vector<1x128xf32> to vector<2x128xf32>
    %1202 = arith.mulf %1194, %1201 : vector<2x128xf32>
    %c123 = arith.constant 123 : index
    %c0_563 = arith.constant 0 : index
    %1203 = vector.load %arg2[%c123, %c0_563] : memref<141x128xf32, #tpu.memory_space<vmem>>, vector<1x128xf32>
    %1204 = vector.broadcast %1203 : vector<1x128xf32> to vector<2x128xf32>
    %1205 = arith.addf %1202, %1204 : vector<2x128xf32>
    %c124 = arith.constant 124 : index
    %c0_564 = arith.constant 0 : index
    %1206 = vector.load %arg2[%c124, %c0_564] : memref<141x128xf32, #tpu.memory_space<vmem>>, vector<1x128xf32>
    %1207 = vector.broadcast %1206 : vector<1x128xf32> to vector<2x128xf32>
    %1208 = arith.mulf %1199, %1207 : vector<2x128xf32>
    %c125 = arith.constant 125 : index
    %c0_565 = arith.constant 0 : index
    %1209 = vector.load %arg2[%c125, %c0_565] : memref<141x128xf32, #tpu.memory_space<vmem>>, vector<1x128xf32>
    %1210 = vector.broadcast %1209 : vector<1x128xf32> to vector<2x128xf32>
    %1211 = arith.addf %1208, %1210 : vector<2x128xf32>
    %1212 = arith.truncf %1205 : vector<2x128xf32> to vector<2x128xbf16>
    %c70_566 = arith.constant 70 : index
    %c0_567 = arith.constant 0 : index
    %c0_568 = arith.constant 0 : index
    %1213 = vector.load %arg1[%c70_566, %c0_567, %c0_568] : memref<77x128x128xbf16, #tpu.memory_space<vmem>>, vector<1x128x128xbf16>
    %1214 = vector.shape_cast %1213 : vector<1x128x128xbf16> to vector<128x128xbf16>
    %cst_569 = arith.constant dense<0.000000e+00> : vector<2x128xf32>
    %1215 = tpu.matmul %1212, %1214, %cst_569 {dimension_numbers = #tpu.dot_dimension_numbers<[1], [0], [0], [1], [0, 0, 1, 1], [], []>} : vector<2x128xbf16>, vector<128x128xbf16>, vector<2x128xf32> -> vector<2x128xf32>
    %1216 = arith.truncf %1211 : vector<2x128xf32> to vector<2x128xbf16>
    %c71_570 = arith.constant 71 : index
    %c0_571 = arith.constant 0 : index
    %c0_572 = arith.constant 0 : index
    %1217 = vector.load %arg1[%c71_570, %c0_571, %c0_572] : memref<77x128x128xbf16, #tpu.memory_space<vmem>>, vector<1x128x128xbf16>
    %1218 = vector.shape_cast %1217 : vector<1x128x128xbf16> to vector<128x128xbf16>
    %cst_573 = arith.constant dense<0.000000e+00> : vector<2x128xf32>
    %1219 = tpu.matmul %1216, %1218, %cst_573 {dimension_numbers = #tpu.dot_dimension_numbers<[1], [0], [0], [1], [0, 0, 1, 1], [], []>} : vector<2x128xbf16>, vector<128x128xbf16>, vector<2x128xf32> -> vector<2x128xf32>
    %1220 = arith.addf %1215, %1219 : vector<2x128xf32>
    %c126 = arith.constant 126 : index
    %c0_574 = arith.constant 0 : index
    %1221 = vector.load %arg2[%c126, %c0_574] : memref<141x128xf32, #tpu.memory_space<vmem>>, vector<1x128xf32>
    %1222 = vector.broadcast %1221 : vector<1x128xf32> to vector<2x128xf32>
    %1223 = arith.addf %1220, %1222 : vector<2x128xf32>
    %c127 = arith.constant 127 : index
    %c0_575 = arith.constant 0 : index
    %1224 = vector.load %arg2[%c127, %c0_575] : memref<141x128xf32, #tpu.memory_space<vmem>>, vector<1x128xf32>
    %1225 = vector.broadcast %1224 : vector<1x128xf32> to vector<2x128xf32>
    %1226 = arith.mulf %1223, %1225 : vector<2x128xf32>
    %c128 = arith.constant 128 : index
    %c0_576 = arith.constant 0 : index
    %1227 = vector.load %arg2[%c128, %c0_576] : memref<141x128xf32, #tpu.memory_space<vmem>>, vector<1x128xf32>
    %1228 = vector.broadcast %1227 : vector<1x128xf32> to vector<2x128xf32>
    %1229 = arith.addf %1226, %1228 : vector<2x128xf32>
    %1230 = arith.truncf %1205 : vector<2x128xf32> to vector<2x128xbf16>
    %c72_577 = arith.constant 72 : index
    %c0_578 = arith.constant 0 : index
    %c0_579 = arith.constant 0 : index
    %1231 = vector.load %arg1[%c72_577, %c0_578, %c0_579] : memref<77x128x128xbf16, #tpu.memory_space<vmem>>, vector<1x128x128xbf16>
    %1232 = vector.shape_cast %1231 : vector<1x128x128xbf16> to vector<128x128xbf16>
    %cst_580 = arith.constant dense<0.000000e+00> : vector<2x128xf32>
    %1233 = tpu.matmul %1230, %1232, %cst_580 {dimension_numbers = #tpu.dot_dimension_numbers<[1], [0], [0], [1], [0, 0, 1, 1], [], []>} : vector<2x128xbf16>, vector<128x128xbf16>, vector<2x128xf32> -> vector<2x128xf32>
    %1234 = arith.truncf %1211 : vector<2x128xf32> to vector<2x128xbf16>
    %c73_581 = arith.constant 73 : index
    %c0_582 = arith.constant 0 : index
    %c0_583 = arith.constant 0 : index
    %1235 = vector.load %arg1[%c73_581, %c0_582, %c0_583] : memref<77x128x128xbf16, #tpu.memory_space<vmem>>, vector<1x128x128xbf16>
    %1236 = vector.shape_cast %1235 : vector<1x128x128xbf16> to vector<128x128xbf16>
    %cst_584 = arith.constant dense<0.000000e+00> : vector<2x128xf32>
    %1237 = tpu.matmul %1234, %1236, %cst_584 {dimension_numbers = #tpu.dot_dimension_numbers<[1], [0], [0], [1], [0, 0, 1, 1], [], []>} : vector<2x128xbf16>, vector<128x128xbf16>, vector<2x128xf32> -> vector<2x128xf32>
    %1238 = arith.addf %1233, %1237 : vector<2x128xf32>
    %c129 = arith.constant 129 : index
    %c0_585 = arith.constant 0 : index
    %1239 = vector.load %arg2[%c129, %c0_585] : memref<141x128xf32, #tpu.memory_space<vmem>>, vector<1x128xf32>
    %1240 = vector.broadcast %1239 : vector<1x128xf32> to vector<2x128xf32>
    %1241 = arith.addf %1238, %1240 : vector<2x128xf32>
    %cst_586 = arith.constant 0.000000e+00 : f32
    %1242 = vector.broadcast %cst_586 : f32 to vector<2x128xf32>
    %1243 = arith.maximumf %1241, %1242 : vector<2x128xf32>
    %c130 = arith.constant 130 : index
    %c0_587 = arith.constant 0 : index
    %1244 = vector.load %arg2[%c130, %c0_587] : memref<141x128xf32, #tpu.memory_space<vmem>>, vector<1x128xf32>
    %1245 = vector.broadcast %1244 : vector<1x128xf32> to vector<2x128xf32>
    %1246 = arith.mulf %1243, %1245 : vector<2x128xf32>
    %c131 = arith.constant 131 : index
    %c0_588 = arith.constant 0 : index
    %1247 = vector.load %arg2[%c131, %c0_588] : memref<141x128xf32, #tpu.memory_space<vmem>>, vector<1x128xf32>
    %1248 = vector.broadcast %1247 : vector<1x128xf32> to vector<2x128xf32>
    %1249 = arith.addf %1246, %1248 : vector<2x128xf32>
    %1250 = arith.truncf %1249 : vector<2x128xf32> to vector<2x128xbf16>
    %c74_589 = arith.constant 74 : index
    %c0_590 = arith.constant 0 : index
    %c0_591 = arith.constant 0 : index
    %1251 = vector.load %arg1[%c74_589, %c0_590, %c0_591] : memref<77x128x128xbf16, #tpu.memory_space<vmem>>, vector<1x128x128xbf16>
    %1252 = vector.shape_cast %1251 : vector<1x128x128xbf16> to vector<128x128xbf16>
    %cst_592 = arith.constant dense<0.000000e+00> : vector<2x128xf32>
    %1253 = tpu.matmul %1250, %1252, %cst_592 {dimension_numbers = #tpu.dot_dimension_numbers<[1], [0], [0], [1], [0, 0, 1, 1], [], []>} : vector<2x128xbf16>, vector<128x128xbf16>, vector<2x128xf32> -> vector<2x128xf32>
    %c132 = arith.constant 132 : index
    %c0_593 = arith.constant 0 : index
    %1254 = vector.load %arg2[%c132, %c0_593] : memref<141x128xf32, #tpu.memory_space<vmem>>, vector<1x128xf32>
    %1255 = vector.broadcast %1254 : vector<1x128xf32> to vector<2x128xf32>
    %1256 = arith.addf %1253, %1255 : vector<2x128xf32>
    %c133 = arith.constant 133 : index
    %c0_594 = arith.constant 0 : index
    %1257 = vector.load %arg2[%c133, %c0_594] : memref<141x128xf32, #tpu.memory_space<vmem>>, vector<1x128xf32>
    %1258 = vector.broadcast %1257 : vector<1x128xf32> to vector<2x128xf32>
    %1259 = arith.mulf %1256, %1258 : vector<2x128xf32>
    %c134 = arith.constant 134 : index
    %c0_595 = arith.constant 0 : index
    %1260 = vector.load %arg2[%c134, %c0_595] : memref<141x128xf32, #tpu.memory_space<vmem>>, vector<1x128xf32>
    %1261 = vector.broadcast %1260 : vector<1x128xf32> to vector<2x128xf32>
    %1262 = arith.addf %1259, %1261 : vector<2x128xf32>
    %cst_596 = arith.constant 7.500000e-01 : f32
    %1263 = vector.broadcast %cst_596 : f32 to vector<2x128xf32>
    %1264 = arith.mulf %1263, %1229 : vector<2x128xf32>
    %cst_597 = arith.constant 2.500000e-01 : f32
    %1265 = vector.broadcast %cst_597 : f32 to vector<2x128xf32>
    %1266 = arith.mulf %1265, %1262 : vector<2x128xf32>
    %1267 = arith.addf %1264, %1266 : vector<2x128xf32>
    %1268 = arith.truncf %1267 : vector<2x128xf32> to vector<2x128xbf16>
    %c75_598 = arith.constant 75 : index
    %c0_599 = arith.constant 0 : index
    %c0_600 = arith.constant 0 : index
    %1269 = vector.load %arg1[%c75_598, %c0_599, %c0_600] : memref<77x128x128xbf16, #tpu.memory_space<vmem>>, vector<1x128x128xbf16>
    %1270 = vector.shape_cast %1269 : vector<1x128x128xbf16> to vector<128x128xbf16>
    %cst_601 = arith.constant dense<0.000000e+00> : vector<2x128xf32>
    %1271 = tpu.matmul %1268, %1270, %cst_601 {dimension_numbers = #tpu.dot_dimension_numbers<[1], [0], [0], [1], [0, 0, 1, 1], [], []>} : vector<2x128xbf16>, vector<128x128xbf16>, vector<2x128xf32> -> vector<2x128xf32>
    %c135 = arith.constant 135 : index
    %c0_602 = arith.constant 0 : index
    %1272 = vector.load %arg2[%c135, %c0_602] : memref<141x128xf32, #tpu.memory_space<vmem>>, vector<1x128xf32>
    %1273 = vector.broadcast %1272 : vector<1x128xf32> to vector<2x128xf32>
    %1274 = arith.addf %1271, %1273 : vector<2x128xf32>
    %c136 = arith.constant 136 : index
    %c0_603 = arith.constant 0 : index
    %1275 = vector.load %arg2[%c136, %c0_603] : memref<141x128xf32, #tpu.memory_space<vmem>>, vector<1x128xf32>
    %1276 = vector.broadcast %1275 : vector<1x128xf32> to vector<2x128xf32>
    %1277 = arith.mulf %1274, %1276 : vector<2x128xf32>
    %c137 = arith.constant 137 : index
    %c0_604 = arith.constant 0 : index
    %1278 = vector.load %arg2[%c137, %c0_604] : memref<141x128xf32, #tpu.memory_space<vmem>>, vector<1x128xf32>
    %1279 = vector.broadcast %1278 : vector<1x128xf32> to vector<2x128xf32>
    %1280 = arith.addf %1277, %1279 : vector<2x128xf32>
    %cst_605 = arith.constant 7.500000e-01 : f32
    %1281 = vector.broadcast %cst_605 : f32 to vector<2x128xf32>
    %1282 = arith.mulf %1281, %1280 : vector<2x128xf32>
    %1283 = arith.truncf %1267 : vector<2x128xf32> to vector<2x128xbf16>
    %c76_606 = arith.constant 76 : index
    %c0_607 = arith.constant 0 : index
    %c0_608 = arith.constant 0 : index
    %1284 = vector.load %arg1[%c76_606, %c0_607, %c0_608] : memref<77x128x128xbf16, #tpu.memory_space<vmem>>, vector<1x128x128xbf16>
    %1285 = vector.shape_cast %1284 : vector<1x128x128xbf16> to vector<128x128xbf16>
    %cst_609 = arith.constant dense<0.000000e+00> : vector<2x128xf32>
    %1286 = tpu.matmul %1283, %1285, %cst_609 {dimension_numbers = #tpu.dot_dimension_numbers<[1], [0], [0], [1], [0, 0, 1, 1], [], []>} : vector<2x128xbf16>, vector<128x128xbf16>, vector<2x128xf32> -> vector<2x128xf32>
    %c138 = arith.constant 138 : index
    %c0_610 = arith.constant 0 : index
    %1287 = vector.load %arg2[%c138, %c0_610] : memref<141x128xf32, #tpu.memory_space<vmem>>, vector<1x128xf32>
    %1288 = vector.broadcast %1287 : vector<1x128xf32> to vector<2x128xf32>
    %1289 = arith.addf %1286, %1288 : vector<2x128xf32>
    %c139 = arith.constant 139 : index
    %c0_611 = arith.constant 0 : index
    %1290 = vector.load %arg2[%c139, %c0_611] : memref<141x128xf32, #tpu.memory_space<vmem>>, vector<1x128xf32>
    %1291 = vector.broadcast %1290 : vector<1x128xf32> to vector<2x128xf32>
    %1292 = arith.mulf %1289, %1291 : vector<2x128xf32>
    %c140 = arith.constant 140 : index
    %c0_612 = arith.constant 0 : index
    %1293 = vector.load %arg2[%c140, %c0_612] : memref<141x128xf32, #tpu.memory_space<vmem>>, vector<1x128xf32>
    %1294 = vector.broadcast %1293 : vector<1x128xf32> to vector<2x128xf32>
    %1295 = arith.addf %1292, %1294 : vector<2x128xf32>
    %cst_613 = arith.constant 2.500000e-01 : f32
    %1296 = vector.broadcast %cst_613 : f32 to vector<2x128xf32>
    %1297 = arith.mulf %1296, %1295 : vector<2x128xf32>
    %1298 = arith.addf %1282, %1297 : vector<2x128xf32>
    %c0_614 = arith.constant 0 : index
    %c0_615 = arith.constant 0 : index
    %1299 = vector.load %arg4[%c0_614, %c0_615] : memref<2x128xf32, #tpu.memory_space<vmem>>, vector<2x128xf32>
    tpu.vector_store %arg4[%c0_614, %c0_615], %1267 {strides = array<i32>} : memref<2x128xf32, #tpu.memory_space<vmem>>, vector<2x128xf32>,
    %c0_616 = arith.constant 0 : index
    %c0_617 = arith.constant 0 : index
    %1300 = vector.load %arg3[%c0_616, %c0_617] : memref<2x128xf32, #tpu.memory_space<vmem>>, vector<2x128xf32>
    tpu.vector_store %arg3[%c0_616, %c0_617], %1298 {strides = array<i32>} : memref<2x128xf32, #tpu.memory_space<vmem>>, vector<2x128xf32>,
    return
  }
}

</mosaic_0001>

<bundles_post_ra>
// kernel: adapter_forward.1
= control target key start
LH: loop header
LB: loop body
LE: loop exit
PB: predicated region body
PF: predicated region fallthrough
CT: control target
= control target key end

     0   :  { %10 = vsyncpa [#allocation3], 0  ;;  %v23_v1 = vlaneseq  ;;  %vm68_vm0 = vcmask 261120   ;;  %v17526_v17 = vmov 0.0   ;;  %s20933_s0 = inlined_call_operand.vmem [shape: bf16[2,16,128], index: 0, kind: input, shape index: {}]   ;;  %s20934_s1 = inlined_call_operand.vmem [shape: bf16[77,128,128], index: 1, kind: input, shape index: {}]   ;;  %s20935_s2 = inlined_call_operand.vmem [shape: f32[141,128], index: 2, kind: input, shape index: {}]   ;;  %s20936_s3 = inlined_call_operand.hbm [shape: f32[2,128], index: 3, kind: output, shape index: {0}]   ;;  %s20937_s4 = inlined_call_operand.hbm [shape: f32[2,128], index: 4, kind: output, shape index: {1}]  }
   0x1   :  { %v17559_v0 = vld [vmem:[%s20933_s0] sm:$0xff]   ;;  %v17564_v2 = vld [vmem:[%s20933_s0 + $0x8] sm:$0xff]   ;;  %v16794_v42 = vld [vmem:[%s20934_s1 + $0x50] sm:$0xff]  }
   0x2   :  { %14973 = vmatprep.subr.bf16.mxu1 %v17559_v0  ;;  %v17567_v3 = vand.u32 127, %v23_v1  ;;  %v17569_v4 = vshrl.u32 %v23_v1, 7  ;;  %v16792_v32 = vld [vmem:[%s20934_s1 + $0x40] sm:$0xff]   ;;  %v16793_v35 = vld [vmem:[%s20934_s1 + $0x48] sm:$0xff]   ;;  %v16795_v47 = vld [vmem:[%s20934_s1 + $0x58] sm:$0xff]  }
   0x3   :  { %14974 = vmatpush3.bf16.msra.mxu1 %v17559_v0  ;;  %14989 = vmatprep.subr.bf16.mxu0 %v16792_v32  ;;  %v16796_v51 = vld [vmem:[%s20934_s1 + $0x60] sm:$0xff]   ;;  %v16785_v55 = vld [vmem:[%s20934_s1 + $0x148] sm:$0xff]   ;;  %v16786_v56 = vld [vmem:[%s20934_s1 + $0x150] sm:$0xff]  }
   0x4   :  { %14975 = vmatprep.subr.bf16.mxu1 %v17564_v2  ;;  %v17574_v5 = vadd.s32 8, %v17569_v4  ;;  %v30_v6 = vadd.s32 4294967294, %v17569_v4  ;;  %v17578_v7 = vadd.s32 16, %v17569_v4  ;;  %v17581_v8 = vadd.s32 24, %v17569_v4  ;;  %14990 = vmatpush3.bf16.msra.mxu0 %v16792_v32  ;;  %v16784_v53 = vld [vmem:[%s20934_s1 + $0x140] sm:$0xff]   ;;  %v16787_v57 = vld [vmem:[%s20934_s1 + $0x158] sm:$0xff]  }
   0x5   :  { %v142_v9 = vadd.s32 4294967295, %v17569_v4  ;;  %v554_v10 = vadd.s32 1, %v17569_v4  ;;  %v17594_v16 = vadd.s32 2, %v17569_v4  ;;  %14991 = vmatprep.subr.bf16.mxu0 %v16793_v35  ;;  %v16788_v58 = vld [vmem:[%s20934_s1 + $0x160] sm:$0xff]   ;;  %v16789_v59 = vld [vmem:[%s20934_s1 + $0x168] sm:$0xff]   ;;  %v16790_v60 = vld [vmem:[%s20934_s1 + $0x170] sm:$0xff]  }
   0x6   :  { %v31_v11 = vadd.s32 4294967294, %v17574_v5  ;;  %vm34_vm1 = vcmp.eq.s32.totalorder %v17567_v3, %v30_v6  ;;  %vm38_vm2 = vcmp.ge.s32.totalorder %v30_v6, 0  ;;  %v32_v12 = vadd.s32 4294967294, %v17578_v7  ;;  %v16791_v61 = vld [vmem:[%s20934_s1 + $0x178] sm:$0xff]   ;;  %v16797_v62 = vld [vmem:[%s20934_s1 + $0x68] sm:$0xff]   ;;  %v16798_v63 = vld [vmem:[%s20934_s1 + $0x70] sm:$0xff]  }
   0x7   :  { %14976 = vmatpush3.bf16.msra.mxu1 %v17564_v2  ;;  %vm40_vm3 = vmand %vm34_vm1, %vm38_vm2  ;;  %v33_v13 = vadd.s32 4294967294, %v17581_v8  ;;  %v143_v14 = vadd.s32 4294967295, %v17574_v5  ;;  %v144_v15 = vadd.s32 4294967295, %v17578_v7  ;;  %vm146_vm6 = vcmp.eq.s32.totalorder %v17567_v3, %v142_v9  ;;  %v16800_v1 = vld [vmem:[%s20934_s1] sm:$0xff]  }
   0x8   :  { %vm35_vm4 = vcmp.eq.s32.totalorder %v17567_v3, %v31_v11  ;;  %v50_v18 = vsel %vm40_vm3, 1.0, %v17526_v17  ;;  %14981 = vmatprep.subr.bf16.mxu1 %v17559_v0  ;;  %vm36_vm5 = vcmp.eq.s32.totalorder %v17567_v3, %v32_v12  ;;  %vm150_vm11 = vcmp.ge.s32.totalorder %v142_v9, 0  ;;  %14992 = vmatpush3.bf16.msra.mxu0 %v16793_v35 }
   0x9   :  { %v51_v19 = vsel %vm35_vm4, 1.0, %v17526_v17  ;;  %vm37_vm7 = vcmp.eq.s32.totalorder %v17567_v3, %v33_v13  ;;  %vm42_vm8 = vmand %vm36_vm5, %vm38_vm2  ;;  %vm147_vm9 = vcmp.eq.s32.totalorder %v17567_v3, %v143_v14  ;;  %vm148_vm10 = vcmp.eq.s32.totalorder %v17567_v3, %v144_v15  ;;  %14993 = vmatprep.subr.bf16.mxu0 %v16794_v42 }
   0xa   :  { %v17606_v20 = vpack.c.bf16 %v51_v19, %v50_v18  ;;  %v52_v21 = vsel %vm42_vm8, 1.0, %v17526_v17  ;;  %v53_v22 = vsel %vm37_vm7, 1.0, %v17526_v17  ;;  %vm152_vm12 = vmand %vm146_vm6, %vm150_vm11  ;;  %v163_v24 = vsel %vm147_vm9, 1.0, %v17526_v17  ;;  %v16801_v19 = vld [vmem:[%s20934_s1 + $0x8] sm:$0xff]  }
   0xb   :  { %v17610_v23 = vpack.c.bf16 %v53_v22, %v52_v21  ;;  %v145_v25 = vadd.s32 4294967295, %v17581_v8  ;;  %v555_v26 = vadd.s32 1, %v17574_v5  ;;  %vm154_vm13 = vmand %vm148_vm10, %vm150_vm11  ;;  %v162_v27 = vsel %vm152_vm12, 1.0, %v17526_v17 }
   0xc   :  { %14977 = vmatprep.mubr.msk.bf16.mxu1 %vm68_vm0, %v17606_v20  ;;  %v557_v28 = vadd.s32 1, %v17581_v8  ;;  %vm558_vm14 = vcmp.eq.s32.totalorder %v17567_v3, %v554_v10  ;;  %v556_v29 = vadd.s32 1, %v17578_v7  ;;  %v164_v30 = vsel %vm154_vm13, 1.0, %v17526_v17  ;;  %14994 = vmatpush3.bf16.msra.mxu0 %v16794_v42  ;;  %v16806_v42 = vld [vmem:[%s20934_s1 + $0x30] sm:$0xff]  }
   0xd   :  { %14978 = vmatmul.mubr.msk.bf16.vlgmr.msra.gmra.mrb[0].mxu1 %vm68_vm0, %v17610_v23  ;;  %v17624_v31 = vpack.c.bf16 %v163_v24, %v162_v27  ;;  %vm149_vm15 = vcmp.eq.s32.totalorder %v17567_v3, %v145_v25  ;;  %vm559_vm1 = vcmp.eq.s32.totalorder %v17567_v3, %v555_v26  ;;  %vm569_vm3 = vcmp.lt.s32.totalorder %v555_v26, 16  ;;  %14995 = vmatprep.subr.bf16.mxu0 %v16795_v47  ;;  %v16802_v25 = vld [vmem:[%s20934_s1 + $0x10] sm:$0xff]  }
   0xe   :  { %14982 = vmatpush3.bf16.msra.mxu1 %v17559_v0  ;;  %v165_v33 = vsel %vm149_vm15, 1.0, %v17526_v17  ;;  %vm561_vm2 = vcmp.eq.s32.totalorder %v17567_v3, %v557_v28  ;;  %v574_v34 = vsel %vm558_vm14, 1.0, %v17526_v17  ;;  %vm571_vm4 = vmand %vm559_vm1, %vm569_vm3  ;;  %v756_v36 = vadd.s32 2, %v17574_v5 }
   0xf   :  { %14983 = vmatprep.subr.bf16.mxu1 %v17564_v2  ;;  %14985 = vmatprep.mubr.msk.bf16.mxu1 %vm68_vm0, %v17624_v31  ;;  %v758_v37 = vadd.s32 2, %v17581_v8  ;;  %v575_v38 = vsel %vm571_vm4, 1.0, %v17526_v17  ;;  %vm560_vm5 = vcmp.eq.s32.totalorder %v17567_v3, %v556_v29  ;;  %v757_v39 = vadd.s32 2, %v17578_v7  ;;  %vm573_vm6 = vmand %vm561_vm2, %vm569_vm3  ;;  %v16803_v29 = vld [vmem:[%s20934_s1 + $0x18] sm:$0xff]  }
  0x10   :  { %v17646_v40 = vpack.c.bf16 %v165_v33, %v164_v30  ;;  %vm759_vm7 = vcmp.eq.s32.totalorder %v17567_v3, %v17594_v16  ;;  %vm760_vm8 = vcmp.eq.s32.totalorder %v17567_v3, %v756_v36  ;;  %v17653_v41 = vpack.c.bf16 %v575_v38, %v574_v34  ;;  %14996 = vmatpush3.bf16.msra.mxu0 %v16795_v47  ;;  %v16804_v34 = vld [vmem:[%s20934_s1 + $0x20] sm:$0xff]   ;;  %v16805_v38 = vld [vmem:[%s20934_s1 + $0x28] sm:$0xff]  }
  0x11   :  { %vm762_vm9 = vcmp.eq.s32.totalorder %v17567_v3, %v758_v37  ;;  %vm770_vm10 = vcmp.lt.s32.totalorder %v756_v36, 16  ;;  %vm761_vm11 = vcmp.eq.s32.totalorder %v17567_v3, %v757_v39  ;;  %v576_v43 = vsel %vm560_vm5, 1.0, %v17526_v17  ;;  %14997 = vmatprep.subr.bf16.mxu0 %v16796_v51  ;;  %v17476_v47 = vld [vmem:[%s20933_s0] sm:$0xff]  }
  0x12   :  { %14984 = vmatpush3.bf16.msra.mxu1 %v17564_v2  ;;  %vm772_vm12 = vmand %vm760_vm8, %vm770_vm10  ;;  %v577_v44 = vsel %vm573_vm6, 1.0, %v17526_v17  ;;  %v775_v45 = vsel %vm759_vm7, 1.0, %v17526_v17  ;;  %v777_v46 = vsel %vm761_vm11, 1.0, %v17526_v17 }
  0x13   :  { %15049 = vmatprep.subr.bf16.mxu1 %v17559_v0  ;;  %vm774_vm13 = vmand %vm762_vm9, %vm770_vm10  ;;  %v776_v48 = vsel %vm772_vm12, 1.0, %v17526_v17  ;;  %v17680_v50 = vpack.c.bf16 %v577_v44, %v576_v43  ;;  %v16807_v43 = vld [vmem:[%s20934_s1 + $0x38] sm:$0xff]   ;;  %v16808_v44 = vld [vmem:[%s20934_s1 + $0x80] sm:$0xff]  }
  0x14   :  { %v778_v49 = vsel %vm774_vm13, 1.0, %v17526_v17  ;;  %v17686_v52 = vpack.c.bf16 %v776_v48, %v775_v45  ;;  %14998 = vmatpush3.bf16.msra.mxu0 %v16796_v51  ;;  %v16809_v45 = vld [vmem:[%s20934_s1 + $0x88] sm:$0xff]   ;;  %v16811_v48 = vld [vmem:[%s20934_s1 + $0x98] sm:$0xff]  }
  0x15   :  { %14986 = vmatmul.mubr.msk.bf16.vlgmr.msra.gmra.mrb[4].mxu1 %vm68_vm0, %v17646_v40  ;;  %v17698_v54 = vpack.c.bf16 %v778_v49, %v777_v46  ;;  %14999 = vmatprep.subr.bf16.mxu0 %v16797_v62  ;;  %v16810_v46 = vld [vmem:[%s20934_s1 + $0x90] sm:$0xff]   ;;  %v12256_v49 = vld [vmem:[%s20935_s2 + $0x3] ss:$0 sm:$0xff] }
  0x16   :  { %15050 = vmatpush3.bf16.msra.mxu1 %v17559_v0  ;;  %15053 = vmatprep.mubr.msk.bf16.mxu1 %vm68_vm0, %v17653_v41 }
  0x17   :  { %15051 = vmatprep.subr.bf16.mxu1 %v17564_v2 }
  0x18   :  { %15000 = vmatpush3.bf16.msra.mxu0 %v16797_v62 }
  0x19   :  { %15001 = vmatprep.subr.bf16.mxu0 %v16798_v63 }
  0x1a   :  { %15052 = vmatpush3.bf16.msra.mxu1 %v17564_v2 }
  0x1b   :  { %15077 = vmatprep.subr.bf16.mxu1 %v17559_v0 }
  0x1c   :  { %15002 = vmatpush3.bf16.msra.mxu0 %v16798_v63  ;;  %v12266_v63 = vld [vmem:[%s20935_s2 + $0x5] ss:$0 sm:$0xff] }
  0x1d   :  { %15054 = vmatmul.mubr.msk.bf16.vlgmr.msra.gmra.mrb[8].mxu1 %vm68_vm0, %v17680_v50 }
  0x1e   :  { %15078 = vmatpush3.bf16.msra.mxu1 %v17559_v0  ;;  %15081 = vmatprep.mubr.msk.bf16.mxu1 %vm68_vm0, %v17686_v52 }
  0x1f   :  { %15079 = vmatprep.subr.bf16.mxu1 %v17564_v2 }
  0x22   :  { %15080 = vmatpush3.bf16.msra.mxu1 %v17564_v2 }
  0x23   :  { %15105 = vmatprep.subr.bf16.mxu1 %v16784_v53 }
  0x25   :  { %15082 = vmatmul.mubr.msk.bf16.vlgmr.msra.gmra.mrb[12].mxu1 %vm68_vm0, %v17698_v54 }
  0x26   :  { %15106 = vmatpush3.bf16.msra.mxu1 %v16784_v53  ;;  %15121 = vmatprep.mubr.bf16.mxu1 %v17559_v0  ;;  %v16799_v0 = vld [vmem:[%s20934_s1 + $0x78] sm:$0xff]   ;;  %v12265_v53 = vld [vmem:[%s20935_s2 + $0x4] ss:$0 sm:$0xff] }
  0x27   :  { %15107 = vmatprep.subr.bf16.mxu1 %v16785_v55  ;;  %15003 = vmatprep.subr.bf16.mxu0 %v16799_v0 }
  0x28   :  { %15004 = vmatpush3.bf16.msra.mxu0 %v16799_v0 }
  0x29   :  { %15009 = vmatprep.subr.bf16.mxu0 %v16800_v1 }
  0x2a   :  { %15108 = vmatpush3.bf16.msra.mxu1 %v16785_v55 }
  0x2b   :  { %15109 = vmatprep.subr.bf16.mxu1 %v16786_v56 }
  0x2e   :  { %15110 = vmatpush3.bf16.msra.mxu1 %v16786_v56 }
  0x2f   :  { %15111 = vmatprep.subr.bf16.mxu1 %v16787_v57 }
  0x32   :  { %15112 = vmatpush3.bf16.msra.mxu1 %v16787_v57  ;;  %v16812_v57 = vld [vmem:[%s20934_s1 + $0xa0] sm:$0xff]  }
  0x33   :  { %15113 = vmatprep.subr.bf16.mxu1 %v16788_v58 }
  0x36   :  { %15114 = vmatpush3.bf16.msra.mxu1 %v16788_v58 }
  0x37   :  { %15115 = vmatprep.subr.bf16.mxu1 %v16789_v59 }
  0x3a   :  { %15116 = vmatpush3.bf16.msra.mxu1 %v16789_v59 }
  0x3b   :  { %15117 = vmatprep.subr.bf16.mxu1 %v16790_v60 }
  0x3e   :  { %15118 = vmatpush3.bf16.msra.mxu1 %v16790_v60 }
  0x3f   :  { %15119 = vmatprep.subr.bf16.mxu1 %v16791_v61 }
  0x42   :  { %15120 = vmatpush3.bf16.msra.mxu1 %v16791_v61 }
  0x45   :  { %15122 = vmatmul.mubr.bf16.vlgmr.msra.gmra.mrb[16].mxu1 %v17564_v2 }
  0x46   :  { %15129 = vmatprep.mubr.msk.bf16.mxu1 %vm68_vm0, %v17606_v20 }
  0xe0   :  { %v14979_v2 = vpop.f32.mrb[0].mxu1 }
  0xe1   :  { %v109_v6 = vpop.f32.mrb[1].mxu1 }
  0xe2   :  { %v14980_v9 = vpop.f32.mrb[2].mxu1 }
  0xe3   :  { %v125_v10 = vpack.c.bf16 %v14980_v9, %v14979_v2  ;;  %v112_v11 = vpop.f32.mrb[3].mxu1  ;;  %v16813_v9 = vld [vmem:[%s20934_s1 + $0xa8] sm:$0xff]  }
  0xe4   :  { %v124_v12 = vpack.c.bf16 %v112_v11, %v109_v6 }
  0xe8   :  { %v14987_v13 = vpop.f32.mrb[4].mxu1 }
  0xe9   :  { %v208_v14 = vpop.f32.mrb[5].mxu1 }
  0xea   :  { %v14988_v15 = vpop.f32.mrb[6].mxu1 }
  0xeb   :  { %v224_v16 = vpack.c.bf16 %v14988_v15, %v14987_v13  ;;  %v211_v18 = vpop.f32.mrb[7].mxu1  ;;  %v16814_v13 = vld [vmem:[%s20934_s1 + $0xb0] sm:$0xff]  }
  0xec   :  { %v223_v21 = vpack.c.bf16 %v211_v18, %v208_v14 }
  0xee   :  { %15005 = vmatprep.mubr.bf16.mxu0 %v223_v21 }
  0xef   :  { %15006 = vmatmul.mubr.bf16.vlgmr.msra.gmra.mrb[0].mxu0 %v224_v16 }
  0xf0   :  { %15010 = vmatpush3.bf16.msra.mxu0 %v16800_v1  ;;  %15025 = vmatprep.mubr.bf16.mxu0 %v124_v12  ;;  %v17743_v22 = vpop.f32.mrb[8].mxu1 }
  0xf1   :  { %v17745_v24 = vpop.f32.mrb[9].mxu1  ;;  %15011 = vmatprep.subr.bf16.mxu0 %v16801_v19 }
  0xf2   :  { %v17750_v26 = vpop.f32.mrb[10].mxu1 }
  0xf3   :  { %v636_v27 = vpack.c.bf16 %v17750_v26, %v17743_v22  ;;  %v17754_v28 = vpop.f32.mrb[11].mxu1  ;;  %v16828_v22 = vld [vmem:[%s20934_s1 + $0x120] sm:$0xff]   ;;  %v16829_v26 = vld [vmem:[%s20934_s1 + $0x128] sm:$0xff]  }
  0xf4   :  { %15012 = vmatpush3.bf16.msra.mxu0 %v16801_v19  ;;  %v635_v30 = vpack.c.bf16 %v17754_v28, %v17745_v24  ;;  %v16820_v24 = vld [vmem:[%s20934_s1 + $0xe0] sm:$0xff]   ;;  %v16835_v28 = vld [vmem:[%s20934_s1 + $0x1d8] sm:$0xff]  }
  0xf5   :  { %15013 = vmatprep.subr.bf16.mxu0 %v16802_v25 }
  0xf8   :  { %15014 = vmatpush3.bf16.msra.mxu0 %v16802_v25  ;;  %v17761_v32 = vpop.f32.mrb[12].mxu1  ;;  %v16815_v25 = vld [vmem:[%s20934_s1 + $0xb8] sm:$0xff]  }
  0xf9   :  { %v17763_v33 = vpop.f32.mrb[13].mxu1  ;;  %15015 = vmatprep.subr.bf16.mxu0 %v16803_v29 }
  0xfa   :  { %v17768_v35 = vpop.f32.mrb[14].mxu1 }
  0xfb   :  { %v837_v36 = vpack.c.bf16 %v17768_v35, %v17761_v32  ;;  %v17772_v37 = vpop.f32.mrb[15].mxu1  ;;  %v16839_v32 = vld [vmem:[%s20934_s1 + $0x1f8] sm:$0xff]   ;;  %v16840_v35 = vld [vmem:[%s20934_s1 + $0x180] sm:$0xff]  }
  0xfc   :  { %15016 = vmatpush3.bf16.msra.mxu0 %v16803_v29  ;;  %v836_v39 = vpack.c.bf16 %v17772_v37, %v17763_v33  ;;  %v16831_v33 = vld [vmem:[%s20934_s1 + $0x138] sm:$0xff]  }
  0xfd   :  { %15017 = vmatprep.subr.bf16.mxu0 %v16804_v34 }
 0x100   :  { %15018 = vmatpush3.bf16.msra.mxu0 %v16804_v34  ;;  %v16816_v34 = vld [vmem:[%s20934_s1 + $0xc0] sm:$0xff]  }
 0x101   :  { %15019 = vmatprep.subr.bf16.mxu0 %v16805_v38 }
 0x104   :  { %15020 = vmatpush3.bf16.msra.mxu0 %v16805_v38  ;;  %v16817_v38 = vld [vmem:[%s20934_s1 + $0xc8] sm:$0xff]  }
 0x105   :  { %15021 = vmatprep.subr.bf16.mxu0 %v16806_v42 }
 0x108   :  { %15022 = vmatpush3.bf16.msra.mxu0 %v16806_v42  ;;  %v16832_v42 = vld [vmem:[%s20934_s1 + $0x1c0] sm:$0xff]  }
 0x109   :  { %15023 = vmatprep.subr.bf16.mxu0 %v16807_v43 }
 0x10c   :  { %15024 = vmatpush3.bf16.msra.mxu0 %v16807_v43  ;;  %v17477_v43 = vld [vmem:[%s20933_s0 + $0x8] sm:$0xff]  }
 0x10d   :  { %15029 = vmatprep.subr.bf16.mxu0 %v16808_v44 }
 0x10f   :  { %15026 = vmatmul.mubr.bf16.vlgmr.msra.gmra.mrb[0].mxu0 %v125_v10 }
 0x110   :  { %15030 = vmatpush3.bf16.msra.mxu0 %v16808_v44  ;;  %15045 = vmatprep.mubr.bf16.mxu0 %v17476_v47  ;;  %v16818_v44 = vld [vmem:[%s20934_s1 + $0xd0] sm:$0xff]  }
 0x111   :  { %15031 = vmatprep.subr.bf16.mxu0 %v16809_v45  ;;  %v16822_v47 = vld [vmem:[%s20934_s1 + $0xf0] sm:$0xff]  }
 0x114   :  { %15032 = vmatpush3.bf16.msra.mxu0 %v16809_v45  ;;  %v16833_v45 = vld [vmem:[%s20934_s1 + $0x1c8] sm:$0xff]  }
 0x115   :  { %15033 = vmatprep.subr.bf16.mxu0 %v16810_v46 }
 0x118   :  { %15034 = vmatpush3.bf16.msra.mxu0 %v16810_v46  ;;  %v15123_v51 = vpop.f32.mrb[16].mxu1  ;;  %v16819_v46 = vld [vmem:[%s20934_s1 + $0xd8] sm:$0xff]  }
 0x119   :  { %v1100_v55 = vadd.f32 %v15123_v51, %v12256_v49  ;;  %v1091_v56 = vpop.f32.mrb[17].mxu1  ;;  %15035 = vmatprep.subr.bf16.mxu0 %v16811_v48  ;;  %v16825_v51 = vld [vmem:[%s20934_s1 + $0x108] sm:$0xff]  }
 0x11a   :  { %v1092_v58 = vadd.f32 %v12256_v49, %v1091_v56  ;;  %v15124_v59 = vpop.f32.mrb[18].mxu1 }
 0x11b   :  { %v1108_v60 = vmax.f32 %v1100_v55, 0.0  ;;  %v1103_v61 = vadd.f32 %v15124_v59, %v12256_v49  ;;  %v1094_v62 = vpop.f32.mrb[19].mxu1  ;;  %v16827_v55 = vld [vmem:[%s20934_s1 + $0x118] sm:$0xff]  }
 0x11c   :  { %v1106_v0 = vmax.f32 %v1092_v58, 0.0  ;;  %v1095_v1 = vadd.f32 %v12256_v49, %v1094_v62  ;;  %15036 = vmatpush3.bf16.msra.mxu0 %v16811_v48  ;;  %v16823_v48 = vld [vmem:[%s20934_s1 + $0xf8] sm:$0xff]   ;;  %v16824_v49 = vld [vmem:[%s20934_s1 + $0x100] sm:$0xff]  }
 0x11d   :  { %v1117_v2 = vmul.f32 %v12265_v53, %v1108_v60  ;;  %v1109_v6 = vmax.f32 %v1103_v61, 0.0  ;;  %15037 = vmatprep.subr.bf16.mxu0 %v16812_v57 }
 0x11e   :  { %v1115_v10 = vmul.f32 %v12265_v53, %v1106_v0  ;;  %v1107_v11 = vmax.f32 %v1095_v1, 0.0 }
 0x11f   :  { %v1118_v12 = vmul.f32 %v12265_v53, %v1109_v6  ;;  %v1126_v15 = vadd.f32 %v12266_v63, %v1117_v2 }
 0x120   :  { %v1116_v14 = vmul.f32 %v12265_v53, %v1107_v11  ;;  %15038 = vmatpush3.bf16.msra.mxu0 %v16812_v57  ;;  %v1124_v18 = vadd.f32 %v12266_v63, %v1115_v10  ;;  %v16826_v53 = vld [vmem:[%s20934_s1 + $0x110] sm:$0xff]  }
 0x121   :  { %v1127_v16 = vadd.f32 %v12266_v63, %v1118_v12  ;;  %15039 = vmatprep.subr.bf16.mxu0 %v16813_v9 }
 0x122   :  { %v1125_v19 = vadd.f32 %v12266_v63, %v1116_v14 }
 0x123   :  { %v17818_v21 = vpack.c.bf16 %v1127_v16, %v1126_v15 }
 0x124   :  { %v17823_v29 = vpack.c.bf16 %v1125_v19, %v1124_v18  ;;  %15040 = vmatpush3.bf16.msra.mxu0 %v16813_v9 }
 0x125   :  { %15041 = vmatprep.subr.bf16.mxu0 %v16814_v13 }
 0x126   :  { %15125 = vmatprep.subr.bf16.mxu1 %v17823_v29 }
 0x127   :  { %15126 = vmatpush3.bf16.msra.mxu1 %v17823_v29 }
 0x128   :  { %15042 = vmatpush3.bf16.msra.mxu0 %v16814_v13  ;;  %15127 = vmatprep.subr.bf16.mxu1 %v17818_v21 }
 0x129   :  { %15043 = vmatprep.subr.bf16.mxu0 %v16815_v25 }
 0x12b   :  { %15128 = vmatpush3.bf16.msra.mxu1 %v17818_v21 }
 0x12c   :  { %15044 = vmatpush3.bf16.msra.mxu0 %v16815_v25  ;;  %15133 = vmatprep.subr.bf16.mxu1 %v17823_v29 }
 0x12d   :  { %15057 = vmatprep.subr.bf16.mxu0 %v16816_v34 }
 0x12e   :  { %15130 = vmatmul.mubr.msk.bf16.vlgmr.msra.gmra.mrb[20].mxu1 %vm68_vm0, %v17610_v23 }
 0x12f   :  { %15046 = vmatmul.mubr.bf16.vlgmr.msra.gmra.mrb[0].mxu0 %v17477_v43  ;;  %15134 = vmatpush3.bf16.msra.mxu1 %v17823_v29 }
 0x130   :  { %15058 = vmatpush3.bf16.msra.mxu0 %v16816_v34  ;;  %15073 = vmatprep.mubr.bf16.mxu0 %v635_v30  ;;  %v16836_v30 = vld [vmem:[%s20934_s1 + $0x1e0] sm:$0xff]  }
 0x131   :  { %15135 = vmatprep.subr.bf16.mxu1 %v17818_v21  ;;  %15059 = vmatprep.subr.bf16.mxu0 %v16817_v38 }
 0x132   :  { %15137 = vmatprep.mubr.msk.bf16.mxu1 %vm68_vm0, %v17624_v31  ;;  %v16834_v31 = vld [vmem:[%s20934_s1 + $0x1d0] sm:$0xff]  }
 0x133   :  { %15136 = vmatpush3.bf16.msra.mxu1 %v17818_v21 }
 0x134   :  { %15060 = vmatpush3.bf16.msra.mxu0 %v16817_v38  ;;  %15141 = vmatprep.subr.bf16.mxu1 %v16832_v42 }
 0x135   :  { %15061 = vmatprep.subr.bf16.mxu0 %v16818_v44 }
 0x136   :  { %15138 = vmatmul.mubr.msk.bf16.vlgmr.msra.gmra.mrb[24].mxu1 %vm68_vm0, %v17646_v40  ;;  %v16821_v40 = vld [vmem:[%s20934_s1 + $0xe8] sm:$0xff]  }
 0x137   :  { %15142 = vmatpush3.bf16.msra.mxu1 %v16832_v42 }
 0x138   :  { %15062 = vmatpush3.bf16.msra.mxu0 %v16818_v44  ;;  %15143 = vmatprep.subr.bf16.mxu1 %v16833_v45 }
 0x139   :  { %15063 = vmatprep.subr.bf16.mxu0 %v16819_v46 }
 0x13b   :  { %15144 = vmatpush3.bf16.msra.mxu1 %v16833_v45 }
 0x13c   :  { %15064 = vmatpush3.bf16.msra.mxu0 %v16819_v46  ;;  %15145 = vmatprep.subr.bf16.mxu1 %v16834_v31 }
 0x13d   :  { %15065 = vmatprep.subr.bf16.mxu0 %v16820_v24 }
 0x13f   :  { %15146 = vmatpush3.bf16.msra.mxu1 %v16834_v31 }
 0x140   :  { %15066 = vmatpush3.bf16.msra.mxu0 %v16820_v24  ;;  %15147 = vmatprep.subr.bf16.mxu1 %v16835_v28 }
 0x141   :  { %15067 = vmatprep.subr.bf16.mxu0 %v16821_v40 }
 0x143   :  { %15148 = vmatpush3.bf16.msra.mxu1 %v16835_v28 }
 0x144   :  { %15068 = vmatpush3.bf16.msra.mxu0 %v16821_v40  ;;  %15149 = vmatprep.subr.bf16.mxu1 %v16836_v30 }
 0x145   :  { %15069 = vmatprep.subr.bf16.mxu0 %v16822_v47 }
 0x147   :  { %15150 = vmatpush3.bf16.msra.mxu1 %v16836_v30 }
 0x148   :  { %15070 = vmatpush3.bf16.msra.mxu0 %v16822_v47 }
 0x149   :  { %15071 = vmatprep.subr.bf16.mxu0 %v16823_v48 }
 0x14c   :  { %15072 = vmatpush3.bf16.msra.mxu0 %v16823_v48 }
 0x14d   :  { %15085 = vmatprep.subr.bf16.mxu0 %v16824_v49 }
 0x14f   :  { %15074 = vmatmul.mubr.bf16.vlgmr.msra.gmra.mrb[0].mxu0 %v636_v27  ;;  %v16830_v27 = vld [vmem:[%s20934_s1 + $0x130] sm:$0xff]  }
 0x150   :  { %15086 = vmatpush3.bf16.msra.mxu0 %v16824_v49  ;;  %15101 = vmatprep.mubr.bf16.mxu0 %v836_v39 }
 0x151   :  { %15087 = vmatprep.subr.bf16.mxu0 %v16825_v51 }
 0x154   :  { %15088 = vmatpush3.bf16.msra.mxu0 %v16825_v51 }
 0x155   :  { %15089 = vmatprep.subr.bf16.mxu0 %v16826_v53 }
 0x158   :  { %15090 = vmatpush3.bf16.msra.mxu0 %v16826_v53 }
 0x159   :  { %15091 = vmatprep.subr.bf16.mxu0 %v16827_v55 }
 0x15c   :  { %15092 = vmatpush3.bf16.msra.mxu0 %v16827_v55 }
 0x15d   :  { %15093 = vmatprep.subr.bf16.mxu0 %v16828_v22 }
 0x160   :  { %15094 = vmatpush3.bf16.msra.mxu0 %v16828_v22 }
 0x161   :  { %15095 = vmatprep.subr.bf16.mxu0 %v16829_v26 }
 0x164   :  { %15096 = vmatpush3.bf16.msra.mxu0 %v16829_v26 }
 0x165   :  { %15097 = vmatprep.subr.bf16.mxu0 %v16830_v27 }
 0x168   :  { %15098 = vmatpush3.bf16.msra.mxu0 %v16830_v27 }
 0x169   :  { %15099 = vmatprep.subr.bf16.mxu0 %v16831_v33 }
 0x16c   :  { %15100 = vmatpush3.bf16.msra.mxu0 %v16831_v33 }
 0x16d   :  { %15201 = vmatprep.subr.bf16.mxu0 %v17823_v29 }
 0x16f   :  { %15102 = vmatmul.mubr.bf16.vlgmr.msra.gmra.mrb[0].mxu0 %v837_v36 }
 0x170   :  { %15202 = vmatpush3.bf16.msra.mxu0 %v17823_v29  ;;  %15205 = vmatprep.mubr.msk.bf16.mxu0 %vm68_vm0, %v17653_v41  ;;  %v16837_v41 = vld [vmem:[%s20934_s1 + $0x1e8] sm:$0xff]  }
 0x171   :  { %15203 = vmatprep.subr.bf16.mxu0 %v17818_v21  ;;  %15151 = vmatprep.subr.bf16.mxu1 %v16837_v41 }
 0x172   :  { %15152 = vmatpush3.bf16.msra.mxu1 %v16837_v41 }
 0x174   :  { %15204 = vmatpush3.bf16.msra.mxu0 %v17818_v21 }
 0x175   :  { %15229 = vmatprep.subr.bf16.mxu0 %v17823_v29 }
 0x177   :  { %15206 = vmatmul.mubr.msk.bf16.vlgmr.msra.gmra.mrb[4].mxu0 %vm68_vm0, %v17680_v50  ;;  %v16838_v50 = vld [vmem:[%s20934_s1 + $0x1f0] sm:$0xff]  }
 0x178   :  { %15230 = vmatpush3.bf16.msra.mxu0 %v17823_v29  ;;  %15233 = vmatprep.mubr.msk.bf16.mxu0 %vm68_vm0, %v17686_v52 }
 0x179   :  { %15231 = vmatprep.subr.bf16.mxu0 %v17818_v21  ;;  %15153 = vmatprep.subr.bf16.mxu1 %v16838_v50 }
 0x17a   :  { %15154 = vmatpush3.bf16.msra.mxu1 %v16838_v50 }
 0x17b   :  { %15155 = vmatprep.subr.bf16.mxu1 %v16839_v32 }
 0x17c   :  { %15232 = vmatpush3.bf16.msra.mxu0 %v17818_v21 }
 0x17e   :  { %15156 = vmatpush3.bf16.msra.mxu1 %v16839_v32 }
 0x17f   :  { %15234 = vmatmul.mubr.msk.bf16.vlgmr.msra.gmra.mrb[8].mxu0 %vm68_vm0, %v17698_v54  ;;  %15161 = vmatprep.subr.bf16.mxu1 %v16840_v35 }
 0x180   :  { %11 = vsyncpa [#allocation5], 0  ;;  %v16841_v1 = vld [vmem:[%s20934_s1 + $0x188] sm:$0xff]   ;;  %v16872_v2 = vld [vmem:[%s20934_s1 + $0x2c0] sm:$0xff]   ;;  %vm2726_vm14 = vcmp.lt.s32.totalorder %v17567_v3, 16  ;;  %vm17527_vm15 = vmmov 0  }
 0x181   :  { %v16873_v6 = vld [vmem:[%s20934_s1 + $0x2c8] sm:$0xff]   ;;  %v16842_v9 = vld [vmem:[%s20934_s1 + $0x190] sm:$0xff]   ;;  %15257 = vmatprep.subr.bf16.mxu0 %v16872_v2  ;;  %v16843_v11 = vld [vmem:[%s20934_s1 + $0x198] sm:$0xff]   ;;  %vm2925_vm1 = vcmask 1041409   ;;  %vm3826_vm2 = vcmp.lt.s32.totalorder %v17567_v3, 4  ;;  %s17529_s15 = smov [#allocation4]  }
 0x182   :  { %15258 = vmatpush3.bf16.msra.mxu0 %v16872_v2  ;;  %v16874_v10 = vld [vmem:[%s20934_s1 + $0x2d0] sm:$0xff]   ;;  %v16875_v12 = vld [vmem:[%s20934_s1 + $0x2d8] sm:$0xff]   ;;  %v16844_v13 = vld [vmem:[%s20934_s1 + $0x1a0] sm:$0xff]   ;;  %s12111_s16 = sshll.u32 %s17529_s15, 4  ;;  %s12112_s16 = int_to_ptr.vmem [resolvable:$true] %s12111_s16 }
 0x183   :  { %15259 = vmatprep.subr.bf16.mxu0 %v16873_v6  ;;  %v16876_v14 = vld [vmem:[%s20934_s1 + $0x2e0] sm:$0xff]   ;;  %v16845_v15 = vld [vmem:[%s20934_s1 + $0x1a8] sm:$0xff]   ;;  %v16846_v16 = vld [vmem:[%s20934_s1 + $0x1b0] sm:$0xff]   ;;  %s17478_s17 = scalar_lea.vmem %s12112_s16, 32  ;;  %p17483_p1 = scmp.lt.s32.totalorder %s12112_s16, %s12112_s16 }
 0x184   :  { %v16847_v18 = vld [vmem:[%s20934_s1 + $0x1b8] sm:$0xff]   ;;  %v16848_v19 = vld [vmem:[%s20934_s1 + $0x200] sm:$0xff]   ;;  %v16849_v25 = vld [vmem:[%s20934_s1 + $0x208] sm:$0xff]   ;;  %p17479_p0 = scmp.ne.s32.totalorder %s12112_s16, %s17478_s17  ;;  %p17484_p2 = scmp.lt.s32.totalorder %s17478_s17, %s17478_s17 }
 0x185   :  { %v16850_v34 = vld [vmem:[%s20934_s1 + $0x210] sm:$0xff]   ;;  %v16851_v38 = vld [vmem:[%s20934_s1 + $0x218] sm:$0xff]   ;;  %v16852_v42 = vld [vmem:[%s20934_s1 + $0x220] sm:$0xff]  }
 0x186   :  { %15260 = vmatpush3.bf16.msra.mxu0 %v16873_v6  ;;  %v16854_v44 = vld [vmem:[%s20934_s1 + $0x230] sm:$0xff]   ;;  %v16855_v24 = vld [vmem:[%s20934_s1 + $0x238] sm:$0xff]   ;;  %v16856_v28 = vld [vmem:[%s20934_s1 + $0x240] sm:$0xff]   ;;  %p17485_p3 = por %p17484_p2, %p17483_p1 }
 0x187   :  { %15261 = vmatprep.subr.bf16.mxu0 %v16874_v10  ;;  %v16857_v51 = vld [vmem:[%s20934_s1 + $0x248] sm:$0xff]   ;;  %v16858_v55 = vld [vmem:[%s20934_s1 + $0x250] sm:$0xff]   ;;  %v16859_v50 = vld [vmem:[%s20934_s1 + $0x258] sm:$0xff]  }
 0x188   :  { %v16880_v2 = vld [vmem:[%s20934_s1 + $0x300] sm:$0xff]   ;;  %p17486_p4 = pnand %p17485_p3, %p17479_p0 }
 0x189   :  { %v12395_v6 = vld [vmem:[%s20935_s2 + $0x6] ss:$0 sm:$0xff] }
 0x18a   :  { %15262 = vmatpush3.bf16.msra.mxu0 %v16874_v10 }
 0x18b   :  { %15263 = vmatprep.subr.bf16.mxu0 %v16875_v12 }
 0x18e   :  { %15264 = vmatpush3.bf16.msra.mxu0 %v16875_v12  ;;  %v12396_v12 = vld [vmem:[%s20935_s2 + $0x7] ss:$0 sm:$0xff] }
 0x18f   :  { %15265 = vmatprep.subr.bf16.mxu0 %v16876_v14 }
 0x192   :  { %15266 = vmatpush3.bf16.msra.mxu0 %v16876_v14 }
 0x201   :  { %v15131_v36 = vpop.f32.mrb[20].mxu1 }
 0x202   :  { %v1164_v37 = vpop.f32.mrb[21].mxu1 }
 0x203   :  { %v15132_v39 = vpop.f32.mrb[22].mxu1 }
 0x204   :  { %v1180_v56 = vpack.c.bf16 %v15132_v39, %v15131_v36  ;;  %v1167_v57 = vpop.f32.mrb[23].mxu1  ;;  %v16862_v36 = vld [vmem:[%s20934_s1 + $0x270] sm:$0xff]   ;;  %v16864_v39 = vld [vmem:[%s20934_s1 + $0x280] sm:$0xff]  }
 0x205   :  { %v1179_v58 = vpack.c.bf16 %v1167_v57, %v1164_v37  ;;  %v16863_v37 = vld [vmem:[%s20934_s1 + $0x278] sm:$0xff]   ;;  %v16866_v57 = vld [vmem:[%s20934_s1 + $0x290] sm:$0xff]  }
 0x209   :  { %v15139_v59 = vpop.f32.mrb[24].mxu1 }
 0x20a   :  { %v1232_v60 = vpop.f32.mrb[25].mxu1 }
 0x20b   :  { %v15140_v61 = vpop.f32.mrb[26].mxu1 }
 0x20c   :  { %v1248_v62 = vpack.c.bf16 %v15140_v61, %v15139_v59  ;;  %v1235_v63 = vpop.f32.mrb[27].mxu1  ;;  %v16868_v59 = vld [vmem:[%s20934_s1 + $0x2a0] sm:$0xff]   ;;  %v16870_v61 = vld [vmem:[%s20934_s1 + $0x2b0] sm:$0xff]  }
 0x20d   :  { %v1247_v0 = vpack.c.bf16 %v1235_v63, %v1232_v60  ;;  %v16869_v60 = vld [vmem:[%s20934_s1 + $0x2a8] sm:$0xff]  }
 0x20e   :  { %v16877_v63 = vld [vmem:[%s20934_s1 + $0x2e8] sm:$0xff]  }
 0x20f   :  { %15157 = vmatprep.mubr.bf16.mxu1 %v1247_v0  ;;  %15267 = vmatprep.subr.bf16.mxu0 %v16877_v63  ;;  %v16878_v0 = vld [vmem:[%s20934_s1 + $0x2f0] sm:$0xff]  }
 0x210   :  { %15158 = vmatmul.mubr.bf16.vlgmr.msra.gmra.mrb[28].mxu1 %v1248_v62  ;;  %v16871_v62 = vld [vmem:[%s20934_s1 + $0x2b8] sm:$0xff]   ;;  %15268 = vmatpush3.bf16.msra.mxu0 %v16877_v63 }
 0x211   :  { %15162 = vmatpush3.bf16.msra.mxu1 %v16840_v35  ;;  %15177 = vmatprep.mubr.bf16.mxu1 %v1179_v58  ;;  %v16861_v35 = vld [vmem:[%s20934_s1 + $0x268] sm:$0xff]   ;;  %v16867_v58 = vld [vmem:[%s20934_s1 + $0x298] sm:$0xff]  }
 0x212   :  { %15163 = vmatprep.subr.bf16.mxu1 %v16841_v1  ;;  %15269 = vmatprep.subr.bf16.mxu0 %v16878_v0 }
 0x214   :  { %15270 = vmatpush3.bf16.msra.mxu0 %v16878_v0 }
 0x215   :  { %15164 = vmatpush3.bf16.msra.mxu1 %v16841_v1  ;;  %v16879_v1 = vld [vmem:[%s20934_s1 + $0x2f8] sm:$0xff]  }
 0x216   :  { %15165 = vmatprep.subr.bf16.mxu1 %v16842_v9  ;;  %15271 = vmatprep.subr.bf16.mxu0 %v16879_v1 }
 0x218   :  { %15272 = vmatpush3.bf16.msra.mxu0 %v16879_v1 }
 0x219   :  { %15166 = vmatpush3.bf16.msra.mxu1 %v16842_v9  ;;  %15277 = vmatprep.subr.bf16.mxu0 %v16880_v2 }
 0x21a   :  { %15167 = vmatprep.subr.bf16.mxu1 %v16843_v11 }
 0x21d   :  { %15168 = vmatpush3.bf16.msra.mxu1 %v16843_v11 }
 0x21e   :  { %15169 = vmatprep.subr.bf16.mxu1 %v16844_v13 }
 0x221   :  { %15170 = vmatpush3.bf16.msra.mxu1 %v16844_v13 }
 0x222   :  { %15171 = vmatprep.subr.bf16.mxu1 %v16845_v15 }
 0x225   :  { %15172 = vmatpush3.bf16.msra.mxu1 %v16845_v15 }
 0x226   :  { %15173 = vmatprep.subr.bf16.mxu1 %v16846_v16 }
 0x229   :  { %15174 = vmatpush3.bf16.msra.mxu1 %v16846_v16 }
 0x22a   :  { %15175 = vmatprep.subr.bf16.mxu1 %v16847_v18 }
 0x22d   :  { %15176 = vmatpush3.bf16.msra.mxu1 %v16847_v18 }
 0x22e   :  { %15181 = vmatprep.subr.bf16.mxu1 %v16848_v19 }
 0x230   :  { %15178 = vmatmul.mubr.bf16.vlgmr.msra.gmra.mrb[28].mxu1 %v1180_v56  ;;  %v16865_v56 = vld [vmem:[%s20934_s1 + $0x288] sm:$0xff]  }
 0x231   :  { %15182 = vmatpush3.bf16.msra.mxu1 %v16848_v19  ;;  %15197 = vmatprep.mubr.bf16.mxu1 %v17823_v29  ;;  %v16853_v29 = vld [vmem:[%s20934_s1 + $0x228] sm:$0xff]  }
 0x232   :  { %15183 = vmatprep.subr.bf16.mxu1 %v16849_v25 }
 0x235   :  { %15184 = vmatpush3.bf16.msra.mxu1 %v16849_v25 }
 0x236   :  { %15185 = vmatprep.subr.bf16.mxu1 %v16850_v34 }
 0x239   :  { %15186 = vmatpush3.bf16.msra.mxu1 %v16850_v34 }
 0x23a   :  { %15187 = vmatprep.subr.bf16.mxu1 %v16851_v38 }
 0x23d   :  { %15188 = vmatpush3.bf16.msra.mxu1 %v16851_v38 }
 0x23e   :  { %15189 = vmatprep.subr.bf16.mxu1 %v16852_v42 }
 0x241   :  { %15190 = vmatpush3.bf16.msra.mxu1 %v16852_v42  ;;  %v12397_v42 = vld [vmem:[%s20935_s2 + $0x8] ss:$0 sm:$0xff] }
 0x242   :  { %v18000_v43 = vpop.f32.mrb[0].mxu0  ;;  %15191 = vmatprep.subr.bf16.mxu1 %v16853_v29 }
 0x243   :  { %v18005_v45 = vpop.f32.mrb[1].mxu0 }
 0x244   :  { %v18007_v46 = vpop.f32.mrb[2].mxu0 }
 0x245   :  { %15192 = vmatpush3.bf16.msra.mxu1 %v16853_v29  ;;  %v18009_v31 = vpop.f32.mrb[3].mxu0 }
 0x246   :  { %15193 = vmatprep.subr.bf16.mxu1 %v16854_v44 }
 0x249   :  { %15194 = vmatpush3.bf16.msra.mxu1 %v16854_v44 }
 0x24a   :  { %15195 = vmatprep.subr.bf16.mxu1 %v16855_v24  ;;  %v15207_v40 = vpop.f32.mrb[4].mxu0 }
 0x24b   :  { %v1612_v30 = vpop.f32.mrb[5].mxu0 }
 0x24c   :  { %v15208_v47 = vpop.f32.mrb[6].mxu0 }
 0x24d   :  { %15196 = vmatpush3.bf16.msra.mxu1 %v16855_v24  ;;  %v1628_v48 = vpack.c.bf16 %v15208_v47, %v15207_v40  ;;  %v1615_v49 = vpop.f32.mrb[7].mxu0 }
 0x24e   :  { %15209 = vmatprep.subr.bf16.mxu1 %v16856_v28  ;;  %v1627_v53 = vpack.c.bf16 %v1615_v49, %v1612_v30 }
 0x250   :  { %15198 = vmatmul.mubr.bf16.vlgmr.msra.gmra.mrb[28].mxu1 %v17818_v21  ;;  %v16860_v21 = vld [vmem:[%s20934_s1 + $0x260] sm:$0xff]  }
 0x251   :  { %15210 = vmatpush3.bf16.msra.mxu1 %v16856_v28  ;;  %15225 = vmatprep.mubr.bf16.mxu1 %v1627_v53  ;;  %v16881_v53 = vld [vmem:[%s20934_s1 + $0x308] sm:$0xff]  }
 0x252   :  { %15211 = vmatprep.subr.bf16.mxu1 %v16857_v51  ;;  %v15235_v22 = vpop.f32.mrb[8].mxu0 }
 0x253   :  { %v1781_v26 = vpop.f32.mrb[9].mxu0 }
 0x254   :  { %v15236_v27 = vpop.f32.mrb[10].mxu0 }
 0x255   :  { %15212 = vmatpush3.bf16.msra.mxu1 %v16857_v51  ;;  %v1797_v33 = vpack.c.bf16 %v15236_v27, %v15235_v22  ;;  %v1784_v41 = vpop.f32.mrb[11].mxu0  ;;  %v16883_v22 = vld [vmem:[%s20934_s1 + $0x318] sm:$0xff]   ;;  %v16885_v27 = vld [vmem:[%s20934_s1 + $0x328] sm:$0xff]  }
 0x256   :  { %15213 = vmatprep.subr.bf16.mxu1 %v16858_v55  ;;  %v1796_v32 = vpack.c.bf16 %v1784_v41, %v1781_v26  ;;  %v16884_v26 = vld [vmem:[%s20934_s1 + $0x320] sm:$0xff]   ;;  %v16887_v41 = vld [vmem:[%s20934_s1 + $0x338] sm:$0xff]  }
 0x259   :  { %15214 = vmatpush3.bf16.msra.mxu1 %v16858_v55  ;;  %v16882_v55 = vld [vmem:[%s20934_s1 + $0x310] sm:$0xff]  }
 0x25a   :  { %15215 = vmatprep.subr.bf16.mxu1 %v16859_v50 }
 0x25d   :  { %15216 = vmatpush3.bf16.msra.mxu1 %v16859_v50  ;;  %v12237_v50 = vld [vmem:[%s20935_s2] ss:$0 sm:$0xff] }
 0x25e   :  { %15217 = vmatprep.subr.bf16.mxu1 %v16860_v21 }
 0x261   :  { %15218 = vmatpush3.bf16.msra.mxu1 %v16860_v21  ;;  %v961_v21 = vadd.f32 %v12237_v50, %v18005_v45 }
 0x262   :  { %15219 = vmatprep.subr.bf16.mxu1 %v16861_v35 }
 0x265   :  { %15220 = vmatpush3.bf16.msra.mxu1 %v16861_v35  ;;  %v964_v35 = vadd.f32 %v18007_v46, %v12237_v50  ;;  %v12239_v46 = vld [vmem:[%s20935_s2 + $0x2] ss:$0 sm:$0xff] }
 0x266   :  { %15221 = vmatprep.subr.bf16.mxu1 %v16862_v36 }
 0x269   :  { %15222 = vmatpush3.bf16.msra.mxu1 %v16862_v36  ;;  %v962_v36 = vadd.f32 %v12237_v50, %v18009_v31 }
 0x26a   :  { %15223 = vmatprep.subr.bf16.mxu1 %v16863_v37 }
 0x26d   :  { %15224 = vmatpush3.bf16.msra.mxu1 %v16863_v37 }
 0x26e   :  { %15237 = vmatprep.subr.bf16.mxu1 %v16864_v39 }
 0x270   :  { %15226 = vmatmul.mubr.bf16.vlgmr.msra.gmra.mrb[28].mxu1 %v1628_v48 }
 0x271   :  { %15238 = vmatpush3.bf16.msra.mxu1 %v16864_v39  ;;  %15253 = vmatprep.mubr.bf16.mxu1 %v1796_v32  ;;  %v963_v32 = vadd.f32 %v18000_v43, %v12237_v50  ;;  %v12238_v39 = vld [vmem:[%s20935_s2 + $0x1] ss:$0 sm:$0xff] }
 0x272   :  { %15239 = vmatprep.subr.bf16.mxu1 %v16865_v56 }
 0x273   :  { %v967_v37 = vmax.f32 %v963_v32, 0.0 }
 0x275   :  { %15240 = vmatpush3.bf16.msra.mxu1 %v16865_v56  ;;  %v965_v56 = vmax.f32 %v961_v21, 0.0  ;;  %v976_v43 = vmul.f32 %v12238_v39, %v967_v37  ;;  %v12441_v21 = vld [vmem:[%s20935_s2 + $0xc] ss:$0 sm:$0xff] }
 0x276   :  { %15241 = vmatprep.subr.bf16.mxu1 %v16866_v57 }
 0x277   :  { %v974_v31 = vmul.f32 %v12238_v39, %v965_v56 }
 0x279   :  { %15242 = vmatpush3.bf16.msra.mxu1 %v16866_v57  ;;  %v12414_v57 = vld [vmem:[%s20935_s2 + $0x9] ss:$0 sm:$0xff] }
 0x27a   :  { %15243 = vmatprep.subr.bf16.mxu1 %v16867_v58 }
 0x27d   :  { %15244 = vmatpush3.bf16.msra.mxu1 %v16867_v58  ;;  %v968_v58 = vmax.f32 %v964_v35, 0.0 }
 0x27e   :  { %15245 = vmatprep.subr.bf16.mxu1 %v16868_v59 }
 0x27f   :  { %v977_v1 = vmul.f32 %v12238_v39, %v968_v58 }
 0x281   :  { %15246 = vmatpush3.bf16.msra.mxu1 %v16868_v59  ;;  %v966_v59 = vmax.f32 %v962_v36, 0.0 }
 0x282   :  { %15247 = vmatprep.subr.bf16.mxu1 %v16869_v60 }
 0x285   :  { %15248 = vmatpush3.bf16.msra.mxu1 %v16869_v60 }
 0x286   :  { %15249 = vmatprep.subr.bf16.mxu1 %v16870_v61 }
 0x289   :  { %15250 = vmatpush3.bf16.msra.mxu1 %v16870_v61 }
 0x28a   :  { %15251 = vmatprep.subr.bf16.mxu1 %v16871_v62 }
 0x28d   :  { %15252 = vmatpush3.bf16.msra.mxu1 %v16871_v62  ;;  %v12423_v62 = vld [vmem:[%s20935_s2 + $0xa] ss:$0 sm:$0xff] }
 0x290   :  { %15254 = vmatmul.mubr.bf16.vlgmr.msra.gmra.mrb[28].mxu1 %v1797_v33  ;;  %v16886_v33 = vld [vmem:[%s20934_s1 + $0x330] sm:$0xff]  }
 0x291   :  { %15301 = vmatprep.mubr.msk.bf16.mxu1 %vm68_vm0, %v17606_v20 }
 0x363   :  { %v15255_v9 = vpop.f32.mrb[28].mxu1 }
 0x364   :  { %v1923_v10 = vadd.f32 %v15255_v9, %v12395_v6  ;;  %v1897_v11 = vpop.f32.mrb[29].mxu1 }
 0x365   :  { %v1921_v13 = vadd.f32 %v12395_v6, %v1897_v11  ;;  %v15256_v14 = vpop.f32.mrb[30].mxu1  ;;  %v12424_v11 = vld [vmem:[%s20935_s2 + $0xb] ss:$0 sm:$0xff] }
 0x366   :  { %v1927_v15 = vmax.f32 %v1923_v10, 0.0  ;;  %v1924_v16 = vadd.f32 %v15256_v14, %v12395_v6  ;;  %v1900_v18 = vpop.f32.mrb[31].mxu1  ;;  %v975_v10 = vmul.f32 %v12238_v39, %v966_v59  ;;  %v985_v14 = vadd.f32 %v12239_v46, %v976_v43  ;;  %v12450_v39 = vld [vmem:[%s20935_s2 + $0xd] ss:$0 sm:$0xff] }
 0x367   :  { %v1925_v19 = vmax.f32 %v1921_v13, 0.0  ;;  %v1922_v25 = vadd.f32 %v12395_v6, %v1900_v18  ;;  %v983_v18 = vadd.f32 %v12239_v46, %v974_v31  ;;  %v12451_v31 = vld [vmem:[%s20935_s2 + $0xe] ss:$0 sm:$0xff] }
 0x368   :  { %v1936_v34 = vmul.f32 %v12396_v12, %v1927_v15  ;;  %v1928_v38 = vmax.f32 %v1924_v16, 0.0 }
 0x369   :  { %v1934_v29 = vmul.f32 %v12396_v12, %v1925_v19  ;;  %v1926_v44 = vmax.f32 %v1922_v25, 0.0 }
 0x36a   :  { %v1937_v24 = vmul.f32 %v12396_v12, %v1928_v38  ;;  %v1945_v40 = vadd.f32 %v12397_v42, %v1936_v34  ;;  %v986_v34 = vadd.f32 %v12239_v46, %v977_v1 }
 0x36b   :  { %v1935_v28 = vmul.f32 %v12396_v12, %v1926_v44  ;;  %v1943_v47 = vadd.f32 %v12397_v42, %v1934_v29  ;;  %v984_v29 = vadd.f32 %v12239_v46, %v975_v10 }
 0x36c   :  { %v1946_v30 = vadd.f32 %v12397_v42, %v1937_v24 }
 0x36d   :  { %v1944_v48 = vadd.f32 %v12397_v42, %v1935_v28  ;;  %v2092_v28 = vmul.f32 0.75, %v985_v14  ;;  %v16889_v14 = vld [vmem:[%s20934_s1 + $0x388] sm:$0xff]  }
 0x36e   :  { %v1948_v49 = vpack.c.bf16 %v1946_v30, %v1945_v40 }
 0x36f   :  { %v1947_v51 = vpack.c.bf16 %v1944_v48, %v1943_v47  ;;  %v2090_v47 = vmul.f32 0.75, %v983_v18  ;;  %v16892_v18 = vld [vmem:[%s20934_s1 + $0x3a0] sm:$0xff]  }
 0x371   :  { %15273 = vmatprep.mubr.bf16.mxu0 %v1947_v51  ;;  %v2093_v51 = vmul.f32 0.75, %v986_v34  ;;  %v16895_v34 = vld [vmem:[%s20934_s1 + $0x3b8] sm:$0xff]  }
 0x372   :  { %15274 = vmatmul.mubr.bf16.vlgmr.msra.gmra.mrb[12].mxu0 %v1948_v49 }
 0x373   :  { %15278 = vmatpush3.bf16.msra.mxu0 %v16880_v2 }
 0x374   :  { %15279 = vmatprep.subr.bf16.mxu0 %v16881_v53 }
 0x377   :  { %15280 = vmatpush3.bf16.msra.mxu0 %v16881_v53 }
 0x378   :  { %15281 = vmatprep.subr.bf16.mxu0 %v16882_v55 }
 0x37b   :  { %15282 = vmatpush3.bf16.msra.mxu0 %v16882_v55 }
 0x37c   :  { %15283 = vmatprep.subr.bf16.mxu0 %v16883_v22 }
 0x37f   :  { %15284 = vmatpush3.bf16.msra.mxu0 %v16883_v22  ;;  %v2091_v22 = vmul.f32 0.75, %v984_v29  ;;  %v16898_v29 = vld [vmem:[%s20934_s1 + $0x350] sm:$0xff]  }
 0x380   :  { %15285 = vmatprep.subr.bf16.mxu0 %v16884_v26 }
 0x383   :  { %15286 = vmatpush3.bf16.msra.mxu0 %v16884_v26 }
 0x384   :  { %15287 = vmatprep.subr.bf16.mxu0 %v16885_v27 }
 0x387   :  { %15288 = vmatpush3.bf16.msra.mxu0 %v16885_v27 }
 0x388   :  { %15289 = vmatprep.subr.bf16.mxu0 %v16886_v33 }
 0x38b   :  { %15290 = vmatpush3.bf16.msra.mxu0 %v16886_v33 }
 0x38c   :  { %15291 = vmatprep.subr.bf16.mxu0 %v16887_v41 }
 0x38f   :  { %15292 = vmatpush3.bf16.msra.mxu0 %v16887_v41 }
 0x445   :  { %v15275_v60 = vpop.f32.mrb[12].mxu0 }
 0x446   :  { %v2062_v61 = vadd.f32 %v15275_v60, %v12414_v57  ;;  %v2053_v45 = vpop.f32.mrb[13].mxu0 }
 0x447   :  { %v2054_v63 = vadd.f32 %v12414_v57, %v2053_v45  ;;  %v15276_v0 = vpop.f32.mrb[14].mxu0 }
 0x448   :  { %v2070_v2 = vmax.f32 %v2062_v61, 0.0  ;;  %v2065_v6 = vadd.f32 %v15276_v0, %v12414_v57  ;;  %v2056_v9 = vpop.f32.mrb[15].mxu0 }
 0x449   :  { %v2068_v12 = vmax.f32 %v2054_v63, 0.0  ;;  %v2057_v13 = vadd.f32 %v12414_v57, %v2056_v9 }
 0x44a   :  { %v2079_v15 = vmul.f32 %v12423_v62, %v2070_v2  ;;  %v2071_v16 = vmax.f32 %v2065_v6, 0.0 }
 0x44b   :  { %v2077_v19 = vmul.f32 %v12423_v62, %v2068_v12  ;;  %v2069_v25 = vmax.f32 %v2057_v13, 0.0  ;;  %v16888_v13 = vld [vmem:[%s20934_s1 + $0x380] sm:$0xff]  }
 0x44c   :  { %v2088_v38 = vadd.f32 %v12424_v11, %v2079_v15  ;;  %v2080_v42 = vmul.f32 %v12423_v62, %v2071_v16  ;;  %v16890_v15 = vld [vmem:[%s20934_s1 + $0x390] sm:$0xff]   ;;  %v16891_v16 = vld [vmem:[%s20934_s1 + $0x398] sm:$0xff]  }
 0x44d   :  { %v2086_v44 = vadd.f32 %v12424_v11, %v2077_v19  ;;  %v2078_v24 = vmul.f32 %v12423_v62, %v2069_v25  ;;  %v16893_v19 = vld [vmem:[%s20934_s1 + $0x3a8] sm:$0xff]   ;;  %v16894_v25 = vld [vmem:[%s20934_s1 + $0x3b0] sm:$0xff]  }
 0x44e   :  { %v2096_v40 = vmul.f32 0.25, %v2088_v38  ;;  %v2089_v30 = vadd.f32 %v12424_v11, %v2080_v42  ;;  %v16896_v38 = vld [vmem:[%s20934_s1 + $0x340] sm:$0xff]   ;;  %v16897_v42 = vld [vmem:[%s20934_s1 + $0x348] sm:$0xff]  }
 0x44f   :  { %v2094_v48 = vmul.f32 0.25, %v2086_v44  ;;  %v2087_v49 = vadd.f32 %v12424_v11, %v2078_v24  ;;  %v16899_v44 = vld [vmem:[%s20934_s1 + $0x358] sm:$0xff]   ;;  %v16900_v24 = vld [vmem:[%s20934_s1 + $0x360] sm:$0xff]  }
 0x450   :  { %v18129_v53 = vadd.f32 %v2096_v40, %v2092_v28  ;;  %v2097_v55 = vmul.f32 0.25, %v2089_v30  ;;  %v16901_v28 = vld [vmem:[%s20934_s1 + $0x368] sm:$0xff]   ;;  %v16902_v40 = vld [vmem:[%s20934_s1 + $0x370] sm:$0xff]   ;;  %v16903_v30 = vld [vmem:[%s20934_s1 + $0x378] sm:$0xff]  }
 0x451   :  { %v18131_v26 = vadd.f32 %v2094_v48, %v2090_v47  ;;  %v2095_v27 = vmul.f32 0.25, %v2087_v49  ;;  %v16904_v47 = vld [vmem:[%s20934_s1 + $0x3c0] sm:$0xff]   ;;  %v16921_v49 = vld [vmem:[%s20934_s1 + $0x408] sm:$0xff]  }
 0x452   :  { %v18133_v33 = vadd.f32 %v2097_v55, %v2093_v51  ;;  %v16920_v48 = vld [vmem:[%s20934_s1 + $0x400] sm:$0xff]   ;;  %v16922_v51 = vld [vmem:[%s20934_s1 + $0x410] sm:$0xff]   ;;  %v16923_v55 = vld [vmem:[%s20934_s1 + $0x418] sm:$0xff]  }
 0x453   :  { %v18135_v41 = vadd.f32 %v2095_v27, %v2091_v22 }
 0x454   :  { %v18143_v32 = vpack.c.bf16 %v18133_v33, %v18129_v53 }
 0x455   :  { %v18139_v50 = vpack.c.bf16 %v18135_v41, %v18131_v26 }
 0x457   :  { %15293 = vmatprep.mubr.bf16.mxu0 %v18139_v50 }
 0x458   :  { %15294 = vmatmul.mubr.bf16.vlgmr.msra.gmra.mrb[16].mxu0 %v18143_v32 }
 0x459   :  { %15349 = vmatprep.mubr.msk.bf16.mxu0 %vm68_vm0, %v17686_v52 }
 0x52b   :  { %v15295_v35 = vpop.f32.mrb[16].mxu0 }
 0x52c   :  { %v2217_v36 = vadd.f32 %v15295_v35, %v12441_v21  ;;  %v2208_v37 = vpop.f32.mrb[17].mxu0 }
 0x52d   :  { %v2209_v56 = vadd.f32 %v12441_v21, %v2208_v37  ;;  %v15296_v57 = vpop.f32.mrb[18].mxu0 }
 0x52e   :  { %v2225_v58 = vmax.f32 %v2217_v36, 0.0  ;;  %v2220_v59 = vadd.f32 %v15296_v57, %v12441_v21  ;;  %v2211_v60 = vpop.f32.mrb[19].mxu0 }
 0x52f   :  { %v2223_v43 = vmax.f32 %v2209_v56, 0.0  ;;  %v2212_v61 = vadd.f32 %v12441_v21, %v2211_v60 }
 0x530   :  { %v2234_v45 = vmul.f32 %v12450_v39, %v2225_v58  ;;  %v2226_v46 = vmax.f32 %v2220_v59, 0.0 }
 0x531   :  { %v2232_v62 = vmul.f32 %v12450_v39, %v2223_v43  ;;  %v2224_v63 = vmax.f32 %v2212_v61, 0.0  ;;  %v16905_v43 = vld [vmem:[%s20934_s1 + $0x3c8] sm:$0xff]   ;;  %v16906_v61 = vld [vmem:[%s20934_s1 + $0x3d0] sm:$0xff]  }
 0x532   :  { %v2235_v0 = vmul.f32 %v12450_v39, %v2226_v46  ;;  %v18158_v2 = vadd.f32 %v12451_v31, %v2234_v45  ;;  %v16907_v45 = vld [vmem:[%s20934_s1 + $0x3d8] sm:$0xff]   ;;  %v16908_v46 = vld [vmem:[%s20934_s1 + $0x3e0] sm:$0xff]  }
 0x533   :  { %v2233_v1 = vmul.f32 %v12450_v39, %v2224_v63  ;;  %v18162_v9 = vadd.f32 %v12451_v31, %v2232_v62  ;;  %v16910_v62 = vld [vmem:[%s20934_s1 + $0x3f0] sm:$0xff]   ;;  %v16911_v63 = vld [vmem:[%s20934_s1 + $0x3f8] sm:$0xff]  }
 0x534   :  { %v18160_v6 = vadd.f32 %v12451_v31, %v2235_v0  ;;  %v16912_v0 = vld [vmem:[%s20934_s1 + $0x4c0] sm:$0xff]  }
 0x535   :  { %v18164_v10 = vadd.f32 %v12451_v31, %v2233_v1  ;;  %v16909_v31 = vld [vmem:[%s20934_s1 + $0x3e8] sm:$0xff]  }
 0x536   :  { %v2246_v11 = vpack.c.bf16 %v18160_v6, %v18158_v2  ;;  %v16913_v1 = vld [vmem:[%s20934_s1 + $0x4c8] sm:$0xff]  }
 0x537   :  { %v2245_v12 = vpack.c.bf16 %v18164_v10, %v18162_v9 }
 0x539   :  { %15297 = vmatprep.subr.bf16.mxu1 %v2245_v12  ;;  %15345 = vmatprep.subr.bf16.mxu0 %v2245_v12 }
 0x53a   :  { %15298 = vmatpush3.bf16.msra.mxu1 %v2245_v12  ;;  %15346 = vmatpush3.bf16.msra.mxu0 %v2245_v12 }
 0x53b   :  { %15299 = vmatprep.subr.bf16.mxu1 %v2246_v11  ;;  %15347 = vmatprep.subr.bf16.mxu0 %v2246_v11 }
 0x53e   :  { %15300 = vmatpush3.bf16.msra.mxu1 %v2246_v11  ;;  %15348 = vmatpush3.bf16.msra.mxu0 %v2246_v11 }
 0x53f   :  { %15305 = vmatprep.subr.bf16.mxu1 %v16888_v13  ;;  %15373 = vmatprep.subr.bf16.mxu0 %v16920_v48 }
 0x541   :  { %15302 = vmatmul.mubr.msk.bf16.vlgmr.msra.gmra.mrb[32].mxu1 %vm68_vm0, %v17610_v23  ;;  %15350 = vmatmul.mubr.msk.bf16.vlgmr.msra.gmra.mrb[20].mxu0 %vm68_vm0, %v17698_v54 }
 0x542   :  { %15306 = vmatpush3.bf16.msra.mxu1 %v16888_v13  ;;  %15321 = vmatprep.mubr.bf16.mxu1 %v2245_v12  ;;  %v16915_v12 = vld [vmem:[%s20934_s1 + $0x4d8] sm:$0xff]   ;;  %v16916_v13 = vld [vmem:[%s20934_s1 + $0x4e0] sm:$0xff]  }
 0x543   :  { %15307 = vmatprep.subr.bf16.mxu1 %v16889_v14  ;;  %15374 = vmatpush3.bf16.msra.mxu0 %v16920_v48 }
 0x544   :  { %15375 = vmatprep.subr.bf16.mxu0 %v16921_v49 }
 0x546   :  { %15308 = vmatpush3.bf16.msra.mxu1 %v16889_v14  ;;  %v16918_v14 = vld [vmem:[%s20934_s1 + $0x4f0] sm:$0xff]  }
 0x547   :  { %15309 = vmatprep.subr.bf16.mxu1 %v16890_v15  ;;  %15376 = vmatpush3.bf16.msra.mxu0 %v16921_v49 }
 0x548   :  { %15377 = vmatprep.subr.bf16.mxu0 %v16922_v51 }
 0x54a   :  { %15310 = vmatpush3.bf16.msra.mxu1 %v16890_v15  ;;  %v16919_v15 = vld [vmem:[%s20934_s1 + $0x4f8] sm:$0xff]  }
 0x54b   :  { %15311 = vmatprep.subr.bf16.mxu1 %v16891_v16  ;;  %15378 = vmatpush3.bf16.msra.mxu0 %v16922_v51 }
 0x54c   :  { %15379 = vmatprep.subr.bf16.mxu0 %v16923_v55 }
 0x54e   :  { %15312 = vmatpush3.bf16.msra.mxu1 %v16891_v16  ;;  %v16924_v16 = vld [vmem:[%s20934_s1 + $0x420] sm:$0xff]  }
 0x54f   :  { %15313 = vmatprep.subr.bf16.mxu1 %v16892_v18  ;;  %15380 = vmatpush3.bf16.msra.mxu0 %v16923_v55 }
 0x550   :  { %15381 = vmatprep.subr.bf16.mxu0 %v16924_v16 }
 0x552   :  { %15314 = vmatpush3.bf16.msra.mxu1 %v16892_v18  ;;  %v16925_v18 = vld [vmem:[%s20934_s1 + $0x428] sm:$0xff]  }
 0x553   :  { %15315 = vmatprep.subr.bf16.mxu1 %v16893_v19  ;;  %15382 = vmatpush3.bf16.msra.mxu0 %v16924_v16 }
 0x554   :  { %15383 = vmatprep.subr.bf16.mxu0 %v16925_v18 }
 0x556   :  { %15316 = vmatpush3.bf16.msra.mxu1 %v16893_v19  ;;  %v16926_v19 = vld [vmem:[%s20934_s1 + $0x430] sm:$0xff]  }
 0x557   :  { %15317 = vmatprep.subr.bf16.mxu1 %v16894_v25  ;;  %15384 = vmatpush3.bf16.msra.mxu0 %v16925_v18  ;;  %v12640_v18 = vld [vmem:[%s20935_s2 + $0x1d] ss:$0 sm:$0xff] }
 0x558   :  { %15385 = vmatprep.subr.bf16.mxu0 %v16926_v19 }
 0x55a   :  { %15318 = vmatpush3.bf16.msra.mxu1 %v16894_v25 }
 0x55b   :  { %15319 = vmatprep.subr.bf16.mxu1 %v16895_v34  ;;  %15386 = vmatpush3.bf16.msra.mxu0 %v16926_v19 }
 0x55e   :  { %15320 = vmatpush3.bf16.msra.mxu1 %v16895_v34 }
 0x55f   :  { %15325 = vmatprep.subr.bf16.mxu1 %v16896_v38 }
 0x561   :  { %15322 = vmatmul.mubr.bf16.vlgmr.msra.gmra.mrb[36].mxu1 %v2246_v11  ;;  %v16914_v11 = vld [vmem:[%s20934_s1 + $0x4d0] sm:$0xff]  }
 0x562   :  { %15326 = vmatpush3.bf16.msra.mxu1 %v16896_v38 }
 0x563   :  { %15327 = vmatprep.subr.bf16.mxu1 %v16897_v42 }
 0x566   :  { %15328 = vmatpush3.bf16.msra.mxu1 %v16897_v42  ;;  %v12529_v42 = vld [vmem:[%s20935_s2 + $0x10] ss:$0 sm:$0xff] }
 0x567   :  { %15329 = vmatprep.subr.bf16.mxu1 %v16898_v29 }
 0x56a   :  { %15330 = vmatpush3.bf16.msra.mxu1 %v16898_v29 }
 0x56b   :  { %15331 = vmatprep.subr.bf16.mxu1 %v16899_v44 }
 0x56e   :  { %15332 = vmatpush3.bf16.msra.mxu1 %v16899_v44 }
 0x56f   :  { %15333 = vmatprep.subr.bf16.mxu1 %v16900_v24 }
 0x572   :  { %15334 = vmatpush3.bf16.msra.mxu1 %v16900_v24 }
 0x573   :  { %15335 = vmatprep.subr.bf16.mxu1 %v16901_v28 }
 0x576   :  { %15336 = vmatpush3.bf16.msra.mxu1 %v16901_v28 }
 0x577   :  { %15337 = vmatprep.subr.bf16.mxu1 %v16902_v40 }
 0x57a   :  { %15338 = vmatpush3.bf16.msra.mxu1 %v16902_v40 }
 0x57b   :  { %15339 = vmatprep.subr.bf16.mxu1 %v16903_v30 }
 0x57e   :  { %15340 = vmatpush3.bf16.msra.mxu1 %v16903_v30  ;;  %v18307_v30 = vsel %vm2726_vm14, 1.0, %v17526_v17 }
 0x57f   :  { %15353 = vmatprep.subr.bf16.mxu1 %v16904_v47 }
 0x614   :  { %v15303_v22 = vpop.f32.mrb[32].mxu1  ;;  %v15351_v27 = vpop.f32.mrb[20].mxu0 }
 0x615   :  { %v2281_v21 = vpop.f32.mrb[33].mxu1  ;;  %v2560_v35 = vpop.f32.mrb[21].mxu0 }
 0x616   :  { %v15304_v36 = vpop.f32.mrb[34].mxu1  ;;  %v15352_v37 = vpop.f32.mrb[22].mxu0 }
 0x617   :  { %v2297_v39 = vpack.c.bf16 %v15304_v36, %v15303_v22  ;;  %v2284_v56 = vpop.f32.mrb[35].mxu1  ;;  %v2576_v57 = vpack.c.bf16 %v15352_v37, %v15351_v27  ;;  %v2563_v58 = vpop.f32.mrb[23].mxu0  ;;  %v2729_v37 = vmul.f32 %v18307_v30, %v18162_v9  ;;  %v12630_v9 = vld [vmem:[%s20935_s2 + $0x1b] ss:$0 sm:$0xff] }
 0x618   :  { %v2296_v59 = vpack.c.bf16 %v2284_v56, %v2281_v21  ;;  %v2575_v60 = vpack.c.bf16 %v2563_v58, %v2560_v35  ;;  %v2731_v21 = vmul.f32 %v18307_v30, %v18158_v2 }
 0x61a   :  { %15341 = vmatprep.mubr.bf16.mxu1 %v2296_v59 }
 0x61b   :  { %15342 = vmatmul.mubr.bf16.vlgmr.msra.gmra.mrb[36].mxu1 %v2297_v39 }
 0x61c   :  { %15354 = vmatpush3.bf16.msra.mxu1 %v16904_v47  ;;  %15369 = vmatprep.mubr.bf16.mxu1 %v2575_v60  ;;  %v12530_v47 = vld [vmem:[%s20935_s2 + $0x11] ss:$0 sm:$0xff]  ;;  %v2730_v60 = vmul.f32 %v18307_v30, %v18164_v10 }
 0x61d   :  { %15355 = vmatprep.subr.bf16.mxu1 %v16905_v43 }
 0x620   :  { %15356 = vmatpush3.bf16.msra.mxu1 %v16905_v43 }
 0x621   :  { %15357 = vmatprep.subr.bf16.mxu1 %v16906_v61 }
 0x624   :  { %15358 = vmatpush3.bf16.msra.mxu1 %v16906_v61 }
 0x625   :  { %15359 = vmatprep.subr.bf16.mxu1 %v16907_v45 }
 0x628   :  { %15360 = vmatpush3.bf16.msra.mxu1 %v16907_v45 }
 0x629   :  { %15361 = vmatprep.subr.bf16.mxu1 %v16908_v46 }
 0x62c   :  { %15362 = vmatpush3.bf16.msra.mxu1 %v16908_v46 }
 0x62d   :  { %15363 = vmatprep.subr.bf16.mxu1 %v16909_v31 }
 0x630   :  { %15364 = vmatpush3.bf16.msra.mxu1 %v16909_v31 }
 0x631   :  { %15365 = vmatprep.subr.bf16.mxu1 %v16910_v62 }
 0x634   :  { %15366 = vmatpush3.bf16.msra.mxu1 %v16910_v62 }
 0x635   :  { %15367 = vmatprep.subr.bf16.mxu1 %v16911_v63 }
 0x638   :  { %15368 = vmatpush3.bf16.msra.mxu1 %v16911_v63 }
 0x639   :  { %15433 = vmatprep.subr.bf16.mxu1 %v16912_v0 }
 0x63b   :  { %15370 = vmatmul.mubr.bf16.vlgmr.msra.gmra.mrb[36].mxu1 %v2576_v57  ;;  %v2732_v57 = vmul.f32 %v18307_v30, %v18160_v6 }
 0x63c   :  { %15434 = vmatpush3.bf16.msra.mxu1 %v16912_v0  ;;  %15449 = vmatprep.mubr.bf16.mxu1 %v18139_v50  ;;  %v16917_v50 = vld [vmem:[%s20934_s1 + $0x4e8] sm:$0xff]   ;;  %v12639_v0 = vld [vmem:[%s20935_s2 + $0x1c] ss:$0 sm:$0xff] }
 0x63d   :  { %15435 = vmatprep.subr.bf16.mxu1 %v16913_v1 }
 0x640   :  { %15436 = vmatpush3.bf16.msra.mxu1 %v16913_v1 }
 0x641   :  { %15437 = vmatprep.subr.bf16.mxu1 %v16914_v11 }
 0x644   :  { %15438 = vmatpush3.bf16.msra.mxu1 %v16914_v11 }
 0x645   :  { %15439 = vmatprep.subr.bf16.mxu1 %v16915_v12 }
 0x648   :  { %15440 = vmatpush3.bf16.msra.mxu1 %v16915_v12 }
 0x649   :  { %15441 = vmatprep.subr.bf16.mxu1 %v16916_v13 }
 0x64c   :  { %15442 = vmatpush3.bf16.msra.mxu1 %v16916_v13 }
 0x64d   :  { %15443 = vmatprep.subr.bf16.mxu1 %v16917_v50 }
 0x650   :  { %15444 = vmatpush3.bf16.msra.mxu1 %v16917_v50 }
 0x651   :  { %15445 = vmatprep.subr.bf16.mxu1 %v16918_v14 }
 0x654   :  { %15446 = vmatpush3.bf16.msra.mxu1 %v16918_v14 }
 0x655   :  { %15447 = vmatprep.subr.bf16.mxu1 %v16919_v15 }
 0x658   :  { %15448 = vmatpush3.bf16.msra.mxu1 %v16919_v15 }
 0x65b   :  { %15450 = vmatmul.mubr.bf16.vlgmr.msra.gmra.mrb[40].mxu1 %v18143_v32  ;;  %v12528_v32 = vld [vmem:[%s20935_s2 + $0xf] ss:$0 sm:$0xff] }
 0x65c   :  { %15505 = vmatprep.mubr.msk.bf16.mxu1 %vm68_vm0, %v17686_v52  ;;  %v16927_v52 = vld [vmem:[%s20934_s1 + $0x438] sm:$0xff]  }
 0x65d   :  { %15387 = vmatprep.subr.bf16.mxu0 %v16927_v52 }
 0x65e   :  { %15388 = vmatpush3.bf16.msra.mxu0 %v16927_v52 }
 0x65f   :  { %15393 = vmatprep.subr.bf16.mxu0 %v17526_v17 }
 0x70e   :  { %v15371_v25 = vpop.f32.mrb[36].mxu1 }
 0x70f   :  { %v2702_v34 = vadd.f32 %v15371_v25, %v12528_v32  ;;  %v2676_v38 = vpop.f32.mrb[37].mxu1 }
 0x710   :  { %v2700_v29 = vadd.f32 %v12528_v32, %v2676_v38  ;;  %v15372_v44 = vpop.f32.mrb[38].mxu1 }
 0x711   :  { %v2706_v24 = vmax.f32 %v2702_v34, 0.0  ;;  %v2703_v28 = vadd.f32 %v15372_v44, %v12528_v32  ;;  %v2679_v40 = vpop.f32.mrb[39].mxu1 }
 0x712   :  { %v2704_v48 = vmax.f32 %v2700_v29, 0.0  ;;  %v2701_v49 = vadd.f32 %v12528_v32, %v2679_v40  ;;  %v16929_v40 = vld [vmem:[%s20934_s1 + $0x448] sm:$0xff]  }
 0x713   :  { %v2715_v51 = vmul.f32 %v12529_v42, %v2706_v24  ;;  %v2707_v55 = vmax.f32 %v2703_v28, 0.0  ;;  %v16928_v28 = vld [vmem:[%s20934_s1 + $0x440] sm:$0xff]  }
 0x714   :  { %v2713_v22 = vmul.f32 %v12529_v42, %v2704_v48  ;;  %v2705_v27 = vmax.f32 %v2701_v49, 0.0  ;;  %v16932_v48 = vld [vmem:[%s20934_s1 + $0x460] sm:$0xff]   ;;  %v16933_v49 = vld [vmem:[%s20934_s1 + $0x468] sm:$0xff]  }
 0x715   :  { %v2724_v35 = vadd.f32 %v12530_v47, %v2715_v51  ;;  %v2716_v36 = vmul.f32 %v12529_v42, %v2707_v55  ;;  %v16934_v51 = vld [vmem:[%s20934_s1 + $0x470] sm:$0xff]   ;;  %v16935_v55 = vld [vmem:[%s20934_s1 + $0x478] sm:$0xff]  }
 0x716   :  { %v2722_v39 = vadd.f32 %v12530_v47, %v2713_v22  ;;  %v2714_v56 = vmul.f32 %v12529_v42, %v2705_v27  ;;  %v12548_v22 = vld [vmem:[%s20935_s2 + $0x12] ss:$0 sm:$0xff] }
 0x717   :  { %v2735_v58 = vadd.f32 %v2731_v21, %v2724_v35  ;;  %v2725_v59 = vadd.f32 %v12530_v47, %v2716_v36  ;;  %v12557_v36 = vld [vmem:[%s20935_s2 + $0x13] ss:$0 sm:$0xff] }
 0x718   :  { %v2723_v43 = vadd.f32 %v12530_v47, %v2714_v56  ;;  %v2733_v61 = vadd.f32 %v2729_v37, %v2722_v39  ;;  %v16930_v47 = vld [vmem:[%s20934_s1 + $0x450] sm:$0xff]  }
 0x719   :  { %v2736_v45 = vadd.f32 %v2732_v57, %v2725_v59 }
 0x71a   :  { %v2734_v46 = vadd.f32 %v2730_v60, %v2723_v43 }
 0x71b   :  { %v2738_v2 = vpack.c.bf16 %v2736_v45, %v2735_v58  ;;  %v12558_v45 = vld [vmem:[%s20935_s2 + $0x14] ss:$0 sm:$0xff] }
 0x71c   :  { %v2737_v31 = vpack.c.bf16 %v2734_v46, %v2733_v61 }
 0x71e   :  { %15389 = vmatprep.mubr.bf16.mxu0 %v2737_v31 }
 0x71f   :  { %15390 = vmatmul.mubr.bf16.vlgmr.msra.gmra.mrb[24].mxu0 %v2738_v2 }
 0x720   :  { %15394 = vmatpush3.bf16.msra.mxu0 %v16928_v28  ;;  %15409 = vmatprep.mubr.msk.bf16.mxu0 %vm17527_vm15, %v17526_v17 }
 0x721   :  { %15395 = vmatprep.subr.bf16.mxu0 %v17526_v17 }
 0x724   :  { %15396 = vmatpush3.bf16.msra.mxu0 %v16929_v40 }
 0x725   :  { %15397 = vmatprep.subr.bf16.mxu0 %v17526_v17 }
 0x728   :  { %15398 = vmatpush3.bf16.msra.mxu0 %v16930_v47 }
 0x729   :  { %15399 = vmatprep.subr.bf16.mxu0 %v17526_v17 }
 0x72e   :  { %v15451_v62 = vpop.f32.mrb[40].mxu1 }
 0x72f   :  { %v3317_v63 = vadd.f32 %v15451_v62, %v12630_v9  ;;  %v3308_v6 = vpop.f32.mrb[41].mxu1 }
 0x730   :  { %v3309_v10 = vadd.f32 %v12630_v9, %v3308_v6  ;;  %v15452_v1 = vpop.f32.mrb[42].mxu1 }
 0x731   :  { %v3325_v11 = vmax.f32 %v3317_v63, 0.0  ;;  %v3320_v12 = vadd.f32 %v15452_v1, %v12630_v9  ;;  %v3311_v13 = vpop.f32.mrb[43].mxu1 }
 0x732   :  { %v3323_v50 = vmax.f32 %v3309_v10, 0.0  ;;  %v3312_v14 = vadd.f32 %v12630_v9, %v3311_v13 }
 0x733   :  { %v3334_v15 = vmul.f32 %v12639_v0, %v3325_v11  ;;  %v3326_v16 = vmax.f32 %v3320_v12, 0.0 }
 0x734   :  { %v3332_v19 = vmul.f32 %v12639_v0, %v3323_v50  ;;  %v3324_v52 = vmax.f32 %v3312_v14, 0.0 }
 0x735   :  { %v3335_v32 = vmul.f32 %v12639_v0, %v3326_v16  ;;  %v18329_v34 = vadd.f32 %v12640_v18, %v3334_v15 }
 0x736   :  { %v3333_v25 = vmul.f32 %v12639_v0, %v3324_v52  ;;  %v18333_v42 = vadd.f32 %v12640_v18, %v3332_v19 }
 0x737   :  { %v18331_v38 = vadd.f32 %v12640_v18, %v3335_v32 }
 0x738   :  { %v18335_v29 = vadd.f32 %v12640_v18, %v3333_v25 }
 0x739   :  { %v18339_v44 = vpack.c.bf16 %v18331_v38, %v18329_v34 }
 0x73a   :  { %v18343_v24 = vpack.c.bf16 %v18335_v29, %v18333_v42 }
 0x73c   :  { %15501 = vmatprep.subr.bf16.mxu1 %v18343_v24 }
 0x73d   :  { %15502 = vmatpush3.bf16.msra.mxu1 %v18343_v24 }
 0x73e   :  { %15503 = vmatprep.subr.bf16.mxu1 %v18339_v44 }
 0x741   :  { %15504 = vmatpush3.bf16.msra.mxu1 %v18339_v44 }
 0x744   :  { %15506 = vmatmul.mubr.msk.bf16.vlgmr.msra.gmra.mrb[44].mxu1 %vm68_vm0, %v17698_v54  ;;  %v16931_v54 = vld [vmem:[%s20934_s1 + $0x458] sm:$0xff]  }
 0x745   :  { %15400 = vmatpush3.bf16.msra.mxu0 %v16931_v54 }
 0x746   :  { %15401 = vmatprep.subr.bf16.mxu0 %v17526_v17 }
 0x749   :  { %15402 = vmatpush3.bf16.msra.mxu0 %v16932_v48 }
 0x74a   :  { %15403 = vmatprep.subr.bf16.mxu0 %v17526_v17 }
 0x74d   :  { %15404 = vmatpush3.bf16.msra.mxu0 %v16933_v49 }
 0x74e   :  { %15405 = vmatprep.subr.bf16.mxu0 %v17526_v17 }
 0x751   :  { %15406 = vmatpush3.bf16.msra.mxu0 %v16934_v51 }
 0x752   :  { %15407 = vmatprep.subr.bf16.mxu0 %v17526_v17 }
 0x755   :  { %15408 = vmatpush3.bf16.msra.mxu0 %v16935_v55  ;;  %v16936_v55 = vld [vmem:[%s20934_s1 + $0x480] sm:$0xff]  }
 0x756   :  { %15413 = vmatprep.subr.bf16.mxu0 %v17526_v17 }
 0x7f2   :  { %v15391_v27 = vpop.f32.mrb[24].mxu0 }
 0x7f3   :  { %v2852_v21 = vadd.f32 %v15391_v27, %v12548_v22  ;;  %v2843_v35 = vpop.f32.mrb[25].mxu0  ;;  %v16937_v27 = vld [vmem:[%s20934_s1 + $0x488] sm:$0xff]  }
 0x7f4   :  { %v2844_v37 = vadd.f32 %v12548_v22, %v2843_v35  ;;  %v15392_v39 = vpop.f32.mrb[26].mxu0  ;;  %v16939_v35 = vld [vmem:[%s20934_s1 + $0x498] sm:$0xff]  }
 0x7f5   :  { %v2860_v56 = vmax.f32 %v2852_v21, 0.0  ;;  %v2855_v57 = vadd.f32 %v15392_v39, %v12548_v22  ;;  %v2846_v58 = vpop.f32.mrb[27].mxu0  ;;  %v16938_v21 = vld [vmem:[%s20934_s1 + $0x490] sm:$0xff]  }
 0x7f6   :  { %v2858_v59 = vmax.f32 %v2844_v37, 0.0  ;;  %v2847_v60 = vadd.f32 %v12548_v22, %v2846_v58  ;;  %v16941_v37 = vld [vmem:[%s20934_s1 + $0x4a8] sm:$0xff]   ;;  %v16942_v39 = vld [vmem:[%s20934_s1 + $0x4b0] sm:$0xff]  }
 0x7f7   :  { %v2869_v43 = vmul.f32 %v12557_v36, %v2860_v56  ;;  %v2861_v61 = vmax.f32 %v2855_v57, 0.0  ;;  %v16943_v56 = vld [vmem:[%s20934_s1 + $0x4b8] sm:$0xff]   ;;  %v12575_v57 = vld [vmem:[%s20935_s2 + $0x15] ss:$0 sm:$0xff] }
 0x7f8   :  { %v2867_v46 = vmul.f32 %v12557_v36, %v2858_v59  ;;  %v2859_v2 = vmax.f32 %v2847_v60, 0.0 }
 0x7f9   :  { %v2870_v31 = vmul.f32 %v12557_v36, %v2861_v61  ;;  %v18394_v62 = vadd.f32 %v12558_v45, %v2869_v43  ;;  %v12584_v43 = vld [vmem:[%s20935_s2 + $0x16] ss:$0 sm:$0xff] }
 0x7fa   :  { %v2868_v9 = vmul.f32 %v12557_v36, %v2859_v2  ;;  %v18398_v6 = vadd.f32 %v12558_v45, %v2867_v46  ;;  %v16940_v36 = vld [vmem:[%s20934_s1 + $0x4a0] sm:$0xff]   ;;  %v12585_v2 = vld [vmem:[%s20935_s2 + $0x17] ss:$0 sm:$0xff] }
 0x7fb   :  { %v18396_v63 = vadd.f32 %v12558_v45, %v2870_v31 }
 0x7fc   :  { %v18400_v0 = vadd.f32 %v12558_v45, %v2868_v9 }
 0x7fd   :  { %v2887_v10 = vadd.f32 %v18396_v63, %v18394_v62 }
 0x7fe   :  { %v2880_v1 = vadd.f32 %v18400_v0, %v18398_v6 }
 0x7ff   :  { %v2888_v11 = vrot.slane %v2887_v10, 4 }
 0x800   :  { %v2881_v12 = vrot.slane %v2880_v1, 4 }
 0x801   :  { %v2889_v13 = vadd.f32 %v2888_v11, %v2887_v10  ;;  %v16945_v11 = vld [vmem:[%s20934_s1 + $0x548] sm:$0xff]  }
 0x802   :  { %v2882_v50 = vadd.f32 %v2881_v12, %v2880_v1  ;;  %v16944_v1 = vld [vmem:[%s20934_s1 + $0x540] sm:$0xff]   ;;  %v16947_v12 = vld [vmem:[%s20934_s1 + $0x558] sm:$0xff]  }
 0x803   :  { %v2890_v14 = vrot.slane %v2889_v13, 2 }
 0x804   :  { %v2883_v15 = vrot.slane %v2882_v50, 2 }
 0x805   :  { %v2891_v16 = vadd.f32 %v2890_v14, %v2889_v13  ;;  %v16950_v13 = vld [vmem:[%s20934_s1 + $0x570] sm:$0xff]   ;;  %v16952_v14 = vld [vmem:[%s20934_s1 + $0x500] sm:$0xff]  }
 0x806   :  { %v2884_v18 = vadd.f32 %v2883_v15, %v2882_v50  ;;  %v16951_v50 = vld [vmem:[%s20934_s1 + $0x578] sm:$0xff]   ;;  %v16953_v15 = vld [vmem:[%s20934_s1 + $0x508] sm:$0xff]  }
 0x807   :  { %v2892_v19 = vrot.slane %v2891_v16, 1 }
 0x808   :  { %v2885_v52 = vrot.slane %v2884_v18, 1 }
 0x809   :  { %v2893_v32 = vadd.f32 %v2892_v19, %v2891_v16  ;;  %v16954_v16 = vld [vmem:[%s20934_s1 + $0x510] sm:$0xff]   ;;  %v16956_v19 = vld [vmem:[%s20934_s1 + $0x520] sm:$0xff]  }
 0x80a   :  { %v2886_v25 = vadd.f32 %v2885_v52, %v2884_v18  ;;  %v16955_v18 = vld [vmem:[%s20934_s1 + $0x518] sm:$0xff]   ;;  %v16958_v52 = vld [vmem:[%s20934_s1 + $0x530] sm:$0xff]  }
 0x80b   :  { %v2896_v28 = vmul.f32 0.0625, %v2893_v32  ;;  %v16959_v32 = vld [vmem:[%s20934_s1 + $0x538] sm:$0xff]  }
 0x80c   :  { %v2895_v40 = vmul.f32 0.0625, %v2886_v25  ;;  %v16960_v25 = vld [vmem:[%s20934_s1 + $0x580] sm:$0xff]  }
 0x80d   :  { %v2898_v47 = vpack.c.bf16 %v2896_v28, %v2896_v28 }
 0x80e   :  { %v2897_v54 = vpack.c.bf16 %v2895_v40, %v2895_v40 }
 0x80f   :  { %v2924_v48 = vunpack.c.l.b16 %v2898_v47 }
 0x810   :  { %v2923_v49 = vunpack.c.l.b16 %v2897_v54 }
 0x812   :  { %v2926_v51 = vsel %vm2925_vm1, %v2924_v48, %v2923_v49 }
 0x813   :  { %v2927_v22 = vpack.c.b16 %v2926_v51, %v2926_v51  ;;  %v16968_v51 = vld [vmem:[%s20934_s1 + $0x5c0] sm:$0xff]  }
 0x814   :  { %15529 = vmatprep.subr.bf16.mxu1 %v16968_v51 }
 0x815   :  { %15410 = vmatmul.mubr.bf16.vlgmr.msra.gmra.mrb[28].mxu0 %v2927_v22  ;;  %15530 = vmatpush3.bf16.msra.mxu1 %v16968_v51  ;;  %v16970_v22 = vld [vmem:[%s20934_s1 + $0x5d0] sm:$0xff]  }
 0x816   :  { %15414 = vmatpush3.bf16.msra.mxu0 %v16936_v55  ;;  %15429 = vmatprep.mubr.msk.bf16.mxu0 %vm17527_vm15, %v17526_v17  ;;  %v16969_v55 = vld [vmem:[%s20934_s1 + $0x5c8] sm:$0xff]  }
 0x817   :  { %15415 = vmatprep.subr.bf16.mxu0 %v17526_v17  ;;  %v15507_v28 = vpop.f32.mrb[44].mxu1  ;;  %15531 = vmatprep.subr.bf16.mxu1 %v16969_v55 }
 0x818   :  { %v3660_v40 = vpop.f32.mrb[45].mxu1 }
 0x819   :  { %v15508_v47 = vpop.f32.mrb[46].mxu1  ;;  %15532 = vmatpush3.bf16.msra.mxu1 %v16969_v55 }
 0x81a   :  { %15416 = vmatpush3.bf16.msra.mxu0 %v16937_v27  ;;  %v3676_v54 = vpack.c.bf16 %v15508_v47, %v15507_v28  ;;  %v3663_v48 = vpop.f32.mrb[47].mxu1  ;;  %15533 = vmatprep.subr.bf16.mxu1 %v16970_v22  ;;  %v16971_v27 = vld [vmem:[%s20934_s1 + $0x5d8] sm:$0xff]  }
 0x81b   :  { %15417 = vmatprep.subr.bf16.mxu0 %v17526_v17  ;;  %v3675_v49 = vpack.c.bf16 %v3663_v48, %v3660_v40 }
 0x81d   :  { %15534 = vmatpush3.bf16.msra.mxu1 %v16970_v22 }
 0x81e   :  { %15418 = vmatpush3.bf16.msra.mxu0 %v16938_v21  ;;  %15535 = vmatprep.subr.bf16.mxu1 %v16971_v27 }
 0x81f   :  { %15419 = vmatprep.subr.bf16.mxu0 %v17526_v17 }
 0x821   :  { %15536 = vmatpush3.bf16.msra.mxu1 %v16971_v27 }
 0x822   :  { %15420 = vmatpush3.bf16.msra.mxu0 %v16939_v35 }
 0x823   :  { %15421 = vmatprep.subr.bf16.mxu0 %v17526_v17 }
 0x826   :  { %15422 = vmatpush3.bf16.msra.mxu0 %v16940_v36 }
 0x827   :  { %15423 = vmatprep.subr.bf16.mxu0 %v17526_v17 }
 0x82a   :  { %15424 = vmatpush3.bf16.msra.mxu0 %v16941_v37 }
 0x82b   :  { %15425 = vmatprep.subr.bf16.mxu0 %v17526_v17 }
 0x82e   :  { %15426 = vmatpush3.bf16.msra.mxu0 %v16942_v39 }
 0x82f   :  { %15427 = vmatprep.subr.bf16.mxu0 %v17526_v17 }
 0x832   :  { %15428 = vmatpush3.bf16.msra.mxu0 %v16943_v56 }
 0x833   :  { %15453 = vmatprep.subr.bf16.mxu0 %v18343_v24 }
 0x8e8   :  { %v3011_v58 = vpop.f32.mrb[28].mxu0 }
 0x8e9   :  { %v3012_v59 = vadd.f32 %v12575_v57, %v3011_v58  ;;  %v15411_v60 = vpop.f32.mrb[29].mxu0 }
 0x8ea   :  { %v3014_v61 = vpop.f32.mrb[30].mxu0 }
 0x8eb   :  { %v3017_v45 = vmax.f32 %v3012_v59, 0.0  ;;  %v15412_v46 = vpop.f32.mrb[31].mxu0  ;;  %v16962_v61 = vld [vmem:[%s20934_s1 + $0x590] sm:$0xff]  }
 0x8ec   :  { %v16964_v46 = vld [vmem:[%s20934_s1 + $0x5a0] sm:$0xff]  }
 0x8ed   :  { %v3023_v31 = vmul.f32 %v12584_v43, %v3017_v45  ;;  %v16961_v43 = vld [vmem:[%s20934_s1 + $0x588] sm:$0xff]   ;;  %v16963_v45 = vld [vmem:[%s20934_s1 + $0x598] sm:$0xff]  }
 0x8ef   :  { %v3029_v9 = vadd.f32 %v12585_v2, %v3023_v31  ;;  %v16965_v2 = vld [vmem:[%s20934_s1 + $0x5a8] sm:$0xff]   ;;  %v16966_v31 = vld [vmem:[%s20934_s1 + $0x5b0] sm:$0xff]  }
 0x8f1   :  { %v3030_v10 = vpack.c.bf16 %v3029_v9, %v3029_v9  ;;  %v16967_v9 = vld [vmem:[%s20934_s1 + $0x5b8] sm:$0xff]  }
 0x8f3   :  { %15430 = vmatmul.mubr.bf16.vlgmr.msra.gmra.mrb[32].mxu0 %v3030_v10  ;;  %v16972_v10 = vld [vmem:[%s20934_s1 + $0x5e0] sm:$0xff]  }
 0x8f4   :  { %15454 = vmatpush3.bf16.msra.mxu0 %v18343_v24  ;;  %15457 = vmatprep.mubr.msk.bf16.mxu0 %vm68_vm0, %v17606_v20  ;;  %v16946_v20 = vld [vmem:[%s20934_s1 + $0x550] sm:$0xff]  }
 0x8f5   :  { %15455 = vmatprep.subr.bf16.mxu0 %v18339_v44  ;;  %15537 = vmatprep.subr.bf16.mxu1 %v16972_v10 }
 0x8f6   :  { %15538 = vmatpush3.bf16.msra.mxu1 %v16972_v10 }
 0x8f8   :  { %15456 = vmatpush3.bf16.msra.mxu0 %v18339_v44 }
 0x8f9   :  { %15461 = vmatprep.subr.bf16.mxu0 %v16944_v1 }
 0x8fb   :  { %15458 = vmatmul.mubr.msk.bf16.vlgmr.msra.gmra.mrb[36].mxu0 %vm68_vm0, %v17610_v23  ;;  %v16948_v23 = vld [vmem:[%s20934_s1 + $0x560] sm:$0xff]  }
 0x8fc   :  { %15462 = vmatpush3.bf16.msra.mxu0 %v16944_v1  ;;  %15477 = vmatprep.mubr.bf16.mxu0 %v18343_v24  ;;  %v16949_v24 = vld [vmem:[%s20934_s1 + $0x568] sm:$0xff]  }
 0x8fd   :  { %15463 = vmatprep.subr.bf16.mxu0 %v16945_v11  ;;  %v16973_v1 = vld [vmem:[%s20934_s1 + $0x5e8] sm:$0xff]  }
 0x8fe   :  { %15539 = vmatprep.subr.bf16.mxu1 %v16973_v1 }
 0x8ff   :  { %15540 = vmatpush3.bf16.msra.mxu1 %v16973_v1 }
 0x900   :  { %15464 = vmatpush3.bf16.msra.mxu0 %v16945_v11  ;;  %v16974_v11 = vld [vmem:[%s20934_s1 + $0x5f0] sm:$0xff]  }
 0x901   :  { %15465 = vmatprep.subr.bf16.mxu0 %v16946_v20  ;;  %15541 = vmatprep.subr.bf16.mxu1 %v16974_v11 }
 0x903   :  { %15542 = vmatpush3.bf16.msra.mxu1 %v16974_v11  ;;  %v12746_v11 = vld [vmem:[%s20935_s2 + $0x22] ss:$0 sm:$0xff] }
 0x904   :  { %15466 = vmatpush3.bf16.msra.mxu0 %v16946_v20  ;;  %v16975_v20 = vld [vmem:[%s20934_s1 + $0x5f8] sm:$0xff]  }
 0x905   :  { %15467 = vmatprep.subr.bf16.mxu0 %v16947_v12  ;;  %15543 = vmatprep.subr.bf16.mxu1 %v16975_v20 }
 0x907   :  { %15544 = vmatpush3.bf16.msra.mxu1 %v16975_v20 }
 0x908   :  { %15468 = vmatpush3.bf16.msra.mxu0 %v16947_v12  ;;  %15549 = vmatprep.subr.bf16.mxu1 %v17526_v17  ;;  %v12717_v12 = vld [vmem:[%s20935_s2 + $0x1e] ss:$0 sm:$0xff] }
 0x909   :  { %15469 = vmatprep.subr.bf16.mxu0 %v16948_v23 }
 0x90c   :  { %15470 = vmatpush3.bf16.msra.mxu0 %v16948_v23 }
 0x90d   :  { %15471 = vmatprep.subr.bf16.mxu0 %v16949_v24 }
 0x910   :  { %15472 = vmatpush3.bf16.msra.mxu0 %v16949_v24 }
 0x911   :  { %15473 = vmatprep.subr.bf16.mxu0 %v16950_v13 }
 0x914   :  { %15474 = vmatpush3.bf16.msra.mxu0 %v16950_v13 }
 0x915   :  { %15475 = vmatprep.subr.bf16.mxu0 %v16951_v50 }
 0x918   :  { %15476 = vmatpush3.bf16.msra.mxu0 %v16951_v50  ;;  %v12718_v50 = vld [vmem:[%s20935_s2 + $0x1f] ss:$0 sm:$0xff] }
 0x919   :  { %15481 = vmatprep.subr.bf16.mxu0 %v16952_v14 }
 0x91b   :  { %15478 = vmatmul.mubr.bf16.vlgmr.msra.gmra.mrb[40].mxu0 %v18339_v44  ;;  %v16957_v44 = vld [vmem:[%s20934_s1 + $0x528] sm:$0xff]  }
 0x91c   :  { %15482 = vmatpush3.bf16.msra.mxu0 %v16952_v14 }
 0x91d   :  { %15483 = vmatprep.subr.bf16.mxu0 %v16953_v15 }
 0x920   :  { %15484 = vmatpush3.bf16.msra.mxu0 %v16953_v15 }
 0x921   :  { %15485 = vmatprep.subr.bf16.mxu0 %v16954_v16 }
 0x924   :  { %15486 = vmatpush3.bf16.msra.mxu0 %v16954_v16 }
 0x925   :  { %15487 = vmatprep.subr.bf16.mxu0 %v16955_v18 }
 0x928   :  { %15488 = vmatpush3.bf16.msra.mxu0 %v16955_v18 }
 0x929   :  { %15489 = vmatprep.subr.bf16.mxu0 %v16956_v19 }
 0x92c   :  { %15490 = vmatpush3.bf16.msra.mxu0 %v16956_v19 }
 0x92d   :  { %15491 = vmatprep.subr.bf16.mxu0 %v16957_v44 }
 0x930   :  { %15492 = vmatpush3.bf16.msra.mxu0 %v16957_v44  ;;  %v18566_v44 = vsel %vm3826_vm2, 1.0, %v17526_v17 }
 0x931   :  { %15493 = vmatprep.subr.bf16.mxu0 %v16958_v52  ;;  %v3831_v48 = vmul.f32 %v18566_v44, %v18329_v34  ;;  %v3829_v55 = vmul.f32 %v18566_v44, %v18333_v42  ;;  %v16977_v42 = vld [vmem:[%s20934_s1 + $0x608] sm:$0xff]  }
 0x934   :  { %15494 = vmatpush3.bf16.msra.mxu0 %v16958_v52  ;;  %v12719_v52 = vld [vmem:[%s20935_s2 + $0x20] ss:$0 sm:$0xff] }
 0x935   :  { %15495 = vmatprep.subr.bf16.mxu0 %v16959_v32 }
 0x938   :  { %15496 = vmatpush3.bf16.msra.mxu0 %v16959_v32 }
 0x939   :  { %15509 = vmatprep.subr.bf16.mxu0 %v16960_v25 }
 0x9c6   :  { %v18522_v21 = vpop.f32.mrb[32].mxu0 }
 0x9c7   :  { %v15431_v35 = vpop.f32.mrb[33].mxu0 }
 0x9c8   :  { %v3138_v36 = vpop.f32.mrb[34].mxu0  ;;  %v3832_v35 = vmul.f32 %v18566_v44, %v18331_v38  ;;  %v16976_v38 = vld [vmem:[%s20934_s1 + $0x600] sm:$0xff]  }
 0x9c9   :  { %v15432_v37 = vpop.f32.mrb[35].mxu0 }
 0x9ce   :  { %v15459_v39 = vpop.f32.mrb[36].mxu0 }
 0x9cf   :  { %v3381_v56 = vpop.f32.mrb[37].mxu0 }
 0x9d0   :  { %v15460_v57 = vpop.f32.mrb[38].mxu0 }
 0x9d1   :  { %v3397_v58 = vpack.c.bf16 %v15460_v57, %v15459_v39  ;;  %v3384_v59 = vpop.f32.mrb[39].mxu0  ;;  %v3830_v39 = vmul.f32 %v18566_v44, %v18335_v29  ;;  %v16978_v29 = vld [vmem:[%s20934_s1 + $0x610] sm:$0xff]  }
 0x9d2   :  { %v3396_v60 = vpack.c.bf16 %v3384_v59, %v3381_v56 }
 0x9d4   :  { %15497 = vmatprep.mubr.bf16.mxu0 %v3396_v60 }
 0x9d5   :  { %15498 = vmatmul.mubr.bf16.vlgmr.msra.gmra.mrb[40].mxu0 %v3397_v58 }
 0x9d6   :  { %15510 = vmatpush3.bf16.msra.mxu0 %v16960_v25  ;;  %15525 = vmatprep.mubr.bf16.mxu0 %v3675_v49 }
 0x9d7   :  { %15511 = vmatprep.subr.bf16.mxu0 %v16961_v43 }
 0x9da   :  { %15512 = vmatpush3.bf16.msra.mxu0 %v16961_v43  ;;  %v16979_v43 = vld [vmem:[%s20934_s1 + $0x618] sm:$0xff]  }
 0x9db   :  { %15513 = vmatprep.subr.bf16.mxu0 %v16962_v61 }
 0x9de   :  { %15514 = vmatpush3.bf16.msra.mxu0 %v16962_v61  ;;  %v16980_v61 = vld [vmem:[%s20934_s1 + $0x620] sm:$0xff]  }
 0x9df   :  { %15515 = vmatprep.subr.bf16.mxu0 %v16963_v45 }
 0x9e2   :  { %15516 = vmatpush3.bf16.msra.mxu0 %v16963_v45  ;;  %v16981_v45 = vld [vmem:[%s20934_s1 + $0x628] sm:$0xff]  }
 0x9e3   :  { %15517 = vmatprep.subr.bf16.mxu0 %v16964_v46 }
 0x9e6   :  { %15518 = vmatpush3.bf16.msra.mxu0 %v16964_v46  ;;  %v16982_v46 = vld [vmem:[%s20934_s1 + $0x630] sm:$0xff]  }
 0x9e7   :  { %15519 = vmatprep.subr.bf16.mxu0 %v16965_v2 }
 0x9ea   :  { %15520 = vmatpush3.bf16.msra.mxu0 %v16965_v2  ;;  %v16983_v2 = vld [vmem:[%s20934_s1 + $0x638] sm:$0xff]  }
 0x9eb   :  { %15521 = vmatprep.subr.bf16.mxu0 %v16966_v31 }
 0x9ee   :  { %15522 = vmatpush3.bf16.msra.mxu0 %v16966_v31  ;;  %v12737_v31 = vld [vmem:[%s20935_s2 + $0x21] ss:$0 sm:$0xff] }
 0x9ef   :  { %15523 = vmatprep.subr.bf16.mxu0 %v16967_v9 }
 0x9f2   :  { %15524 = vmatpush3.bf16.msra.mxu0 %v16967_v9 }
 0x9f5   :  { %15526 = vmatmul.mubr.bf16.vlgmr.msra.gmra.mrb[40].mxu0 %v3676_v54 }
 0xac8   :  { %v15527_v23 = vpop.f32.mrb[40].mxu0 }
 0xac9   :  { %v3802_v24 = vadd.f32 %v15527_v23, %v12717_v12  ;;  %v3776_v13 = vpop.f32.mrb[41].mxu0 }
 0xaca   :  { %v3800_v14 = vadd.f32 %v12717_v12, %v3776_v13  ;;  %v15528_v15 = vpop.f32.mrb[42].mxu0 }
 0xacb   :  { %v3806_v16 = vmax.f32 %v3802_v24, 0.0  ;;  %v3803_v18 = vadd.f32 %v15528_v15, %v12717_v12  ;;  %v3779_v19 = vpop.f32.mrb[43].mxu0 }
 0xacc   :  { %v3804_v32 = vmax.f32 %v3800_v14, 0.0  ;;  %v3801_v25 = vadd.f32 %v12717_v12, %v3779_v19 }
 0xacd   :  { %v3815_v28 = vmul.f32 %v12718_v50, %v3806_v16  ;;  %v3807_v40 = vmax.f32 %v3803_v18, 0.0  ;;  %v12747_v18 = vld [vmem:[%s20935_s2 + $0x23] ss:$0 sm:$0xff] }
 0xace   :  { %v3813_v47 = vmul.f32 %v12718_v50, %v3804_v32  ;;  %v3805_v54 = vmax.f32 %v3801_v25, 0.0 }
 0xacf   :  { %v3824_v49 = vadd.f32 %v12719_v52, %v3815_v28  ;;  %v3816_v51 = vmul.f32 %v12718_v50, %v3807_v40 }
 0xad0   :  { %v3822_v22 = vadd.f32 %v12719_v52, %v3813_v47  ;;  %v3814_v27 = vmul.f32 %v12718_v50, %v3805_v54 }
 0xad1   :  { %v3835_v36 = vadd.f32 %v3831_v48, %v3824_v49  ;;  %v3825_v37 = vadd.f32 %v12719_v52, %v3816_v51 }
 0xad2   :  { %v3823_v56 = vadd.f32 %v12719_v52, %v3814_v27  ;;  %v3833_v57 = vadd.f32 %v3829_v55, %v3822_v22 }
 0xad3   :  { %v3836_v58 = vadd.f32 %v3832_v35, %v3825_v37 }
 0xad4   :  { %v3834_v59 = vadd.f32 %v3830_v39, %v3823_v56 }
 0xad5   :  { %v3838_v34 = vpack.c.bf16 %v3836_v58, %v3835_v36 }
 0xad6   :  { %v3837_v60 = vpack.c.bf16 %v3834_v59, %v3833_v57 }
 0xad8   :  { %15545 = vmatprep.mubr.bf16.mxu1 %v3837_v60 }
 0xad9   :  { %15546 = vmatmul.mubr.bf16.vlgmr.msra.gmra.mrb[48].mxu1 %v3838_v34 }
 0xada   :  { %15565 = vmatprep.mubr.msk.bf16.mxu1 %vm17527_vm15, %v17526_v17  ;;  %15550 = vmatpush3.bf16.msra.mxu1 %v16976_v38 }
 0xadb   :  { %15551 = vmatprep.subr.bf16.mxu1 %v17526_v17 }
 0xade   :  { %15552 = vmatpush3.bf16.msra.mxu1 %v16977_v42 }
 0xadf   :  { %15553 = vmatprep.subr.bf16.mxu1 %v17526_v17 }
 0xae2   :  { %15554 = vmatpush3.bf16.msra.mxu1 %v16978_v29 }
 0xae3   :  { %15555 = vmatprep.subr.bf16.mxu1 %v17526_v17 }
 0xae6   :  { %15556 = vmatpush3.bf16.msra.mxu1 %v16979_v43 }
 0xae7   :  { %15557 = vmatprep.subr.bf16.mxu1 %v17526_v17 }
 0xaea   :  { %15558 = vmatpush3.bf16.msra.mxu1 %v16980_v61 }
 0xaeb   :  { %15559 = vmatprep.subr.bf16.mxu1 %v17526_v17 }
 0xaee   :  { %15560 = vmatpush3.bf16.msra.mxu1 %v16981_v45  ;;  %v16984_v45 = vld [vmem:[%s20934_s1 + $0x640] sm:$0xff]  }
 0xaef   :  { %15561 = vmatprep.subr.bf16.mxu1 %v17526_v17 }
 0xaf2   :  { %15562 = vmatpush3.bf16.msra.mxu1 %v16982_v46 }
 0xaf3   :  { %15563 = vmatprep.subr.bf16.mxu1 %v17526_v17 }
 0xaf6   :  { %15564 = vmatpush3.bf16.msra.mxu1 %v16983_v2  ;;  %v16985_v2 = vld [vmem:[%s20934_s1 + $0x648] sm:$0xff]  }
 0xaf7   :  { %15569 = vmatprep.subr.bf16.mxu1 %v17526_v17 }
 0xbac   :  { %v15547_v9 = vpop.f32.mrb[48].mxu1 }
 0xbad   :  { %v3952_v10 = vadd.f32 %v15547_v9, %v12737_v31  ;;  %v3943_v1 = vpop.f32.mrb[49].mxu1  ;;  %v16987_v9 = vld [vmem:[%s20934_s1 + $0x658] sm:$0xff]  }
 0xbae   :  { %v3944_v20 = vadd.f32 %v12737_v31, %v3943_v1  ;;  %v15548_v12 = vpop.f32.mrb[50].mxu1  ;;  %v16989_v1 = vld [vmem:[%s20934_s1 + $0x668] sm:$0xff]  }
 0xbaf   :  { %v3960_v23 = vmax.f32 %v3952_v10, 0.0  ;;  %v3955_v24 = vadd.f32 %v15548_v12, %v12737_v31  ;;  %v3946_v13 = vpop.f32.mrb[51].mxu1  ;;  %v16988_v10 = vld [vmem:[%s20934_s1 + $0x660] sm:$0xff]  }
 0xbb0   :  { %v3958_v50 = vmax.f32 %v3944_v20, 0.0  ;;  %v3947_v14 = vadd.f32 %v12737_v31, %v3946_v13  ;;  %v16986_v31 = vld [vmem:[%s20934_s1 + $0x650] sm:$0xff]   ;;  %v16991_v20 = vld [vmem:[%s20934_s1 + $0x678] sm:$0xff]   ;;  %v12764_v12 = vld [vmem:[%s20935_s2 + $0x24] ss:$0 sm:$0xff] }
 0xbb1   :  { %v3969_v15 = vmul.f32 %v12746_v11, %v3960_v23  ;;  %v3961_v16 = vmax.f32 %v3955_v24, 0.0 }
 0xbb2   :  { %v3967_v19 = vmul.f32 %v12746_v11, %v3958_v50  ;;  %v3959_v52 = vmax.f32 %v3947_v14, 0.0  ;;  %v12773_v50 = vld [vmem:[%s20935_s2 + $0x25] ss:$0 sm:$0xff] }
 0xbb3   :  { %v3970_v32 = vmul.f32 %v12746_v11, %v3961_v16  ;;  %v18622_v28 = vadd.f32 %v12747_v18, %v3969_v15 }
 0xbb4   :  { %v3968_v25 = vmul.f32 %v12746_v11, %v3959_v52  ;;  %v18626_v47 = vadd.f32 %v12747_v18, %v3967_v19  ;;  %v16990_v11 = vld [vmem:[%s20934_s1 + $0x670] sm:$0xff]  }
 0xbb5   :  { %v18624_v40 = vadd.f32 %v12747_v18, %v3970_v32 }
 0xbb6   :  { %v18628_v54 = vadd.f32 %v12747_v18, %v3968_v25  ;;  %v12774_v18 = vld [vmem:[%s20935_s2 + $0x26] ss:$0 sm:$0xff] }
 0xbb7   :  { %v3987_v48 = vadd.f32 %v18624_v40, %v18622_v28  ;;  %v16992_v25 = vld [vmem:[%s20934_s1 + $0x680] sm:$0xff]  }
 0xbb8   :  { %v3980_v49 = vadd.f32 %v18628_v54, %v18626_v47  ;;  %15589 = vmatprep.subr.bf16.mxu0 %v16992_v25 }
 0xbb9   :  { %v3988_v51 = vrot.slane %v3987_v48, 4  ;;  %15590 = vmatpush3.bf16.msra.mxu0 %v16992_v25 }
 0xbba   :  { %v3981_v55 = vrot.slane %v3980_v49, 4 }
 0xbbb   :  { %v3989_v22 = vadd.f32 %v3988_v51, %v3987_v48  ;;  %v16993_v48 = vld [vmem:[%s20934_s1 + $0x688] sm:$0xff]   ;;  %v16995_v51 = vld [vmem:[%s20934_s1 + $0x698] sm:$0xff]  }
 0xbbc   :  { %v3982_v27 = vadd.f32 %v3981_v55, %v3980_v49  ;;  %15591 = vmatprep.subr.bf16.mxu0 %v16993_v48  ;;  %v16994_v49 = vld [vmem:[%s20934_s1 + $0x690] sm:$0xff]   ;;  %v16996_v55 = vld [vmem:[%s20934_s1 + $0x6a0] sm:$0xff]  }
 0xbbd   :  { %v3990_v35 = vrot.slane %v3989_v22, 2  ;;  %15592 = vmatpush3.bf16.msra.mxu0 %v16993_v48 }
 0xbbe   :  { %v3983_v36 = vrot.slane %v3982_v27, 2  ;;  %15593 = vmatprep.subr.bf16.mxu0 %v16994_v49 }
 0xbbf   :  { %v3991_v37 = vadd.f32 %v3990_v35, %v3989_v22  ;;  %v16997_v22 = vld [vmem:[%s20934_s1 + $0x6a8] sm:$0xff]   ;;  %v16999_v35 = vld [vmem:[%s20934_s1 + $0x6b8] sm:$0xff]  }
 0xbc0   :  { %v3984_v39 = vadd.f32 %v3983_v36, %v3982_v27  ;;  %v16998_v27 = vld [vmem:[%s20934_s1 + $0x6b0] sm:$0xff]   ;;  %v12602_v36 = vld [vmem:[%s20935_s2 + $0x18] ss:$0 sm:$0xff] }
 0xbc1   :  { %v3992_v56 = vrot.slane %v3991_v37, 1  ;;  %15594 = vmatpush3.bf16.msra.mxu0 %v16994_v49 }
 0xbc2   :  { %v3985_v57 = vrot.slane %v3984_v39, 1  ;;  %15595 = vmatprep.subr.bf16.mxu0 %v16995_v51 }
 0xbc3   :  { %v3993_v58 = vadd.f32 %v3992_v56, %v3991_v37  ;;  %v3136_v37 = vadd.f32 %v12602_v36, %v18522_v21  ;;  %v12612_v21 = vld [vmem:[%s20935_s2 + $0x19] ss:$0 sm:$0xff] }
 0xbc4   :  { %v3986_v59 = vadd.f32 %v3985_v57, %v3984_v39 }
 0xbc5   :  { %v3995_v34 = vmul.f32 0.0625, %v3993_v58  ;;  %15596 = vmatpush3.bf16.msra.mxu0 %v16995_v51  ;;  %v12611_v39 = vmul.f32 -1.442695, %v3136_v37  ;;  %v12791_v58 = vld [vmem:[%s20935_s2 + $0x27] ss:$0 sm:$0xff] }
 0xbc6   :  { %v3994_v60 = vmul.f32 0.0625, %v3986_v59  ;;  %15597 = vmatprep.subr.bf16.mxu0 %v16996_v55 }
 0xbc7   :  { %v3997_v38 = vpack.c.bf16 %v3995_v34, %v3995_v34  ;;  %17400 = vpow2.f32 %v12611_v39 }
 0xbc8   :  { %v3996_v42 = vpack.c.bf16 %v3994_v60, %v3994_v60 }
 0xbc9   :  { %v4023_v29 = vunpack.c.l.b16 %v3997_v38  ;;  %15598 = vmatpush3.bf16.msra.mxu0 %v16996_v55 }
 0xbca   :  { %v4022_v43 = vunpack.c.l.b16 %v3996_v42  ;;  %15599 = vmatprep.subr.bf16.mxu0 %v16997_v22 }
 0xbcc   :  { %v4024_v61 = vsel %vm2925_vm1, %v4023_v29, %v4022_v43  ;;  %v17528_v43 = vmov 1966171168  }
 0xbcd   :  { %v4025_v46 = vpack.c.b16 %v4024_v61, %v4024_v61  ;;  %15600 = vmatpush3.bf16.msra.mxu0 %v16997_v22  ;;  %v3161_v61 = vunpack.c.l.s4 %v17528_v43 }
 0xbce   :  { %15601 = vmatprep.subr.bf16.mxu0 %v16998_v27 }
 0xbcf   :  { %15566 = vmatmul.mubr.bf16.vlgmr.msra.gmra.mrb[52].mxu1 %v4025_v46  ;;  %v3162_v46 = vunpack.c.0.s8 %v3161_v61 }
 0xbd0   :  { %15570 = vmatpush3.bf16.msra.mxu1 %v16984_v45  ;;  %15585 = vmatprep.mubr.msk.bf16.mxu1 %vm17527_vm15, %v17526_v17 }
 0xbd1   :  { %15571 = vmatprep.subr.bf16.mxu1 %v17526_v17  ;;  %15602 = vmatpush3.bf16.msra.mxu0 %v16998_v27  ;;  %v17401_v56 = vpop.eup %17400 }
 0xbd2   :  { %15603 = vmatprep.subr.bf16.mxu0 %v16999_v35  ;;  %v3144_v57 = vadd.f32 1.0, %v17401_v56 }
 0xbd4   :  { %15572 = vmatpush3.bf16.msra.mxu1 %v16985_v2  ;;  %17402 = vrcp.f32 %v3144_v57 }
 0xbd5   :  { %15573 = vmatprep.subr.bf16.mxu1 %v17526_v17  ;;  %15604 = vmatpush3.bf16.msra.mxu0 %v16999_v35 }
 0xbd8   :  { %15574 = vmatpush3.bf16.msra.mxu1 %v16986_v31  ;;  %v12613_v31 = vld [vmem:[%s20935_s2 + $0x1a] ss:$0 sm:$0xff] }
 0xbd9   :  { %15575 = vmatprep.subr.bf16.mxu1 %v17526_v17 }
 0xbdc   :  { %15576 = vmatpush3.bf16.msra.mxu1 %v16987_v9 }
 0xbdd   :  { %15577 = vmatprep.subr.bf16.mxu1 %v17526_v17 }
 0xbde   :  { %v17403_v45 = vpop.eup %17402 }
 0xbdf   :  { %v3152_v2 = vmul.f32 %v17403_v45, %v12612_v21 }
 0xbe0   :  { %15578 = vmatpush3.bf16.msra.mxu1 %v16988_v10  ;;  %v18715_v10 = vsub.s32 %v3162_v46, %v17569_v4  ;;  %v4450_v46 = vadd.s32 4294967293, %v17574_v5 }
 0xbe1   :  { %15579 = vmatprep.subr.bf16.mxu1 %v17526_v17 }
 0xbe2   :  { %vm4454_vm5 = vcmp.eq.s32.totalorder %v17567_v3, %v4450_v46  ;;  %v17004_v46 = vld [vmem:[%s20934_s1 + $0x720] sm:$0xff]  }
 0xbe4   :  { %15580 = vmatpush3.bf16.msra.mxu1 %v16989_v1  ;;  %v3158_v1 = vadd.f32 %v12613_v31, %v3152_v2  ;;  %v4470_v31 = vsel %vm4454_vm5, 1.0, %v17526_v17 }
 0xbe5   :  { %15581 = vmatprep.subr.bf16.mxu1 %v17526_v17 }
 0xbe8   :  { %15582 = vmatpush3.bf16.msra.mxu1 %v16990_v11 }
 0xbe9   :  { %15583 = vmatprep.subr.bf16.mxu1 %v17526_v17 }
 0xbec   :  { %15584 = vmatpush3.bf16.msra.mxu1 %v16991_v20  ;;  %v3166_v20 = vrot.slane %v3158_v1, %v18715_v10  ;;  %v4763_v1 = vadd.s32 3, %v17574_v5 }
 0xbee   :  { %vm4767_vm7 = vcmp.eq.s32.totalorder %v17567_v3, %v4763_v1  ;;  %vm4777_vm8 = vcmp.lt.s32.totalorder %v4763_v1, 16  ;;  %v17007_v1 = vld [vmem:[%s20934_s1 + $0x738] sm:$0xff]  }
 0xbef   :  { %vm4779_vm10 = vmand %vm4767_vm7, %vm4777_vm8 }
 0xca2   :  { %v4109_v23 = vpop.f32.mrb[52].mxu1 }
 0xca3   :  { %v4110_v24 = vadd.f32 %v12764_v12, %v4109_v23  ;;  %v15567_v13 = vpop.f32.mrb[53].mxu1  ;;  %v3167_v12 = vcombine.high %v3166_v20, %v3166_v20  ;;  %v12801_v23 = vld [vmem:[%s20935_s2 + $0x28] ss:$0 sm:$0xff] }
 0xca4   :  { %v4112_v14 = vpop.f32.mrb[54].mxu1  ;;  %v18723_v13 = vsub.s32 0, %v17569_v4 }
 0xca5   :  { %v4115_v15 = vmax.f32 %v4110_v24, 0.0  ;;  %v15568_v16 = vpop.f32.mrb[55].mxu1  ;;  %v3174_v24 = vrot.slane %v3166_v20, %v18715_v10  ;;  %v12802_v14 = vld [vmem:[%s20935_s2 + $0x29] ss:$0 sm:$0xff] }
 0xca7   :  { %v4121_v19 = vmul.f32 %v12773_v50, %v4115_v15  ;;  %v3181_v15 = vrot.slane %v3167_v12, %v18715_v10  ;;  %v4783_v12 = vsel %vm4779_vm10, 1.0, %v17526_v17 }
 0xca9   :  { %v4127_v52 = vadd.f32 %v12774_v18, %v4121_v19  ;;  %v3185_v18 = vrot.slane %v3174_v24, %v18723_v13  ;;  %v12819_v24 = vld [vmem:[%s20935_s2 + $0x2a] ss:$0 sm:$0xff] }
 0xcab   :  { %v4128_v32 = vpack.c.bf16 %v4127_v52, %v4127_v52  ;;  %v3189_v52 = vrot.slane %v3181_v15, %v18723_v13  ;;  %v3192_v25 = vmul.f32 %v3185_v18, %v18398_v6  ;;  %v3193_v48 = vmul.f32 %v3185_v18, %v18400_v0 }
 0xcad   :  { %15586 = vmatmul.mubr.bf16.vlgmr.msra.gmra.mrb[56].mxu1 %v4128_v32  ;;  %v3194_v55 = vmul.f32 %v3189_v52, %v18394_v62  ;;  %v3195_v22 = vmul.f32 %v3189_v52, %v18396_v63  ;;  %v3196_v36 = vadd.f32 %v3192_v25, %v18131_v26  ;;  %v3197_v37 = vadd.f32 %v3193_v48, %v18135_v41 }
 0xcaf   :  { %v3198_v56 = vadd.f32 %v3194_v55, %v18129_v53  ;;  %v3199_v62 = vadd.f32 %v3195_v22, %v18133_v33 }
 0xcb1   :  { %v3203_v43 = vmul.f32 0.75, %v3199_v62 }
 0xd80   :  { %v4233_v59 = vpop.f32.mrb[56].mxu1 }
 0xd81   :  { %v4234_v34 = vadd.f32 %v12791_v58, %v4233_v59  ;;  %v15587_v60 = vpop.f32.mrb[57].mxu1 }
 0xd82   :  { %v4236_v38 = vpop.f32.mrb[58].mxu1  ;;  %v3201_v60 = vmul.f32 0.75, %v3197_v37 }
 0xd83   :  { %v12800_v42 = vmul.f32 -1.442695, %v4234_v34  ;;  %v15588_v29 = vpop.f32.mrb[59].mxu1  ;;  %v3200_v34 = vmul.f32 0.75, %v3196_v36 }
 0xd84   :  { %v3202_v29 = vmul.f32 0.75, %v3198_v56  ;;  %v4764_v56 = vadd.s32 3, %v17578_v7 }
 0xd85   :  { %17404 = vpow2.f32 %v12800_v42 }
 0xd8f   :  { %v17405_v9 = vpop.eup %17404 }
 0xd90   :  { %v4242_v11 = vadd.f32 1.0, %v17405_v9 }
 0xd92   :  { %17406 = vrcp.f32 %v4242_v11  ;;  %v4762_v11 = vadd.s32 3, %v17569_v4 }
 0xd94   :  { %vm4766_vm9 = vcmp.eq.s32.totalorder %v17567_v3, %v4762_v11  ;;  %v17008_v11 = vld [vmem:[%s20934_s1 + $0x6c0] sm:$0xff]  }
 0xd95   :  { %v4782_v20 = vsel %vm4766_vm9, 1.0, %v17526_v17 }
 0xd9c   :  { %v17407_v50 = vpop.eup %17406 }
 0xd9d   :  { %v4250_v16 = vmul.f32 %v17407_v50, %v12801_v23  ;;  %v18788_v23 = vpack.c.bf16 %v4783_v12, %v4782_v20  ;;  %v17009_v20 = vld [vmem:[%s20934_s1 + $0x6c8] sm:$0xff]   ;;  %v17010_v12 = vld [vmem:[%s20934_s1 + $0x6d0] sm:$0xff]  }
 0xd9f   :  { %v4256_v19 = vadd.f32 %v12802_v14, %v4250_v16  ;;  %v12828_v16 = vld [vmem:[%s20935_s2 + $0x2b] ss:$0 sm:$0xff] }
 0xda1   :  { %v4264_v32 = vrot.slane %v4256_v19, %v18715_v10 }
 0xda3   :  { %v4265_v49 = vcombine.high %v4264_v32, %v4264_v32  ;;  %v4272_v51 = vrot.slane %v4264_v32, %v18715_v10 }
 0xda5   :  { %v4283_v27 = vrot.slane %v4272_v51, %v18723_v13  ;;  %v4279_v35 = vrot.slane %v4265_v49, %v18715_v10  ;;  %v4451_v51 = vadd.s32 4294967293, %v17578_v7 }
 0xda7   :  { %v4290_v39 = vmul.f32 %v4283_v27, %v18626_v47  ;;  %v4291_v6 = vmul.f32 %v4283_v27, %v18628_v54  ;;  %v4287_v0 = vrot.slane %v4279_v35, %v18723_v13  ;;  %v4765_v27 = vadd.s32 3, %v17581_v8  ;;  %v12829_v35 = vld [vmem:[%s20935_s2 + $0x2c] ss:$0 sm:$0xff] }
 0xda8   :  { %vm4455_vm11 = vcmp.eq.s32.totalorder %v17567_v3, %v4451_v51 }
 0xda9   :  { %v4294_v63 = vadd.f32 %v4290_v39, %v18131_v26  ;;  %v4295_v57 = vadd.f32 %v4291_v6, %v18135_v41  ;;  %v4292_v58 = vmul.f32 %v4287_v0, %v18622_v28  ;;  %v4293_v59 = vmul.f32 %v4287_v0, %v18624_v40 }
 0xdaa   :  { %v4452_v0 = vadd.s32 4294967293, %v17581_v8  ;;  %vm4769_vm12 = vcmp.eq.s32.totalorder %v17567_v3, %v4765_v27 }
 0xdab   :  { %v4298_v38 = vmul.f32 0.25, %v4294_v63  ;;  %v4299_v47 = vmul.f32 0.25, %v4295_v57  ;;  %v4296_v54 = vadd.f32 %v4292_v58, %v18129_v53  ;;  %v4297_v42 = vadd.f32 %v4293_v59, %v18133_v33  ;;  %vm4781_vm2 = vmand %vm4769_vm12, %vm4777_vm8 }
 0xdac   :  { %v4449_v33 = vadd.s32 4294967293, %v17569_v4  ;;  %vm4456_vm14 = vcmp.eq.s32.totalorder %v17567_v3, %v4452_v0 }
 0xdad   :  { %v18752_v61 = vadd.f32 %v4298_v38, %v3200_v34  ;;  %v18754_v45 = vadd.f32 %v4299_v47, %v3201_v60  ;;  %v4300_v26 = vmul.f32 0.25, %v4296_v54  ;;  %v4301_v41 = vmul.f32 0.25, %v4297_v42  ;;  %v17000_v42 = vld [vmem:[%s20934_s1 + $0x700] sm:$0xff]  }
 0xdae   :  { %vm4453_vm3 = vcmp.eq.s32.totalorder %v17567_v3, %v4449_v33  ;;  %vm4457_vm4 = vcmp.ge.s32.totalorder %v4449_v33, 0  ;;  %v4472_v38 = vsel %vm4456_vm14, 1.0, %v17526_v17  ;;  %v4785_v47 = vsel %vm4781_vm2, 1.0, %v17526_v17  ;;  %v17003_v33 = vld [vmem:[%s20934_s1 + $0x718] sm:$0xff]  }
 0xdaf   :  { %v18758_v28 = vpack.c.bf16 %v18754_v45, %v18752_v61  ;;  %v18760_v40 = vadd.f32 %v4300_v26, %v3202_v29  ;;  %v18762_v21 = vadd.f32 %v4301_v41, %v3203_v43  ;;  %vm4459_vm6 = vmand %vm4453_vm3, %vm4457_vm4  ;;  %vm4768_vm3 = vcmp.eq.s32.totalorder %v17567_v3, %v4764_v56  ;;  %v17001_v26 = vld [vmem:[%s20934_s1 + $0x708] sm:$0xff]   ;;  %v17002_v41 = vld [vmem:[%s20934_s1 + $0x710] sm:$0xff]  }
 0xdb0   :  { %v4469_v2 = vsel %vm4459_vm6, 1.0, %v17526_v17  ;;  %vm4461_vm13 = vmand %vm4455_vm11, %vm4457_vm4  ;;  %v4784_v54 = vsel %vm4768_vm3, 1.0, %v17526_v17  ;;  %v17017_v56 = vld [vmem:[%s20934_s1 + $0x748] sm:$0xff]  }
 0xdb1   :  { %15605 = vmatprep.mubr.bf16.mxu0 %v18758_v28  ;;  %v18767_v53 = vpack.c.bf16 %v18762_v21, %v18760_v40  ;;  %v18777_v9 = vpack.c.bf16 %v4470_v31, %v4469_v2  ;;  %v4471_v60 = vsel %vm4461_vm13, 1.0, %v17526_v17  ;;  %v18832_v43 = vpack.c.bf16 %v4785_v47, %v4784_v54  ;;  %v17005_v2 = vld [vmem:[%s20934_s1 + $0x728] sm:$0xff]   ;;  %v17006_v31 = vld [vmem:[%s20934_s1 + $0x730] sm:$0xff]   ;;  %v17023_v54 = vld [vmem:[%s20934_s1 + $0x778] sm:$0xff]  }
 0xdb2   :  { %v18830_v29 = vpack.c.bf16 %v4472_v38, %v4471_v60  ;;  %v17020_v60 = vld [vmem:[%s20934_s1 + $0x760] sm:$0xff]   ;;  %v17021_v38 = vld [vmem:[%s20934_s1 + $0x768] sm:$0xff]   ;;  %v17022_v47 = vld [vmem:[%s20934_s1 + $0x770] sm:$0xff]  }
 0xdb3   :  { %15606 = vmatmul.mubr.bf16.vlgmr.msra.gmra.mrb[44].mxu0 %v18767_v53  ;;  %15613 = vmatprep.mubr.msk.bf16.mxu1 %vm68_vm0, %v18777_v9 }
 0xdb4   :  { %15661 = vmatprep.mubr.msk.bf16.mxu0 %vm68_vm0, %v18788_v23 }
 0xe86   :  { %v15607_v50 = vpop.f32.mrb[44].mxu0 }
 0xe87   :  { %v4421_v14 = vadd.f32 %v15607_v50, %v12819_v24  ;;  %v4412_v15 = vpop.f32.mrb[45].mxu0  ;;  %v17012_v50 = vld [vmem:[%s20934_s1 + $0x6e0] sm:$0xff]  }
 0xe88   :  { %v4413_v18 = vadd.f32 %v12819_v24, %v4412_v15  ;;  %v15608_v19 = vpop.f32.mrb[46].mxu0  ;;  %v17014_v15 = vld [vmem:[%s20934_s1 + $0x6f0] sm:$0xff]  }
 0xe89   :  { %v4429_v52 = vmax.f32 %v4421_v14, 0.0  ;;  %v4424_v32 = vadd.f32 %v15608_v19, %v12819_v24  ;;  %v4415_v25 = vpop.f32.mrb[47].mxu0  ;;  %v17013_v14 = vld [vmem:[%s20934_s1 + $0x6e8] sm:$0xff]   ;;  %v17032_v19 = vld [vmem:[%s20934_s1 + $0x780] sm:$0xff]  }
 0xe8a   :  { %v4427_v48 = vmax.f32 %v4413_v18, 0.0  ;;  %v4416_v49 = vadd.f32 %v12819_v24, %v4415_v25  ;;  %v17011_v24 = vld [vmem:[%s20934_s1 + $0x6d8] sm:$0xff]   ;;  %v17016_v18 = vld [vmem:[%s20934_s1 + $0x740] sm:$0xff]  }
 0xe8b   :  { %v4438_v55 = vmul.f32 %v12828_v16, %v4429_v52  ;;  %v4430_v22 = vmax.f32 %v4424_v32, 0.0  ;;  %v17033_v52 = vld [vmem:[%s20934_s1 + $0x788] sm:$0xff]   ;;  %v17034_v32 = vld [vmem:[%s20934_s1 + $0x790] sm:$0xff]   ;;  %v17035_v25 = vld [vmem:[%s20934_s1 + $0x798] sm:$0xff]  }
 0xe8c   :  { %v4436_v36 = vmul.f32 %v12828_v16, %v4427_v48  ;;  %v4428_v37 = vmax.f32 %v4416_v49, 0.0 }
 0xe8d   :  { %v4439_v39 = vmul.f32 %v12828_v16, %v4430_v22  ;;  %v18806_v62 = vadd.f32 %v12829_v35, %v4438_v55 }
 0xe8e   :  { %v4437_v6 = vmul.f32 %v12828_v16, %v4428_v37  ;;  %v18811_v57 = vadd.f32 %v12829_v35, %v4436_v36  ;;  %v17015_v16 = vld [vmem:[%s20934_s1 + $0x6f8] sm:$0xff]  }
 0xe8f   :  { %v18808_v63 = vadd.f32 %v12829_v35, %v4439_v39 }
 0xe90   :  { %v18813_v58 = vadd.f32 %v12829_v35, %v4437_v6 }
 0xe91   :  { %v4476_v59 = vpack.c.bf16 %v18808_v63, %v18806_v62 }
 0xe92   :  { %v4475_v34 = vpack.c.bf16 %v18813_v58, %v18811_v57 }
 0xe94   :  { %15609 = vmatprep.subr.bf16.mxu1 %v4475_v34  ;;  %15657 = vmatprep.subr.bf16.mxu0 %v4475_v34 }
 0xe95   :  { %15610 = vmatpush3.bf16.msra.mxu1 %v4475_v34  ;;  %15658 = vmatpush3.bf16.msra.mxu0 %v4475_v34 }
 0xe96   :  { %15611 = vmatprep.subr.bf16.mxu1 %v4476_v59  ;;  %15659 = vmatprep.subr.bf16.mxu0 %v4476_v59 }
 0xe99   :  { %15612 = vmatpush3.bf16.msra.mxu1 %v4476_v59  ;;  %15660 = vmatpush3.bf16.msra.mxu0 %v4476_v59 }
 0xe9a   :  { %15617 = vmatprep.subr.bf16.mxu1 %v17000_v42  ;;  %15685 = vmatprep.subr.bf16.mxu0 %v17032_v19 }
 0xe9c   :  { %15614 = vmatmul.mubr.msk.bf16.vlgmr.msra.gmra.mrb[60].mxu1 %vm68_vm0, %v18830_v29  ;;  %15662 = vmatmul.mubr.msk.bf16.vlgmr.msra.gmra.mrb[48].mxu0 %vm68_vm0, %v18832_v43 }
 0xe9d   :  { %15618 = vmatpush3.bf16.msra.mxu1 %v17000_v42  ;;  %15633 = vmatprep.mubr.bf16.mxu1 %v4475_v34  ;;  %v17019_v34 = vld [vmem:[%s20934_s1 + $0x758] sm:$0xff]   ;;  %v17024_v42 = vld [vmem:[%s20934_s1 + $0x840] sm:$0xff]  }
 0xe9e   :  { %15619 = vmatprep.subr.bf16.mxu1 %v17001_v26  ;;  %15686 = vmatpush3.bf16.msra.mxu0 %v17032_v19 }
 0xe9f   :  { %15687 = vmatprep.subr.bf16.mxu0 %v17033_v52 }
 0xea1   :  { %15620 = vmatpush3.bf16.msra.mxu1 %v17001_v26  ;;  %v17025_v26 = vld [vmem:[%s20934_s1 + $0x848] sm:$0xff]  }
 0xea2   :  { %15621 = vmatprep.subr.bf16.mxu1 %v17002_v41  ;;  %15688 = vmatpush3.bf16.msra.mxu0 %v17033_v52 }
 0xea3   :  { %15689 = vmatprep.subr.bf16.mxu0 %v17034_v32 }
 0xea5   :  { %15622 = vmatpush3.bf16.msra.mxu1 %v17002_v41  ;;  %v17026_v41 = vld [vmem:[%s20934_s1 + $0x850] sm:$0xff]  }
 0xea6   :  { %15623 = vmatprep.subr.bf16.mxu1 %v17003_v33  ;;  %15690 = vmatpush3.bf16.msra.mxu0 %v17034_v32 }
 0xea7   :  { %15691 = vmatprep.subr.bf16.mxu0 %v17035_v25 }
 0xea9   :  { %15624 = vmatpush3.bf16.msra.mxu1 %v17003_v33  ;;  %v17027_v33 = vld [vmem:[%s20934_s1 + $0x858] sm:$0xff]  }
 0xeaa   :  { %15625 = vmatprep.subr.bf16.mxu1 %v17004_v46  ;;  %15692 = vmatpush3.bf16.msra.mxu0 %v17035_v25 }
 0xead   :  { %15626 = vmatpush3.bf16.msra.mxu1 %v17004_v46  ;;  %v17028_v46 = vld [vmem:[%s20934_s1 + $0x860] sm:$0xff]  }
 0xeae   :  { %15627 = vmatprep.subr.bf16.mxu1 %v17005_v2 }
 0xeb1   :  { %15628 = vmatpush3.bf16.msra.mxu1 %v17005_v2  ;;  %v17029_v2 = vld [vmem:[%s20934_s1 + $0x868] sm:$0xff]  }
 0xeb2   :  { %15629 = vmatprep.subr.bf16.mxu1 %v17006_v31 }
 0xeb5   :  { %15630 = vmatpush3.bf16.msra.mxu1 %v17006_v31  ;;  %v17030_v31 = vld [vmem:[%s20934_s1 + $0x870] sm:$0xff]  }
 0xeb6   :  { %15631 = vmatprep.subr.bf16.mxu1 %v17007_v1 }
 0xeb9   :  { %15632 = vmatpush3.bf16.msra.mxu1 %v17007_v1  ;;  %v17031_v1 = vld [vmem:[%s20934_s1 + $0x878] sm:$0xff]  }
 0xeba   :  { %15637 = vmatprep.subr.bf16.mxu1 %v17008_v11 }
 0xebc   :  { %15634 = vmatmul.mubr.bf16.vlgmr.msra.gmra.mrb[64].mxu1 %v4476_v59  ;;  %v17018_v59 = vld [vmem:[%s20934_s1 + $0x750] sm:$0xff]  }
 0xebd   :  { %15638 = vmatpush3.bf16.msra.mxu1 %v17008_v11  ;;  %v17036_v11 = vld [vmem:[%s20934_s1 + $0x7a0] sm:$0xff]  }
 0xebe   :  { %15639 = vmatprep.subr.bf16.mxu1 %v17009_v20  ;;  %15693 = vmatprep.subr.bf16.mxu0 %v17036_v11 }
 0xebf   :  { %15694 = vmatpush3.bf16.msra.mxu0 %v17036_v11 }
 0xec1   :  { %15640 = vmatpush3.bf16.msra.mxu1 %v17009_v20  ;;  %v17037_v20 = vld [vmem:[%s20934_s1 + $0x7a8] sm:$0xff]  }
 0xec2   :  { %15641 = vmatprep.subr.bf16.mxu1 %v17010_v12  ;;  %15695 = vmatprep.subr.bf16.mxu0 %v17037_v20 }
 0xec3   :  { %15696 = vmatpush3.bf16.msra.mxu0 %v17037_v20 }
 0xec5   :  { %15642 = vmatpush3.bf16.msra.mxu1 %v17010_v12  ;;  %v17038_v12 = vld [vmem:[%s20934_s1 + $0x7b0] sm:$0xff]  }
 0xec6   :  { %15643 = vmatprep.subr.bf16.mxu1 %v17011_v24  ;;  %15697 = vmatprep.subr.bf16.mxu0 %v17038_v12 }
 0xec7   :  { %15698 = vmatpush3.bf16.msra.mxu0 %v17038_v12 }
 0xec9   :  { %15644 = vmatpush3.bf16.msra.mxu1 %v17011_v24  ;;  %v12906_v24 = vld [vmem:[%s20935_s2 + $0x2d] ss:$0 sm:$0xff] }
 0xeca   :  { %15645 = vmatprep.subr.bf16.mxu1 %v17012_v50 }
 0xecd   :  { %15646 = vmatpush3.bf16.msra.mxu1 %v17012_v50 }
 0xece   :  { %15647 = vmatprep.subr.bf16.mxu1 %v17013_v14 }
 0xed1   :  { %15648 = vmatpush3.bf16.msra.mxu1 %v17013_v14 }
 0xed2   :  { %15649 = vmatprep.subr.bf16.mxu1 %v17014_v15 }
 0xed5   :  { %15650 = vmatpush3.bf16.msra.mxu1 %v17014_v15 }
 0xed6   :  { %15651 = vmatprep.subr.bf16.mxu1 %v17015_v16 }
 0xed9   :  { %15652 = vmatpush3.bf16.msra.mxu1 %v17015_v16  ;;  %v12907_v16 = vld [vmem:[%s20935_s2 + $0x2e] ss:$0 sm:$0xff] }
 0xeda   :  { %15665 = vmatprep.subr.bf16.mxu1 %v17016_v18 }
 0xf6f   :  { %v15615_v48 = vpop.f32.mrb[60].mxu1  ;;  %v15663_v49 = vpop.f32.mrb[48].mxu0 }
 0xf70   :  { %v4517_v51 = vpop.f32.mrb[61].mxu1  ;;  %v4828_v55 = vpop.f32.mrb[49].mxu0 }
 0xf71   :  { %v15616_v22 = vpop.f32.mrb[62].mxu1  ;;  %v15664_v27 = vpop.f32.mrb[50].mxu0 }
 0xf72   :  { %v4533_v35 = vpack.c.bf16 %v15616_v22, %v15615_v48  ;;  %v4520_v36 = vpop.f32.mrb[63].mxu1  ;;  %v4844_v37 = vpack.c.bf16 %v15664_v27, %v15663_v49  ;;  %v4831_v39 = vpop.f32.mrb[51].mxu0  ;;  %v12908_v48 = vld [vmem:[%s20935_s2 + $0x2f] ss:$0 sm:$0xff] }
 0xf73   :  { %v4532_v6 = vpack.c.bf16 %v4520_v36, %v4517_v51  ;;  %v4843_v0 = vpack.c.bf16 %v4831_v39, %v4828_v55  ;;  %v4996_v36 = vmul.f32 %v18307_v30, %v18806_v62 }
 0xf75   :  { %15653 = vmatprep.mubr.bf16.mxu1 %v4532_v6  ;;  %v4994_v6 = vmul.f32 %v18307_v30, %v18811_v57 }
 0xf76   :  { %15654 = vmatmul.mubr.bf16.vlgmr.msra.gmra.mrb[64].mxu1 %v4533_v35 }
 0xf77   :  { %15666 = vmatpush3.bf16.msra.mxu1 %v17016_v18  ;;  %15681 = vmatprep.mubr.bf16.mxu1 %v4843_v0 }
 0xf78   :  { %15667 = vmatprep.subr.bf16.mxu1 %v17017_v56 }
 0xf7b   :  { %15668 = vmatpush3.bf16.msra.mxu1 %v17017_v56 }
 0xf7c   :  { %15669 = vmatprep.subr.bf16.mxu1 %v17018_v59 }
 0xf7f   :  { %15670 = vmatpush3.bf16.msra.mxu1 %v17018_v59  ;;  %v4997_v59 = vmul.f32 %v18307_v30, %v18808_v63  ;;  %v13007_v63 = vld [vmem:[%s20935_s2 + $0x39] ss:$0 sm:$0xff] }
 0xf80   :  { %15671 = vmatprep.subr.bf16.mxu1 %v17019_v34 }
 0xf83   :  { %15672 = vmatpush3.bf16.msra.mxu1 %v17019_v34 }
 0xf84   :  { %15673 = vmatprep.subr.bf16.mxu1 %v17020_v60 }
 0xf87   :  { %15674 = vmatpush3.bf16.msra.mxu1 %v17020_v60 }
 0xf88   :  { %15675 = vmatprep.subr.bf16.mxu1 %v17021_v38 }
 0xf8b   :  { %15676 = vmatpush3.bf16.msra.mxu1 %v17021_v38  ;;  %v4995_v38 = vmul.f32 %v18307_v30, %v18813_v58  ;;  %v13016_v58 = vld [vmem:[%s20935_s2 + $0x3a] ss:$0 sm:$0xff] }
 0xf8c   :  { %15677 = vmatprep.subr.bf16.mxu1 %v17022_v47 }
 0xf8f   :  { %15678 = vmatpush3.bf16.msra.mxu1 %v17022_v47 }
 0xf90   :  { %15679 = vmatprep.subr.bf16.mxu1 %v17023_v54 }
 0xf93   :  { %15680 = vmatpush3.bf16.msra.mxu1 %v17023_v54 }
 0xf94   :  { %15745 = vmatprep.subr.bf16.mxu1 %v17024_v42 }
 0xf96   :  { %15682 = vmatmul.mubr.bf16.vlgmr.msra.gmra.mrb[64].mxu1 %v4844_v37 }
 0xf97   :  { %15746 = vmatpush3.bf16.msra.mxu1 %v17024_v42  ;;  %15761 = vmatprep.mubr.bf16.mxu1 %v18758_v28 }
 0xf98   :  { %15747 = vmatprep.subr.bf16.mxu1 %v17025_v26 }
 0xf9b   :  { %15748 = vmatpush3.bf16.msra.mxu1 %v17025_v26 }
 0xf9c   :  { %15749 = vmatprep.subr.bf16.mxu1 %v17026_v41 }
 0xf9f   :  { %15750 = vmatpush3.bf16.msra.mxu1 %v17026_v41 }
 0xfa0   :  { %15751 = vmatprep.subr.bf16.mxu1 %v17027_v33 }
 0xfa3   :  { %15752 = vmatpush3.bf16.msra.mxu1 %v17027_v33 }
 0xfa4   :  { %15753 = vmatprep.subr.bf16.mxu1 %v17028_v46 }
 0xfa7   :  { %15754 = vmatpush3.bf16.msra.mxu1 %v17028_v46 }
 0xfa8   :  { %15755 = vmatprep.subr.bf16.mxu1 %v17029_v2 }
 0xfab   :  { %15756 = vmatpush3.bf16.msra.mxu1 %v17029_v2 }
 0xfac   :  { %15757 = vmatprep.subr.bf16.mxu1 %v17030_v31 }
 0xfaf   :  { %15758 = vmatpush3.bf16.msra.mxu1 %v17030_v31 }
 0xfb0   :  { %15759 = vmatprep.subr.bf16.mxu1 %v17031_v1 }
 0xfb3   :  { %15760 = vmatpush3.bf16.msra.mxu1 %v17031_v1 }
 0xfb6   :  { %15762 = vmatmul.mubr.bf16.vlgmr.msra.gmra.mrb[68].mxu1 %v18767_v53 }
 0xfb7   :  { %15817 = vmatprep.mubr.msk.bf16.mxu1 %vm68_vm0, %v18788_v23  ;;  %v17039_v23 = vld [vmem:[%s20934_s1 + $0x7b8] sm:$0xff]  }
 0xfb8   :  { %15699 = vmatprep.subr.bf16.mxu0 %v17039_v23 }
 0xfb9   :  { %15700 = vmatpush3.bf16.msra.mxu0 %v17039_v23 }
 0xfba   :  { %15705 = vmatprep.subr.bf16.mxu0 %v17526_v17 }
0x1069   :  { %v15683_v50 = vpop.f32.mrb[64].mxu1 }
0x106a   :  { %v4970_v14 = vadd.f32 %v15683_v50, %v12906_v24  ;;  %v4944_v15 = vpop.f32.mrb[65].mxu1 }
0x106b   :  { %v4968_v18 = vadd.f32 %v12906_v24, %v4944_v15  ;;  %v15684_v19 = vpop.f32.mrb[66].mxu1 }
0x106c   :  { %v4974_v52 = vmax.f32 %v4970_v14, 0.0  ;;  %v4971_v32 = vadd.f32 %v15684_v19, %v12906_v24  ;;  %v4947_v25 = vpop.f32.mrb[67].mxu1  ;;  %v13017_v14 = vld [vmem:[%s20935_s2 + $0x3b] ss:$0 sm:$0xff] }
0x106d   :  { %v4972_v49 = vmax.f32 %v4968_v18, 0.0  ;;  %v4969_v51 = vadd.f32 %v12906_v24, %v4947_v25 }
0x106e   :  { %v4983_v55 = vmul.f32 %v12907_v16, %v4974_v52  ;;  %v4975_v22 = vmax.f32 %v4971_v32, 0.0 }
0x106f   :  { %v4981_v27 = vmul.f32 %v12907_v16, %v4972_v49  ;;  %v4973_v35 = vmax.f32 %v4969_v51, 0.0 }
0x1070   :  { %v4992_v37 = vadd.f32 %v12908_v48, %v4983_v55  ;;  %v4984_v39 = vmul.f32 %v12907_v16, %v4975_v22  ;;  %v17040_v55 = vld [vmem:[%s20934_s1 + $0x7c0] sm:$0xff]   ;;  %v17041_v22 = vld [vmem:[%s20934_s1 + $0x7c8] sm:$0xff]  }
0x1071   :  { %v4990_v0 = vadd.f32 %v12908_v48, %v4981_v27  ;;  %v4982_v56 = vmul.f32 %v12907_v16, %v4973_v35  ;;  %v17042_v27 = vld [vmem:[%s20934_s1 + $0x7d0] sm:$0xff]   ;;  %v17044_v35 = vld [vmem:[%s20934_s1 + $0x7e0] sm:$0xff]  }
0x1072   :  { %v5000_v34 = vadd.f32 %v4996_v36, %v4992_v37  ;;  %v4993_v60 = vadd.f32 %v12908_v48, %v4984_v39  ;;  %v17045_v36 = vld [vmem:[%s20934_s1 + $0x7e8] sm:$0xff]   ;;  %v17046_v37 = vld [vmem:[%s20934_s1 + $0x7f0] sm:$0xff]   ;;  %v17047_v39 = vld [vmem:[%s20934_s1 + $0x7f8] sm:$0xff]  }
0x1073   :  { %v4991_v47 = vadd.f32 %v12908_v48, %v4982_v56  ;;  %v4998_v54 = vadd.f32 %v4994_v6, %v4990_v0  ;;  %v12925_v6 = vld [vmem:[%s20935_s2 + $0x30] ss:$0 sm:$0xff] }
0x1074   :  { %v5001_v42 = vadd.f32 %v4997_v59, %v4993_v60 }
0x1075   :  { %v4999_v26 = vadd.f32 %v4995_v38, %v4991_v47 }
0x1076   :  { %v5003_v62 = vpack.c.bf16 %v5001_v42, %v5000_v34  ;;  %v12934_v34 = vld [vmem:[%s20935_s2 + $0x31] ss:$0 sm:$0xff] }
0x1077   :  { %v5002_v41 = vpack.c.bf16 %v4999_v26, %v4998_v54 }
0x1079   :  { %15701 = vmatprep.mubr.bf16.mxu0 %v5002_v41 }
0x107a   :  { %15702 = vmatmul.mubr.bf16.vlgmr.msra.gmra.mrb[52].mxu0 %v5003_v62 }
0x107b   :  { %15721 = vmatprep.mubr.msk.bf16.mxu0 %vm17527_vm15, %v17526_v17  ;;  %15706 = vmatpush3.bf16.msra.mxu0 %v17040_v55 }
0x107c   :  { %15707 = vmatprep.subr.bf16.mxu0 %v17526_v17 }
0x107f   :  { %15708 = vmatpush3.bf16.msra.mxu0 %v17041_v22 }
0x1080   :  { %15709 = vmatprep.subr.bf16.mxu0 %v17526_v17 }
0x1083   :  { %15710 = vmatpush3.bf16.msra.mxu0 %v17042_v27 }
0x1084   :  { %15711 = vmatprep.subr.bf16.mxu0 %v17526_v17 }
0x1089   :  { %v15763_v57 = vpop.f32.mrb[68].mxu1 }
0x108a   :  { %v5580_v33 = vadd.f32 %v15763_v57, %v13007_v63  ;;  %v5571_v46 = vpop.f32.mrb[69].mxu1  ;;  %v12935_v57 = vld [vmem:[%s20935_s2 + $0x32] ss:$0 sm:$0xff] }
0x108b   :  { %v5572_v2 = vadd.f32 %v13007_v63, %v5571_v46  ;;  %v15764_v31 = vpop.f32.mrb[70].mxu1 }
0x108c   :  { %v5588_v1 = vmax.f32 %v5580_v33, 0.0  ;;  %v5583_v11 = vadd.f32 %v15764_v31, %v13007_v63  ;;  %v5574_v20 = vpop.f32.mrb[71].mxu1 }
0x108d   :  { %v5586_v12 = vmax.f32 %v5572_v2, 0.0  ;;  %v5575_v23 = vadd.f32 %v13007_v63, %v5574_v20 }
0x108e   :  { %v5597_v24 = vmul.f32 %v13016_v58, %v5588_v1  ;;  %v5589_v50 = vmax.f32 %v5583_v11, 0.0 }
0x108f   :  { %v5595_v15 = vmul.f32 %v13016_v58, %v5586_v12  ;;  %v5587_v16 = vmax.f32 %v5575_v23, 0.0 }
0x1090   :  { %v5598_v18 = vmul.f32 %v13016_v58, %v5589_v50  ;;  %v18988_v52 = vadd.f32 %v13017_v14, %v5597_v24 }
0x1091   :  { %v5596_v19 = vmul.f32 %v13016_v58, %v5587_v16  ;;  %v18992_v25 = vadd.f32 %v13017_v14, %v5595_v15 }
0x1092   :  { %v18990_v32 = vadd.f32 %v13017_v14, %v5598_v18 }
0x1093   :  { %v18994_v48 = vadd.f32 %v13017_v14, %v5596_v19 }
0x1094   :  { %v18998_v49 = vpack.c.bf16 %v18990_v32, %v18988_v52 }
0x1095   :  { %v19002_v51 = vpack.c.bf16 %v18994_v48, %v18992_v25 }
0x1097   :  { %15813 = vmatprep.subr.bf16.mxu1 %v19002_v51 }
0x1098   :  { %15814 = vmatpush3.bf16.msra.mxu1 %v19002_v51 }
0x1099   :  { %15815 = vmatprep.subr.bf16.mxu1 %v18998_v49 }
0x109c   :  { %15816 = vmatpush3.bf16.msra.mxu1 %v18998_v49 }
0x109f   :  { %15818 = vmatmul.mubr.msk.bf16.vlgmr.msra.gmra.mrb[72].mxu1 %vm68_vm0, %v18832_v43  ;;  %v17043_v43 = vld [vmem:[%s20934_s1 + $0x7d8] sm:$0xff]  }
0x10a0   :  { %15712 = vmatpush3.bf16.msra.mxu0 %v17043_v43 }
0x10a1   :  { %15713 = vmatprep.subr.bf16.mxu0 %v17526_v17 }
0x10a4   :  { %15714 = vmatpush3.bf16.msra.mxu0 %v17044_v35 }
0x10a5   :  { %15715 = vmatprep.subr.bf16.mxu0 %v17526_v17 }
0x10a8   :  { %15716 = vmatpush3.bf16.msra.mxu0 %v17045_v36 }
0x10a9   :  { %15717 = vmatprep.subr.bf16.mxu0 %v17526_v17 }
0x10ac   :  { %15718 = vmatpush3.bf16.msra.mxu0 %v17046_v37 }
0x10ad   :  { %15719 = vmatprep.subr.bf16.mxu0 %v17526_v17 }
0x10b0   :  { %15720 = vmatpush3.bf16.msra.mxu0 %v17047_v39 }
0x10b1   :  { %15725 = vmatprep.subr.bf16.mxu0 %v17526_v17 }
0x114d   :  { %v15703_v0 = vpop.f32.mrb[52].mxu0 }
0x114e   :  { %v5117_v56 = vadd.f32 %v15703_v0, %v12925_v6  ;;  %v5108_v59 = vpop.f32.mrb[53].mxu0 }
0x114f   :  { %v5109_v60 = vadd.f32 %v12925_v6, %v5108_v59  ;;  %v15704_v38 = vpop.f32.mrb[54].mxu0 }
0x1150   :  { %v5125_v47 = vmax.f32 %v5117_v56, 0.0  ;;  %v5120_v54 = vadd.f32 %v15704_v38, %v12925_v6  ;;  %v5111_v42 = vpop.f32.mrb[55].mxu0  ;;  %v17049_v38 = vld [vmem:[%s20934_s1 + $0x808] sm:$0xff]  }
0x1151   :  { %v5123_v26 = vmax.f32 %v5109_v60, 0.0  ;;  %v5112_v62 = vadd.f32 %v12925_v6, %v5111_v42  ;;  %v17052_v42 = vld [vmem:[%s20934_s1 + $0x820] sm:$0xff]  }
0x1152   :  { %v5134_v41 = vmul.f32 %v12934_v34, %v5125_v47  ;;  %v5126_v63 = vmax.f32 %v5120_v54, 0.0  ;;  %v17050_v47 = vld [vmem:[%s20934_s1 + $0x810] sm:$0xff]   ;;  %v17051_v54 = vld [vmem:[%s20934_s1 + $0x818] sm:$0xff]  }
0x1153   :  { %v5132_v33 = vmul.f32 %v12934_v34, %v5123_v26  ;;  %v5124_v46 = vmax.f32 %v5112_v62, 0.0  ;;  %v17053_v26 = vld [vmem:[%s20934_s1 + $0x828] sm:$0xff]   ;;  %v17054_v62 = vld [vmem:[%s20934_s1 + $0x830] sm:$0xff]  }
0x1154   :  { %v5135_v58 = vmul.f32 %v12934_v34, %v5126_v63  ;;  %v19051_v31 = vadd.f32 %v12935_v57, %v5134_v41  ;;  %v17055_v41 = vld [vmem:[%s20934_s1 + $0x838] sm:$0xff]   ;;  %v12952_v63 = vld [vmem:[%s20935_s2 + $0x33] ss:$0 sm:$0xff] }
0x1155   :  { %v5133_v2 = vmul.f32 %v12934_v34, %v5124_v46  ;;  %v19055_v11 = vadd.f32 %v12935_v57, %v5132_v33  ;;  %v17048_v34 = vld [vmem:[%s20934_s1 + $0x800] sm:$0xff]  }
0x1156   :  { %v19053_v1 = vadd.f32 %v12935_v57, %v5135_v58  ;;  %v12961_v58 = vld [vmem:[%s20935_s2 + $0x34] ss:$0 sm:$0xff] }
0x1157   :  { %v19057_v20 = vadd.f32 %v12935_v57, %v5133_v2 }
0x1158   :  { %v5152_v12 = vadd.f32 %v19053_v1, %v19051_v31 }
0x1159   :  { %v5145_v23 = vadd.f32 %v19057_v20, %v19055_v11 }
0x115a   :  { %v5153_v24 = vrot.slane %v5152_v12, 4 }
0x115b   :  { %v5146_v50 = vrot.slane %v5145_v23, 4 }
0x115c   :  { %v5154_v14 = vadd.f32 %v5153_v24, %v5152_v12  ;;  %v12962_v24 = vld [vmem:[%s20935_s2 + $0x35] ss:$0 sm:$0xff] }
0x115d   :  { %v5147_v15 = vadd.f32 %v5146_v50, %v5145_v23 }
0x115e   :  { %v5155_v16 = vrot.slane %v5154_v14, 2 }
0x115f   :  { %v5148_v18 = vrot.slane %v5147_v15, 2 }
0x1160   :  { %v5156_v19 = vadd.f32 %v5155_v16, %v5154_v14  ;;  %v17056_v16 = vld [vmem:[%s20934_s1 + $0x8c0] sm:$0xff]  }
0x1161   :  { %v5149_v55 = vadd.f32 %v5148_v18, %v5147_v15  ;;  %v17057_v18 = vld [vmem:[%s20934_s1 + $0x8c8] sm:$0xff]  }
0x1162   :  { %v5157_v22 = vrot.slane %v5156_v19, 1 }
0x1163   :  { %v5150_v27 = vrot.slane %v5149_v55, 1 }
0x1164   :  { %v5158_v43 = vadd.f32 %v5157_v22, %v5156_v19  ;;  %v17059_v19 = vld [vmem:[%s20934_s1 + $0x8d8] sm:$0xff]  }
0x1165   :  { %v5151_v35 = vadd.f32 %v5150_v27, %v5149_v55  ;;  %v17062_v55 = vld [vmem:[%s20934_s1 + $0x8f0] sm:$0xff]   ;;  %v17063_v22 = vld [vmem:[%s20934_s1 + $0x8f8] sm:$0xff]   ;;  %v17064_v27 = vld [vmem:[%s20934_s1 + $0x880] sm:$0xff]  }
0x1166   :  { %v5160_v36 = vmul.f32 0.0625, %v5158_v43  ;;  %v17065_v43 = vld [vmem:[%s20934_s1 + $0x888] sm:$0xff]  }
0x1167   :  { %v5159_v37 = vmul.f32 0.0625, %v5151_v35  ;;  %v17066_v35 = vld [vmem:[%s20934_s1 + $0x890] sm:$0xff]  }
0x1168   :  { %v5162_v39 = vpack.c.bf16 %v5160_v36, %v5160_v36  ;;  %v17067_v36 = vld [vmem:[%s20934_s1 + $0x898] sm:$0xff]  }
0x1169   :  { %v5161_v6 = vpack.c.bf16 %v5159_v37, %v5159_v37  ;;  %v17068_v37 = vld [vmem:[%s20934_s1 + $0x8a0] sm:$0xff]  }
0x116a   :  { %v5188_v0 = vunpack.c.l.b16 %v5162_v39  ;;  %v17070_v39 = vld [vmem:[%s20934_s1 + $0x8b0] sm:$0xff]  }
0x116b   :  { %v5187_v56 = vunpack.c.l.b16 %v5161_v6  ;;  %v17071_v6 = vld [vmem:[%s20934_s1 + $0x8b8] sm:$0xff]  }
0x116d   :  { %v5189_v59 = vsel %vm2925_vm1, %v5188_v0, %v5187_v56  ;;  %v17072_v0 = vld [vmem:[%s20934_s1 + $0x900] sm:$0xff]  }
0x116e   :  { %v5190_v60 = vpack.c.b16 %v5189_v59, %v5189_v59 }
0x1170   :  { %15722 = vmatmul.mubr.bf16.vlgmr.msra.gmra.mrb[56].mxu0 %v5190_v60 }
0x1171   :  { %15726 = vmatpush3.bf16.msra.mxu0 %v17048_v34  ;;  %15741 = vmatprep.mubr.msk.bf16.mxu0 %vm17527_vm15, %v17526_v17 }
0x1172   :  { %15727 = vmatprep.subr.bf16.mxu0 %v17526_v17  ;;  %v15819_v56 = vpop.f32.mrb[72].mxu1 }
0x1173   :  { %v5923_v59 = vpop.f32.mrb[73].mxu1 }
0x1174   :  { %v15820_v34 = vpop.f32.mrb[74].mxu1 }
0x1175   :  { %15728 = vmatpush3.bf16.msra.mxu0 %v17049_v38  ;;  %v5939_v60 = vpack.c.bf16 %v15820_v34, %v15819_v56  ;;  %v5926_v38 = vpop.f32.mrb[75].mxu1 }
0x1176   :  { %15729 = vmatprep.subr.bf16.mxu0 %v17526_v17 }
0x1179   :  { %15730 = vmatpush3.bf16.msra.mxu0 %v17050_v47  ;;  %v5938_v47 = vpack.c.bf16 %v5926_v38, %v5923_v59  ;;  %v13096_v59 = vld [vmem:[%s20935_s2 + $0x3e] ss:$0 sm:$0xff] }
0x117a   :  { %15731 = vmatprep.subr.bf16.mxu0 %v17526_v17 }
0x117d   :  { %15732 = vmatpush3.bf16.msra.mxu0 %v17051_v54  ;;  %v17080_v54 = vld [vmem:[%s20934_s1 + $0x940] sm:$0xff]  }
0x117e   :  { %15733 = vmatprep.subr.bf16.mxu0 %v17526_v17  ;;  %15841 = vmatprep.subr.bf16.mxu1 %v17080_v54 }
0x117f   :  { %15842 = vmatpush3.bf16.msra.mxu1 %v17080_v54 }
0x1181   :  { %15734 = vmatpush3.bf16.msra.mxu0 %v17052_v42  ;;  %v17081_v42 = vld [vmem:[%s20934_s1 + $0x948] sm:$0xff]  }
0x1182   :  { %15735 = vmatprep.subr.bf16.mxu0 %v17526_v17  ;;  %15843 = vmatprep.subr.bf16.mxu1 %v17081_v42 }
0x1183   :  { %15844 = vmatpush3.bf16.msra.mxu1 %v17081_v42 }
0x1185   :  { %15736 = vmatpush3.bf16.msra.mxu0 %v17053_v26  ;;  %v17082_v26 = vld [vmem:[%s20934_s1 + $0x950] sm:$0xff]  }
0x1186   :  { %15737 = vmatprep.subr.bf16.mxu0 %v17526_v17  ;;  %15845 = vmatprep.subr.bf16.mxu1 %v17082_v26 }
0x1187   :  { %15846 = vmatpush3.bf16.msra.mxu1 %v17082_v26  ;;  %v6091_v26 = vmul.f32 %v18566_v44, %v18988_v52 }
0x1189   :  { %15738 = vmatpush3.bf16.msra.mxu0 %v17054_v62  ;;  %v17083_v62 = vld [vmem:[%s20934_s1 + $0x958] sm:$0xff]  }
0x118a   :  { %15739 = vmatprep.subr.bf16.mxu0 %v17526_v17  ;;  %15847 = vmatprep.subr.bf16.mxu1 %v17083_v62 }
0x118b   :  { %15848 = vmatpush3.bf16.msra.mxu1 %v17083_v62 }
0x118d   :  { %15740 = vmatpush3.bf16.msra.mxu0 %v17055_v41 }
0x118e   :  { %15765 = vmatprep.subr.bf16.mxu0 %v19002_v51 }
0x1243   :  { %v5274_v57 = vpop.f32.mrb[56].mxu0 }
0x1244   :  { %v5275_v33 = vadd.f32 %v12952_v63, %v5274_v57  ;;  %v15723_v46 = vpop.f32.mrb[57].mxu0 }
0x1245   :  { %v5277_v2 = vpop.f32.mrb[58].mxu0 }
0x1246   :  { %v5280_v12 = vmax.f32 %v5275_v33, 0.0  ;;  %v15724_v23 = vpop.f32.mrb[59].mxu0 }
0x1248   :  { %v5286_v50 = vmul.f32 %v12961_v58, %v5280_v12 }
0x124a   :  { %v5292_v14 = vadd.f32 %v12962_v24, %v5286_v50  ;;  %v17073_v50 = vld [vmem:[%s20934_s1 + $0x908] sm:$0xff]  }
0x124c   :  { %v5293_v15 = vpack.c.bf16 %v5292_v14, %v5292_v14  ;;  %v17074_v14 = vld [vmem:[%s20934_s1 + $0x910] sm:$0xff]  }
0x124e   :  { %15742 = vmatmul.mubr.bf16.vlgmr.msra.gmra.mrb[60].mxu0 %v5293_v15  ;;  %v17075_v15 = vld [vmem:[%s20934_s1 + $0x918] sm:$0xff]  }
0x124f   :  { %15766 = vmatpush3.bf16.msra.mxu0 %v19002_v51  ;;  %15769 = vmatprep.mubr.msk.bf16.mxu0 %vm68_vm0, %v18777_v9  ;;  %v17058_v9 = vld [vmem:[%s20934_s1 + $0x8d0] sm:$0xff]  }
0x1250   :  { %15767 = vmatprep.subr.bf16.mxu0 %v18998_v49 }
0x1253   :  { %15768 = vmatpush3.bf16.msra.mxu0 %v18998_v49 }
0x1254   :  { %15773 = vmatprep.subr.bf16.mxu0 %v17056_v16 }
0x1256   :  { %15770 = vmatmul.mubr.msk.bf16.vlgmr.msra.gmra.mrb[64].mxu0 %vm68_vm0, %v18830_v29  ;;  %v17060_v29 = vld [vmem:[%s20934_s1 + $0x8e0] sm:$0xff]  }
0x1257   :  { %15774 = vmatpush3.bf16.msra.mxu0 %v17056_v16  ;;  %15789 = vmatprep.mubr.bf16.mxu0 %v19002_v51  ;;  %v17061_v51 = vld [vmem:[%s20934_s1 + $0x8e8] sm:$0xff]   ;;  %v17076_v16 = vld [vmem:[%s20934_s1 + $0x920] sm:$0xff]  }
0x1258   :  { %15775 = vmatprep.subr.bf16.mxu0 %v17057_v18 }
0x125b   :  { %15776 = vmatpush3.bf16.msra.mxu0 %v17057_v18  ;;  %v17077_v18 = vld [vmem:[%s20934_s1 + $0x928] sm:$0xff]  }
0x125c   :  { %15777 = vmatprep.subr.bf16.mxu0 %v17058_v9 }
0x125f   :  { %15778 = vmatpush3.bf16.msra.mxu0 %v17058_v9  ;;  %v17078_v9 = vld [vmem:[%s20934_s1 + $0x930] sm:$0xff]  }
0x1260   :  { %15779 = vmatprep.subr.bf16.mxu0 %v17059_v19 }
0x1263   :  { %15780 = vmatpush3.bf16.msra.mxu0 %v17059_v19  ;;  %v17079_v19 = vld [vmem:[%s20934_s1 + $0x938] sm:$0xff]  }
0x1264   :  { %15781 = vmatprep.subr.bf16.mxu0 %v17060_v29 }
0x1267   :  { %15782 = vmatpush3.bf16.msra.mxu0 %v17060_v29  ;;  %v17084_v29 = vld [vmem:[%s20934_s1 + $0x960] sm:$0xff]  }
0x1268   :  { %15783 = vmatprep.subr.bf16.mxu0 %v17061_v51  ;;  %15849 = vmatprep.subr.bf16.mxu1 %v17084_v29 }
0x1269   :  { %15850 = vmatpush3.bf16.msra.mxu1 %v17084_v29  ;;  %v17094_v29 = vld [vmem:[%s20934_s1 + $0x9b0] sm:$0xff]  }
0x126b   :  { %15784 = vmatpush3.bf16.msra.mxu0 %v17061_v51  ;;  %v17085_v51 = vld [vmem:[%s20934_s1 + $0x968] sm:$0xff]  }
0x126c   :  { %15785 = vmatprep.subr.bf16.mxu0 %v17062_v55  ;;  %15851 = vmatprep.subr.bf16.mxu1 %v17085_v51 }
0x126d   :  { %15852 = vmatpush3.bf16.msra.mxu1 %v17085_v51  ;;  %v17095_v51 = vld [vmem:[%s20934_s1 + $0x9b8] sm:$0xff]  }
0x126f   :  { %15786 = vmatpush3.bf16.msra.mxu0 %v17062_v55  ;;  %v17086_v55 = vld [vmem:[%s20934_s1 + $0x970] sm:$0xff]  }
0x1270   :  { %15787 = vmatprep.subr.bf16.mxu0 %v17063_v22  ;;  %15853 = vmatprep.subr.bf16.mxu1 %v17086_v55 }
0x1271   :  { %15854 = vmatpush3.bf16.msra.mxu1 %v17086_v55  ;;  %v13113_v55 = vld [vmem:[%s20935_s2 + $0x3f] ss:$0 sm:$0xff] }
0x1273   :  { %15788 = vmatpush3.bf16.msra.mxu0 %v17063_v22  ;;  %v17087_v22 = vld [vmem:[%s20934_s1 + $0x978] sm:$0xff]  }
0x1274   :  { %15793 = vmatprep.subr.bf16.mxu0 %v17064_v27  ;;  %15855 = vmatprep.subr.bf16.mxu1 %v17087_v22 }
0x1275   :  { %15856 = vmatpush3.bf16.msra.mxu1 %v17087_v22 }
0x1276   :  { %15790 = vmatmul.mubr.bf16.vlgmr.msra.gmra.mrb[68].mxu0 %v18998_v49  ;;  %v17069_v49 = vld [vmem:[%s20934_s1 + $0x8a8] sm:$0xff]   ;;  %15861 = vmatprep.subr.bf16.mxu1 %v17526_v17 }
0x1277   :  { %15794 = vmatpush3.bf16.msra.mxu0 %v17064_v27  ;;  %v13094_v27 = vld [vmem:[%s20935_s2 + $0x3c] ss:$0 sm:$0xff] }
0x1278   :  { %15795 = vmatprep.subr.bf16.mxu0 %v17065_v43 }
0x127b   :  { %15796 = vmatpush3.bf16.msra.mxu0 %v17065_v43 }
0x127c   :  { %15797 = vmatprep.subr.bf16.mxu0 %v17066_v35 }
0x127f   :  { %15798 = vmatpush3.bf16.msra.mxu0 %v17066_v35 }
0x1280   :  { %15799 = vmatprep.subr.bf16.mxu0 %v17067_v36 }
0x1283   :  { %15800 = vmatpush3.bf16.msra.mxu0 %v17067_v36 }
0x1284   :  { %15801 = vmatprep.subr.bf16.mxu0 %v17068_v37 }
0x1287   :  { %15802 = vmatpush3.bf16.msra.mxu0 %v17068_v37  ;;  %v13095_v37 = vld [vmem:[%s20935_s2 + $0x3d] ss:$0 sm:$0xff] }
0x1288   :  { %15803 = vmatprep.subr.bf16.mxu0 %v17069_v49 }
0x128b   :  { %15804 = vmatpush3.bf16.msra.mxu0 %v17069_v49 }
0x128c   :  { %15805 = vmatprep.subr.bf16.mxu0 %v17070_v39 }
0x128f   :  { %15806 = vmatpush3.bf16.msra.mxu0 %v17070_v39 }
0x1290   :  { %15807 = vmatprep.subr.bf16.mxu0 %v17071_v6 }
0x1293   :  { %15808 = vmatpush3.bf16.msra.mxu0 %v17071_v6 }
0x1294   :  { %15821 = vmatprep.subr.bf16.mxu0 %v17072_v0 }
0x1321   :  { %v19179_v41 = vpop.f32.mrb[60].mxu0 }
0x1322   :  { %v15743_v63 = vpop.f32.mrb[61].mxu0 }
0x1323   :  { %v5401_v57 = vpop.f32.mrb[62].mxu0 }
0x1324   :  { %v15744_v33 = vpop.f32.mrb[63].mxu0  ;;  %v6089_v57 = vmul.f32 %v18566_v44, %v18992_v25  ;;  %v17089_v25 = vld [vmem:[%s20934_s1 + $0x988] sm:$0xff]  }
0x1329   :  { %v15771_v46 = vpop.f32.mrb[64].mxu0 }
0x132a   :  { %v5644_v58 = vpop.f32.mrb[65].mxu0 }
0x132b   :  { %v15772_v2 = vpop.f32.mrb[66].mxu0 }
0x132c   :  { %v5660_v12 = vpack.c.bf16 %v15772_v2, %v15771_v46  ;;  %v5647_v23 = vpop.f32.mrb[67].mxu0 }
0x132d   :  { %v5659_v24 = vpack.c.bf16 %v5647_v23, %v5644_v58  ;;  %v6092_v58 = vmul.f32 %v18566_v44, %v18990_v32  ;;  %v6090_v23 = vmul.f32 %v18566_v44, %v18994_v48  ;;  %v17088_v32 = vld [vmem:[%s20934_s1 + $0x980] sm:$0xff]   ;;  %v17090_v48 = vld [vmem:[%s20934_s1 + $0x990] sm:$0xff]  }
0x132f   :  { %15809 = vmatprep.mubr.bf16.mxu0 %v5659_v24 }
0x1330   :  { %15810 = vmatmul.mubr.bf16.vlgmr.msra.gmra.mrb[68].mxu0 %v5660_v12 }
0x1331   :  { %15822 = vmatpush3.bf16.msra.mxu0 %v17072_v0  ;;  %15837 = vmatprep.mubr.bf16.mxu0 %v5938_v47 }
0x1332   :  { %15823 = vmatprep.subr.bf16.mxu0 %v17073_v50 }
0x1335   :  { %15824 = vmatpush3.bf16.msra.mxu0 %v17073_v50 }
0x1336   :  { %15825 = vmatprep.subr.bf16.mxu0 %v17074_v14 }
0x1339   :  { %15826 = vmatpush3.bf16.msra.mxu0 %v17074_v14 }
0x133a   :  { %15827 = vmatprep.subr.bf16.mxu0 %v17075_v15 }
0x133d   :  { %15828 = vmatpush3.bf16.msra.mxu0 %v17075_v15 }
0x133e   :  { %15829 = vmatprep.subr.bf16.mxu0 %v17076_v16 }
0x1341   :  { %15830 = vmatpush3.bf16.msra.mxu0 %v17076_v16 }
0x1342   :  { %15831 = vmatprep.subr.bf16.mxu0 %v17077_v18 }
0x1345   :  { %15832 = vmatpush3.bf16.msra.mxu0 %v17077_v18  ;;  %v17091_v18 = vld [vmem:[%s20934_s1 + $0x998] sm:$0xff]  }
0x1346   :  { %15833 = vmatprep.subr.bf16.mxu0 %v17078_v9 }
0x1349   :  { %15834 = vmatpush3.bf16.msra.mxu0 %v17078_v9  ;;  %v17092_v9 = vld [vmem:[%s20934_s1 + $0x9a0] sm:$0xff]  }
0x134a   :  { %15835 = vmatprep.subr.bf16.mxu0 %v17079_v19 }
0x134d   :  { %15836 = vmatpush3.bf16.msra.mxu0 %v17079_v19  ;;  %v17093_v19 = vld [vmem:[%s20934_s1 + $0x9a8] sm:$0xff]  }
0x1350   :  { %15838 = vmatmul.mubr.bf16.vlgmr.msra.gmra.mrb[68].mxu0 %v5939_v60 }
0x1423   :  { %v15839_v43 = vpop.f32.mrb[68].mxu0 }
0x1424   :  { %v6065_v35 = vadd.f32 %v15839_v43, %v13094_v27  ;;  %v6039_v36 = vpop.f32.mrb[69].mxu0 }
0x1425   :  { %v6063_v49 = vadd.f32 %v13094_v27, %v6039_v36  ;;  %v15840_v39 = vpop.f32.mrb[70].mxu0 }
0x1426   :  { %v6069_v6 = vmax.f32 %v6065_v35, 0.0  ;;  %v6066_v0 = vadd.f32 %v15840_v39, %v13094_v27  ;;  %v6042_v56 = vpop.f32.mrb[71].mxu0  ;;  %v13122_v35 = vld [vmem:[%s20935_s2 + $0x40] ss:$0 sm:$0xff] }
0x1427   :  { %v6067_v34 = vmax.f32 %v6063_v49, 0.0  ;;  %v6064_v60 = vadd.f32 %v13094_v27, %v6042_v56 }
0x1428   :  { %v6078_v38 = vmul.f32 %v13095_v37, %v6069_v6  ;;  %v6070_v47 = vmax.f32 %v6066_v0, 0.0 }
0x1429   :  { %v6076_v54 = vmul.f32 %v13095_v37, %v6067_v34  ;;  %v6068_v42 = vmax.f32 %v6064_v60, 0.0  ;;  %v13123_v60 = vld [vmem:[%s20935_s2 + $0x41] ss:$0 sm:$0xff] }
0x142a   :  { %v6087_v62 = vadd.f32 %v13096_v59, %v6078_v38  ;;  %v6079_v63 = vmul.f32 %v13095_v37, %v6070_v47 }
0x142b   :  { %v6085_v33 = vadd.f32 %v13096_v59, %v6076_v54  ;;  %v6077_v46 = vmul.f32 %v13095_v37, %v6068_v42 }
0x142c   :  { %v6095_v2 = vadd.f32 %v6091_v26, %v6087_v62  ;;  %v6088_v12 = vadd.f32 %v13096_v59, %v6079_v63 }
0x142d   :  { %v6086_v24 = vadd.f32 %v13096_v59, %v6077_v46  ;;  %v6093_v50 = vadd.f32 %v6089_v57, %v6085_v33 }
0x142e   :  { %v6096_v14 = vadd.f32 %v6092_v58, %v6088_v12 }
0x142f   :  { %v6094_v15 = vadd.f32 %v6090_v23, %v6086_v24 }
0x1430   :  { %v6098_v52 = vpack.c.bf16 %v6096_v14, %v6095_v2 }
0x1431   :  { %v6097_v16 = vpack.c.bf16 %v6094_v15, %v6093_v50 }
0x1433   :  { %15857 = vmatprep.mubr.bf16.mxu1 %v6097_v16 }
0x1434   :  { %15858 = vmatmul.mubr.bf16.vlgmr.msra.gmra.mrb[76].mxu1 %v6098_v52 }
0x1435   :  { %15877 = vmatprep.mubr.msk.bf16.mxu1 %vm17527_vm15, %v17526_v17  ;;  %15862 = vmatpush3.bf16.msra.mxu1 %v17088_v32 }
0x1436   :  { %15863 = vmatprep.subr.bf16.mxu1 %v17526_v17 }
0x1439   :  { %15864 = vmatpush3.bf16.msra.mxu1 %v17089_v25 }
0x143a   :  { %15865 = vmatprep.subr.bf16.mxu1 %v17526_v17 }
0x143d   :  { %15866 = vmatpush3.bf16.msra.mxu1 %v17090_v48 }
0x143e   :  { %15867 = vmatprep.subr.bf16.mxu1 %v17526_v17 }
0x1441   :  { %15868 = vmatpush3.bf16.msra.mxu1 %v17091_v18 }
0x1442   :  { %15869 = vmatprep.subr.bf16.mxu1 %v17526_v17 }
0x1445   :  { %15870 = vmatpush3.bf16.msra.mxu1 %v17092_v9 }
0x1446   :  { %15871 = vmatprep.subr.bf16.mxu1 %v17526_v17 }
0x1449   :  { %15872 = vmatpush3.bf16.msra.mxu1 %v17093_v19 }
0x144a   :  { %15873 = vmatprep.subr.bf16.mxu1 %v17526_v17 }
0x144d   :  { %15874 = vmatpush3.bf16.msra.mxu1 %v17094_v29 }
0x144e   :  { %15875 = vmatprep.subr.bf16.mxu1 %v17526_v17 }
0x1451   :  { %15876 = vmatpush3.bf16.msra.mxu1 %v17095_v51 }
0x1452   :  { %15881 = vmatprep.subr.bf16.mxu1 %v17526_v17 }
0x1507   :  { %v15859_v22 = vpop.f32.mrb[76].mxu1 }
0x1508   :  { %v6212_v27 = vadd.f32 %v15859_v22, %v13113_v55  ;;  %v6203_v43 = vpop.f32.mrb[77].mxu1  ;;  %v17096_v22 = vld [vmem:[%s20934_s1 + $0x9c0] sm:$0xff]  }
0x1509   :  { %v6204_v36 = vadd.f32 %v13113_v55, %v6203_v43  ;;  %v15860_v37 = vpop.f32.mrb[78].mxu1  ;;  %v17097_v43 = vld [vmem:[%s20934_s1 + $0x9c8] sm:$0xff]  }
0x150a   :  { %v6220_v49 = vmax.f32 %v6212_v27, 0.0  ;;  %v6215_v39 = vadd.f32 %v15860_v37, %v13113_v55  ;;  %v6206_v6 = vpop.f32.mrb[79].mxu1  ;;  %v17100_v37 = vld [vmem:[%s20934_s1 + $0x9e0] sm:$0xff]  }
0x150b   :  { %v6218_v0 = vmax.f32 %v6204_v36, 0.0  ;;  %v6207_v56 = vadd.f32 %v13113_v55, %v6206_v6  ;;  %v17099_v36 = vld [vmem:[%s20934_s1 + $0x9d8] sm:$0xff]  }
0x150c   :  { %v6229_v59 = vmul.f32 %v13122_v35, %v6220_v49  ;;  %v6221_v34 = vmax.f32 %v6215_v39, 0.0  ;;  %v17101_v49 = vld [vmem:[%s20934_s1 + $0x9e8] sm:$0xff]   ;;  %v17102_v39 = vld [vmem:[%s20934_s1 + $0x9f0] sm:$0xff]   ;;  %v17103_v6 = vld [vmem:[%s20934_s1 + $0x9f8] sm:$0xff]  }
0x150d   :  { %v6227_v38 = vmul.f32 %v13122_v35, %v6218_v0  ;;  %v6219_v47 = vmax.f32 %v6207_v56, 0.0  ;;  %v13140_v0 = vld [vmem:[%s20935_s2 + $0x42] ss:$0 sm:$0xff] }
0x150e   :  { %v6230_v54 = vmul.f32 %v13122_v35, %v6221_v34  ;;  %v19275_v26 = vadd.f32 %v13123_v60, %v6229_v59 }
0x150f   :  { %v6228_v42 = vmul.f32 %v13122_v35, %v6219_v47  ;;  %v19279_v63 = vadd.f32 %v13123_v60, %v6227_v38  ;;  %v17098_v35 = vld [vmem:[%s20934_s1 + $0x9d0] sm:$0xff]  }
0x1510   :  { %v19277_v62 = vadd.f32 %v13123_v60, %v6230_v54 }
0x1511   :  { %v19281_v57 = vadd.f32 %v13123_v60, %v6228_v42  ;;  %v13149_v60 = vld [vmem:[%s20935_s2 + $0x43] ss:$0 sm:$0xff]  ;;  %v13150_v42 = vld [vmem:[%s20935_s2 + $0x44] ss:$0 sm:$0xff] }
0x1512   :  { %v6247_v33 = vadd.f32 %v19277_v62, %v19275_v26 }
0x1513   :  { %v6240_v46 = vadd.f32 %v19281_v57, %v19279_v63 }
0x1514   :  { %v6248_v58 = vrot.slane %v6247_v33, 4 }
0x1515   :  { %v6241_v2 = vrot.slane %v6240_v46, 4 }
0x1516   :  { %v6249_v12 = vadd.f32 %v6248_v58, %v6247_v33 }
0x1517   :  { %v6242_v23 = vadd.f32 %v6241_v2, %v6240_v46  ;;  %v17104_v2 = vld [vmem:[%s20934_s1 + $0xa00] sm:$0xff]  }
0x1518   :  { %v6250_v24 = vrot.slane %v6249_v12, 2  ;;  %15901 = vmatprep.subr.bf16.mxu0 %v17104_v2 }
0x1519   :  { %v6243_v50 = vrot.slane %v6242_v23, 2  ;;  %15902 = vmatpush3.bf16.msra.mxu0 %v17104_v2 }
0x151a   :  { %v6251_v14 = vadd.f32 %v6250_v24, %v6249_v12  ;;  %v17105_v12 = vld [vmem:[%s20934_s1 + $0xa08] sm:$0xff]   ;;  %v17107_v24 = vld [vmem:[%s20934_s1 + $0xa18] sm:$0xff]  }
0x151b   :  { %v6244_v15 = vadd.f32 %v6243_v50, %v6242_v23  ;;  %15903 = vmatprep.subr.bf16.mxu0 %v17105_v12  ;;  %v17106_v23 = vld [vmem:[%s20934_s1 + $0xa10] sm:$0xff]   ;;  %v17108_v50 = vld [vmem:[%s20934_s1 + $0xa20] sm:$0xff]  }
0x151c   :  { %v6252_v52 = vrot.slane %v6251_v14, 1 }
0x151d   :  { %v6245_v16 = vrot.slane %v6244_v15, 1  ;;  %15904 = vmatpush3.bf16.msra.mxu0 %v17105_v12 }
0x151e   :  { %v6253_v32 = vadd.f32 %v6252_v52, %v6251_v14  ;;  %15905 = vmatprep.subr.bf16.mxu0 %v17106_v23  ;;  %v17109_v14 = vld [vmem:[%s20934_s1 + $0xa28] sm:$0xff]   ;;  %v17111_v52 = vld [vmem:[%s20934_s1 + $0xa38] sm:$0xff]  }
0x151f   :  { %v6246_v25 = vadd.f32 %v6245_v16, %v6244_v15  ;;  %v17110_v15 = vld [vmem:[%s20934_s1 + $0xa30] sm:$0xff]  }
0x1520   :  { %v6255_v48 = vmul.f32 0.0625, %v6253_v32  ;;  %v12979_v16 = vld [vmem:[%s20935_s2 + $0x36] ss:$0 sm:$0xff] }
0x1521   :  { %v6254_v18 = vmul.f32 0.0625, %v6246_v25  ;;  %15906 = vmatpush3.bf16.msra.mxu0 %v17106_v23  ;;  %v5399_v32 = vadd.f32 %v12979_v16, %v19179_v41  ;;  %v12989_v41 = vld [vmem:[%s20935_s2 + $0x37] ss:$0 sm:$0xff] }
0x1522   :  { %v6257_v9 = vpack.c.bf16 %v6255_v48, %v6255_v48  ;;  %15907 = vmatprep.subr.bf16.mxu0 %v17107_v24 }
0x1523   :  { %v6256_v19 = vpack.c.bf16 %v6254_v18, %v6254_v18  ;;  %v12988_v25 = vmul.f32 -1.442695, %v5399_v32 }
0x1524   :  { %v6283_v29 = vunpack.c.l.b16 %v6257_v9  ;;  %v13167_v9 = vld [vmem:[%s20935_s2 + $0x45] ss:$0 sm:$0xff] }
0x1525   :  { %v6282_v51 = vunpack.c.l.b16 %v6256_v19  ;;  %15908 = vmatpush3.bf16.msra.mxu0 %v17107_v24  ;;  %17408 = vpow2.f32 %v12988_v25 }
0x1526   :  { %15909 = vmatprep.subr.bf16.mxu0 %v17108_v50 }
0x1527   :  { %v6284_v55 = vsel %vm2925_vm1, %v6283_v29, %v6282_v51 }
0x1528   :  { %v6285_v27 = vpack.c.b16 %v6284_v55, %v6284_v55 }
0x1529   :  { %15910 = vmatpush3.bf16.msra.mxu0 %v17108_v50 }
0x152a   :  { %15878 = vmatmul.mubr.bf16.vlgmr.msra.gmra.mrb[80].mxu1 %v6285_v27  ;;  %15911 = vmatprep.subr.bf16.mxu0 %v17109_v14 }
0x152b   :  { %15882 = vmatpush3.bf16.msra.mxu1 %v17096_v22  ;;  %15897 = vmatprep.mubr.msk.bf16.mxu1 %vm17527_vm15, %v17526_v17 }
0x152c   :  { %15883 = vmatprep.subr.bf16.mxu1 %v17526_v17 }
0x152d   :  { %15912 = vmatpush3.bf16.msra.mxu0 %v17109_v14 }
0x152e   :  { %15913 = vmatprep.subr.bf16.mxu0 %v17110_v15 }
0x152f   :  { %15884 = vmatpush3.bf16.msra.mxu1 %v17097_v43  ;;  %v17409_v48 = vpop.eup %17408 }
0x1530   :  { %15885 = vmatprep.subr.bf16.mxu1 %v17526_v17  ;;  %v5407_v18 = vadd.f32 1.0, %v17409_v48 }
0x1531   :  { %15914 = vmatpush3.bf16.msra.mxu0 %v17110_v15 }
0x1532   :  { %15915 = vmatprep.subr.bf16.mxu0 %v17111_v52  ;;  %17410 = vrcp.f32 %v5407_v18 }
0x1533   :  { %15886 = vmatpush3.bf16.msra.mxu1 %v17098_v35 }
0x1534   :  { %15887 = vmatprep.subr.bf16.mxu1 %v17526_v17 }
0x1535   :  { %15916 = vmatpush3.bf16.msra.mxu0 %v17111_v52 }
0x1537   :  { %15888 = vmatpush3.bf16.msra.mxu1 %v17099_v36  ;;  %v12990_v36 = vld [vmem:[%s20935_s2 + $0x38] ss:$0 sm:$0xff] }
0x1538   :  { %15889 = vmatprep.subr.bf16.mxu1 %v17526_v17 }
0x153b   :  { %15890 = vmatpush3.bf16.msra.mxu1 %v17100_v37 }
0x153c   :  { %15891 = vmatprep.subr.bf16.mxu1 %v17526_v17  ;;  %v17411_v43 = vpop.eup %17410 }
0x153d   :  { %v5415_v35 = vmul.f32 %v17411_v43, %v12989_v41 }
0x153f   :  { %15892 = vmatpush3.bf16.msra.mxu1 %v17101_v49  ;;  %v5421_v49 = vadd.f32 %v12990_v36, %v5415_v35  ;;  %v6710_v36 = vadd.s32 4294967292, %v17574_v5 }
0x1540   :  { %15893 = vmatprep.subr.bf16.mxu1 %v17526_v17 }
0x1541   :  { %vm6714_vm6 = vcmp.eq.s32.totalorder %v17567_v3, %v6710_v36  ;;  %v17119_v36 = vld [vmem:[%s20934_s1 + $0xab8] sm:$0xff]  }
0x1543   :  { %15894 = vmatpush3.bf16.msra.mxu1 %v17102_v39 }
0x1544   :  { %15895 = vmatprep.subr.bf16.mxu1 %v17526_v17 }
0x1547   :  { %15896 = vmatpush3.bf16.msra.mxu1 %v17103_v6  ;;  %v5429_v6 = vrot.slane %v5421_v49, %v18715_v10  ;;  %v6730_v49 = vsel %vm6714_vm6, 1.0, %v17526_v17 }
0x15fd   :  { %v6369_v56 = vpop.f32.mrb[80].mxu1 }
0x15fe   :  { %v6370_v59 = vadd.f32 %v13140_v0, %v6369_v56  ;;  %v15879_v34 = vpop.f32.mrb[81].mxu1  ;;  %v5430_v0 = vcombine.high %v5429_v6, %v5429_v6  ;;  %v13177_v56 = vld [vmem:[%s20935_s2 + $0x46] ss:$0 sm:$0xff] }
0x15ff   :  { %v6372_v38 = vpop.f32.mrb[82].mxu1 }
0x1600   :  { %v6375_v47 = vmax.f32 %v6370_v59, 0.0  ;;  %v15880_v54 = vpop.f32.mrb[83].mxu1  ;;  %v5437_v59 = vrot.slane %v5429_v6, %v18715_v10  ;;  %v5444_v38 = vrot.slane %v5430_v0, %v18715_v10  ;;  %v7023_v6 = vadd.s32 4, %v17574_v5 }
0x1601   :  { %v7022_v0 = vadd.s32 4, %v17569_v4 }
0x1602   :  { %v6381_v33 = vmul.f32 %v13149_v60, %v6375_v47  ;;  %v13178_v60 = vld [vmem:[%s20935_s2 + $0x47] ss:$0 sm:$0xff]  ;;  %v5448_v54 = vrot.slane %v5437_v59, %v18723_v13  ;;  %vm7027_vm8 = vcmp.eq.s32.totalorder %v17567_v3, %v7023_v6  ;;  %vm7037_vm9 = vcmp.lt.s32.totalorder %v7023_v6, 16  ;;  %v17122_v6 = vld [vmem:[%s20934_s1 + $0xa50] sm:$0xff]  }
0x1603   :  { %vm7026_vm10 = vcmp.eq.s32.totalorder %v17567_v3, %v7022_v0  ;;  %vm7039_vm11 = vmand %vm7027_vm8, %vm7037_vm9  ;;  %v17123_v0 = vld [vmem:[%s20934_s1 + $0xa58] sm:$0xff]  }
0x1604   :  { %v6387_v46 = vadd.f32 %v13150_v42, %v6381_v33  ;;  %v5452_v33 = vrot.slane %v5444_v38, %v18723_v13  ;;  %v5456_v2 = vmul.f32 %v5448_v54, %v19057_v20  ;;  %v7043_v59 = vsel %vm7039_vm11, 1.0, %v17526_v17 }
0x1606   :  { %v6388_v58 = vpack.c.bf16 %v6387_v46, %v6387_v46  ;;  %v5457_v24 = vmul.f32 %v5452_v33, %v19051_v31  ;;  %v5458_v50 = vmul.f32 %v5452_v33, %v19053_v1  ;;  %v5460_v16 = vadd.f32 %v5456_v2, %v18754_v45 }
0x1608   :  { %15898 = vmatmul.mubr.bf16.vlgmr.msra.gmra.mrb[84].mxu1 %v6388_v58  ;;  %v5455_v58 = vmul.f32 %v5448_v54, %v19055_v11  ;;  %v5461_v25 = vadd.f32 %v5457_v24, %v18760_v40  ;;  %v5462_v31 = vadd.f32 %v5458_v50, %v18762_v21 }
0x160a   :  { %v5459_v52 = vadd.f32 %v5455_v58, %v18752_v61 }
0x16db   :  { %v6493_v19 = vpop.f32.mrb[84].mxu1 }
0x16dc   :  { %v6494_v29 = vadd.f32 %v13167_v9, %v6493_v19  ;;  %v15899_v51 = vpop.f32.mrb[85].mxu1  ;;  %v5463_v19 = vmul.f32 0.75, %v5459_v52 }
0x16dd   :  { %v6496_v55 = vpop.f32.mrb[86].mxu1 }
0x16de   :  { %v13176_v22 = vmul.f32 -1.442695, %v6494_v29  ;;  %v15900_v27 = vpop.f32.mrb[87].mxu1  ;;  %v5464_v29 = vmul.f32 0.75, %v5460_v16 }
0x16df   :  { %v5466_v27 = vmul.f32 0.75, %v5462_v31 }
0x16e0   :  { %17412 = vpow2.f32 %v13176_v22  ;;  %v5465_v22 = vmul.f32 0.75, %v5461_v25  ;;  %v7024_v25 = vadd.s32 4, %v17578_v7 }
0x16ea   :  { %v17413_v37 = vpop.eup %17412 }
0x16eb   :  { %v6502_v39 = vadd.f32 1.0, %v17413_v37 }
0x16ed   :  { %17414 = vrcp.f32 %v6502_v39 }
0x16f7   :  { %v17415_v34 = vpop.eup %17414 }
0x16f8   :  { %v6510_v47 = vmul.f32 %v17415_v34, %v13177_v56  ;;  %v7042_v56 = vsel %vm7026_vm10, 1.0, %v17526_v17 }
0x16f9   :  { %v19435_v34 = vpack.c.bf16 %v7043_v59, %v7042_v56  ;;  %v17124_v56 = vld [vmem:[%s20934_s1 + $0xa60] sm:$0xff]   ;;  %v17125_v59 = vld [vmem:[%s20934_s1 + $0xa68] sm:$0xff]  }
0x16fa   :  { %v6516_v42 = vadd.f32 %v13178_v60, %v6510_v47  ;;  %v13204_v47 = vld [vmem:[%s20935_s2 + $0x49] ss:$0 sm:$0xff] }
0x16fc   :  { %v6524_v46 = vrot.slane %v6516_v42, %v18715_v10 }
0x16fe   :  { %v6525_v12 = vcombine.high %v6524_v46, %v6524_v46  ;;  %v6532_v23 = vrot.slane %v6524_v46, %v18715_v10 }
0x1700   :  { %v6543_v14 = vrot.slane %v6532_v23, %v18723_v13  ;;  %v6539_v15 = vrot.slane %v6525_v12, %v18715_v10  ;;  %v6711_v23 = vadd.s32 4294967292, %v17578_v7 }
0x1702   :  { %v6550_v32 = vmul.f32 %v6543_v14, %v19279_v63  ;;  %v6551_v11 = vmul.f32 %v6543_v14, %v19281_v57  ;;  %v6547_v20 = vrot.slane %v6539_v15, %v18723_v13  ;;  %v7025_v14 = vadd.s32 4, %v17581_v8  ;;  %v13205_v15 = vld [vmem:[%s20935_s2 + $0x4a] ss:$0 sm:$0xff] }
0x1703   :  { %vm6715_vm12 = vcmp.eq.s32.totalorder %v17567_v3, %v6711_v23 }
0x1704   :  { %v6554_v1 = vadd.f32 %v6550_v32, %v18752_v61  ;;  %v6555_v48 = vadd.f32 %v6551_v11, %v18754_v45  ;;  %v6552_v18 = vmul.f32 %v6547_v20, %v19275_v26  ;;  %v6553_v9 = vmul.f32 %v6547_v20, %v19277_v62 }
0x1705   :  { %v6712_v20 = vadd.s32 4294967292, %v17581_v8  ;;  %vm7029_vm13 = vcmp.eq.s32.totalorder %v17567_v3, %v7025_v14 }
0x1706   :  { %v6558_v51 = vmul.f32 0.25, %v6554_v1  ;;  %v6559_v63 = vmul.f32 0.25, %v6555_v48  ;;  %v6556_v57 = vadd.f32 %v6552_v18, %v18760_v40  ;;  %v6557_v55 = vadd.f32 %v6553_v9, %v18762_v21  ;;  %vm7041_vm3 = vmand %vm7029_vm13, %vm7037_vm9 }
0x1707   :  { %v6709_v21 = vadd.s32 4294967292, %v17569_v4  ;;  %v13195_v4 = vld [vmem:[%s20935_s2 + $0x48] ss:$0 sm:$0xff]  ;;  %vm6716_vm2 = vcmp.eq.s32.totalorder %v17567_v3, %v6712_v20  ;;  %v17131_v20 = vld [vmem:[%s20934_s1 + $0xad8] sm:$0xff]  }
0x1708   :  { %v19399_v43 = vadd.f32 %v6558_v51, %v5463_v19  ;;  %v19401_v41 = vadd.f32 %v6559_v63, %v5464_v29  ;;  %v6560_v61 = vmul.f32 0.25, %v6556_v57  ;;  %v6561_v45 = vmul.f32 0.25, %v6557_v55  ;;  %v17112_v63 = vld [vmem:[%s20934_s1 + $0xa80] sm:$0xff]   ;;  %v17113_v55 = vld [vmem:[%s20934_s1 + $0xa88] sm:$0xff]  }
0x1709   :  { %vm6713_vm4 = vcmp.eq.s32.totalorder %v17567_v3, %v6709_v21  ;;  %vm6717_vm5 = vcmp.ge.s32.totalorder %v6709_v21, 0  ;;  %v6732_v19 = vsel %vm6716_vm2, 1.0, %v17526_v17  ;;  %v7045_v29 = vsel %vm7041_vm3, 1.0, %v17526_v17  ;;  %v17118_v21 = vld [vmem:[%s20934_s1 + $0xab0] sm:$0xff]  }
0x170a   :  { %v19405_v26 = vpack.c.bf16 %v19401_v41, %v19399_v43  ;;  %v19407_v62 = vadd.f32 %v6560_v61, %v5465_v22  ;;  %v19409_v35 = vadd.f32 %v6561_v45, %v5466_v27  ;;  %vm6719_vm7 = vmand %vm6713_vm4, %vm6717_vm5  ;;  %vm7028_vm4 = vcmp.eq.s32.totalorder %v17567_v3, %v7024_v25  ;;  %v17114_v22 = vld [vmem:[%s20934_s1 + $0xa90] sm:$0xff]   ;;  %v17115_v27 = vld [vmem:[%s20934_s1 + $0xa98] sm:$0xff]  }
0x170b   :  { %v6729_v37 = vsel %vm6719_vm7, 1.0, %v17526_v17  ;;  %vm6721_vm14 = vmand %vm6715_vm12, %vm6717_vm5  ;;  %v7044_v51 = vsel %vm7028_vm4, 1.0, %v17526_v17  ;;  %v17116_v61 = vld [vmem:[%s20934_s1 + $0xaa0] sm:$0xff]   ;;  %v17117_v45 = vld [vmem:[%s20934_s1 + $0xaa8] sm:$0xff]  }
0x170c   :  { %15917 = vmatprep.mubr.bf16.mxu0 %v19405_v26  ;;  %v19414_v40 = vpack.c.bf16 %v19409_v35, %v19407_v62  ;;  %v19424_v39 = vpack.c.bf16 %v6730_v49, %v6729_v37  ;;  %v6731_v7 = vsel %vm6721_vm14, 1.0, %v17526_v17  ;;  %v19479_v3 = vpack.c.bf16 %v7045_v29, %v7044_v51  ;;  %v17120_v37 = vld [vmem:[%s20934_s1 + $0xa40] sm:$0xff]   ;;  %v17121_v49 = vld [vmem:[%s20934_s1 + $0xa48] sm:$0xff]   ;;  %v17138_v51 = vld [vmem:[%s20934_s1 + $0xbd0] sm:$0xff]  }
0x170d   :  { %v19477_v57 = vpack.c.bf16 %v6732_v19, %v6731_v7  ;;  %v17132_v25 = vld [vmem:[%s20934_s1 + $0xae0] sm:$0xff]   ;;  %v17135_v7 = vld [vmem:[%s20934_s1 + $0xaf8] sm:$0xff]   ;;  %v17137_v29 = vld [vmem:[%s20934_s1 + $0xbc8] sm:$0xff]  }
0x170e   :  { %15918 = vmatmul.mubr.bf16.vlgmr.msra.gmra.mrb[72].mxu0 %v19414_v40  ;;  %15925 = vmatprep.mubr.msk.bf16.mxu1 %vm68_vm0, %v19424_v39  ;;  %v17136_v19 = vld [vmem:[%s20934_s1 + $0xbc0] sm:$0xff]  }
0x170f   :  { %15973 = vmatprep.mubr.msk.bf16.mxu0 %vm68_vm0, %v19435_v34 }
0x17e1   :  { %v15919_v5 = vpop.f32.mrb[72].mxu0 }
0x17e2   :  { %v6681_v60 = vadd.f32 %v15919_v5, %v13195_v4  ;;  %v6672_v38 = vpop.f32.mrb[73].mxu0  ;;  %v17127_v5 = vld [vmem:[%s20934_s1 + $0xa78] sm:$0xff]  }
0x17e3   :  { %v6673_v54 = vadd.f32 %v13195_v4, %v6672_v38  ;;  %v15920_v42 = vpop.f32.mrb[74].mxu0  ;;  %v17144_v38 = vld [vmem:[%s20934_s1 + $0xb00] sm:$0xff]  }
0x17e4   :  { %v6689_v33 = vmax.f32 %v6681_v60, 0.0  ;;  %v6684_v46 = vadd.f32 %v15920_v42, %v13195_v4  ;;  %v6675_v58 = vpop.f32.mrb[75].mxu0  ;;  %v17128_v60 = vld [vmem:[%s20934_s1 + $0xac0] sm:$0xff]   ;;  %v17147_v42 = vld [vmem:[%s20934_s1 + $0xb18] sm:$0xff]  }
0x17e5   :  { %v6687_v2 = vmax.f32 %v6673_v54, 0.0  ;;  %v6676_v12 = vadd.f32 %v13195_v4, %v6675_v58  ;;  %v17126_v4 = vld [vmem:[%s20934_s1 + $0xa70] sm:$0xff]  }
0x17e6   :  { %v6698_v24 = vmul.f32 %v13204_v47, %v6689_v33  ;;  %v6690_v50 = vmax.f32 %v6684_v46, 0.0  ;;  %v17146_v54 = vld [vmem:[%s20934_s1 + $0xb10] sm:$0xff]  }
0x17e7   :  { %v6696_v52 = vmul.f32 %v13204_v47, %v6687_v2  ;;  %v6688_v16 = vmax.f32 %v6676_v12, 0.0 }
0x17e8   :  { %v6699_v32 = vmul.f32 %v13204_v47, %v6690_v50  ;;  %v19453_v31 = vadd.f32 %v13205_v15, %v6698_v24 }
0x17e9   :  { %v6697_v11 = vmul.f32 %v13204_v47, %v6688_v16  ;;  %v19458_v48 = vadd.f32 %v13205_v15, %v6696_v52  ;;  %v17145_v47 = vld [vmem:[%s20934_s1 + $0xb08] sm:$0xff]  }
0x17ea   :  { %v19455_v1 = vadd.f32 %v13205_v15, %v6699_v32  ;;  %v17129_v32 = vld [vmem:[%s20934_s1 + $0xac8] sm:$0xff]  }
0x17eb   :  { %v19460_v18 = vadd.f32 %v13205_v15, %v6697_v11  ;;  %v17130_v11 = vld [vmem:[%s20934_s1 + $0xad0] sm:$0xff]  }
0x17ec   :  { %v6736_v9 = vpack.c.bf16 %v19455_v1, %v19453_v31 }
0x17ed   :  { %v6735_v8 = vpack.c.bf16 %v19460_v18, %v19458_v48 }
0x17ef   :  { %15921 = vmatprep.subr.bf16.mxu1 %v6735_v8  ;;  %15969 = vmatprep.subr.bf16.mxu0 %v6735_v8 }
0x17f0   :  { %15922 = vmatpush3.bf16.msra.mxu1 %v6735_v8  ;;  %15970 = vmatpush3.bf16.msra.mxu0 %v6735_v8 }
0x17f1   :  { %15923 = vmatprep.subr.bf16.mxu1 %v6736_v9  ;;  %15971 = vmatprep.subr.bf16.mxu0 %v6736_v9 }
0x17f4   :  { %15924 = vmatpush3.bf16.msra.mxu1 %v6736_v9  ;;  %15972 = vmatpush3.bf16.msra.mxu0 %v6736_v9 }
0x17f5   :  { %15929 = vmatprep.subr.bf16.mxu1 %v17112_v63  ;;  %15997 = vmatprep.subr.bf16.mxu0 %v17144_v38 }
0x17f7   :  { %15926 = vmatmul.mubr.msk.bf16.vlgmr.msra.gmra.mrb[88].mxu1 %vm68_vm0, %v19477_v57  ;;  %15974 = vmatmul.mubr.msk.bf16.vlgmr.msra.gmra.mrb[76].mxu0 %vm68_vm0, %v19479_v3 }
0x17f8   :  { %15930 = vmatpush3.bf16.msra.mxu1 %v17112_v63  ;;  %15945 = vmatprep.mubr.bf16.mxu1 %v6735_v8  ;;  %v17134_v8 = vld [vmem:[%s20934_s1 + $0xaf0] sm:$0xff]   ;;  %v17139_v63 = vld [vmem:[%s20934_s1 + $0xbd8] sm:$0xff]  }
0x17f9   :  { %15931 = vmatprep.subr.bf16.mxu1 %v17113_v55  ;;  %15998 = vmatpush3.bf16.msra.mxu0 %v17144_v38 }
0x17fa   :  { %15999 = vmatprep.subr.bf16.mxu0 %v17145_v47 }
0x17fc   :  { %15932 = vmatpush3.bf16.msra.mxu1 %v17113_v55  ;;  %v17140_v55 = vld [vmem:[%s20934_s1 + $0xbe0] sm:$0xff]  }
0x17fd   :  { %15933 = vmatprep.subr.bf16.mxu1 %v17114_v22  ;;  %16000 = vmatpush3.bf16.msra.mxu0 %v17145_v47  ;;  %v13284_v47 = vld [vmem:[%s20935_s2 + $0x4d] ss:$0 sm:$0xff] }
0x17fe   :  { %16001 = vmatprep.subr.bf16.mxu0 %v17146_v54 }
0x1800   :  { %15934 = vmatpush3.bf16.msra.mxu1 %v17114_v22  ;;  %v17141_v22 = vld [vmem:[%s20934_s1 + $0xbe8] sm:$0xff]  }
0x1801   :  { %15935 = vmatprep.subr.bf16.mxu1 %v17115_v27  ;;  %16002 = vmatpush3.bf16.msra.mxu0 %v17146_v54 }
0x1802   :  { %16003 = vmatprep.subr.bf16.mxu0 %v17147_v42 }
0x1804   :  { %15936 = vmatpush3.bf16.msra.mxu1 %v17115_v27  ;;  %v17142_v27 = vld [vmem:[%s20934_s1 + $0xbf0] sm:$0xff]  }
0x1805   :  { %15937 = vmatprep.subr.bf16.mxu1 %v17116_v61  ;;  %16004 = vmatpush3.bf16.msra.mxu0 %v17147_v42 }
0x1808   :  { %15938 = vmatpush3.bf16.msra.mxu1 %v17116_v61  ;;  %v17143_v61 = vld [vmem:[%s20934_s1 + $0xbf8] sm:$0xff]  }
0x1809   :  { %15939 = vmatprep.subr.bf16.mxu1 %v17117_v45 }
0x180c   :  { %15940 = vmatpush3.bf16.msra.mxu1 %v17117_v45  ;;  %v17148_v45 = vld [vmem:[%s20934_s1 + $0xb20] sm:$0xff]  }
0x180d   :  { %15941 = vmatprep.subr.bf16.mxu1 %v17118_v21  ;;  %16005 = vmatprep.subr.bf16.mxu0 %v17148_v45 }
0x180e   :  { %16006 = vmatpush3.bf16.msra.mxu0 %v17148_v45 }
0x1810   :  { %15942 = vmatpush3.bf16.msra.mxu1 %v17118_v21  ;;  %v17149_v21 = vld [vmem:[%s20934_s1 + $0xb28] sm:$0xff]  }
0x1811   :  { %15943 = vmatprep.subr.bf16.mxu1 %v17119_v36  ;;  %16007 = vmatprep.subr.bf16.mxu0 %v17149_v21 }
0x1812   :  { %16008 = vmatpush3.bf16.msra.mxu0 %v17149_v21 }
0x1814   :  { %15944 = vmatpush3.bf16.msra.mxu1 %v17119_v36  ;;  %v17150_v36 = vld [vmem:[%s20934_s1 + $0xb30] sm:$0xff]  }
0x1815   :  { %15949 = vmatprep.subr.bf16.mxu1 %v17120_v37  ;;  %16009 = vmatprep.subr.bf16.mxu0 %v17150_v36 }
0x1816   :  { %16010 = vmatpush3.bf16.msra.mxu0 %v17150_v36  ;;  %v13393_v36 = vld [vmem:[%s20935_s2 + $0x59] ss:$0 sm:$0xff] }
0x1817   :  { %15946 = vmatmul.mubr.bf16.vlgmr.msra.gmra.mrb[92].mxu1 %v6736_v9  ;;  %v17133_v9 = vld [vmem:[%s20934_s1 + $0xae8] sm:$0xff]  }
0x1818   :  { %15950 = vmatpush3.bf16.msra.mxu1 %v17120_v37  ;;  %v13282_v37 = vld [vmem:[%s20935_s2 + $0x4b] ss:$0 sm:$0xff] }
0x1819   :  { %15951 = vmatprep.subr.bf16.mxu1 %v17121_v49 }
0x181c   :  { %15952 = vmatpush3.bf16.msra.mxu1 %v17121_v49 }
0x181d   :  { %15953 = vmatprep.subr.bf16.mxu1 %v17122_v6 }
0x1820   :  { %15954 = vmatpush3.bf16.msra.mxu1 %v17122_v6 }
0x1821   :  { %15955 = vmatprep.subr.bf16.mxu1 %v17123_v0 }
0x1824   :  { %15956 = vmatpush3.bf16.msra.mxu1 %v17123_v0 }
0x1825   :  { %15957 = vmatprep.subr.bf16.mxu1 %v17124_v56 }
0x1828   :  { %15958 = vmatpush3.bf16.msra.mxu1 %v17124_v56  ;;  %v13283_v56 = vld [vmem:[%s20935_s2 + $0x4c] ss:$0 sm:$0xff] }
0x1829   :  { %15959 = vmatprep.subr.bf16.mxu1 %v17125_v59 }
0x182c   :  { %15960 = vmatpush3.bf16.msra.mxu1 %v17125_v59 }
0x182d   :  { %15961 = vmatprep.subr.bf16.mxu1 %v17126_v4 }
0x1830   :  { %15962 = vmatpush3.bf16.msra.mxu1 %v17126_v4 }
0x1831   :  { %15963 = vmatprep.subr.bf16.mxu1 %v17127_v5 }
0x1834   :  { %15964 = vmatpush3.bf16.msra.mxu1 %v17127_v5 }
0x1835   :  { %15977 = vmatprep.subr.bf16.mxu1 %v17128_v60 }
0x18ca   :  { %v15927_v33 = vpop.f32.mrb[88].mxu1  ;;  %v15975_v46 = vpop.f32.mrb[76].mxu0 }
0x18cb   :  { %v6777_v58 = vpop.f32.mrb[89].mxu1  ;;  %v7088_v2 = vpop.f32.mrb[77].mxu0 }
0x18cc   :  { %v15928_v12 = vpop.f32.mrb[90].mxu1  ;;  %v15976_v23 = vpop.f32.mrb[78].mxu0 }
0x18cd   :  { %v6793_v24 = vpack.c.bf16 %v15928_v12, %v15927_v33  ;;  %v6780_v50 = vpop.f32.mrb[91].mxu1  ;;  %v7104_v14 = vpack.c.bf16 %v15976_v23, %v15975_v46  ;;  %v7091_v15 = vpop.f32.mrb[79].mxu0  ;;  %v7256_v12 = vmul.f32 %v18307_v30, %v19453_v31 }
0x18ce   :  { %v6792_v52 = vpack.c.bf16 %v6780_v50, %v6777_v58  ;;  %v7103_v16 = vpack.c.bf16 %v7091_v15, %v7088_v2  ;;  %v7254_v50 = vmul.f32 %v18307_v30, %v19458_v48 }
0x18d0   :  { %15965 = vmatprep.mubr.bf16.mxu1 %v6792_v52  ;;  %v7257_v52 = vmul.f32 %v18307_v30, %v19455_v1  ;;  %v13383_v1 = vld [vmem:[%s20935_s2 + $0x57] ss:$0 sm:$0xff] }
0x18d1   :  { %15966 = vmatmul.mubr.bf16.vlgmr.msra.gmra.mrb[92].mxu1 %v6793_v24 }
0x18d2   :  { %15978 = vmatpush3.bf16.msra.mxu1 %v17128_v60  ;;  %15993 = vmatprep.mubr.bf16.mxu1 %v7103_v16 }
0x18d3   :  { %15979 = vmatprep.subr.bf16.mxu1 %v17129_v32 }
0x18d6   :  { %15980 = vmatpush3.bf16.msra.mxu1 %v17129_v32 }
0x18d7   :  { %15981 = vmatprep.subr.bf16.mxu1 %v17130_v11 }
0x18da   :  { %15982 = vmatpush3.bf16.msra.mxu1 %v17130_v11  ;;  %v7255_v11 = vmul.f32 %v18307_v30, %v19460_v18  ;;  %v13392_v30 = vld [vmem:[%s20935_s2 + $0x58] ss:$0 sm:$0xff] }
0x18db   :  { %15983 = vmatprep.subr.bf16.mxu1 %v17131_v20 }
0x18de   :  { %15984 = vmatpush3.bf16.msra.mxu1 %v17131_v20 }
0x18df   :  { %15985 = vmatprep.subr.bf16.mxu1 %v17132_v25 }
0x18e2   :  { %15986 = vmatpush3.bf16.msra.mxu1 %v17132_v25 }
0x18e3   :  { %15987 = vmatprep.subr.bf16.mxu1 %v17133_v9 }
0x18e6   :  { %15988 = vmatpush3.bf16.msra.mxu1 %v17133_v9 }
0x18e7   :  { %15989 = vmatprep.subr.bf16.mxu1 %v17134_v8 }
0x18ea   :  { %15990 = vmatpush3.bf16.msra.mxu1 %v17134_v8 }
0x18eb   :  { %15991 = vmatprep.subr.bf16.mxu1 %v17135_v7 }
0x18ee   :  { %15992 = vmatpush3.bf16.msra.mxu1 %v17135_v7 }
0x18ef   :  { %16057 = vmatprep.subr.bf16.mxu1 %v17136_v19 }
0x18f1   :  { %15994 = vmatmul.mubr.bf16.vlgmr.msra.gmra.mrb[92].mxu1 %v7104_v14 }
0x18f2   :  { %16058 = vmatpush3.bf16.msra.mxu1 %v17136_v19  ;;  %16073 = vmatprep.mubr.bf16.mxu1 %v19405_v26 }
0x18f3   :  { %16059 = vmatprep.subr.bf16.mxu1 %v17137_v29 }
0x18f6   :  { %16060 = vmatpush3.bf16.msra.mxu1 %v17137_v29 }
0x18f7   :  { %16061 = vmatprep.subr.bf16.mxu1 %v17138_v51 }
0x18fa   :  { %16062 = vmatpush3.bf16.msra.mxu1 %v17138_v51 }
0x18fb   :  { %16063 = vmatprep.subr.bf16.mxu1 %v17139_v63 }
0x18fe   :  { %16064 = vmatpush3.bf16.msra.mxu1 %v17139_v63 }
0x18ff   :  { %16065 = vmatprep.subr.bf16.mxu1 %v17140_v55 }
0x1902   :  { %16066 = vmatpush3.bf16.msra.mxu1 %v17140_v55 }
0x1903   :  { %16067 = vmatprep.subr.bf16.mxu1 %v17141_v22 }
0x1906   :  { %16068 = vmatpush3.bf16.msra.mxu1 %v17141_v22 }
0x1907   :  { %16069 = vmatprep.subr.bf16.mxu1 %v17142_v27 }
0x190a   :  { %16070 = vmatpush3.bf16.msra.mxu1 %v17142_v27 }
0x190b   :  { %16071 = vmatprep.subr.bf16.mxu1 %v17143_v61 }
0x190e   :  { %16072 = vmatpush3.bf16.msra.mxu1 %v17143_v61 }
0x1911   :  { %16074 = vmatmul.mubr.bf16.vlgmr.msra.gmra.mrb[96].mxu1 %v19414_v40 }
0x1912   :  { %16129 = vmatprep.mubr.msk.bf16.mxu1 %vm68_vm0, %v19435_v34  ;;  %v17151_v34 = vld [vmem:[%s20934_s1 + $0xb38] sm:$0xff]  }
0x1913   :  { %16011 = vmatprep.subr.bf16.mxu0 %v17151_v34 }
0x1914   :  { %16012 = vmatpush3.bf16.msra.mxu0 %v17151_v34 }
0x1915   :  { %16017 = vmatprep.subr.bf16.mxu0 %v17526_v17 }
0x19c4   :  { %v15995_v49 = vpop.f32.mrb[92].mxu1 }
0x19c5   :  { %v7230_v6 = vadd.f32 %v15995_v49, %v13282_v37  ;;  %v7204_v0 = vpop.f32.mrb[93].mxu1 }
0x19c6   :  { %v7228_v59 = vadd.f32 %v13282_v37, %v7204_v0  ;;  %v15996_v4 = vpop.f32.mrb[94].mxu1 }
0x19c7   :  { %v7234_v5 = vmax.f32 %v7230_v6, 0.0  ;;  %v7231_v60 = vadd.f32 %v15996_v4, %v13282_v37  ;;  %v7207_v38 = vpop.f32.mrb[95].mxu1 }
0x19c8   :  { %v7232_v54 = vmax.f32 %v7228_v59, 0.0  ;;  %v7229_v42 = vadd.f32 %v13282_v37, %v7207_v38  ;;  %v17152_v38 = vld [vmem:[%s20934_s1 + $0xb40] sm:$0xff]  }
0x19c9   :  { %v7243_v33 = vmul.f32 %v13283_v56, %v7234_v5  ;;  %v7235_v46 = vmax.f32 %v7231_v60, 0.0 }
0x19ca   :  { %v7241_v58 = vmul.f32 %v13283_v56, %v7232_v54  ;;  %v7233_v2 = vmax.f32 %v7229_v42, 0.0  ;;  %v17154_v54 = vld [vmem:[%s20934_s1 + $0xb50] sm:$0xff]   ;;  %v17156_v42 = vld [vmem:[%s20934_s1 + $0xb60] sm:$0xff]  }
0x19cb   :  { %v7252_v23 = vadd.f32 %v13284_v47, %v7243_v33  ;;  %v7244_v24 = vmul.f32 %v13283_v56, %v7235_v46  ;;  %v17157_v33 = vld [vmem:[%s20934_s1 + $0xb68] sm:$0xff]   ;;  %v17158_v46 = vld [vmem:[%s20934_s1 + $0xb70] sm:$0xff]  }
0x19cc   :  { %v7250_v14 = vadd.f32 %v13284_v47, %v7241_v58  ;;  %v7242_v15 = vmul.f32 %v13283_v56, %v7233_v2  ;;  %v17159_v58 = vld [vmem:[%s20934_s1 + $0xb78] sm:$0xff]   ;;  %v13301_v2 = vld [vmem:[%s20935_s2 + $0x4e] ss:$0 sm:$0xff] }
0x19cd   :  { %v7260_v16 = vadd.f32 %v7256_v12, %v7252_v23  ;;  %v7253_v32 = vadd.f32 %v13284_v47, %v7244_v24 }
0x19ce   :  { %v7251_v20 = vadd.f32 %v13284_v47, %v7242_v15  ;;  %v7258_v25 = vadd.f32 %v7254_v50, %v7250_v14  ;;  %v17153_v47 = vld [vmem:[%s20934_s1 + $0xb48] sm:$0xff]  }
0x19cf   :  { %v7261_v9 = vadd.f32 %v7257_v52, %v7253_v32  ;;  %v13310_v50 = vld [vmem:[%s20935_s2 + $0x4f] ss:$0 sm:$0xff] }
0x19d0   :  { %v7259_v8 = vadd.f32 %v7255_v11, %v7251_v20 }
0x19d1   :  { %v7263_v31 = vpack.c.bf16 %v7261_v9, %v7260_v16 }
0x19d2   :  { %v7262_v7 = vpack.c.bf16 %v7259_v8, %v7258_v25  ;;  %v13311_v8 = vld [vmem:[%s20935_s2 + $0x50] ss:$0 sm:$0xff] }
0x19d4   :  { %16013 = vmatprep.mubr.bf16.mxu0 %v7262_v7 }
0x19d5   :  { %16014 = vmatmul.mubr.bf16.vlgmr.msra.gmra.mrb[80].mxu0 %v7263_v31 }
0x19d6   :  { %16033 = vmatprep.mubr.msk.bf16.mxu0 %vm17527_vm15, %v17526_v17  ;;  %16018 = vmatpush3.bf16.msra.mxu0 %v17152_v38 }
0x19d7   :  { %16019 = vmatprep.subr.bf16.mxu0 %v17526_v17 }
0x19da   :  { %16020 = vmatpush3.bf16.msra.mxu0 %v17153_v47 }
0x19db   :  { %16021 = vmatprep.subr.bf16.mxu0 %v17526_v17 }
0x19de   :  { %16022 = vmatpush3.bf16.msra.mxu0 %v17154_v54 }
0x19df   :  { %16023 = vmatprep.subr.bf16.mxu0 %v17526_v17 }
0x19e4   :  { %v16075_v48 = vpop.f32.mrb[96].mxu1 }
0x19e5   :  { %v7840_v19 = vadd.f32 %v16075_v48, %v13383_v1  ;;  %v7831_v29 = vpop.f32.mrb[97].mxu1 }
0x19e6   :  { %v7832_v18 = vadd.f32 %v13383_v1, %v7831_v29  ;;  %v16076_v51 = vpop.f32.mrb[98].mxu1 }
0x19e7   :  { %v7848_v63 = vmax.f32 %v7840_v19, 0.0  ;;  %v7843_v55 = vadd.f32 %v16076_v51, %v13383_v1  ;;  %v7834_v22 = vpop.f32.mrb[99].mxu1 }
0x19e8   :  { %v7846_v27 = vmax.f32 %v7832_v18, 0.0  ;;  %v7835_v61 = vadd.f32 %v13383_v1, %v7834_v22 }
0x19e9   :  { %v7857_v45 = vmul.f32 %v13392_v30, %v7848_v63  ;;  %v7849_v21 = vmax.f32 %v7843_v55, 0.0 }
0x19ea   :  { %v7855_v34 = vmul.f32 %v13392_v30, %v7846_v27  ;;  %v7847_v37 = vmax.f32 %v7835_v61, 0.0 }
0x19eb   :  { %v7858_v49 = vmul.f32 %v13392_v30, %v7849_v21  ;;  %v19635_v0 = vadd.f32 %v13393_v36, %v7857_v45 }
0x19ec   :  { %v7856_v6 = vmul.f32 %v13392_v30, %v7847_v37  ;;  %v19639_v59 = vadd.f32 %v13393_v36, %v7855_v34 }
0x19ed   :  { %v19637_v56 = vadd.f32 %v13393_v36, %v7858_v49 }
0x19ee   :  { %v19641_v4 = vadd.f32 %v13393_v36, %v7856_v6 }
0x19ef   :  { %v19645_v5 = vpack.c.bf16 %v19637_v56, %v19635_v0 }
0x19f0   :  { %v19649_v60 = vpack.c.bf16 %v19641_v4, %v19639_v59 }
0x19f2   :  { %16125 = vmatprep.subr.bf16.mxu1 %v19649_v60 }
0x19f3   :  { %16126 = vmatpush3.bf16.msra.mxu1 %v19649_v60 }
0x19f4   :  { %16127 = vmatprep.subr.bf16.mxu1 %v19645_v5 }
0x19f7   :  { %16128 = vmatpush3.bf16.msra.mxu1 %v19645_v5 }
0x19fa   :  { %16130 = vmatmul.mubr.msk.bf16.vlgmr.msra.gmra.mrb[100].mxu1 %vm68_vm0, %v19479_v3  ;;  %v17155_v3 = vld [vmem:[%s20934_s1 + $0xb58] sm:$0xff]  }
0x19fb   :  { %16024 = vmatpush3.bf16.msra.mxu0 %v17155_v3 }
0x19fc   :  { %16025 = vmatprep.subr.bf16.mxu0 %v17526_v17 }
0x19ff   :  { %16026 = vmatpush3.bf16.msra.mxu0 %v17156_v42 }
0x1a00   :  { %16027 = vmatprep.subr.bf16.mxu0 %v17526_v17 }
0x1a03   :  { %16028 = vmatpush3.bf16.msra.mxu0 %v17157_v33 }
0x1a04   :  { %16029 = vmatprep.subr.bf16.mxu0 %v17526_v17 }
0x1a07   :  { %16030 = vmatpush3.bf16.msra.mxu0 %v17158_v46 }
0x1a08   :  { %16031 = vmatprep.subr.bf16.mxu0 %v17526_v17 }
0x1a0b   :  { %16032 = vmatpush3.bf16.msra.mxu0 %v17159_v58 }
0x1a0c   :  { %16037 = vmatprep.subr.bf16.mxu0 %v17526_v17 }
0x1aa8   :  { %v16015_v12 = vpop.f32.mrb[80].mxu0 }
0x1aa9   :  { %v7377_v23 = vadd.f32 %v16015_v12, %v13301_v2  ;;  %v7368_v24 = vpop.f32.mrb[81].mxu0 }
0x1aaa   :  { %v7369_v14 = vadd.f32 %v13301_v2, %v7368_v24  ;;  %v16016_v15 = vpop.f32.mrb[82].mxu0  ;;  %v17162_v24 = vld [vmem:[%s20934_s1 + $0xb90] sm:$0xff]  }
0x1aab   :  { %v7385_v52 = vmax.f32 %v7377_v23, 0.0  ;;  %v7380_v16 = vadd.f32 %v16016_v15, %v13301_v2  ;;  %v7371_v32 = vpop.f32.mrb[83].mxu0  ;;  %v17161_v23 = vld [vmem:[%s20934_s1 + $0xb88] sm:$0xff]  }
0x1aac   :  { %v7383_v11 = vmax.f32 %v7369_v14, 0.0  ;;  %v7372_v20 = vadd.f32 %v13301_v2, %v7371_v32  ;;  %v17160_v2 = vld [vmem:[%s20934_s1 + $0xb80] sm:$0xff]   ;;  %v17165_v15 = vld [vmem:[%s20934_s1 + $0xba8] sm:$0xff]   ;;  %v13328_v32 = vld [vmem:[%s20935_s2 + $0x51] ss:$0 sm:$0xff] }
0x1aad   :  { %v7394_v25 = vmul.f32 %v13310_v50, %v7385_v52  ;;  %v7386_v9 = vmax.f32 %v7380_v16, 0.0  ;;  %v17164_v14 = vld [vmem:[%s20934_s1 + $0xba0] sm:$0xff]   ;;  %v17166_v52 = vld [vmem:[%s20934_s1 + $0xbb0] sm:$0xff]   ;;  %v17167_v16 = vld [vmem:[%s20934_s1 + $0xbb8] sm:$0xff]  }
0x1aae   :  { %v7392_v31 = vmul.f32 %v13310_v50, %v7383_v11  ;;  %v7384_v7 = vmax.f32 %v7372_v20, 0.0 }
0x1aaf   :  { %v7395_v1 = vmul.f32 %v13310_v50, %v7386_v9  ;;  %v19698_v19 = vadd.f32 %v13311_v8, %v7394_v25  ;;  %v13337_v9 = vld [vmem:[%s20935_s2 + $0x52] ss:$0 sm:$0xff] }
0x1ab0   :  { %v7393_v48 = vmul.f32 %v13310_v50, %v7384_v7  ;;  %v19702_v30 = vadd.f32 %v13311_v8, %v7392_v31  ;;  %v17163_v50 = vld [vmem:[%s20934_s1 + $0xb98] sm:$0xff]  }
0x1ab1   :  { %v19700_v29 = vadd.f32 %v13311_v8, %v7395_v1  ;;  %v13338_v1 = vld [vmem:[%s20935_s2 + $0x53] ss:$0 sm:$0xff] }
0x1ab2   :  { %v19704_v18 = vadd.f32 %v13311_v8, %v7393_v48 }
0x1ab3   :  { %v7412_v51 = vadd.f32 %v19700_v29, %v19698_v19 }
0x1ab4   :  { %v7405_v63 = vadd.f32 %v19704_v18, %v19702_v30 }
0x1ab5   :  { %v7413_v55 = vrot.slane %v7412_v51, 4 }
0x1ab6   :  { %v7406_v22 = vrot.slane %v7405_v63, 4 }
0x1ab7   :  { %v7414_v27 = vadd.f32 %v7413_v55, %v7412_v51  ;;  %v17168_v55 = vld [vmem:[%s20934_s1 + $0xc40] sm:$0xff]  }
0x1ab8   :  { %v7407_v61 = vadd.f32 %v7406_v22, %v7405_v63  ;;  %v17169_v22 = vld [vmem:[%s20934_s1 + $0xc48] sm:$0xff]  }
0x1ab9   :  { %v7415_v45 = vrot.slane %v7414_v27, 2 }
0x1aba   :  { %v7408_v21 = vrot.slane %v7407_v61, 2 }
0x1abb   :  { %v7416_v36 = vadd.f32 %v7415_v45, %v7414_v27  ;;  %v17171_v27 = vld [vmem:[%s20934_s1 + $0xc58] sm:$0xff]  }
0x1abc   :  { %v7409_v34 = vadd.f32 %v7408_v21, %v7407_v61  ;;  %v17174_v61 = vld [vmem:[%s20934_s1 + $0xc70] sm:$0xff]   ;;  %v17175_v45 = vld [vmem:[%s20934_s1 + $0xc78] sm:$0xff]   ;;  %v17176_v21 = vld [vmem:[%s20934_s1 + $0xc00] sm:$0xff]  }
0x1abd   :  { %v7417_v37 = vrot.slane %v7416_v36, 1 }
0x1abe   :  { %v7410_v49 = vrot.slane %v7409_v34, 1 }
0x1abf   :  { %v7418_v6 = vadd.f32 %v7417_v37, %v7416_v36  ;;  %v17177_v36 = vld [vmem:[%s20934_s1 + $0xc08] sm:$0xff]   ;;  %v17179_v37 = vld [vmem:[%s20934_s1 + $0xc18] sm:$0xff]  }
0x1ac0   :  { %v7411_v38 = vadd.f32 %v7410_v49, %v7409_v34  ;;  %v17178_v34 = vld [vmem:[%s20934_s1 + $0xc10] sm:$0xff]   ;;  %v17180_v49 = vld [vmem:[%s20934_s1 + $0xc20] sm:$0xff]  }
0x1ac1   :  { %v7420_v47 = vmul.f32 0.0625, %v7418_v6  ;;  %v17182_v6 = vld [vmem:[%s20934_s1 + $0xc30] sm:$0xff]  }
0x1ac2   :  { %v7419_v54 = vmul.f32 0.0625, %v7411_v38  ;;  %v17183_v38 = vld [vmem:[%s20934_s1 + $0xc38] sm:$0xff]  }
0x1ac3   :  { %v7422_v3 = vpack.c.bf16 %v7420_v47, %v7420_v47  ;;  %v17184_v47 = vld [vmem:[%s20934_s1 + $0xc80] sm:$0xff]  }
0x1ac4   :  { %v7421_v42 = vpack.c.bf16 %v7419_v54, %v7419_v54 }
0x1ac5   :  { %v7448_v33 = vunpack.c.l.b16 %v7422_v3 }
0x1ac6   :  { %v7447_v46 = vunpack.c.l.b16 %v7421_v42 }
0x1ac8   :  { %v7449_v58 = vsel %vm2925_vm1, %v7448_v33, %v7447_v46 }
0x1ac9   :  { %v7450_v12 = vpack.c.b16 %v7449_v58, %v7449_v58 }
0x1acb   :  { %16034 = vmatmul.mubr.bf16.vlgmr.msra.gmra.mrb[84].mxu0 %v7450_v12  ;;  %v17209_v12 = vld [vmem:[%s20934_s1 + $0xcc8] sm:$0xff]  }
0x1acc   :  { %16038 = vmatpush3.bf16.msra.mxu0 %v17160_v2  ;;  %16053 = vmatprep.mubr.msk.bf16.mxu0 %vm17527_vm15, %v17526_v17  ;;  %v17208_v2 = vld [vmem:[%s20934_s1 + $0xcc0] sm:$0xff]  }
0x1acd   :  { %16039 = vmatprep.subr.bf16.mxu0 %v17526_v17  ;;  %v16131_v54 = vpop.f32.mrb[100].mxu1  ;;  %16153 = vmatprep.subr.bf16.mxu1 %v17208_v2 }
0x1ace   :  { %v8183_v3 = vpop.f32.mrb[101].mxu1  ;;  %16154 = vmatpush3.bf16.msra.mxu1 %v17208_v2 }
0x1acf   :  { %v16132_v42 = vpop.f32.mrb[102].mxu1  ;;  %16155 = vmatprep.subr.bf16.mxu1 %v17209_v12 }
0x1ad0   :  { %16040 = vmatpush3.bf16.msra.mxu0 %v17161_v23  ;;  %v8199_v33 = vpack.c.bf16 %v16132_v42, %v16131_v54  ;;  %v8186_v46 = vpop.f32.mrb[103].mxu1  ;;  %v17210_v23 = vld [vmem:[%s20934_s1 + $0xcd0] sm:$0xff]   ;;  %v17213_v54 = vld [vmem:[%s20934_s1 + $0xce8] sm:$0xff]   ;;  %v17215_v42 = vld [vmem:[%s20934_s1 + $0xcf8] sm:$0xff]  }
0x1ad1   :  { %16041 = vmatprep.subr.bf16.mxu0 %v17526_v17  ;;  %v8198_v58 = vpack.c.bf16 %v8186_v46, %v8183_v3  ;;  %v17214_v3 = vld [vmem:[%s20934_s1 + $0xcf0] sm:$0xff]  }
0x1ad2   :  { %16156 = vmatpush3.bf16.msra.mxu1 %v17209_v12  ;;  %v13471_v12 = vld [vmem:[%s20935_s2 + $0x5b] ss:$0 sm:$0xff] }
0x1ad3   :  { %16157 = vmatprep.subr.bf16.mxu1 %v17210_v23 }
0x1ad4   :  { %16042 = vmatpush3.bf16.msra.mxu0 %v17162_v24  ;;  %v17211_v24 = vld [vmem:[%s20934_s1 + $0xcd8] sm:$0xff]  }
0x1ad5   :  { %16043 = vmatprep.subr.bf16.mxu0 %v17526_v17 }
0x1ad6   :  { %16158 = vmatpush3.bf16.msra.mxu1 %v17210_v23 }
0x1ad7   :  { %16159 = vmatprep.subr.bf16.mxu1 %v17211_v24 }
0x1ad8   :  { %16044 = vmatpush3.bf16.msra.mxu0 %v17163_v50 }
0x1ad9   :  { %16045 = vmatprep.subr.bf16.mxu0 %v17526_v17 }
0x1ada   :  { %16160 = vmatpush3.bf16.msra.mxu1 %v17211_v24 }
0x1adc   :  { %16046 = vmatpush3.bf16.msra.mxu0 %v17164_v14 }
0x1add   :  { %16047 = vmatprep.subr.bf16.mxu0 %v17526_v17 }
0x1ae0   :  { %16048 = vmatpush3.bf16.msra.mxu0 %v17165_v15 }
0x1ae1   :  { %16049 = vmatprep.subr.bf16.mxu0 %v17526_v17 }
0x1ae4   :  { %16050 = vmatpush3.bf16.msra.mxu0 %v17166_v52 }
0x1ae5   :  { %16051 = vmatprep.subr.bf16.mxu0 %v17526_v17 }
0x1ae8   :  { %16052 = vmatpush3.bf16.msra.mxu0 %v17167_v16 }
0x1ae9   :  { %16077 = vmatprep.subr.bf16.mxu0 %v19649_v60 }
0x1b9e   :  { %v7534_v11 = vpop.f32.mrb[84].mxu0 }
0x1b9f   :  { %v7535_v20 = vadd.f32 %v13328_v32, %v7534_v11  ;;  %v16035_v25 = vpop.f32.mrb[85].mxu0 }
0x1ba0   :  { %v7537_v8 = vpop.f32.mrb[86].mxu0 }
0x1ba1   :  { %v7540_v31 = vmax.f32 %v7535_v20, 0.0  ;;  %v16036_v7 = vpop.f32.mrb[87].mxu0  ;;  %v17185_v8 = vld [vmem:[%s20934_s1 + $0xc88] sm:$0xff]  }
0x1ba2   :  { %v17187_v7 = vld [vmem:[%s20934_s1 + $0xc98] sm:$0xff]  }
0x1ba3   :  { %v7546_v48 = vmul.f32 %v13337_v9, %v7540_v31  ;;  %v17186_v31 = vld [vmem:[%s20934_s1 + $0xc90] sm:$0xff]  }
0x1ba5   :  { %v7552_v51 = vadd.f32 %v13338_v1, %v7546_v48  ;;  %v17188_v1 = vld [vmem:[%s20934_s1 + $0xca0] sm:$0xff]   ;;  %v17189_v48 = vld [vmem:[%s20934_s1 + $0xca8] sm:$0xff]  }
0x1ba7   :  { %v7553_v63 = vpack.c.bf16 %v7552_v51, %v7552_v51  ;;  %v17190_v51 = vld [vmem:[%s20934_s1 + $0xcb0] sm:$0xff]  }
0x1ba9   :  { %16054 = vmatmul.mubr.bf16.vlgmr.msra.gmra.mrb[88].mxu0 %v7553_v63  ;;  %v17191_v63 = vld [vmem:[%s20934_s1 + $0xcb8] sm:$0xff]  }
0x1baa   :  { %16078 = vmatpush3.bf16.msra.mxu0 %v19649_v60  ;;  %16081 = vmatprep.mubr.msk.bf16.mxu0 %vm68_vm0, %v19424_v39  ;;  %v17170_v39 = vld [vmem:[%s20934_s1 + $0xc50] sm:$0xff]  }
0x1bab   :  { %16079 = vmatprep.subr.bf16.mxu0 %v19645_v5 }
0x1bae   :  { %16080 = vmatpush3.bf16.msra.mxu0 %v19645_v5 }
0x1baf   :  { %16085 = vmatprep.subr.bf16.mxu0 %v17168_v55 }
0x1bb1   :  { %16082 = vmatmul.mubr.msk.bf16.vlgmr.msra.gmra.mrb[92].mxu0 %vm68_vm0, %v19477_v57  ;;  %v17172_v57 = vld [vmem:[%s20934_s1 + $0xc60] sm:$0xff]  }
0x1bb2   :  { %16086 = vmatpush3.bf16.msra.mxu0 %v17168_v55  ;;  %16101 = vmatprep.mubr.bf16.mxu0 %v19649_v60  ;;  %v17173_v60 = vld [vmem:[%s20934_s1 + $0xc68] sm:$0xff]   ;;  %v17192_v55 = vld [vmem:[%s20934_s1 + $0xdc0] sm:$0xff]  }
0x1bb3   :  { %16087 = vmatprep.subr.bf16.mxu0 %v17169_v22 }
0x1bb6   :  { %16088 = vmatpush3.bf16.msra.mxu0 %v17169_v22  ;;  %v17193_v22 = vld [vmem:[%s20934_s1 + $0xdc8] sm:$0xff]  }
0x1bb7   :  { %16089 = vmatprep.subr.bf16.mxu0 %v17170_v39 }
0x1bba   :  { %16090 = vmatpush3.bf16.msra.mxu0 %v17170_v39  ;;  %v17194_v39 = vld [vmem:[%s20934_s1 + $0xdd0] sm:$0xff]  }
0x1bbb   :  { %16091 = vmatprep.subr.bf16.mxu0 %v17171_v27 }
0x1bbe   :  { %16092 = vmatpush3.bf16.msra.mxu0 %v17171_v27  ;;  %v17195_v27 = vld [vmem:[%s20934_s1 + $0xdd8] sm:$0xff]  }
0x1bbf   :  { %16093 = vmatprep.subr.bf16.mxu0 %v17172_v57 }
0x1bc2   :  { %16094 = vmatpush3.bf16.msra.mxu0 %v17172_v57  ;;  %v17196_v57 = vld [vmem:[%s20934_s1 + $0xde0] sm:$0xff]  }
0x1bc3   :  { %16095 = vmatprep.subr.bf16.mxu0 %v17173_v60 }
0x1bc6   :  { %16096 = vmatpush3.bf16.msra.mxu0 %v17173_v60  ;;  %v17197_v60 = vld [vmem:[%s20934_s1 + $0xde8] sm:$0xff]  }
0x1bc7   :  { %16097 = vmatprep.subr.bf16.mxu0 %v17174_v61 }
0x1bca   :  { %16098 = vmatpush3.bf16.msra.mxu0 %v17174_v61  ;;  %v17198_v61 = vld [vmem:[%s20934_s1 + $0xdf0] sm:$0xff]  }
0x1bcb   :  { %16099 = vmatprep.subr.bf16.mxu0 %v17175_v45 }
0x1bce   :  { %16100 = vmatpush3.bf16.msra.mxu0 %v17175_v45  ;;  %v17199_v45 = vld [vmem:[%s20934_s1 + $0xdf8] sm:$0xff]  }
0x1bcf   :  { %16105 = vmatprep.subr.bf16.mxu0 %v17176_v21 }
0x1bd1   :  { %16102 = vmatmul.mubr.bf16.vlgmr.msra.gmra.mrb[96].mxu0 %v19645_v5  ;;  %v17181_v5 = vld [vmem:[%s20934_s1 + $0xc28] sm:$0xff]  }
0x1bd2   :  { %16106 = vmatpush3.bf16.msra.mxu0 %v17176_v21  ;;  %v17200_v21 = vld [vmem:[%s20934_s1 + $0xd80] sm:$0xff]  }
0x1bd3   :  { %16107 = vmatprep.subr.bf16.mxu0 %v17177_v36 }
0x1bd6   :  { %16108 = vmatpush3.bf16.msra.mxu0 %v17177_v36  ;;  %v17201_v36 = vld [vmem:[%s20934_s1 + $0xd88] sm:$0xff]  }
0x1bd7   :  { %16109 = vmatprep.subr.bf16.mxu0 %v17178_v34 }
0x1bda   :  { %16110 = vmatpush3.bf16.msra.mxu0 %v17178_v34  ;;  %v17202_v34 = vld [vmem:[%s20934_s1 + $0xd90] sm:$0xff]  }
0x1bdb   :  { %16111 = vmatprep.subr.bf16.mxu0 %v17179_v37 }
0x1bde   :  { %16112 = vmatpush3.bf16.msra.mxu0 %v17179_v37  ;;  %v17203_v37 = vld [vmem:[%s20934_s1 + $0xd98] sm:$0xff]  }
0x1bdf   :  { %16113 = vmatprep.subr.bf16.mxu0 %v17180_v49 }
0x1be2   :  { %16114 = vmatpush3.bf16.msra.mxu0 %v17180_v49  ;;  %v17204_v49 = vld [vmem:[%s20934_s1 + $0xda0] sm:$0xff]  }
0x1be3   :  { %16115 = vmatprep.subr.bf16.mxu0 %v17181_v5 }
0x1be6   :  { %16116 = vmatpush3.bf16.msra.mxu0 %v17181_v5  ;;  %v17205_v5 = vld [vmem:[%s20934_s1 + $0xda8] sm:$0xff]  }
0x1be7   :  { %16117 = vmatprep.subr.bf16.mxu0 %v17182_v6 }
0x1bea   :  { %16118 = vmatpush3.bf16.msra.mxu0 %v17182_v6  ;;  %v17206_v6 = vld [vmem:[%s20934_s1 + $0xdb0] sm:$0xff]  }
0x1beb   :  { %16119 = vmatprep.subr.bf16.mxu0 %v17183_v38 }
0x1bee   :  { %16120 = vmatpush3.bf16.msra.mxu0 %v17183_v38  ;;  %v17207_v38 = vld [vmem:[%s20934_s1 + $0xdb8] sm:$0xff]  }
0x1bef   :  { %16133 = vmatprep.subr.bf16.mxu0 %v17184_v47 }
0x1c7c   :  { %v19826_v50 = vpop.f32.mrb[88].mxu0 }
0x1c7d   :  { %v16055_v14 = vpop.f32.mrb[89].mxu0 }
0x1c7e   :  { %v7661_v15 = vpop.f32.mrb[90].mxu0 }
0x1c7f   :  { %v16056_v52 = vpop.f32.mrb[91].mxu0 }
0x1c84   :  { %v16083_v16 = vpop.f32.mrb[92].mxu0 }
0x1c85   :  { %v7904_v32 = vpop.f32.mrb[93].mxu0 }
0x1c86   :  { %v16084_v11 = vpop.f32.mrb[94].mxu0 }
0x1c87   :  { %v7920_v20 = vpack.c.bf16 %v16084_v11, %v16083_v16  ;;  %v7907_v25 = vpop.f32.mrb[95].mxu0  ;;  %v13472_v16 = vld [vmem:[%s20935_s2 + $0x5c] ss:$0 sm:$0xff] }
0x1c88   :  { %v7919_v9 = vpack.c.bf16 %v7907_v25, %v7904_v32 }
0x1c8a   :  { %16121 = vmatprep.mubr.bf16.mxu0 %v7919_v9 }
0x1c8b   :  { %16122 = vmatmul.mubr.bf16.vlgmr.msra.gmra.mrb[96].mxu0 %v7920_v20 }
0x1c8c   :  { %16134 = vmatpush3.bf16.msra.mxu0 %v17184_v47  ;;  %16149 = vmatprep.mubr.bf16.mxu0 %v8198_v58  ;;  %v17212_v47 = vld [vmem:[%s20934_s1 + $0xce0] sm:$0xff]  }
0x1c8d   :  { %16135 = vmatprep.subr.bf16.mxu0 %v17185_v8  ;;  %16161 = vmatprep.subr.bf16.mxu1 %v17212_v47 }
0x1c8e   :  { %16162 = vmatpush3.bf16.msra.mxu1 %v17212_v47 }
0x1c8f   :  { %16163 = vmatprep.subr.bf16.mxu1 %v17213_v54 }
0x1c90   :  { %16136 = vmatpush3.bf16.msra.mxu0 %v17185_v8 }
0x1c91   :  { %16137 = vmatprep.subr.bf16.mxu0 %v17186_v31 }
0x1c92   :  { %16164 = vmatpush3.bf16.msra.mxu1 %v17213_v54  ;;  %v13498_v54 = vld [vmem:[%s20935_s2 + $0x5e] ss:$0 sm:$0xff] }
0x1c93   :  { %16165 = vmatprep.subr.bf16.mxu1 %v17214_v3 }
0x1c94   :  { %16138 = vmatpush3.bf16.msra.mxu0 %v17186_v31  ;;  %v8351_v31 = vmul.f32 %v18566_v44, %v19635_v0 }
0x1c95   :  { %16139 = vmatprep.subr.bf16.mxu0 %v17187_v7 }
0x1c96   :  { %16166 = vmatpush3.bf16.msra.mxu1 %v17214_v3 }
0x1c97   :  { %16167 = vmatprep.subr.bf16.mxu1 %v17215_v42 }
0x1c98   :  { %16140 = vmatpush3.bf16.msra.mxu0 %v17187_v7 }
0x1c99   :  { %16141 = vmatprep.subr.bf16.mxu0 %v17188_v1 }
0x1c9a   :  { %16168 = vmatpush3.bf16.msra.mxu1 %v17215_v42 }
0x1c9b   :  { %16173 = vmatprep.subr.bf16.mxu1 %v17526_v17 }
0x1c9c   :  { %16142 = vmatpush3.bf16.msra.mxu0 %v17188_v1 }
0x1c9d   :  { %16143 = vmatprep.subr.bf16.mxu0 %v17189_v48 }
0x1ca0   :  { %16144 = vmatpush3.bf16.msra.mxu0 %v17189_v48  ;;  %v8349_v48 = vmul.f32 %v18566_v44, %v19639_v59  ;;  %v17218_v59 = vld [vmem:[%s20934_s1 + $0xd10] sm:$0xff]  }
0x1ca1   :  { %16145 = vmatprep.subr.bf16.mxu0 %v17190_v51 }
0x1ca4   :  { %16146 = vmatpush3.bf16.msra.mxu0 %v17190_v51 }
0x1ca5   :  { %16147 = vmatprep.subr.bf16.mxu0 %v17191_v63 }
0x1ca8   :  { %16148 = vmatpush3.bf16.msra.mxu0 %v17191_v63 }
0x1ca9   :  { %16213 = vmatprep.subr.bf16.mxu0 %v17192_v55 }
0x1cab   :  { %16150 = vmatmul.mubr.bf16.vlgmr.msra.gmra.mrb[96].mxu0 %v8199_v33  ;;  %v13470_v33 = vld [vmem:[%s20935_s2 + $0x5a] ss:$0 sm:$0xff] }
0x1cac   :  { %16214 = vmatpush3.bf16.msra.mxu0 %v17192_v55  ;;  %16229 = vmatprep.mubr.bf16.mxu0 %v19405_v26  ;;  %v8352_v55 = vmul.f32 %v18566_v44, %v19637_v56  ;;  %v17216_v56 = vld [vmem:[%s20934_s1 + $0xd00] sm:$0xff]  }
0x1cad   :  { %16215 = vmatprep.subr.bf16.mxu0 %v17193_v22 }
0x1cb0   :  { %16216 = vmatpush3.bf16.msra.mxu0 %v17193_v22 }
0x1cb1   :  { %16217 = vmatprep.subr.bf16.mxu0 %v17194_v39 }
0x1cb4   :  { %16218 = vmatpush3.bf16.msra.mxu0 %v17194_v39 }
0x1cb5   :  { %16219 = vmatprep.subr.bf16.mxu0 %v17195_v27 }
0x1cb8   :  { %16220 = vmatpush3.bf16.msra.mxu0 %v17195_v27  ;;  %v8350_v27 = vmul.f32 %v18566_v44, %v19641_v4  ;;  %v17217_v44 = vld [vmem:[%s20934_s1 + $0xd08] sm:$0xff]   ;;  %v17219_v4 = vld [vmem:[%s20934_s1 + $0xd18] sm:$0xff]  }
0x1cb9   :  { %16221 = vmatprep.subr.bf16.mxu0 %v17196_v57 }
0x1cbc   :  { %16222 = vmatpush3.bf16.msra.mxu0 %v17196_v57 }
0x1cbd   :  { %16223 = vmatprep.subr.bf16.mxu0 %v17197_v60 }
0x1cc0   :  { %16224 = vmatpush3.bf16.msra.mxu0 %v17197_v60 }
0x1cc1   :  { %16225 = vmatprep.subr.bf16.mxu0 %v17198_v61 }
0x1cc4   :  { %16226 = vmatpush3.bf16.msra.mxu0 %v17198_v61 }
0x1cc5   :  { %16227 = vmatprep.subr.bf16.mxu0 %v17199_v45 }
0x1cc8   :  { %16228 = vmatpush3.bf16.msra.mxu0 %v17199_v45 }
0x1cc9   :  { %16233 = vmatprep.subr.bf16.mxu0 %v17200_v21 }
0x1ccb   :  { %16230 = vmatmul.mubr.bf16.vlgmr.msra.gmra.mrb[100].mxu0 %v19414_v40 }
0x1ccc   :  { %16234 = vmatpush3.bf16.msra.mxu0 %v17200_v21  ;;  %16249 = vmatprep.mubr.bf16.mxu0 %v18758_v28 }
0x1ccd   :  { %16235 = vmatprep.subr.bf16.mxu0 %v17201_v36 }
0x1cd0   :  { %16236 = vmatpush3.bf16.msra.mxu0 %v17201_v36  ;;  %v17220_v36 = vld [vmem:[%s20934_s1 + $0xd20] sm:$0xff]  }
0x1cd1   :  { %16237 = vmatprep.subr.bf16.mxu0 %v17202_v34 }
0x1cd4   :  { %16238 = vmatpush3.bf16.msra.mxu0 %v17202_v34  ;;  %v17221_v34 = vld [vmem:[%s20934_s1 + $0xd28] sm:$0xff]  }
0x1cd5   :  { %16239 = vmatprep.subr.bf16.mxu0 %v17203_v37 }
0x1cd8   :  { %16240 = vmatpush3.bf16.msra.mxu0 %v17203_v37  ;;  %v17222_v37 = vld [vmem:[%s20934_s1 + $0xd30] sm:$0xff]  }
0x1cd9   :  { %16241 = vmatprep.subr.bf16.mxu0 %v17204_v49 }
0x1cdc   :  { %16242 = vmatpush3.bf16.msra.mxu0 %v17204_v49  ;;  %v17223_v49 = vld [vmem:[%s20934_s1 + $0xd38] sm:$0xff]  }
0x1cdd   :  { %16243 = vmatprep.subr.bf16.mxu0 %v17205_v5 }
0x1ce0   :  { %16244 = vmatpush3.bf16.msra.mxu0 %v17205_v5  ;;  %v13489_v5 = vld [vmem:[%s20935_s2 + $0x5d] ss:$0 sm:$0xff] }
0x1ce1   :  { %16245 = vmatprep.subr.bf16.mxu0 %v17206_v6 }
0x1ce4   :  { %16246 = vmatpush3.bf16.msra.mxu0 %v17206_v6 }
0x1ce5   :  { %16247 = vmatprep.subr.bf16.mxu0 %v17207_v38 }
0x1ce8   :  { %16248 = vmatpush3.bf16.msra.mxu0 %v17207_v38 }
0x1ceb   :  { %16250 = vmatmul.mubr.bf16.vlgmr.msra.gmra.mrb[100].mxu0 %v18767_v53 }
0x1d7e   :  { %v16151_v46 = vpop.f32.mrb[96].mxu0 }
0x1d7f   :  { %v8325_v58 = vadd.f32 %v16151_v46, %v13470_v33  ;;  %v8299_v2 = vpop.f32.mrb[97].mxu0 }
0x1d80   :  { %v8323_v23 = vadd.f32 %v13470_v33, %v8299_v2  ;;  %v16152_v24 = vpop.f32.mrb[98].mxu0 }
0x1d81   :  { %v8329_v14 = vmax.f32 %v8325_v58, 0.0  ;;  %v8326_v15 = vadd.f32 %v16152_v24, %v13470_v33  ;;  %v8302_v52 = vpop.f32.mrb[99].mxu0 }
0x1d82   :  { %v8327_v32 = vmax.f32 %v8323_v23, 0.0  ;;  %v8324_v11 = vadd.f32 %v13470_v33, %v8302_v52 }
0x1d83   :  { %v8338_v20 = vmul.f32 %v13471_v12, %v8329_v14  ;;  %v8330_v25 = vmax.f32 %v8326_v15, 0.0  ;;  %v13499_v14 = vld [vmem:[%s20935_s2 + $0x5f] ss:$0 sm:$0xff] }
0x1d84   :  { %v8336_v9 = vmul.f32 %v13471_v12, %v8327_v32  ;;  %v8328_v8 = vmax.f32 %v8324_v11, 0.0 }
0x1d85   :  { %v8347_v7 = vadd.f32 %v13472_v16, %v8338_v20  ;;  %v8339_v1 = vmul.f32 %v13471_v12, %v8330_v25 }
0x1d86   :  { %v8345_v51 = vadd.f32 %v13472_v16, %v8336_v9  ;;  %v8337_v63 = vmul.f32 %v13471_v12, %v8328_v8 }
0x1d87   :  { %v8355_v22 = vadd.f32 %v8351_v31, %v8347_v7  ;;  %v8348_v39 = vadd.f32 %v13472_v16, %v8339_v1 }
0x1d88   :  { %v8346_v57 = vadd.f32 %v13472_v16, %v8337_v63  ;;  %v8353_v60 = vadd.f32 %v8349_v48, %v8345_v51 }
0x1d89   :  { %v8356_v61 = vadd.f32 %v8352_v55, %v8348_v39 }
0x1d8a   :  { %v8354_v45 = vadd.f32 %v8350_v27, %v8346_v57 }
0x1d8b   :  { %v8358_v0 = vpack.c.bf16 %v8356_v61, %v8355_v22 }
0x1d8c   :  { %v8357_v21 = vpack.c.bf16 %v8354_v45, %v8353_v60 }
0x1d8e   :  { %16169 = vmatprep.mubr.bf16.mxu1 %v8357_v21 }
0x1d8f   :  { %16170 = vmatmul.mubr.bf16.vlgmr.msra.gmra.mrb[104].mxu1 %v8358_v0 }
0x1d90   :  { %16189 = vmatprep.mubr.msk.bf16.mxu1 %vm17527_vm15, %v17526_v17  ;;  %16174 = vmatpush3.bf16.msra.mxu1 %v17216_v56 }
0x1d91   :  { %16175 = vmatprep.subr.bf16.mxu1 %v17526_v17 }
0x1d94   :  { %16176 = vmatpush3.bf16.msra.mxu1 %v17217_v44 }
0x1d95   :  { %16177 = vmatprep.subr.bf16.mxu1 %v17526_v17 }
0x1d98   :  { %16178 = vmatpush3.bf16.msra.mxu1 %v17218_v59 }
0x1d99   :  { %16179 = vmatprep.subr.bf16.mxu1 %v17526_v17 }
0x1d9c   :  { %16180 = vmatpush3.bf16.msra.mxu1 %v17219_v4 }
0x1d9d   :  { %16181 = vmatprep.subr.bf16.mxu1 %v17526_v17 }
0x1da0   :  { %16182 = vmatpush3.bf16.msra.mxu1 %v17220_v36  ;;  %v17224_v36 = vld [vmem:[%s20934_s1 + $0xd40] sm:$0xff]  }
0x1da1   :  { %16183 = vmatprep.subr.bf16.mxu1 %v17526_v17 }
0x1da4   :  { %16184 = vmatpush3.bf16.msra.mxu1 %v17221_v34 }
0x1da5   :  { %16185 = vmatprep.subr.bf16.mxu1 %v17526_v17 }
0x1da8   :  { %16186 = vmatpush3.bf16.msra.mxu1 %v17222_v37  ;;  %v17225_v37 = vld [vmem:[%s20934_s1 + $0xd48] sm:$0xff]  }
0x1da9   :  { %16187 = vmatprep.subr.bf16.mxu1 %v17526_v17 }
0x1dac   :  { %16188 = vmatpush3.bf16.msra.mxu1 %v17223_v49  ;;  %v17226_v49 = vld [vmem:[%s20934_s1 + $0xd50] sm:$0xff]  }
0x1dad   :  { %16193 = vmatprep.subr.bf16.mxu1 %v17526_v17 }
0x1e62   :  { %v16171_v6 = vpop.f32.mrb[104].mxu1 }
0x1e63   :  { %v8472_v38 = vadd.f32 %v16171_v6, %v13489_v5  ;;  %v8463_v47 = vpop.f32.mrb[105].mxu1  ;;  %v17228_v6 = vld [vmem:[%s20934_s1 + $0xd60] sm:$0xff]  }
0x1e64   :  { %v8464_v3 = vadd.f32 %v13489_v5, %v8463_v47  ;;  %v16172_v42 = vpop.f32.mrb[106].mxu1  ;;  %v17230_v47 = vld [vmem:[%s20934_s1 + $0xd70] sm:$0xff]  }
0x1e65   :  { %v8480_v33 = vmax.f32 %v8472_v38, 0.0  ;;  %v8475_v46 = vadd.f32 %v16172_v42, %v13489_v5  ;;  %v8466_v58 = vpop.f32.mrb[107].mxu1  ;;  %v17229_v38 = vld [vmem:[%s20934_s1 + $0xd68] sm:$0xff]   ;;  %v13516_v42 = vld [vmem:[%s20935_s2 + $0x60] ss:$0 sm:$0xff] }
0x1e66   :  { %v8478_v2 = vmax.f32 %v8464_v3, 0.0  ;;  %v8467_v12 = vadd.f32 %v13489_v5, %v8466_v58  ;;  %v17227_v5 = vld [vmem:[%s20934_s1 + $0xd58] sm:$0xff]   ;;  %v17232_v3 = vld [vmem:[%s20934_s1 + $0xe80] sm:$0xff]  }
0x1e67   :  { %v8489_v23 = vmul.f32 %v13498_v54, %v8480_v33  ;;  %v8481_v24 = vmax.f32 %v8475_v46, 0.0 }
0x1e68   :  { %v8487_v15 = vmul.f32 %v13498_v54, %v8478_v2  ;;  %v8479_v52 = vmax.f32 %v8467_v12, 0.0  ;;  %v13525_v2 = vld [vmem:[%s20935_s2 + $0x61] ss:$0 sm:$0xff] }
0x1e69   :  { %v8490_v16 = vmul.f32 %v13498_v54, %v8481_v24  ;;  %v19974_v11 = vadd.f32 %v13499_v14, %v8489_v23 }
0x1e6a   :  { %v8488_v32 = vmul.f32 %v13498_v54, %v8479_v52  ;;  %v19978_v25 = vadd.f32 %v13499_v14, %v8487_v15  ;;  %v17231_v54 = vld [vmem:[%s20934_s1 + $0xd78] sm:$0xff]  }
0x1e6b   :  { %v19976_v20 = vadd.f32 %v13499_v14, %v8490_v16 }
0x1e6c   :  { %v19980_v9 = vadd.f32 %v13499_v14, %v8488_v32  ;;  %v13526_v14 = vld [vmem:[%s20935_s2 + $0x62] ss:$0 sm:$0xff]  ;;  %v17233_v32 = vld [vmem:[%s20934_s1 + $0xe88] sm:$0xff]  }
0x1e6d   :  { %v8507_v8 = vadd.f32 %v19976_v20, %v19974_v11 }
0x1e6e   :  { %v8500_v31 = vadd.f32 %v19980_v9, %v19978_v25 }
0x1e6f   :  { %v8508_v7 = vrot.slane %v8507_v8, 4 }
0x1e70   :  { %v8501_v1 = vrot.slane %v8500_v31, 4 }
0x1e71   :  { %v8509_v48 = vadd.f32 %v8508_v7, %v8507_v8  ;;  %v17234_v8 = vld [vmem:[%s20934_s1 + $0xe90] sm:$0xff]   ;;  %v17236_v7 = vld [vmem:[%s20934_s1 + $0xea0] sm:$0xff]  }
0x1e72   :  { %v8502_v51 = vadd.f32 %v8501_v1, %v8500_v31  ;;  %v17235_v31 = vld [vmem:[%s20934_s1 + $0xe98] sm:$0xff]   ;;  %v17238_v1 = vld [vmem:[%s20934_s1 + $0xeb0] sm:$0xff]  }
0x1e73   :  { %v8510_v63 = vrot.slane %v8509_v48, 2 }
0x1e74   :  { %v8503_v55 = vrot.slane %v8502_v51, 2 }
0x1e75   :  { %v8511_v22 = vadd.f32 %v8510_v63, %v8509_v48  ;;  %v17239_v48 = vld [vmem:[%s20934_s1 + $0xeb8] sm:$0xff]   ;;  %v17241_v63 = vld [vmem:[%s20934_s1 + $0xe48] sm:$0xff]  }
0x1e76   :  { %v8504_v39 = vadd.f32 %v8503_v55, %v8502_v51  ;;  %v17240_v51 = vld [vmem:[%s20934_s1 + $0xe40] sm:$0xff]   ;;  %v17242_v55 = vld [vmem:[%s20934_s1 + $0xe50] sm:$0xff]  }
0x1e77   :  { %v8512_v27 = vrot.slane %v8511_v22, 1 }
0x1e78   :  { %v8505_v57 = vrot.slane %v8504_v39, 1 }
0x1e79   :  { %v8513_v60 = vadd.f32 %v8512_v27, %v8511_v22  ;;  %v17243_v22 = vld [vmem:[%s20934_s1 + $0xe58] sm:$0xff]  }
0x1e7a   :  { %v8506_v61 = vadd.f32 %v8505_v57, %v8504_v39  ;;  %v17246_v39 = vld [vmem:[%s20934_s1 + $0xe70] sm:$0xff]   ;;  %v17247_v27 = vld [vmem:[%s20934_s1 + $0xe78] sm:$0xff]   ;;  %v17248_v57 = vld [vmem:[%s20934_s1 + $0xe00] sm:$0xff]  }
0x1e7b   :  { %v8515_v45 = vmul.f32 0.0625, %v8513_v60  ;;  %v17249_v60 = vld [vmem:[%s20934_s1 + $0xec0] sm:$0xff]   ;;  %16253 = vmatprep.subr.bf16.mxu0 %v17248_v57 }
0x1e7c   :  { %v8514_v0 = vmul.f32 0.0625, %v8506_v61  ;;  %16254 = vmatpush3.bf16.msra.mxu0 %v17248_v57  ;;  %v17250_v61 = vld [vmem:[%s20934_s1 + $0xe08] sm:$0xff]  }
0x1e7d   :  { %v8517_v21 = vpack.c.bf16 %v8515_v45, %v8515_v45  ;;  %16255 = vmatprep.subr.bf16.mxu0 %v17250_v61  ;;  %v17252_v45 = vld [vmem:[%s20934_s1 + $0xe10] sm:$0xff]  }
0x1e7e   :  { %v8516_v56 = vpack.c.bf16 %v8514_v0, %v8514_v0  ;;  %v17253_v0 = vld [vmem:[%s20934_s1 + $0xed0] sm:$0xff]  }
0x1e7f   :  { %v8543_v44 = vunpack.c.l.b16 %v8517_v21  ;;  %v17254_v21 = vld [vmem:[%s20934_s1 + $0xe18] sm:$0xff]  }
0x1e80   :  { %v8542_v59 = vunpack.c.l.b16 %v8516_v56  ;;  %16256 = vmatpush3.bf16.msra.mxu0 %v17250_v61  ;;  %v17255_v56 = vld [vmem:[%s20934_s1 + $0xed8] sm:$0xff]  }
0x1e81   :  { %16257 = vmatprep.subr.bf16.mxu0 %v17252_v45 }
0x1e82   :  { %v8544_v4 = vsel %vm2925_vm1, %v8543_v44, %v8542_v59  ;;  %v17256_v44 = vld [vmem:[%s20934_s1 + $0xe20] sm:$0xff]  }
0x1e83   :  { %v8545_v34 = vpack.c.b16 %v8544_v4, %v8544_v4  ;;  %v17257_v59 = vld [vmem:[%s20934_s1 + $0xee0] sm:$0xff]   ;;  %v17258_v4 = vld [vmem:[%s20934_s1 + $0xe28] sm:$0xff]  }
0x1e84   :  { %16258 = vmatpush3.bf16.msra.mxu0 %v17252_v45 }
0x1e85   :  { %16190 = vmatmul.mubr.bf16.vlgmr.msra.gmra.mrb[108].mxu1 %v8545_v34  ;;  %16259 = vmatprep.subr.bf16.mxu0 %v17254_v21  ;;  %v17260_v34 = vld [vmem:[%s20934_s1 + $0xe30] sm:$0xff]  }
0x1e86   :  { %16194 = vmatpush3.bf16.msra.mxu1 %v17224_v36  ;;  %16209 = vmatprep.mubr.msk.bf16.mxu1 %vm17527_vm15, %v17526_v17  ;;  %v17259_v36 = vld [vmem:[%s20934_s1 + $0xee8] sm:$0xff]  }
0x1e87   :  { %16195 = vmatprep.subr.bf16.mxu1 %v17526_v17 }
0x1e88   :  { %16260 = vmatpush3.bf16.msra.mxu0 %v17254_v21 }
0x1e89   :  { %16261 = vmatprep.subr.bf16.mxu0 %v17256_v44 }
0x1e8a   :  { %16196 = vmatpush3.bf16.msra.mxu1 %v17225_v37  ;;  %v17261_v37 = vld [vmem:[%s20934_s1 + $0xef0] sm:$0xff]  }
0x1e8b   :  { %16197 = vmatprep.subr.bf16.mxu1 %v17526_v17 }
0x1e8c   :  { %16262 = vmatpush3.bf16.msra.mxu0 %v17256_v44 }
0x1e8d   :  { %16263 = vmatprep.subr.bf16.mxu0 %v17258_v4 }
0x1e8e   :  { %16198 = vmatpush3.bf16.msra.mxu1 %v17226_v49  ;;  %v17262_v49 = vld [vmem:[%s20934_s1 + $0xe38] sm:$0xff]  }
0x1e8f   :  { %16199 = vmatprep.subr.bf16.mxu1 %v17526_v17 }
0x1e90   :  { %16264 = vmatpush3.bf16.msra.mxu0 %v17258_v4 }
0x1e91   :  { %16265 = vmatprep.subr.bf16.mxu0 %v17260_v34 }
0x1e92   :  { %16200 = vmatpush3.bf16.msra.mxu1 %v17227_v5  ;;  %v17263_v5 = vld [vmem:[%s20934_s1 + $0xef8] sm:$0xff]  }
0x1e93   :  { %16201 = vmatprep.subr.bf16.mxu1 %v17526_v17 }
0x1e94   :  { %16266 = vmatpush3.bf16.msra.mxu0 %v17260_v34 }
0x1e95   :  { %16267 = vmatprep.subr.bf16.mxu0 %v17262_v49 }
0x1e96   :  { %16202 = vmatpush3.bf16.msra.mxu1 %v17228_v6  ;;  %v20132_v6 = vld [vmem:[%s20934_s1 + $0xf00] sm:$0xff]  }
0x1e97   :  { %16203 = vmatprep.subr.bf16.mxu1 %v17526_v17 }
0x1e98   :  { %16268 = vmatpush3.bf16.msra.mxu0 %v17262_v49 }
0x1e99   :  { %16333 = vmatprep.subr.bf16.mxu0 %v20132_v6 }
0x1e9a   :  { %16204 = vmatpush3.bf16.msra.mxu1 %v17229_v38  ;;  %v13355_v38 = vld [vmem:[%s20935_s2 + $0x54] ss:$0 sm:$0xff] }
0x1e9b   :  { %16205 = vmatprep.subr.bf16.mxu1 %v17526_v17 }
0x1e9e   :  { %16206 = vmatpush3.bf16.msra.mxu1 %v17230_v47  ;;  %v7659_v47 = vadd.f32 %v13355_v38, %v19826_v50  ;;  %v13365_v50 = vld [vmem:[%s20935_s2 + $0x55] ss:$0 sm:$0xff] }
0x1e9f   :  { %16207 = vmatprep.subr.bf16.mxu1 %v17526_v17 }
0x1ea2   :  { %16208 = vmatpush3.bf16.msra.mxu1 %v17231_v54  ;;  %v13364_v54 = vmul.f32 -1.442695, %v7659_v47 }
0x1ea3   :  { %16273 = vmatprep.subr.bf16.mxu1 %v17232_v3 }
0x1ea4   :  { %17416 = vpow2.f32 %v13364_v54 }
0x1f58   :  { %v8629_v33 = vpop.f32.mrb[108].mxu1 }
0x1f59   :  { %v8630_v46 = vadd.f32 %v13516_v42, %v8629_v33  ;;  %v16191_v58 = vpop.f32.mrb[109].mxu1  ;;  %v13543_v33 = vld [vmem:[%s20935_s2 + $0x63] ss:$0 sm:$0xff] }
0x1f5a   :  { %v8632_v12 = vpop.f32.mrb[110].mxu1 }
0x1f5b   :  { %v8635_v23 = vmax.f32 %v8630_v46, 0.0  ;;  %v16192_v24 = vpop.f32.mrb[111].mxu1 }
0x1f5d   :  { %v8641_v15 = vmul.f32 %v13525_v2, %v8635_v23 }
0x1f5f   :  { %v8647_v52 = vadd.f32 %v13526_v14, %v8641_v15 }
0x1f61   :  { %v8648_v16 = vpack.c.bf16 %v8647_v52, %v8647_v52  ;;  %v13366_v52 = vld [vmem:[%s20935_s2 + $0x56] ss:$0 sm:$0xff] }
0x1f63   :  { %16210 = vmatmul.mubr.bf16.vlgmr.msra.gmra.mrb[112].mxu1 %v8648_v16 }
0x1f64   :  { %16274 = vmatpush3.bf16.msra.mxu1 %v17232_v3  ;;  %16289 = vmatprep.mubr.bf16.mxu1 %v19405_v26  ;;  %v17237_v26 = vld [vmem:[%s20934_s1 + $0xea8] sm:$0xff]   ;;  %v17417_v3 = vpop.eup %17416 }
0x1f65   :  { %16275 = vmatprep.subr.bf16.mxu1 %v17233_v32  ;;  %v7667_v42 = vadd.f32 1.0, %v17417_v3 }
0x1f67   :  { %17418 = vrcp.f32 %v7667_v42 }
0x1f68   :  { %16276 = vmatpush3.bf16.msra.mxu1 %v17233_v32 }
0x1f69   :  { %16277 = vmatprep.subr.bf16.mxu1 %v17234_v8 }
0x1f6c   :  { %16278 = vmatpush3.bf16.msra.mxu1 %v17234_v8 }
0x1f6d   :  { %16279 = vmatprep.subr.bf16.mxu1 %v17235_v31 }
0x1f70   :  { %16280 = vmatpush3.bf16.msra.mxu1 %v17235_v31 }
0x1f71   :  { %16281 = vmatprep.subr.bf16.mxu1 %v17236_v7  ;;  %v17419_v14 = vpop.eup %17418 }
0x1f72   :  { %v7675_v15 = vmul.f32 %v17419_v14, %v13365_v50  ;;  %v17272_v14 = vld [vmem:[%s20934_s1 + $0xf40] sm:$0xff]   ;;  %v17273_v50 = vld [vmem:[%s20934_s1 + $0xf48] sm:$0xff]  }
0x1f74   :  { %16282 = vmatpush3.bf16.msra.mxu1 %v17236_v7  ;;  %v7681_v32 = vadd.f32 %v13366_v52, %v7675_v15  ;;  %v17274_v15 = vld [vmem:[%s20934_s1 + $0xf50] sm:$0xff]   ;;  %v17275_v52 = vld [vmem:[%s20934_s1 + $0xf58] sm:$0xff]  }
0x1f75   :  { %16283 = vmatprep.subr.bf16.mxu1 %v17237_v26 }
0x1f76   :  { %v7689_v31 = vrot.slane %v7681_v32, %v18715_v10  ;;  %v13702_v32 = vld [vmem:[%s20935_s2 + $0x69] ss:$0 sm:$0xff] }
0x1f78   :  { %16284 = vmatpush3.bf16.msra.mxu1 %v17237_v26  ;;  %v7690_v7 = vcombine.high %v7689_v31, %v7689_v31  ;;  %v13553_v26 = vld [vmem:[%s20935_s2 + $0x64] ss:$0 sm:$0xff] }
0x1f79   :  { %16285 = vmatprep.subr.bf16.mxu1 %v17238_v1 }
0x1f7c   :  { %16286 = vmatpush3.bf16.msra.mxu1 %v17238_v1  ;;  %v7697_v1 = vrot.slane %v7689_v31, %v18715_v10 }
0x1f7d   :  { %16287 = vmatprep.subr.bf16.mxu1 %v17239_v48 }
0x1f80   :  { %16288 = vmatpush3.bf16.msra.mxu1 %v17239_v48 }
0x1f81   :  { %16293 = vmatprep.subr.bf16.mxu1 %v17240_v51 }
0x1f83   :  { %16290 = vmatmul.mubr.bf16.vlgmr.msra.gmra.mrb[116].mxu1 %v19414_v40  ;;  %v17244_v40 = vld [vmem:[%s20934_s1 + $0xe60] sm:$0xff]  }
0x1f84   :  { %16294 = vmatpush3.bf16.msra.mxu1 %v17240_v51  ;;  %16309 = vmatprep.mubr.bf16.mxu1 %v18758_v28  ;;  %v17245_v28 = vld [vmem:[%s20934_s1 + $0xe68] sm:$0xff]   ;;  %v13554_v51 = vld [vmem:[%s20935_s2 + $0x65] ss:$0 sm:$0xff] }
0x1f85   :  { %16295 = vmatprep.subr.bf16.mxu1 %v17241_v63 }
0x1f88   :  { %16296 = vmatpush3.bf16.msra.mxu1 %v17241_v63  ;;  %v7704_v63 = vrot.slane %v7690_v7, %v18715_v10 }
0x1f89   :  { %16297 = vmatprep.subr.bf16.mxu1 %v17242_v55 }
0x1f8c   :  { %16298 = vmatpush3.bf16.msra.mxu1 %v17242_v55 }
0x1f8d   :  { %16299 = vmatprep.subr.bf16.mxu1 %v17243_v22 }
0x1f90   :  { %16300 = vmatpush3.bf16.msra.mxu1 %v17243_v22  ;;  %v7708_v22 = vrot.slane %v7697_v1, %v18723_v13 }
0x1f91   :  { %16301 = vmatprep.subr.bf16.mxu1 %v17244_v40 }
0x1f92   :  { %v7716_v57 = vmul.f32 %v7708_v22, %v19704_v18 }
0x1f94   :  { %16302 = vmatpush3.bf16.msra.mxu1 %v17244_v40  ;;  %v7720_v44 = vadd.f32 %v7716_v57, %v19401_v41 }
0x1f95   :  { %16303 = vmatprep.subr.bf16.mxu1 %v17245_v28 }
0x1f98   :  { %16304 = vmatpush3.bf16.msra.mxu1 %v17245_v28  ;;  %v7712_v28 = vrot.slane %v7704_v63, %v18723_v13 }
0x1f99   :  { %16305 = vmatprep.subr.bf16.mxu1 %v17246_v39 }
0x1f9a   :  { %v7718_v45 = vmul.f32 %v7712_v28, %v19700_v29 }
0x1f9c   :  { %16306 = vmatpush3.bf16.msra.mxu1 %v17246_v39 }
0x1f9d   :  { %16307 = vmatprep.subr.bf16.mxu1 %v17247_v27 }
0x1fa0   :  { %16308 = vmatpush3.bf16.msra.mxu1 %v17247_v27  ;;  %v7715_v27 = vmul.f32 %v7708_v22, %v19702_v30 }
0x1fa1   :  { %16313 = vmatprep.subr.bf16.mxu1 %v17249_v60 }
0x1fa3   :  { %16310 = vmatmul.mubr.bf16.vlgmr.msra.gmra.mrb[116].mxu1 %v18767_v53  ;;  %v17251_v53 = vld [vmem:[%s20934_s1 + $0xec8] sm:$0xff]  }
0x1fa4   :  { %16314 = vmatpush3.bf16.msra.mxu1 %v17249_v60 }
0x1fa5   :  { %16315 = vmatprep.subr.bf16.mxu1 %v17251_v53 }
0x1fa8   :  { %16316 = vmatpush3.bf16.msra.mxu1 %v17251_v53  ;;  %v7717_v53 = vmul.f32 %v7712_v28, %v19698_v19  ;;  %v7722_v19 = vadd.f32 %v7718_v45, %v19409_v35 }
0x1fa9   :  { %16317 = vmatprep.subr.bf16.mxu1 %v17253_v0 }
0x1faa   :  { %v7721_v4 = vadd.f32 %v7717_v53, %v19407_v62  ;;  %v7726_v3 = vmul.f32 0.75, %v7722_v19  ;;  %v13704_v53 = vld [vmem:[%s20935_s2 + $0x6b] ss:$0 sm:$0xff] }
0x1fac   :  { %16318 = vmatpush3.bf16.msra.mxu1 %v17253_v0  ;;  %v7725_v54 = vmul.f32 0.75, %v7721_v4 }
0x1fad   :  { %16319 = vmatprep.subr.bf16.mxu1 %v17255_v56 }
0x1fb0   :  { %16320 = vmatpush3.bf16.msra.mxu1 %v17255_v56  ;;  %v7719_v56 = vadd.f32 %v7715_v27, %v19399_v43 }
0x1fb1   :  { %16321 = vmatprep.subr.bf16.mxu1 %v17257_v59 }
0x1fb2   :  { %v7723_v49 = vmul.f32 0.75, %v7719_v56 }
0x1fb4   :  { %16322 = vmatpush3.bf16.msra.mxu1 %v17257_v59 }
0x1fb5   :  { %16323 = vmatprep.subr.bf16.mxu1 %v17259_v36 }
0x1fb8   :  { %16324 = vmatpush3.bf16.msra.mxu1 %v17259_v36 }
0x1fb9   :  { %16325 = vmatprep.subr.bf16.mxu1 %v17261_v37 }
0x1fbc   :  { %16326 = vmatpush3.bf16.msra.mxu1 %v17261_v37 }
0x1fbd   :  { %16327 = vmatprep.subr.bf16.mxu1 %v17263_v5 }
0x1fc0   :  { %16328 = vmatpush3.bf16.msra.mxu1 %v17263_v5  ;;  %v7724_v5 = vmul.f32 0.75, %v7720_v44 }
0x1fc1   :  { %16353 = vmatprep.subr.bf16.mxu1 %v17272_v14 }
0x2036   :  { %v8753_v46 = vpop.f32.mrb[112].mxu1 }
0x2037   :  { %v8754_v58 = vadd.f32 %v13543_v33, %v8753_v46  ;;  %v16211_v2 = vpop.f32.mrb[113].mxu1 }
0x2038   :  { %v8756_v12 = vpop.f32.mrb[114].mxu1 }
0x2039   :  { %v13552_v23 = vmul.f32 -1.442695, %v8754_v58  ;;  %v16212_v24 = vpop.f32.mrb[115].mxu1  ;;  %v17268_v12 = vld [vmem:[%s20934_s1 + $0xf20] sm:$0xff]  }
0x203a   :  { %v17271_v24 = vld [vmem:[%s20934_s1 + $0xf38] sm:$0xff]  }
0x203b   :  { %17420 = vpow2.f32 %v13552_v23  ;;  %v17270_v23 = vld [vmem:[%s20934_s1 + $0xf30] sm:$0xff]  }
0x2045   :  { %v17421_v16 = vpop.eup %17420 }
0x2046   :  { %v8762_v8 = vadd.f32 1.0, %v17421_v16  ;;  %v17276_v16 = vld [vmem:[%s20934_s1 + $0xf60] sm:$0xff]  }
0x2048   :  { %17422 = vrcp.f32 %v8762_v8 }
0x2052   :  { %v17423_v48 = vpop.eup %17422 }
0x2053   :  { %v8770_v55 = vmul.f32 %v17423_v48, %v13553_v26  ;;  %v13703_v48 = vld [vmem:[%s20935_s2 + $0x6a] ss:$0 sm:$0xff] }
0x2055   :  { %v8776_v40 = vadd.f32 %v13554_v51, %v8770_v55 }
0x2057   :  { %v8784_v39 = vrot.slane %v8776_v40, %v18715_v10 }
0x2059   :  { %v8785_v60 = vcombine.high %v8784_v39, %v8784_v39  ;;  %v8792_v61 = vrot.slane %v8784_v39, %v18715_v10 }
0x205b   :  { %v8803_v0 = vrot.slane %v8792_v61, %v18723_v13  ;;  %v8799_v21 = vrot.slane %v8785_v60, %v18715_v10 }
0x205d   :  { %v8810_v59 = vmul.f32 %v8803_v0, %v19978_v25  ;;  %v8811_v30 = vmul.f32 %v8803_v0, %v19980_v9  ;;  %v8807_v18 = vrot.slane %v8799_v21, %v18723_v13 }
0x205f   :  { %v8814_v29 = vadd.f32 %v8810_v59, %v19399_v43  ;;  %v8815_v36 = vadd.f32 %v8811_v30, %v19401_v41  ;;  %v8812_v34 = vmul.f32 %v8807_v18, %v19974_v11  ;;  %v8813_v37 = vmul.f32 %v8807_v18, %v19976_v20  ;;  %v17265_v20 = vld [vmem:[%s20934_s1 + $0xf08] sm:$0xff]  }
0x2061   :  { %v8818_v38 = vmul.f32 0.25, %v8814_v29  ;;  %v8819_v25 = vmul.f32 0.25, %v8815_v36  ;;  %v8816_v9 = vadd.f32 %v8812_v34, %v19407_v62  ;;  %v8817_v47 = vadd.f32 %v8813_v37, %v19409_v35  ;;  %v17266_v62 = vld [vmem:[%s20934_s1 + $0xf10] sm:$0xff]   ;;  %v17267_v35 = vld [vmem:[%s20934_s1 + $0xf18] sm:$0xff]   ;;  %v17277_v29 = vld [vmem:[%s20934_s1 + $0xf68] sm:$0xff]  }
0x2062   :  { %v17278_v36 = vld [vmem:[%s20934_s1 + $0xf70] sm:$0xff]   ;;  %v17279_v34 = vld [vmem:[%s20934_s1 + $0xf78] sm:$0xff]   ;;  %v17280_v37 = vld [vmem:[%s20934_s1 + $0xf80] sm:$0xff]  }
0x2063   :  { %v8822_v42 = vadd.f32 %v8818_v38, %v7723_v49  ;;  %v8823_v33 = vadd.f32 %v8819_v25, %v7724_v5  ;;  %v8820_v46 = vmul.f32 0.25, %v8816_v9  ;;  %v8821_v43 = vmul.f32 0.25, %v8817_v47  ;;  %v13721_v49 = vld [vmem:[%s20935_s2 + $0x6c] ss:$0 sm:$0xff]  ;;  %v13730_v9 = vld [vmem:[%s20935_s2 + $0x6d] ss:$0 sm:$0xff] }
0x2065   :  { %v9054_v58 = vpack.c.bf16 %v8823_v33, %v8822_v42  ;;  %v8824_v41 = vadd.f32 %v8820_v46, %v7725_v54  ;;  %v8825_v2 = vadd.f32 %v8821_v43, %v7726_v3 }
0x2067   :  { %16269 = vmatprep.mubr.bf16.mxu0 %v9054_v58  ;;  %16329 = vmatprep.mubr.bf16.mxu1 %v9054_v58  ;;  %v9055_v11 = vpack.c.bf16 %v8825_v2, %v8824_v41  ;;  %v13731_v2 = vld [vmem:[%s20935_s2 + $0x6e] ss:$0 sm:$0xff] }
0x2069   :  { %16270 = vmatmul.mubr.bf16.vlgmr.msra.gmra.mrb[100].mxu0 %v9055_v11  ;;  %16330 = vmatmul.mubr.bf16.vlgmr.msra.gmra.mrb[116].mxu1 %v9055_v11 }
0x206a   :  { %16334 = vmatpush3.bf16.msra.mxu0 %v20132_v6  ;;  %v17269_v6 = vld [vmem:[%s20934_s1 + $0xf28] sm:$0xff]   ;;  %16354 = vmatpush3.bf16.msra.mxu1 %v17272_v14 }
0x206b   :  { %16335 = vmatprep.subr.bf16.mxu0 %v17265_v20  ;;  %16355 = vmatprep.subr.bf16.mxu1 %v17273_v50 }
0x206e   :  { %16336 = vmatpush3.bf16.msra.mxu0 %v17265_v20  ;;  %16356 = vmatpush3.bf16.msra.mxu1 %v17273_v50 }
0x206f   :  { %16337 = vmatprep.subr.bf16.mxu0 %v17266_v62  ;;  %16357 = vmatprep.subr.bf16.mxu1 %v17274_v15 }
0x2072   :  { %16338 = vmatpush3.bf16.msra.mxu0 %v17266_v62  ;;  %16358 = vmatpush3.bf16.msra.mxu1 %v17274_v15  ;;  %v17281_v15 = vld [vmem:[%s20934_s1 + $0xf88] sm:$0xff]  }
0x2073   :  { %16339 = vmatprep.subr.bf16.mxu0 %v17267_v35  ;;  %16359 = vmatprep.subr.bf16.mxu1 %v17275_v52 }
0x2076   :  { %16340 = vmatpush3.bf16.msra.mxu0 %v17267_v35  ;;  %16360 = vmatpush3.bf16.msra.mxu1 %v17275_v52  ;;  %v17282_v52 = vld [vmem:[%s20934_s1 + $0xf90] sm:$0xff]  }
0x2077   :  { %16341 = vmatprep.subr.bf16.mxu0 %v17268_v12  ;;  %16361 = vmatprep.subr.bf16.mxu1 %v17276_v16 }
0x207a   :  { %16342 = vmatpush3.bf16.msra.mxu0 %v17268_v12  ;;  %16362 = vmatpush3.bf16.msra.mxu1 %v17276_v16  ;;  %v17283_v16 = vld [vmem:[%s20934_s1 + $0xf98] sm:$0xff]  }
0x207b   :  { %16343 = vmatprep.subr.bf16.mxu0 %v17269_v6  ;;  %16363 = vmatprep.subr.bf16.mxu1 %v17277_v29 }
0x207e   :  { %16344 = vmatpush3.bf16.msra.mxu0 %v17269_v6  ;;  %16364 = vmatpush3.bf16.msra.mxu1 %v17277_v29  ;;  %v13757_v29 = vld [vmem:[%s20935_s2 + $0x70] ss:$0 sm:$0xff] }
0x207f   :  { %16345 = vmatprep.subr.bf16.mxu0 %v17270_v23  ;;  %16365 = vmatprep.subr.bf16.mxu1 %v17278_v36 }
0x2082   :  { %16346 = vmatpush3.bf16.msra.mxu0 %v17270_v23  ;;  %16366 = vmatpush3.bf16.msra.mxu1 %v17278_v36 }
0x2083   :  { %16347 = vmatprep.subr.bf16.mxu0 %v17271_v24  ;;  %16367 = vmatprep.subr.bf16.mxu1 %v17279_v34 }
0x2086   :  { %16348 = vmatpush3.bf16.msra.mxu0 %v17271_v24  ;;  %16368 = vmatpush3.bf16.msra.mxu1 %v17279_v34 }
0x2087   :  { %16373 = vmatprep.subr.bf16.mxu0 %v17526_v17  ;;  %16413 = vmatprep.subr.bf16.mxu1 %v17280_v37 }
0x213c   :  { %v20221_v8 = vpop.f32.mrb[100].mxu0  ;;  %v16331_v31 = vpop.f32.mrb[116].mxu1 }
0x213d   :  { %v9558_v7 = vadd.f32 %v16331_v31, %v13702_v32  ;;  %v20223_v26 = vpop.f32.mrb[101].mxu0  ;;  %v9532_v1 = vpop.f32.mrb[117].mxu1  ;;  %v17285_v31 = vld [vmem:[%s20934_s1 + $0xfa8] sm:$0xff]  }
0x213e   :  { %v9556_v51 = vadd.f32 %v13702_v32, %v9532_v1  ;;  %v20228_v63 = vpop.f32.mrb[102].mxu0  ;;  %v16332_v55 = vpop.f32.mrb[118].mxu1  ;;  %v17287_v1 = vld [vmem:[%s20934_s1 + $0xfb8] sm:$0xff]  }
0x213f   :  { %v9562_v22 = vmax.f32 %v9558_v7, 0.0  ;;  %v9559_v40 = vadd.f32 %v16332_v55, %v13702_v32  ;;  %v20230_v28 = vpop.f32.mrb[103].mxu0  ;;  %v9535_v39 = vpop.f32.mrb[119].mxu1  ;;  %v17286_v7 = vld [vmem:[%s20934_s1 + $0xfb0] sm:$0xff]  }
0x2140   :  { %v9560_v27 = vmax.f32 %v9556_v51, 0.0  ;;  %v9557_v57 = vadd.f32 %v13702_v32, %v9535_v39  ;;  %v17284_v32 = vld [vmem:[%s20934_s1 + $0xfa0] sm:$0xff]   ;;  %v17289_v51 = vld [vmem:[%s20934_s1 + $0x1008] sm:$0xff]   ;;  %v17290_v55 = vld [vmem:[%s20934_s1 + $0x1010] sm:$0xff]  }
0x2141   :  { %v9571_v60 = vmul.f32 %v13703_v48, %v9562_v22  ;;  %v9563_v61 = vmax.f32 %v9559_v40, 0.0  ;;  %v17291_v22 = vld [vmem:[%s20934_s1 + $0x1018] sm:$0xff]   ;;  %v17292_v40 = vld [vmem:[%s20934_s1 + $0x1020] sm:$0xff]   ;;  %v17293_v39 = vld [vmem:[%s20934_s1 + $0x1028] sm:$0xff]  }
0x2142   :  { %v9569_v45 = vmul.f32 %v13703_v48, %v9560_v27  ;;  %v9561_v0 = vmax.f32 %v9557_v57, 0.0  ;;  %v17294_v27 = vld [vmem:[%s20934_s1 + $0x1030] sm:$0xff]   ;;  %v17295_v57 = vld [vmem:[%s20934_s1 + $0x1038] sm:$0xff]  }
0x2143   :  { %v9572_v21 = vmul.f32 %v13703_v48, %v9563_v61  ;;  %v9580_v44 = vadd.f32 %v13704_v53, %v9571_v60  ;;  %v13627_v60 = vld [vmem:[%s20935_s2 + $0x66] ss:$0 sm:$0xff] }
0x2144   :  { %v9570_v56 = vmul.f32 %v13703_v48, %v9561_v0  ;;  %v9578_v30 = vadd.f32 %v13704_v53, %v9569_v45  ;;  %v17288_v48 = vld [vmem:[%s20934_s1 + $0x1000] sm:$0xff]   ;;  %v9181_v61 = vadd.f32 %v20221_v8, %v13627_v60  ;;  %v9182_v45 = vadd.f32 %v20228_v63, %v13627_v60  ;;  %v13629_v63 = vld [vmem:[%s20935_s2 + $0x68] ss:$0 sm:$0xff] }
0x2145   :  { %v9581_v59 = vadd.f32 %v13704_v53, %v9572_v21  ;;  %v9180_v0 = vadd.f32 %v13627_v60, %v20230_v28 }
0x2146   :  { %v9579_v18 = vadd.f32 %v13704_v53, %v9570_v56  ;;  %v9179_v53 = vadd.f32 %v13627_v60, %v20223_v26  ;;  %v9185_v21 = vmax.f32 %v9181_v61, 0.0  ;;  %v13628_v56 = vld [vmem:[%s20935_s2 + $0x67] ss:$0 sm:$0xff] }
0x2147   :  { %v9583_v4 = vpack.c.bf16 %v9581_v59, %v9580_v44  ;;  %v13748_v59 = vld [vmem:[%s20935_s2 + $0x6f] ss:$0 sm:$0xff] }
0x2148   :  { %v9582_v19 = vpack.c.bf16 %v9579_v18, %v9578_v30  ;;  %v9183_v44 = vmax.f32 %v9179_v53, 0.0  ;;  %v9186_v30 = vmax.f32 %v9182_v45, 0.0  ;;  %v9184_v18 = vmax.f32 %v9180_v0, 0.0 }
0x2149   :  { %v9194_v8 = vmul.f32 %v13628_v56, %v9185_v21 }
0x214a   :  { %16349 = vmatprep.mubr.bf16.mxu0 %v9582_v19  ;;  %v9192_v28 = vmul.f32 %v13628_v56, %v9183_v44 }
0x214b   :  { %16350 = vmatmul.mubr.bf16.vlgmr.msra.gmra.mrb[104].mxu0 %v9583_v4 }
0x214c   :  { %16389 = vmatprep.mubr.msk.bf16.mxu0 %vm17527_vm15, %v17526_v17  ;;  %16374 = vmatpush3.bf16.msra.mxu0 %v17288_v48 }
0x214d   :  { %16375 = vmatprep.subr.bf16.mxu0 %v17526_v17 }
0x2150   :  { %16376 = vmatpush3.bf16.msra.mxu0 %v17289_v51 }
0x2151   :  { %16377 = vmatprep.subr.bf16.mxu0 %v17526_v17 }
0x2154   :  { %16378 = vmatpush3.bf16.msra.mxu0 %v17290_v55 }
0x2155   :  { %16379 = vmatprep.subr.bf16.mxu0 %v17526_v17 }
0x2158   :  { %16380 = vmatpush3.bf16.msra.mxu0 %v17291_v22 }
0x2159   :  { %16381 = vmatprep.subr.bf16.mxu0 %v17526_v17 }
0x215c   :  { %16382 = vmatpush3.bf16.msra.mxu0 %v17292_v40 }
0x215d   :  { %16383 = vmatprep.subr.bf16.mxu0 %v17526_v17 }
0x2160   :  { %16384 = vmatpush3.bf16.msra.mxu0 %v17293_v39 }
0x2161   :  { %16385 = vmatprep.subr.bf16.mxu0 %v17526_v17 }
0x2164   :  { %16386 = vmatpush3.bf16.msra.mxu0 %v17294_v27 }
0x2165   :  { %16387 = vmatprep.subr.bf16.mxu0 %v17526_v17 }
0x2168   :  { %16388 = vmatpush3.bf16.msra.mxu0 %v17295_v57 }
0x2169   :  { %16393 = vmatprep.subr.bf16.mxu0 %v17526_v17 }
0x221e   :  { %v16351_v5 = vpop.f32.mrb[104].mxu0 }
0x221f   :  { %v9697_v38 = vadd.f32 %v16351_v5, %v13721_v49  ;;  %v9688_v25 = vpop.f32.mrb[105].mxu0 }
0x2220   :  { %v9689_v47 = vadd.f32 %v13721_v49, %v9688_v25  ;;  %v16352_v54 = vpop.f32.mrb[106].mxu0  ;;  %v9193_v25 = vmul.f32 %v13628_v56, %v9184_v18 }
0x2221   :  { %v9705_v3 = vmax.f32 %v9697_v38, 0.0  ;;  %v9700_v42 = vadd.f32 %v16352_v54, %v13721_v49  ;;  %v9691_v33 = vpop.f32.mrb[107].mxu0 }
0x2222   :  { %v9703_v46 = vmax.f32 %v9689_v47, 0.0  ;;  %v9692_v43 = vadd.f32 %v13721_v49, %v9691_v33 }
0x2223   :  { %v9714_v58 = vmul.f32 %v13730_v9, %v9705_v3  ;;  %v9706_v41 = vmax.f32 %v9700_v42, 0.0  ;;  %v9203_v3 = vadd.f32 %v13629_v63, %v9194_v8 }
0x2224   :  { %v9712_v11 = vmul.f32 %v13730_v9, %v9703_v46  ;;  %v9704_v20 = vmax.f32 %v9692_v43, 0.0  ;;  %v9201_v46 = vadd.f32 %v13629_v63, %v9192_v28 }
0x2225   :  { %v9715_v62 = vmul.f32 %v13730_v9, %v9706_v41  ;;  %v9723_v12 = vadd.f32 %v13731_v2, %v9714_v58 }
0x2226   :  { %v9713_v35 = vmul.f32 %v13730_v9, %v9704_v20  ;;  %v9721_v23 = vadd.f32 %v13731_v2, %v9712_v11  ;;  %v13758_v9 = vld [vmem:[%s20935_s2 + $0x71] ss:$0 sm:$0xff]  ;;  %v9202_v20 = vadd.f32 %v13629_v63, %v9193_v25 }
0x2227   :  { %v9724_v6 = vadd.f32 %v13731_v2, %v9715_v62 }
0x2228   :  { %v9722_v24 = vadd.f32 %v13731_v2, %v9713_v35 }
0x2229   :  { %v9726_v14 = vpack.c.bf16 %v9724_v6, %v9723_v12  ;;  %v9870_v12 = vmul.f32 0.75, %v9203_v3 }
0x222a   :  { %v9725_v50 = vpack.c.bf16 %v9722_v24, %v9721_v23  ;;  %v9868_v24 = vmul.f32 0.75, %v9201_v46 }
0x222c   :  { %16369 = vmatprep.mubr.bf16.mxu1 %v9725_v50 }
0x222d   :  { %16370 = vmatmul.mubr.bf16.vlgmr.msra.gmra.mrb[120].mxu1 %v9726_v14 }
0x222e   :  { %16414 = vmatpush3.bf16.msra.mxu1 %v17280_v37  ;;  %v9195_v37 = vmul.f32 %v13628_v56, %v9186_v30 }
0x222f   :  { %16415 = vmatprep.subr.bf16.mxu1 %v17281_v15 }
0x2230   :  { %v9204_v41 = vadd.f32 %v13629_v63, %v9195_v37 }
0x2232   :  { %16416 = vmatpush3.bf16.msra.mxu1 %v17281_v15  ;;  %v9871_v15 = vmul.f32 0.75, %v9204_v41 }
0x2233   :  { %16417 = vmatprep.subr.bf16.mxu1 %v17282_v52 }
0x2236   :  { %16418 = vmatpush3.bf16.msra.mxu1 %v17282_v52 }
0x2237   :  { %16419 = vmatprep.subr.bf16.mxu1 %v17283_v16 }
0x223a   :  { %16420 = vmatpush3.bf16.msra.mxu1 %v17283_v16 }
0x223b   :  { %16421 = vmatprep.subr.bf16.mxu1 %v17284_v32 }
0x223e   :  { %16422 = vmatpush3.bf16.msra.mxu1 %v17284_v32  ;;  %v9869_v32 = vmul.f32 0.75, %v9202_v20 }
0x223f   :  { %16423 = vmatprep.subr.bf16.mxu1 %v17285_v31 }
0x2242   :  { %16424 = vmatpush3.bf16.msra.mxu1 %v17285_v31 }
0x2243   :  { %16425 = vmatprep.subr.bf16.mxu1 %v17286_v7 }
0x2246   :  { %16426 = vmatpush3.bf16.msra.mxu1 %v17286_v7 }
0x2247   :  { %16427 = vmatprep.subr.bf16.mxu1 %v17287_v1 }
0x224a   :  { %16428 = vmatpush3.bf16.msra.mxu1 %v17287_v1 }
0x2300   :  { %v16371_v4 = vpop.f32.mrb[120].mxu1 }
0x2301   :  { %v9840_v19 = vadd.f32 %v16371_v4, %v13748_v59  ;;  %v9831_v26 = vpop.f32.mrb[121].mxu1 }
0x2302   :  { %v9832_v36 = vadd.f32 %v13748_v59, %v9831_v26  ;;  %v16372_v34 = vpop.f32.mrb[122].mxu1 }
0x2303   :  { %v9848_v49 = vmax.f32 %v9840_v19, 0.0  ;;  %v9843_v5 = vadd.f32 %v16372_v34, %v13748_v59  ;;  %v9834_v38 = vpop.f32.mrb[123].mxu1 }
0x2304   :  { %v9846_v47 = vmax.f32 %v9832_v36, 0.0  ;;  %v9835_v54 = vadd.f32 %v13748_v59, %v9834_v38 }
0x2305   :  { %v9857_v42 = vmul.f32 %v13757_v29, %v9848_v49  ;;  %v9849_v33 = vmax.f32 %v9843_v5, 0.0 }
0x2306   :  { %v9855_v43 = vmul.f32 %v13757_v29, %v9846_v47  ;;  %v9847_v58 = vmax.f32 %v9835_v54, 0.0 }
0x2307   :  { %v9866_v2 = vadd.f32 %v13758_v9, %v9857_v42  ;;  %v9858_v11 = vmul.f32 %v13757_v29, %v9849_v33 }
0x2308   :  { %v9864_v62 = vadd.f32 %v13758_v9, %v9855_v43  ;;  %v9856_v35 = vmul.f32 %v13757_v29, %v9847_v58 }
0x2309   :  { %v9874_v6 = vmul.f32 0.25, %v9866_v2  ;;  %v9867_v23 = vadd.f32 %v13758_v9, %v9858_v11 }
0x230a   :  { %v9872_v14 = vmul.f32 0.25, %v9864_v62  ;;  %v9865_v50 = vadd.f32 %v13758_v9, %v9856_v35 }
0x230b   :  { %v20333_v52 = vadd.f32 %v9874_v6, %v9870_v12  ;;  %v9875_v16 = vmul.f32 0.25, %v9867_v23 }
0x230c   :  { %v20335_v31 = vadd.f32 %v9872_v14, %v9868_v24  ;;  %v9873_v7 = vmul.f32 0.25, %v9865_v50 }
0x230d   :  { %v20337_v1 = vadd.f32 %v9875_v16, %v9871_v15 }
0x230e   :  { %v20339_v48 = vadd.f32 %v9873_v7, %v9869_v32 }
0x230f   :  { %v9887_v51 = vadd.f32 %v20337_v1, %v20333_v52  ;;  %v20351_v39 = vpack.c.bf16 %v20337_v1, %v20333_v52 }
0x2310   :  { %v9880_v55 = vadd.f32 %v20339_v48, %v20335_v31  ;;  %v20347_v22 = vpack.c.bf16 %v20339_v48, %v20335_v31 }
0x2311   :  { %v9888_v40 = vrot.slane %v9887_v51, 4 }
0x2312   :  { %v9881_v27 = vrot.slane %v9880_v55, 4  ;;  %16429 = vmatprep.mubr.bf16.mxu1 %v20347_v22 }
0x2313   :  { %v9889_v57 = vadd.f32 %v9888_v40, %v9887_v51  ;;  %16430 = vmatmul.mubr.bf16.vlgmr.msra.gmra.mrb[124].mxu1 %v20351_v39 }
0x2314   :  { %v9882_v60 = vadd.f32 %v9881_v27, %v9880_v55 }
0x2315   :  { %v9890_v61 = vrot.slane %v9889_v57, 2 }
0x2316   :  { %v9883_v53 = vrot.slane %v9882_v60, 2 }
0x2317   :  { %v9891_v45 = vadd.f32 %v9890_v61, %v9889_v57 }
0x2318   :  { %v9884_v0 = vadd.f32 %v9883_v53, %v9882_v60  ;;  %v17296_v53 = vld [vmem:[%s20934_s1 + $0xfc0] sm:$0xff]  }
0x2319   :  { %v9892_v21 = vrot.slane %v9891_v45, 1 }
0x231a   :  { %v9885_v56 = vrot.slane %v9884_v0, 1 }
0x231b   :  { %v9893_v44 = vadd.f32 %v9892_v21, %v9891_v45  ;;  %v17298_v21 = vld [vmem:[%s20934_s1 + $0xfd0] sm:$0xff]  }
0x231c   :  { %v9886_v59 = vadd.f32 %v9885_v56, %v9884_v0  ;;  %v17297_v0 = vld [vmem:[%s20934_s1 + $0xfc8] sm:$0xff]   ;;  %v17299_v56 = vld [vmem:[%s20934_s1 + $0xfd8] sm:$0xff]  }
0x231d   :  { %v9895_v30 = vmul.f32 0.0625, %v9893_v44  ;;  %v17300_v44 = vld [vmem:[%s20934_s1 + $0xfe0] sm:$0xff]  }
0x231e   :  { %v9894_v18 = vmul.f32 0.0625, %v9886_v59  ;;  %v17301_v59 = vld [vmem:[%s20934_s1 + $0xfe8] sm:$0xff]  }
0x231f   :  { %v9898_v4 = vsub.f32 %v20333_v52, %v9895_v30  ;;  %v9899_v8 = vsub.f32 %v20337_v1, %v9895_v30  ;;  %v9937_v19 = vpack.c.bf16 %v9895_v30, %v9895_v30  ;;  %v17302_v30 = vld [vmem:[%s20934_s1 + $0xff0] sm:$0xff]  }
0x2320   :  { %v9896_v26 = vsub.f32 %v20335_v31, %v9894_v18  ;;  %v9897_v63 = vsub.f32 %v20339_v48, %v9894_v18  ;;  %v9936_v28 = vpack.c.bf16 %v9894_v18, %v9894_v18  ;;  %v17303_v18 = vld [vmem:[%s20934_s1 + $0xff8] sm:$0xff]  }
0x2321   :  { %v9902_v29 = vmul.f32 %v9898_v4, %v9898_v4  ;;  %v9903_v36 = vmul.f32 %v9899_v8, %v9899_v8  ;;  %v10072_v34 = vunpack.c.l.b16 %v9937_v19  ;;  %v17304_v4 = vld [vmem:[%s20934_s1 + $0x1100] sm:$0xff]  }
0x2322   :  { %v9900_v37 = vmul.f32 %v9896_v26, %v9896_v26  ;;  %v9901_v49 = vmul.f32 %v9897_v63, %v9897_v63  ;;  %v10071_v5 = vunpack.c.l.b16 %v9936_v28  ;;  %v17320_v8 = vld [vmem:[%s20934_s1 + $0x1040] sm:$0xff]   ;;  %v17305_v26 = vld [vmem:[%s20934_s1 + $0x1108] sm:$0xff]   ;;  %v17306_v63 = vld [vmem:[%s20934_s1 + $0x1110] sm:$0xff]  }
0x2323   :  { %v9911_v38 = vadd.f32 %v9903_v36, %v9902_v29  ;;  %16433 = vmatprep.subr.bf16.mxu1 %v17320_v8  ;;  %v17307_v28 = vld [vmem:[%s20934_s1 + $0x1118] sm:$0xff]   ;;  %v17308_v29 = vld [vmem:[%s20934_s1 + $0x1120] sm:$0xff]   ;;  %v17309_v36 = vld [vmem:[%s20934_s1 + $0x1128] sm:$0xff]  }
0x2324   :  { %v9904_v25 = vadd.f32 %v9901_v49, %v9900_v37  ;;  %v20360_v9 = vsel %vm2925_vm1, %v10072_v34, %v10071_v5  ;;  %16434 = vmatpush3.bf16.msra.mxu1 %v17320_v8  ;;  %v17310_v34 = vld [vmem:[%s20934_s1 + $0x1130] sm:$0xff]   ;;  %v17311_v37 = vld [vmem:[%s20934_s1 + $0x1138] sm:$0xff]   ;;  %v17312_v49 = vld [vmem:[%s20934_s1 + $0x10c0] sm:$0xff]  }
0x2325   :  { %v9912_v47 = vrot.slane %v9911_v38, 4  ;;  %v10074_v19 = vpack.c.b16 %v20360_v9, %v20360_v9  ;;  %v17313_v5 = vld [vmem:[%s20934_s1 + $0x10c8] sm:$0xff]   ;;  %v17316_v9 = vld [vmem:[%s20934_s1 + $0x10e0] sm:$0xff]  }
0x2326   :  { %v9905_v54 = vrot.slane %v9904_v25, 4 }
0x2327   :  { %v9913_v3 = vadd.f32 %v9912_v47, %v9911_v38  ;;  %v17314_v38 = vld [vmem:[%s20934_s1 + $0x10d0] sm:$0xff]   ;;  %v17317_v47 = vld [vmem:[%s20934_s1 + $0x10e8] sm:$0xff]  }
0x2328   :  { %v9906_v42 = vadd.f32 %v9905_v54, %v9904_v25  ;;  %v17315_v25 = vld [vmem:[%s20934_s1 + $0x10d8] sm:$0xff]   ;;  %v17318_v54 = vld [vmem:[%s20934_s1 + $0x10f0] sm:$0xff]  }
0x2329   :  { %v9914_v33 = vrot.slane %v9913_v3, 2 }
0x232a   :  { %v9907_v46 = vrot.slane %v9906_v42, 2 }
0x232b   :  { %v9915_v43 = vadd.f32 %v9914_v33, %v9913_v3  ;;  %v17319_v3 = vld [vmem:[%s20934_s1 + $0x10f8] sm:$0xff]   ;;  %v17322_v33 = vld [vmem:[%s20934_s1 + $0x1050] sm:$0xff]  }
0x232c   :  { %v9908_v58 = vadd.f32 %v9907_v46, %v9906_v42  ;;  %v17321_v42 = vld [vmem:[%s20934_s1 + $0x1048] sm:$0xff]   ;;  %v17323_v46 = vld [vmem:[%s20934_s1 + $0x1058] sm:$0xff]  }
0x232d   :  { %v9916_v41 = vrot.slane %v9915_v43, 1  ;;  %16435 = vmatprep.subr.bf16.mxu1 %v17321_v42 }
0x232e   :  { %v9909_v2 = vrot.slane %v9908_v58, 1  ;;  %16436 = vmatpush3.bf16.msra.mxu1 %v17321_v42  ;;  %v17334_v42 = vld [vmem:[%s20934_s1 + $0x10b0] sm:$0xff]  }
0x232f   :  { %v9917_v11 = vadd.f32 %v9916_v41, %v9915_v43  ;;  %16437 = vmatprep.subr.bf16.mxu1 %v17322_v33  ;;  %v17324_v43 = vld [vmem:[%s20934_s1 + $0x1060] sm:$0xff]   ;;  %v17326_v41 = vld [vmem:[%s20934_s1 + $0x1070] sm:$0xff]  }
0x2330   :  { %v9910_v20 = vadd.f32 %v9909_v2, %v9908_v58  ;;  %v17325_v58 = vld [vmem:[%s20934_s1 + $0x1068] sm:$0xff]   ;;  %v17327_v2 = vld [vmem:[%s20934_s1 + $0x1078] sm:$0xff]  }
0x2331   :  { %v9919_v62 = vmul.f32 0.0625, %v9917_v11  ;;  %v17328_v11 = vld [vmem:[%s20934_s1 + $0x1080] sm:$0xff]  }
0x2332   :  { %v9918_v35 = vmul.f32 0.0625, %v9910_v20  ;;  %16438 = vmatpush3.bf16.msra.mxu1 %v17322_v33  ;;  %v17335_v33 = vld [vmem:[%s20934_s1 + $0x10b8] sm:$0xff]  }
0x2333   :  { %v9921_v12 = vmax.f32 %v9919_v62, 1e-12  ;;  %16439 = vmatprep.subr.bf16.mxu1 %v17323_v46 }
0x2334   :  { %v9920_v6 = vmax.f32 %v9918_v35, 1e-12 }
0x2335   :  { %17424 = vrsqrt.f32 %v9921_v12  ;;  %vm9931_vm0 = vcmp.eq.f32.partialorder %v9921_v12, inf  ;;  %v9934_v15 = vand.u32 2147483648, %v9921_v12  ;;  %vm9933_vm6 = vcmp.eq.f32.partialorder %v9921_v12, 0.0 }
0x2336   :  { %17426 = vrsqrt.f32 %v9920_v6  ;;  %vm9924_vm5 = vcmp.eq.f32.partialorder %v9920_v6, inf  ;;  %v9927_v16 = vand.u32 2147483648, %v9920_v6  ;;  %vm9926_vm7 = vcmp.eq.f32.partialorder %v9920_v6, 0.0  ;;  %16440 = vmatpush3.bf16.msra.mxu1 %v17323_v46 }
0x2337   :  { %16441 = vmatprep.subr.bf16.mxu1 %v17324_v43 }
0x233a   :  { %16442 = vmatpush3.bf16.msra.mxu1 %v17324_v43 }
0x233b   :  { %16443 = vmatprep.subr.bf16.mxu1 %v17325_v58 }
0x233e   :  { %16444 = vmatpush3.bf16.msra.mxu1 %v17325_v58 }
0x233f   :  { %v17425_v23 = vpop.eup %17424  ;;  %16445 = vmatprep.subr.bf16.mxu1 %v17326_v41 }
0x2340   :  { %v17427_v24 = vpop.eup %17426  ;;  %v9930_v14 = vmul.f32 %v17425_v23, %v9921_v12 }
0x2341   :  { %v9923_v50 = vmul.f32 %v17427_v24, %v9920_v6 }
0x2342   :  { %v9932_v32 = vsel %vm9931_vm0, %v9921_v12, %v9930_v14  ;;  %16446 = vmatpush3.bf16.msra.mxu1 %v17326_v41 }
0x2343   :  { %v9925_v7 = vsel %vm9924_vm5, %v9920_v6, %v9923_v50  ;;  %v9935_v51 = vsel %vm9933_vm6, %v9934_v15, %v9932_v32  ;;  %16447 = vmatprep.subr.bf16.mxu1 %v17327_v2 }
0x2344   :  { %v9928_v55 = vsel %vm9926_vm7, %v9927_v16, %v9925_v7  ;;  %v9956_v40 = vpack.c.bf16 %v9935_v51, %v9935_v51  ;;  %v13831_v51 = vld [vmem:[%s20935_s2 + $0x73] ss:$0 sm:$0xff] }
0x2345   :  { %v9955_v27 = vpack.c.bf16 %v9928_v55, %v9928_v55 }
0x2346   :  { %v9977_v57 = vunpack.c.l.b16 %v9956_v40  ;;  %16448 = vmatpush3.bf16.msra.mxu1 %v17327_v2  ;;  %v17336_v2 = vld [vmem:[%s20934_s1 + $0x1140] sm:$0xff]  }
0x2347   :  { %v9976_v60 = vunpack.c.l.b16 %v9955_v27  ;;  %16493 = vmatprep.subr.bf16.mxu1 %v17328_v11 }
0x2349   :  { %v9978_v61 = vsel %vm2925_vm1, %v9977_v57, %v9976_v60 }
0x234a   :  { %v9979_v45 = vpack.c.b16 %v9978_v61, %v9978_v61 }
0x234c   :  { %16390 = vmatmul.mubr.bf16.vlgmr.msra.gmra.mrb[108].mxu0 %v9979_v45 }
0x234d   :  { %16394 = vmatpush3.bf16.msra.mxu0 %v17296_v53  ;;  %16409 = vmatprep.mubr.msk.bf16.mxu0 %vm17527_vm15, %v17526_v17 }
0x234e   :  { %16395 = vmatprep.subr.bf16.mxu0 %v17526_v17 }
0x2351   :  { %16396 = vmatpush3.bf16.msra.mxu0 %v17297_v0 }
0x2352   :  { %16397 = vmatprep.subr.bf16.mxu0 %v17526_v17 }
0x2355   :  { %16398 = vmatpush3.bf16.msra.mxu0 %v17298_v21 }
0x2356   :  { %16399 = vmatprep.subr.bf16.mxu0 %v17526_v17 }
0x2359   :  { %16400 = vmatpush3.bf16.msra.mxu0 %v17299_v56 }
0x235a   :  { %16401 = vmatprep.subr.bf16.mxu0 %v17526_v17 }
0x235d   :  { %16402 = vmatpush3.bf16.msra.mxu0 %v17300_v44 }
0x235e   :  { %16403 = vmatprep.subr.bf16.mxu0 %v17526_v17 }
0x2361   :  { %16404 = vmatpush3.bf16.msra.mxu0 %v17301_v59  ;;  %v13833_v59 = vld [vmem:[%s20935_s2 + $0x75] ss:$0 sm:$0xff] }
0x2362   :  { %16405 = vmatprep.subr.bf16.mxu0 %v17526_v17 }
0x2365   :  { %16406 = vmatpush3.bf16.msra.mxu0 %v17302_v30 }
0x2366   :  { %16407 = vmatprep.subr.bf16.mxu0 %v17526_v17 }
0x2369   :  { %16408 = vmatpush3.bf16.msra.mxu0 %v17303_v18 }
0x236a   :  { %16453 = vmatprep.subr.bf16.mxu0 %v17526_v17 }
0x236c   :  { %16410 = vmatmul.mubr.bf16.vlgmr.msra.gmra.mrb[108].mxu0 %v10074_v19 }
0x236d   :  { %16454 = vmatpush3.bf16.msra.mxu0 %v17304_v4  ;;  %16469 = vmatprep.mubr.msk.bf16.mxu0 %vm17527_vm15, %v17526_v17 }
0x236e   :  { %16455 = vmatprep.subr.bf16.mxu0 %v17526_v17 }
0x2371   :  { %16456 = vmatpush3.bf16.msra.mxu0 %v17305_v26 }
0x2372   :  { %16457 = vmatprep.subr.bf16.mxu0 %v17526_v17 }
0x2375   :  { %16458 = vmatpush3.bf16.msra.mxu0 %v17306_v63 }
0x2376   :  { %16459 = vmatprep.subr.bf16.mxu0 %v17526_v17 }
0x2379   :  { %16460 = vmatpush3.bf16.msra.mxu0 %v17307_v28 }
0x237a   :  { %16461 = vmatprep.subr.bf16.mxu0 %v17526_v17 }
0x237d   :  { %16462 = vmatpush3.bf16.msra.mxu0 %v17308_v29 }
0x237e   :  { %16463 = vmatprep.subr.bf16.mxu0 %v17526_v17 }
0x2381   :  { %16464 = vmatpush3.bf16.msra.mxu0 %v17309_v36 }
0x2382   :  { %16465 = vmatprep.subr.bf16.mxu0 %v17526_v17 }
0x2385   :  { %16466 = vmatpush3.bf16.msra.mxu0 %v17310_v34 }
0x2386   :  { %16467 = vmatprep.subr.bf16.mxu0 %v17526_v17 }
0x2389   :  { %16468 = vmatpush3.bf16.msra.mxu0 %v17311_v37 }
0x238a   :  { %16473 = vmatprep.subr.bf16.mxu0 %v17526_v17 }
0x238c   :  { %16470 = vmatmul.mubr.bf16.vlgmr.msra.gmra.mrb[112].mxu0 %v9979_v45  ;;  %v13832_v45 = vld [vmem:[%s20935_s2 + $0x74] ss:$0 sm:$0xff] }
0x238d   :  { %16474 = vmatpush3.bf16.msra.mxu0 %v17312_v49  ;;  %16489 = vmatprep.mubr.msk.bf16.mxu0 %vm17527_vm15, %v17526_v17 }
0x238e   :  { %16475 = vmatprep.subr.bf16.mxu0 %v17526_v17 }
0x2391   :  { %16476 = vmatpush3.bf16.msra.mxu0 %v17313_v5 }
0x2392   :  { %16477 = vmatprep.subr.bf16.mxu0 %v17526_v17 }
0x2395   :  { %16478 = vmatpush3.bf16.msra.mxu0 %v17314_v38 }
0x2396   :  { %16479 = vmatprep.subr.bf16.mxu0 %v17526_v17 }
0x2399   :  { %16480 = vmatpush3.bf16.msra.mxu0 %v17315_v25 }
0x239a   :  { %16481 = vmatprep.subr.bf16.mxu0 %v17526_v17 }
0x239d   :  { %16482 = vmatpush3.bf16.msra.mxu0 %v17316_v9  ;;  %v17329_v9 = vld [vmem:[%s20934_s1 + $0x1088] sm:$0xff]  }
0x239e   :  { %16483 = vmatprep.subr.bf16.mxu0 %v17526_v17 }
0x23a1   :  { %16484 = vmatpush3.bf16.msra.mxu0 %v17317_v47  ;;  %v17330_v47 = vld [vmem:[%s20934_s1 + $0x1090] sm:$0xff]  }
0x23a2   :  { %16485 = vmatprep.subr.bf16.mxu0 %v17526_v17 }
0x23a5   :  { %16486 = vmatpush3.bf16.msra.mxu0 %v17318_v54  ;;  %v17331_v54 = vld [vmem:[%s20934_s1 + $0x1098] sm:$0xff]  }
0x23a6   :  { %16487 = vmatprep.subr.bf16.mxu0 %v17526_v17 }
0x23a9   :  { %16488 = vmatpush3.bf16.msra.mxu0 %v17319_v3  ;;  %v17332_v3 = vld [vmem:[%s20934_s1 + $0x10a0] sm:$0xff]  }
0x23aa   :  { %16533 = vmatprep.subr.bf16.mxu0 %v17526_v17 }
0x23ac   :  { %16490 = vmatmul.mubr.bf16.vlgmr.msra.gmra.mrb[112].mxu0 %v10074_v19 }
0x23ad   :  { %16549 = vmatprep.mubr.msk.bf16.mxu0 %vm17527_vm15, %v17526_v17 }
0x23e6   :  { %v16431_v20 = vpop.f32.mrb[124].mxu1 }
0x23e7   :  { %v10265_v62 = vpop.f32.mrb[125].mxu1 }
0x23e8   :  { %v16432_v35 = vpop.f32.mrb[126].mxu1 }
0x23e9   :  { %v10268_v12 = vpop.f32.mrb[127].mxu1 }
0x243f   :  { %v10158_v6 = vpop.f32.mrb[108].mxu0 }
0x2440   :  { %v10287_v23 = vrot.slane %v10158_v6, %v18715_v10  ;;  %v16411_v24 = vpop.f32.mrb[109].mxu0  ;;  %v17343_v6 = vld [vmem:[%s20934_s1 + $0x1178] sm:$0xff]  }
0x2441   :  { %v10161_v14 = vpop.f32.mrb[110].mxu0  ;;  %v13850_v24 = vld [vmem:[%s20935_s2 + $0x72] ss:$0 sm:$0xff] }
0x2442   :  { %v10288_v50 = vcombine.high %v10287_v23, %v10287_v23  ;;  %v10295_v15 = vrot.slane %v10287_v23, %v18715_v10  ;;  %v16412_v16 = vpop.f32.mrb[111].mxu0 }
0x2444   :  { %v10302_v32 = vrot.slane %v10288_v50, %v18715_v10  ;;  %v10306_v7 = vrot.slane %v10295_v15, %v18723_v13 }
0x2446   :  { %v10310_v55 = vrot.slane %v10302_v32, %v18723_v13  ;;  %v10313_v40 = vadd.f32 %v10306_v7, %v10265_v62  ;;  %v10314_v27 = vadd.f32 %v10306_v7, %v10268_v12  ;;  %v17340_v62 = vld [vmem:[%s20934_s1 + $0x1160] sm:$0xff]   ;;  %v17342_v12 = vld [vmem:[%s20934_s1 + $0x1170] sm:$0xff]  }
0x2448   :  { %v10315_v57 = vadd.f32 %v16431_v20, %v10310_v55  ;;  %v10316_v60 = vadd.f32 %v16432_v35, %v10310_v55  ;;  %v10322_v61 = vadd.f32 %v13831_v51, %v10313_v40  ;;  %v10323_v53 = vadd.f32 %v13831_v51, %v10314_v27  ;;  %v17338_v20 = vld [vmem:[%s20934_s1 + $0x1150] sm:$0xff]   ;;  %v17341_v35 = vld [vmem:[%s20934_s1 + $0x1168] sm:$0xff]  }
0x244a   :  { %v10324_v0 = vadd.f32 %v13831_v51, %v10315_v57  ;;  %v10325_v21 = vadd.f32 %v13831_v51, %v10316_v60  ;;  %v10326_v56 = vmax.f32 %v10322_v61, 0.0  ;;  %v10327_v44 = vmax.f32 %v10323_v53, 0.0 }
0x244c   :  { %v10328_v30 = vmax.f32 %v10324_v0, 0.0  ;;  %v10329_v18 = vmax.f32 %v10325_v21, 0.0  ;;  %v10335_v4 = vmul.f32 %v13832_v45, %v10326_v56  ;;  %v10336_v8 = vmul.f32 %v13832_v45, %v10327_v44 }
0x244e   :  { %v10337_v19 = vmul.f32 %v13832_v45, %v10328_v30  ;;  %v10338_v26 = vmul.f32 %v13832_v45, %v10329_v18  ;;  %v10344_v63 = vadd.f32 %v13833_v59, %v10335_v4  ;;  %v10345_v28 = vadd.f32 %v13833_v59, %v10336_v8 }
0x2450   :  { %v10346_v29 = vadd.f32 %v13833_v59, %v10337_v19  ;;  %v10347_v36 = vadd.f32 %v13833_v59, %v10338_v26  ;;  %17428 = vtanh.f32 %v10344_v63 }
0x2451   :  { %17430 = vtanh.f32 %v10345_v28 }
0x2452   :  { %17432 = vtanh.f32 %v10346_v29 }
0x2453   :  { %17434 = vtanh.f32 %v10347_v36 }
0x245a   :  { %v17429_v34 = vpop.eup %17428 }
0x245b   :  { %v17431_v37 = vpop.eup %17430 }
0x245c   :  { %v17433_v49 = vpop.eup %17432  ;;  %v10352_v5 = vpack.c.bf16 %v17431_v37, %v17429_v34 }
0x245d   :  { %v17435_v38 = vpop.eup %17434 }
0x245e   :  { %16449 = vmatprep.mubr.bf16.mxu1 %v10352_v5  ;;  %v10353_v25 = vpack.c.bf16 %v17435_v38, %v17433_v49 }
0x2460   :  { %16450 = vmatmul.mubr.bf16.vlgmr.msra.gmra.mrb[128].mxu1 %v10353_v25  ;;  %v13931_v25 = vld [vmem:[%s20935_s2 + $0x77] ss:$0 sm:$0xff] }
0x2461   :  { %16494 = vmatpush3.bf16.msra.mxu1 %v17328_v11  ;;  %16509 = vmatprep.mubr.bf16.mxu1 %v20347_v22  ;;  %v17333_v22 = vld [vmem:[%s20934_s1 + $0x10a8] sm:$0xff]  }
0x2462   :  { %16495 = vmatprep.subr.bf16.mxu1 %v17329_v9  ;;  %v17337_v11 = vld [vmem:[%s20934_s1 + $0x1148] sm:$0xff]  }
0x2465   :  { %16496 = vmatpush3.bf16.msra.mxu1 %v17329_v9 }
0x2466   :  { %16497 = vmatprep.subr.bf16.mxu1 %v17330_v47 }
0x2469   :  { %16498 = vmatpush3.bf16.msra.mxu1 %v17330_v47 }
0x246a   :  { %16499 = vmatprep.subr.bf16.mxu1 %v17331_v54 }
0x246d   :  { %16500 = vmatpush3.bf16.msra.mxu1 %v17331_v54 }
0x246e   :  { %16501 = vmatprep.subr.bf16.mxu1 %v17332_v3 }
0x2471   :  { %16502 = vmatpush3.bf16.msra.mxu1 %v17332_v3 }
0x2472   :  { %16503 = vmatprep.subr.bf16.mxu1 %v17333_v22 }
0x2475   :  { %16504 = vmatpush3.bf16.msra.mxu1 %v17333_v22 }
0x2476   :  { %16505 = vmatprep.subr.bf16.mxu1 %v17334_v42 }
0x2479   :  { %16506 = vmatpush3.bf16.msra.mxu1 %v17334_v42 }
0x247a   :  { %16507 = vmatprep.subr.bf16.mxu1 %v17335_v33 }
0x247d   :  { %16508 = vmatpush3.bf16.msra.mxu1 %v17335_v33 }
0x247e   :  { %16513 = vmatprep.subr.bf16.mxu1 %v17336_v2 }
0x247f   :  { %v10783_v46 = vpop.f32.mrb[112].mxu0 }
0x2480   :  { %16510 = vmatmul.mubr.bf16.vlgmr.msra.gmra.mrb[132].mxu1 %v20351_v39  ;;  %v16491_v43 = vpop.f32.mrb[113].mxu0  ;;  %v17339_v39 = vld [vmem:[%s20934_s1 + $0x1158] sm:$0xff]   ;;  %v10910_v18 = vrot.slane %v10783_v46, %v18715_v10 }
0x2481   :  { %v10786_v58 = vpop.f32.mrb[114].mxu0  ;;  %16514 = vmatpush3.bf16.msra.mxu1 %v17336_v2 }
0x2482   :  { %v16492_v41 = vpop.f32.mrb[115].mxu0  ;;  %16515 = vmatprep.subr.bf16.mxu1 %v17337_v11  ;;  %v10911_v34 = vcombine.high %v10910_v18, %v10910_v18  ;;  %v10918_v49 = vrot.slane %v10910_v18, %v18715_v10 }
0x2484   :  { %v10925_v37 = vrot.slane %v10911_v34, %v18715_v10  ;;  %v10929_v9 = vrot.slane %v10918_v49, %v18723_v13 }
0x2485   :  { %16516 = vmatpush3.bf16.msra.mxu1 %v17337_v11  ;;  %v13932_v11 = vld [vmem:[%s20935_s2 + $0x78] ss:$0 sm:$0xff] }
0x2486   :  { %16517 = vmatprep.subr.bf16.mxu1 %v17338_v20  ;;  %v10933_v5 = vrot.slane %v10925_v37, %v18723_v13 }
0x2489   :  { %16518 = vmatpush3.bf16.msra.mxu1 %v17338_v20 }
0x248a   :  { %16519 = vmatprep.subr.bf16.mxu1 %v17339_v39 }
0x248d   :  { %16520 = vmatpush3.bf16.msra.mxu1 %v17339_v39 }
0x248e   :  { %16521 = vmatprep.subr.bf16.mxu1 %v17340_v62 }
0x2491   :  { %16522 = vmatpush3.bf16.msra.mxu1 %v17340_v62 }
0x2492   :  { %16523 = vmatprep.subr.bf16.mxu1 %v17341_v35 }
0x2495   :  { %16524 = vmatpush3.bf16.msra.mxu1 %v17341_v35 }
0x2496   :  { %16525 = vmatprep.subr.bf16.mxu1 %v17342_v12 }
0x2499   :  { %16526 = vmatpush3.bf16.msra.mxu1 %v17342_v12 }
0x249a   :  { %16527 = vmatprep.subr.bf16.mxu1 %v17343_v6 }
0x249d   :  { %16528 = vmatpush3.bf16.msra.mxu1 %v17343_v6  ;;  %v13933_v6 = vld [vmem:[%s20935_s2 + $0x79] ss:$0 sm:$0xff] }
0x249e   :  { %16553 = vmatprep.subr.bf16.mxu1 %v17526_v17 }
0x2533   :  { %v16451_v23 = vpop.f32.mrb[128].mxu1 }
0x2534   :  { %v10458_v14 = vpop.f32.mrb[129].mxu1  ;;  %v10467_v15 = vadd.f32 %v16451_v23, %v13850_v24 }
0x2535   :  { %v16452_v50 = vpop.f32.mrb[130].mxu1  ;;  %v10459_v7 = vadd.f32 %v13850_v24, %v10458_v14 }
0x2536   :  { %v10470_v16 = vadd.f32 %v16452_v50, %v13850_v24  ;;  %v10461_v32 = vpop.f32.mrb[131].mxu1 }
0x2537   :  { %v10462_v51 = vadd.f32 %v13850_v24, %v10461_v32 }
0x2538   :  { %v10480_v55 = vmax.f32 %v10467_v15, %v10470_v16 }
0x2539   :  { %v10473_v40 = vmax.f32 %v10459_v7, %v10462_v51 }
0x253a   :  { %v10481_v27 = vrot.slane %v10480_v55, 4 }
0x253b   :  { %v10474_v57 = vrot.slane %v10473_v40, 4 }
0x253c   :  { %v10482_v60 = vmax.f32 %v10480_v55, %v10481_v27 }
0x253d   :  { %v10475_v61 = vmax.f32 %v10473_v40, %v10474_v57 }
0x253e   :  { %v10483_v53 = vrot.slane %v10482_v60, 2 }
0x253f   :  { %v10476_v45 = vrot.slane %v10475_v61, 2 }
0x2540   :  { %v10484_v0 = vmax.f32 %v10482_v60, %v10483_v53 }
0x2541   :  { %v10477_v21 = vmax.f32 %v10475_v61, %v10476_v45 }
0x2542   :  { %v10485_v56 = vrot.slane %v10484_v0, 1 }
0x2543   :  { %v10478_v44 = vrot.slane %v10477_v21, 1 }
0x2544   :  { %v10486_v59 = vmax.f32 %v10484_v0, %v10485_v56 }
0x2545   :  { %v10479_v30 = vmax.f32 %v10477_v21, %v10478_v44 }
0x2546   :  { %v10489_v4 = vsub.f32 %v10467_v15, %v10486_v59  ;;  %v10490_v8 = vsub.f32 %v10470_v16, %v10486_v59 }
0x2547   :  { %v10487_v19 = vsub.f32 %v10459_v7, %v10479_v30  ;;  %v10488_v26 = vsub.f32 %v10462_v51, %v10479_v30 }
0x2548   :  { %v10495_v63 = vmul.f32 1.442695, %v10489_v4  ;;  %v10497_v28 = vmul.f32 1.442695, %v10490_v8 }
0x2549   :  { %v10491_v29 = vmul.f32 1.442695, %v10487_v19  ;;  %v10493_v36 = vmul.f32 1.442695, %v10488_v26 }
0x254a   :  { %17436 = vpow2.f32 %v10495_v63 }
0x254b   :  { %17438 = vpow2.f32 %v10497_v28 }
0x254c   :  { %17440 = vpow2.f32 %v10491_v29 }
0x254d   :  { %17442 = vpow2.f32 %v10493_v36 }
0x2553   :  { %v16511_v38 = vpop.f32.mrb[132].mxu1 }
0x2554   :  { %v17437_v47 = vpop.eup %17436  ;;  %v10938_v54 = vadd.f32 %v16511_v38, %v10933_v5  ;;  %v10888_v3 = vpop.f32.mrb[133].mxu1 }
0x2555   :  { %v17439_v22 = vpop.eup %17438  ;;  %v10936_v42 = vadd.f32 %v10929_v9, %v10888_v3  ;;  %v16512_v33 = vpop.f32.mrb[134].mxu1 }
0x2556   :  { %v17441_v46 = vpop.eup %17440  ;;  %v10506_v43 = vadd.f32 %v17439_v22, %v17437_v47  ;;  %v10947_v58 = vadd.f32 %v13931_v25, %v10938_v54  ;;  %v10939_v41 = vadd.f32 %v16512_v33, %v10933_v5  ;;  %v10891_v10 = vpop.f32.mrb[135].mxu1 }
0x2557   :  { %v17443_v2 = vpop.eup %17442  ;;  %v10945_v20 = vadd.f32 %v13931_v25, %v10936_v42  ;;  %v10937_v39 = vadd.f32 %v10929_v9, %v10891_v10 }
0x2558   :  { %v10507_v62 = vrot.slane %v10506_v43, 4  ;;  %v10499_v13 = vadd.f32 %v17443_v2, %v17441_v46  ;;  %v10951_v35 = vmax.f32 %v10947_v58, 0.0  ;;  %v10948_v12 = vadd.f32 %v13931_v25, %v10939_v41 }
0x2559   :  { %v10949_v23 = vmax.f32 %v10945_v20, 0.0  ;;  %v10946_v24 = vadd.f32 %v13931_v25, %v10937_v39 }
0x255a   :  { %v10508_v14 = vadd.f32 %v10507_v62, %v10506_v43  ;;  %v10500_v50 = vrot.slane %v10499_v13, 4  ;;  %v10960_v15 = vmul.f32 %v13932_v11, %v10951_v35  ;;  %v10952_v16 = vmax.f32 %v10948_v12, 0.0 }
0x255b   :  { %v10958_v32 = vmul.f32 %v13932_v11, %v10949_v23  ;;  %v10950_v7 = vmax.f32 %v10946_v24, 0.0 }
0x255c   :  { %v10509_v51 = vrot.slane %v10508_v14, 2  ;;  %v10501_v55 = vadd.f32 %v10500_v50, %v10499_v13  ;;  %v10969_v40 = vadd.f32 %v13933_v6, %v10960_v15  ;;  %v10961_v27 = vmul.f32 %v13932_v11, %v10952_v16 }
0x255d   :  { %v10967_v57 = vadd.f32 %v13933_v6, %v10958_v32  ;;  %v10959_v60 = vmul.f32 %v13932_v11, %v10950_v7 }
0x255e   :  { %v10510_v61 = vadd.f32 %v10509_v51, %v10508_v14  ;;  %v10502_v53 = vrot.slane %v10501_v55, 2  ;;  %17444 = vtanh.f32 %v10969_v40  ;;  %v10970_v45 = vadd.f32 %v13933_v6, %v10961_v27  ;;  %v17344_v51 = vld [vmem:[%s20934_s1 + $0x1180] sm:$0xff]   ;;  %v17346_v40 = vld [vmem:[%s20934_s1 + $0x1190] sm:$0xff]   ;;  %v17347_v27 = vld [vmem:[%s20934_s1 + $0x1198] sm:$0xff]  }
0x255f   :  { %17446 = vtanh.f32 %v10967_v57  ;;  %v10968_v0 = vadd.f32 %v13933_v6, %v10959_v60  ;;  %v17348_v57 = vld [vmem:[%s20934_s1 + $0x11a0] sm:$0xff]   ;;  %v17349_v60 = vld [vmem:[%s20934_s1 + $0x11a8] sm:$0xff]  }
0x2560   :  { %v10511_v21 = vrot.slane %v10510_v61, 1  ;;  %v10503_v56 = vadd.f32 %v10502_v53, %v10501_v55  ;;  %17448 = vtanh.f32 %v10970_v45  ;;  %v17345_v55 = vld [vmem:[%s20934_s1 + $0x1188] sm:$0xff]   ;;  %v17351_v53 = vld [vmem:[%s20934_s1 + $0x11b8] sm:$0xff]   ;;  %v17354_v45 = vld [vmem:[%s20934_s1 + $0x11c0] sm:$0xff]  }
0x2561   :  { %17450 = vtanh.f32 %v10968_v0  ;;  %16534 = vmatpush3.bf16.msra.mxu0 %v17354_v45  ;;  %v17356_v0 = vld [vmem:[%s20934_s1 + $0x11c8] sm:$0xff]  }
0x2562   :  { %v10512_v44 = vadd.f32 %v10511_v21, %v10510_v61  ;;  %v10504_v59 = vrot.slane %v10503_v56, 1  ;;  %v17350_v61 = vld [vmem:[%s20934_s1 + $0x11b0] sm:$0xff]   ;;  %16535 = vmatprep.subr.bf16.mxu0 %v17526_v17 }
0x2563   :  { %v17358_v21 = vld [vmem:[%s20934_s1 + $0x11d0] sm:$0xff]  }
0x2564   :  { %17452 = vrcp.f32 %v10512_v44  ;;  %v10505_v30 = vadd.f32 %v10504_v59, %v10503_v56  ;;  %v17360_v56 = vld [vmem:[%s20934_s1 + $0x11d8] sm:$0xff]   ;;  %v17362_v44 = vld [vmem:[%s20934_s1 + $0x11e0] sm:$0xff]   ;;  %v17364_v59 = vld [vmem:[%s20934_s1 + $0x11e8] sm:$0xff]  }
0x2565   :  { %16536 = vmatpush3.bf16.msra.mxu0 %v17356_v0 }
0x2566   :  { %17454 = vrcp.f32 %v10505_v30  ;;  %16537 = vmatprep.subr.bf16.mxu0 %v17526_v17  ;;  %v17366_v30 = vld [vmem:[%s20934_s1 + $0x11f0] sm:$0xff]  }
0x2568   :  { %v17445_v18 = vpop.eup %17444 }
0x2569   :  { %v17447_v4 = vpop.eup %17446  ;;  %16538 = vmatpush3.bf16.msra.mxu0 %v17358_v21 }
0x256a   :  { %v17449_v8 = vpop.eup %17448  ;;  %16539 = vmatprep.subr.bf16.mxu0 %v17526_v17 }
0x256b   :  { %v17451_v19 = vpop.eup %17450  ;;  %v10976_v26 = vpack.c.bf16 %v17449_v8, %v17445_v18  ;;  %v17367_v8 = vld [vmem:[%s20934_s1 + $0x11f8] sm:$0xff]  }
0x256c   :  { %v10975_v63 = vpack.c.bf16 %v17451_v19, %v17447_v4  ;;  %v13950_v4 = vld [vmem:[%s20935_s2 + $0x76] ss:$0 sm:$0xff] }
0x256d   :  { %16540 = vmatpush3.bf16.msra.mxu0 %v17360_v56 }
0x256e   :  { %v17453_v28 = vpop.eup %17452  ;;  %16529 = vmatprep.mubr.bf16.mxu1 %v10975_v63  ;;  %16541 = vmatprep.subr.bf16.mxu0 %v17526_v17 }
0x256f   :  { %v10517_v29 = vmul.f32 %v17453_v28, %v17437_v47  ;;  %v10518_v36 = vmul.f32 %v17453_v28, %v17439_v22  ;;  %16530 = vmatmul.mubr.bf16.vlgmr.msra.gmra.mrb[136].mxu1 %v10976_v26 }
0x2570   :  { %v17455_v34 = vpop.eup %17454  ;;  %16569 = vmatprep.mubr.msk.bf16.mxu1 %vm17527_vm15, %v17526_v17  ;;  %16554 = vmatpush3.bf16.msra.mxu1 %v17344_v51 }
0x2571   :  { %v10521_v37 = vmul.f32 %v10517_v29, %v20333_v52  ;;  %v10522_v49 = vmul.f32 %v10518_v36, %v20337_v1  ;;  %v10514_v5 = vmul.f32 %v17455_v34, %v17441_v46  ;;  %v10515_v38 = vmul.f32 %v17455_v34, %v17443_v2  ;;  %16555 = vmatprep.subr.bf16.mxu1 %v17526_v17 }
0x2572   :  { %16542 = vmatpush3.bf16.msra.mxu0 %v17362_v44 }
0x2573   :  { %v10530_v25 = vadd.f32 %v10522_v49, %v10521_v37  ;;  %v10519_v9 = vmul.f32 %v10514_v5, %v20335_v31  ;;  %v10520_v54 = vmul.f32 %v10515_v38, %v20339_v48  ;;  %16543 = vmatprep.subr.bf16.mxu0 %v17526_v17 }
0x2574   :  { %16556 = vmatpush3.bf16.msra.mxu1 %v17345_v55 }
0x2575   :  { %v10531_v3 = vrot.slane %v10530_v25, 4  ;;  %v10523_v42 = vadd.f32 %v10520_v54, %v10519_v9  ;;  %16557 = vmatprep.subr.bf16.mxu1 %v17526_v17 }
0x2576   :  { %16544 = vmatpush3.bf16.msra.mxu0 %v17364_v59 }
0x2577   :  { %v10532_v47 = vadd.f32 %v10531_v3, %v10530_v25  ;;  %v10524_v22 = vrot.slane %v10523_v42, 4  ;;  %16545 = vmatprep.subr.bf16.mxu0 %v17526_v17 }
0x2578   :  { %16558 = vmatpush3.bf16.msra.mxu1 %v17346_v40 }
0x2579   :  { %v10533_v33 = vrot.slane %v10532_v47, 2  ;;  %v10525_v43 = vadd.f32 %v10524_v22, %v10523_v42  ;;  %16559 = vmatprep.subr.bf16.mxu1 %v17526_v17 }
0x257a   :  { %16546 = vmatpush3.bf16.msra.mxu0 %v17366_v30 }
0x257b   :  { %v10534_v58 = vadd.f32 %v10533_v33, %v10532_v47  ;;  %v10526_v41 = vrot.slane %v10525_v43, 2  ;;  %16547 = vmatprep.subr.bf16.mxu0 %v17526_v17 }
0x257c   :  { %16560 = vmatpush3.bf16.msra.mxu1 %v17347_v27 }
0x257d   :  { %v10535_v10 = vrot.slane %v10534_v58, 1  ;;  %v10527_v11 = vadd.f32 %v10526_v41, %v10525_v43  ;;  %16561 = vmatprep.subr.bf16.mxu1 %v17526_v17 }
0x257e   :  { %16548 = vmatpush3.bf16.msra.mxu0 %v17367_v8 }
0x257f   :  { %v20581_v20 = vadd.f32 %v10535_v10, %v10534_v58  ;;  %v10528_v39 = vrot.slane %v10527_v11, 1  ;;  %16573 = vmatprep.subr.bf16.mxu0 %v17526_v17 }
0x2580   :  { %16562 = vmatpush3.bf16.msra.mxu1 %v17348_v57 }
0x2581   :  { %v10539_v46 = vsub.f32 %v20333_v52, %v20581_v20  ;;  %v10540_v2 = vsub.f32 %v20337_v1, %v20581_v20  ;;  %v20587_v62 = vadd.f32 %v10528_v39, %v10527_v11  ;;  %16563 = vmatprep.subr.bf16.mxu1 %v17526_v17 }
0x2583   :  { %v10543_v13 = vmul.f32 %v10539_v46, %v10539_v46  ;;  %v10544_v35 = vmul.f32 %v10540_v2, %v10540_v2  ;;  %v10537_v12 = vsub.f32 %v20335_v31, %v20587_v62  ;;  %v10538_v6 = vsub.f32 %v20339_v48, %v20587_v62 }
0x2584   :  { %16564 = vmatpush3.bf16.msra.mxu1 %v17349_v60 }
0x2585   :  { %v10547_v23 = vmul.f32 %v10543_v13, %v10517_v29  ;;  %v10548_v24 = vmul.f32 %v10544_v35, %v10518_v36  ;;  %v10541_v14 = vmul.f32 %v10537_v12, %v10537_v12  ;;  %v10542_v50 = vmul.f32 %v10538_v6, %v10538_v6  ;;  %16565 = vmatprep.subr.bf16.mxu1 %v17526_v17 }
0x2587   :  { %v20593_v15 = vadd.f32 %v10548_v24, %v10547_v23  ;;  %v10545_v16 = vmul.f32 %v10541_v14, %v10514_v5  ;;  %v10546_v32 = vmul.f32 %v10542_v50, %v10515_v38 }
0x2588   :  { %16566 = vmatpush3.bf16.msra.mxu1 %v17350_v61 }
0x2589   :  { %v20595_v7 = vadd.f32 %v10546_v32, %v10545_v16  ;;  %16567 = vmatprep.subr.bf16.mxu1 %v17526_v17 }
0x258c   :  { %16568 = vmatpush3.bf16.msra.mxu1 %v17351_v53 }
0x258d   :  { %16593 = vmatprep.subr.bf16.mxu1 %v17526_v17 }
0x2642   :  { %v16531_v18 = vpop.f32.mrb[136].mxu1 }
0x2643   :  { %v11081_v19 = vpop.f32.mrb[137].mxu1  ;;  %v11090_v63 = vadd.f32 %v16531_v18, %v13950_v4 }
0x2644   :  { %v16532_v26 = vpop.f32.mrb[138].mxu1  ;;  %v11082_v36 = vadd.f32 %v13950_v4, %v11081_v19  ;;  %v10557_v19 = vrot.slane %v20593_v15, 4 }
0x2645   :  { %v11093_v28 = vadd.f32 %v16532_v26, %v13950_v4  ;;  %v11084_v29 = vpop.f32.mrb[139].mxu1 }
0x2646   :  { %v11085_v34 = vadd.f32 %v13950_v4, %v11084_v29  ;;  %v10550_v29 = vrot.slane %v20595_v7, 4 }
0x2647   :  { %v11103_v37 = vmax.f32 %v11090_v63, %v11093_v28 }
0x2648   :  { %v11096_v49 = vmax.f32 %v11082_v36, %v11085_v34 }
0x2649   :  { %v11104_v5 = vrot.slane %v11103_v37, 4 }
0x264a   :  { %v11097_v38 = vrot.slane %v11096_v49, 4 }
0x264b   :  { %v11105_v25 = vmax.f32 %v11103_v37, %v11104_v5  ;;  %v10558_v37 = vadd.f32 %v10557_v19, %v20593_v15 }
0x264c   :  { %v11098_v9 = vmax.f32 %v11096_v49, %v11097_v38  ;;  %v10551_v38 = vadd.f32 %v10550_v29, %v20595_v7  ;;  %v11203_v7 = vmul.f32 0.75, %v20581_v20  ;;  %v13960_v20 = vld [vmem:[%s20935_s2 + $0x7b] ss:$0 sm:$0xff] }
0x264d   :  { %v11106_v54 = vrot.slane %v11105_v25, 2 }
0x264e   :  { %v11099_v3 = vrot.slane %v11098_v9, 2 }
0x264f   :  { %v11107_v42 = vmax.f32 %v11105_v25, %v11106_v54  ;;  %v10559_v54 = vrot.slane %v10558_v37, 2 }
0x2650   :  { %v11100_v47 = vmax.f32 %v11098_v9, %v11099_v3 }
0x2651   :  { %v11108_v22 = vrot.slane %v11107_v42, 1 }
0x2652   :  { %v11101_v33 = vrot.slane %v11100_v47, 1 }
0x2653   :  { %v11109_v43 = vmax.f32 %v11107_v42, %v11108_v22 }
0x2654   :  { %v11102_v58 = vmax.f32 %v11100_v47, %v11101_v33  ;;  %v10552_v47 = vrot.slane %v10551_v38, 2 }
0x2655   :  { %v11112_v41 = vsub.f32 %v11090_v63, %v11109_v43  ;;  %v11113_v10 = vsub.f32 %v11093_v28, %v11109_v43  ;;  %v10560_v43 = vadd.f32 %v10559_v54, %v10558_v37 }
0x2656   :  { %v11110_v11 = vsub.f32 %v11082_v36, %v11102_v58  ;;  %v11111_v39 = vsub.f32 %v11085_v34, %v11102_v58 }
0x2657   :  { %v11118_v46 = vmul.f32 1.442695, %v11112_v41  ;;  %v11120_v2 = vmul.f32 1.442695, %v11113_v10  ;;  %v10553_v10 = vadd.f32 %v10552_v47, %v10551_v38  ;;  %v17355_v47 = vld [vmem:[%s20934_s1 + $0x1210] sm:$0xff]  }
0x2658   :  { %v11114_v13 = vmul.f32 1.442695, %v11110_v11  ;;  %v11116_v35 = vmul.f32 1.442695, %v11111_v39 }
0x2659   :  { %17456 = vpow2.f32 %v11118_v46 }
0x265a   :  { %17458 = vpow2.f32 %v11120_v2  ;;  %v10561_v2 = vrot.slane %v10560_v43, 1 }
0x265b   :  { %17460 = vpow2.f32 %v11114_v13 }
0x265c   :  { %17462 = vpow2.f32 %v11116_v35 }
0x2663   :  { %v17457_v12 = vpop.eup %17456 }
0x2664   :  { %v17459_v6 = vpop.eup %17458 }
0x2665   :  { %v17461_v23 = vpop.eup %17460  ;;  %v11129_v24 = vadd.f32 %v17459_v6, %v17457_v12 }
0x2666   :  { %v17463_v14 = vpop.eup %17462 }
0x2667   :  { %v11130_v50 = vrot.slane %v11129_v24, 4  ;;  %v11122_v16 = vadd.f32 %v17463_v14, %v17461_v23 }
0x2669   :  { %v11131_v32 = vadd.f32 %v11130_v50, %v11129_v24  ;;  %v11123_v51 = vrot.slane %v11122_v16, 4  ;;  %v10554_v24 = vrot.slane %v10553_v10, 1 }
0x266b   :  { %v11132_v55 = vrot.slane %v11131_v32, 2  ;;  %v11124_v40 = vadd.f32 %v11123_v51, %v11122_v16 }
0x266d   :  { %v11133_v27 = vadd.f32 %v11132_v55, %v11131_v32  ;;  %v11125_v57 = vrot.slane %v11124_v40, 2 }
0x266f   :  { %v11134_v60 = vrot.slane %v11133_v27, 1  ;;  %v11126_v61 = vadd.f32 %v11125_v57, %v11124_v40 }
0x2671   :  { %v11135_v53 = vadd.f32 %v11134_v60, %v11133_v27  ;;  %v11127_v45 = vrot.slane %v11126_v61, 1 }
0x2673   :  { %17464 = vrcp.f32 %v11135_v53  ;;  %v11128_v0 = vadd.f32 %v11127_v45, %v11126_v61  ;;  %v10555_v53 = vadd.f32 %v10554_v24, %v10553_v10  ;;  %v17359_v10 = vld [vmem:[%s20934_s1 + $0x1220] sm:$0xff]  }
0x2675   :  { %17466 = vrcp.f32 %v11128_v0  ;;  %v10563_v19 = vmax.f32 %v10555_v53, 1e-12 }
0x2677   :  { %vm10567_vm9 = vcmp.eq.f32.partialorder %v10563_v19, inf  ;;  %vm10569_vm12 = vcmp.eq.f32.partialorder %v10563_v19, 0.0 }
0x267d   :  { %v17465_v21 = vpop.eup %17464 }
0x267e   :  { %v11140_v56 = vmul.f32 %v17465_v21, %v17457_v12  ;;  %v11141_v44 = vmul.f32 %v17465_v21, %v17459_v6 }
0x267f   :  { %v17467_v59 = vpop.eup %17466 }
0x2680   :  { %v11144_v30 = vmul.f32 %v11140_v56, %v20333_v52  ;;  %v11145_v18 = vmul.f32 %v11141_v44, %v20337_v1  ;;  %v11137_v4 = vmul.f32 %v17467_v59, %v17461_v23  ;;  %v11138_v8 = vmul.f32 %v17467_v59, %v17463_v14  ;;  %v13959_v23 = vld [vmem:[%s20935_s2 + $0x7a] ss:$0 sm:$0xff] }
0x2682   :  { %v11153_v26 = vadd.f32 %v11145_v18, %v11144_v30  ;;  %v11142_v63 = vmul.f32 %v11137_v4, %v20335_v31  ;;  %v11143_v28 = vmul.f32 %v11138_v8, %v20339_v48 }
0x2684   :  { %v11154_v36 = vrot.slane %v11153_v26, 4  ;;  %v11146_v34 = vadd.f32 %v11143_v28, %v11142_v63 }
0x2686   :  { %v11155_v49 = vadd.f32 %v11154_v36, %v11153_v26  ;;  %v11147_v5 = vrot.slane %v11146_v34, 4 }
0x2688   :  { %v11156_v25 = vrot.slane %v11155_v49, 2  ;;  %v11148_v9 = vadd.f32 %v11147_v5, %v11146_v34  ;;  %v17352_v34 = vld [vmem:[%s20934_s1 + $0x1200] sm:$0xff]  }
0x268a   :  { %v11157_v3 = vadd.f32 %v11156_v25, %v11155_v49  ;;  %v11149_v42 = vrot.slane %v11148_v9, 2 }
0x268c   :  { %v11158_v22 = vrot.slane %v11157_v3, 1  ;;  %v11150_v33 = vadd.f32 %v11149_v42, %v11148_v9  ;;  %v17353_v9 = vld [vmem:[%s20934_s1 + $0x1208] sm:$0xff]  }
0x268e   :  { %v11159_v58 = vadd.f32 %v11158_v22, %v11157_v3  ;;  %v11151_v41 = vrot.slane %v11150_v33, 1 }
0x2690   :  { %v11162_v11 = vsub.f32 %v20333_v52, %v11159_v58  ;;  %v11163_v15 = vsub.f32 %v20337_v1, %v11159_v58  ;;  %v11152_v39 = vadd.f32 %v11151_v41, %v11150_v33  ;;  %v11205_v46 = vmul.f32 0.25, %v11159_v58 }
0x2691   :  { %v11202_v52 = vmul.f32 0.75, %v20587_v62 }
0x2692   :  { %v11166_v13 = vmul.f32 %v11162_v11, %v11162_v11  ;;  %v11167_v35 = vmul.f32 %v11163_v15, %v11163_v15  ;;  %v11160_v12 = vsub.f32 %v20335_v31, %v11152_v39  ;;  %v11161_v6 = vsub.f32 %v20339_v48, %v11152_v39 }
0x2693   :  { %v11204_v14 = vmul.f32 0.25, %v11152_v39  ;;  %v11207_v1 = vadd.f32 %v11205_v46, %v11203_v7  ;;  %v10562_v48 = vadd.f32 %v10561_v2, %v10560_v43  ;;  %v17357_v43 = vld [vmem:[%s20934_s1 + $0x1218] sm:$0xff]  }
0x2694   :  { %v11170_v50 = vmul.f32 %v11166_v13, %v11140_v56  ;;  %v11171_v16 = vmul.f32 %v11167_v35, %v11141_v44  ;;  %v11164_v32 = vmul.f32 %v11160_v12, %v11160_v12  ;;  %v11165_v51 = vmul.f32 %v11161_v6, %v11161_v6  ;;  %v17361_v6 = vld [vmem:[%s20934_s1 + $0x1228] sm:$0xff]  }
0x2695   :  { %v11206_v31 = vadd.f32 %v11204_v14, %v11202_v52  ;;  %v11220_v55 = vmul.f32 %v13959_v23, %v11207_v1  ;;  %v10564_v56 = vmax.f32 %v10562_v48, 1e-12  ;;  %v10570_v13 = vand.u32 2147483648, %v10563_v19 }
0x2696   :  { %v11179_v40 = vadd.f32 %v11171_v16, %v11170_v50  ;;  %v11168_v27 = vmul.f32 %v11164_v32, %v11137_v4  ;;  %v11169_v57 = vmul.f32 %v11165_v51, %v11138_v8 }
0x2697   :  { %v11219_v60 = vmul.f32 %v13959_v23, %v11206_v31  ;;  %v11227_v61 = vadd.f32 %v13960_v20, %v11220_v55  ;;  %17468 = vrsqrt.f32 %v10564_v56  ;;  %vm10574_vm8 = vcmp.eq.f32.partialorder %v10564_v56, inf  ;;  %v17363_v31 = vld [vmem:[%s20934_s1 + $0x1230] sm:$0xff]  }
0x2698   :  { %v11180_v62 = vrot.slane %v11179_v40, 4  ;;  %v11172_v45 = vadd.f32 %v11169_v57, %v11168_v27  ;;  %17470 = vrsqrt.f32 %v10563_v19  ;;  %v10577_v39 = vand.u32 2147483648, %v10564_v56  ;;  %v13962_v27 = vld [vmem:[%s20935_s2 + $0x7d] ss:$0 sm:$0xff] }
0x2699   :  { %v11226_v0 = vadd.f32 %v13960_v20, %v11219_v60  ;;  %v11243_v21 = vpack.c.bf16 %v11227_v61, %v11227_v61  ;;  %vm10576_vm10 = vcmp.eq.f32.partialorder %v10564_v56, 0.0  ;;  %v13961_v20 = vld [vmem:[%s20935_s2 + $0x7c] ss:$0 sm:$0xff] }
0x269a   :  { %v11181_v44 = vadd.f32 %v11180_v62, %v11179_v40  ;;  %v11173_v59 = vrot.slane %v11172_v45, 4  ;;  %v17365_v61 = vld [vmem:[%s20934_s1 + $0x1238] sm:$0xff]  }
0x269b   :  { %v11242_v30 = vpack.c.bf16 %v11226_v0, %v11226_v0  ;;  %v11379_v18 = vunpack.c.l.b16 %v11243_v21 }
0x269c   :  { %v11182_v26 = vrot.slane %v11181_v44, 2  ;;  %v11174_v63 = vadd.f32 %v11173_v59, %v11172_v45 }
0x269d   :  { %v11378_v28 = vunpack.c.l.b16 %v11242_v30  ;;  %v11380_v29 = vrot.slane %v11379_v18, 7  ;;  %v17368_v18 = vld [vmem:[%s20934_s1 + $0x1240] sm:$0xff]  }
0x269e   :  { %v11183_v36 = vadd.f32 %v11182_v26, %v11181_v44  ;;  %v11175_v4 = vrot.slane %v11174_v63, 2  ;;  %v17369_v26 = vld [vmem:[%s20934_s1 + $0x1248] sm:$0xff]  }
0x269f   :  { %v11381_v8 = vsel %vm2925_vm1, %v11380_v29, %v11378_v28  ;;  %v17371_v28 = vld [vmem:[%s20934_s1 + $0x1258] sm:$0xff]   ;;  %v17372_v29 = vld [vmem:[%s20934_s1 + $0x1260] sm:$0xff]  }
0x26a0   :  { %v11184_v37 = vrot.slane %v11183_v36, 1  ;;  %v11176_v49 = vadd.f32 %v11175_v4, %v11174_v63  ;;  %v20688_v5 = vpack.c.b16 %v11381_v8, %v11381_v8  ;;  %v17370_v63 = vld [vmem:[%s20934_s1 + $0x1250] sm:$0xff]   ;;  %v17375_v8 = vld [vmem:[%s20934_s1 + $0x1278] sm:$0xff]  }
0x26a1   :  { %v17469_v22 = vpop.eup %17468  ;;  %v17374_v4 = vld [vmem:[%s20934_s1 + $0x1270] sm:$0xff]  }
0x26a2   :  { %v11185_v38 = vadd.f32 %v11184_v37, %v11183_v36  ;;  %v11177_v25 = vrot.slane %v11176_v49, 1  ;;  %16570 = vmatmul.mubr.bf16.vlgmr.msra.gmra.mrb[140].mxu1 %v20688_v5  ;;  %v17471_v33 = vpop.eup %17470  ;;  %v10573_v58 = vmul.f32 %v17469_v22, %v10564_v56  ;;  %v17373_v36 = vld [vmem:[%s20934_s1 + $0x1268] sm:$0xff]   ;;  %v17390_v22 = vld [vmem:[%s20934_s1 + $0x12d8] sm:$0xff]  }
0x26a3   :  { %16594 = vmatpush3.bf16.msra.mxu1 %v17352_v34  ;;  %16609 = vmatprep.mubr.msk.bf16.mxu1 %vm17527_vm15, %v17526_v17  ;;  %v10566_v41 = vmul.f32 %v17471_v33, %v10563_v19  ;;  %v17376_v34 = vld [vmem:[%s20934_s1 + $0x1280] sm:$0xff]   ;;  %v17377_v37 = vld [vmem:[%s20934_s1 + $0x1288] sm:$0xff]  }
0x26a4   :  { %v11187_v54 = vmax.f32 %v11185_v38, 1e-12  ;;  %v11178_v3 = vadd.f32 %v11177_v25, %v11176_v49  ;;  %16595 = vmatprep.subr.bf16.mxu1 %v17526_v17  ;;  %v10575_v11 = vsel %vm10574_vm8, %v10564_v56, %v10573_v58  ;;  %v17378_v49 = vld [vmem:[%s20934_s1 + $0x1290] sm:$0xff]   ;;  %v17380_v38 = vld [vmem:[%s20934_s1 + $0x12a0] sm:$0xff]   ;;  %v17381_v25 = vld [vmem:[%s20934_s1 + $0x12a8] sm:$0xff]  }
0x26a5   :  { %v10568_v46 = vsel %vm10567_vm9, %v10563_v19, %v10566_v41  ;;  %v10578_v35 = vsel %vm10576_vm10, %v10577_v39, %v10575_v11  ;;  %v17392_v33 = vld [vmem:[%s20934_s1 + $0x12e0] sm:$0xff]  }
0x26a6   :  { %v11186_v42 = vmax.f32 %v11178_v3, 1e-12  ;;  %17472 = vrsqrt.f32 %v11187_v54  ;;  %vm11197_vm11 = vcmp.eq.f32.partialorder %v11187_v54, inf  ;;  %v11200_v12 = vand.u32 2147483648, %v11187_v54  ;;  %v17384_v3 = vld [vmem:[%s20934_s1 + $0x12c0] sm:$0xff]  }
0x26a7   :  { %16596 = vmatpush3.bf16.msra.mxu1 %v17353_v9  ;;  %vm11199_vm13 = vcmp.eq.f32.partialorder %v11187_v54, 0.0  ;;  %v10571_v52 = vsel %vm10569_vm12, %v10570_v13, %v10568_v46  ;;  %v11209_v16 = vmul.f32 0.75, %v10578_v35  ;;  %v17382_v9 = vld [vmem:[%s20934_s1 + $0x12b0] sm:$0xff]  }
0x26a8   :  { %16597 = vmatprep.subr.bf16.mxu1 %v17526_v17  ;;  %17474 = vrsqrt.f32 %v11186_v42  ;;  %vm11190_vm14 = vcmp.eq.f32.partialorder %v11186_v42, inf  ;;  %v11193_v14 = vand.u32 2147483648, %v11186_v42  ;;  %vm11192_vm2 = vcmp.eq.f32.partialorder %v11186_v42, 0.0 }
0x26a9   :  { %v11208_v55 = vmul.f32 0.75, %v10571_v52 }
0x26ab   :  { %16598 = vmatpush3.bf16.msra.mxu1 %v17355_v47  ;;  %v17388_v47 = vld [vmem:[%s20934_s1 + $0x12d0] sm:$0xff]  }
0x26ac   :  { %16599 = vmatprep.subr.bf16.mxu1 %v17526_v17 }
0x26af   :  { %16600 = vmatpush3.bf16.msra.mxu1 %v17357_v43 }
0x26b0   :  { %v17473_v15 = vpop.eup %17472  ;;  %16601 = vmatprep.subr.bf16.mxu1 %v17526_v17 }
0x26b1   :  { %v11196_v2 = vmul.f32 %v17473_v15, %v11187_v54 }
0x26b2   :  { %v17475_v7 = vpop.eup %17474 }
0x26b3   :  { %16602 = vmatpush3.bf16.msra.mxu1 %v17359_v10  ;;  %v11189_v23 = vmul.f32 %v17475_v7, %v11186_v42  ;;  %v11198_v24 = vsel %vm11197_vm11, %v11187_v54, %v11196_v2  ;;  %v17383_v54 = vld [vmem:[%s20934_s1 + $0x12b8] sm:$0xff]  }
0x26b4   :  { %16603 = vmatprep.subr.bf16.mxu1 %v17526_v17  ;;  %v11201_v1 = vsel %vm11199_vm13, %v11200_v12, %v11198_v24 }
0x26b5   :  { %v11191_v50 = vsel %vm11190_vm14, %v11186_v42, %v11189_v23  ;;  %v11211_v32 = vmul.f32 0.25, %v11201_v1  ;;  %v17386_v42 = vld [vmem:[%s20934_s1 + $0x12c8] sm:$0xff]   ;;  %v14062_v23 = vld [vmem:[%s20935_s2 + $0x81] ss:$0 sm:$0xff] }
0x26b6   :  { %v11194_v51 = vsel %vm11192_vm2, %v11193_v14, %v11191_v50 }
0x26b7   :  { %16604 = vmatpush3.bf16.msra.mxu1 %v17361_v6  ;;  %v11210_v48 = vmul.f32 0.25, %v11194_v51  ;;  %v11213_v40 = vadd.f32 %v11211_v32, %v11209_v16  ;;  %v14063_v16 = vld [vmem:[%s20935_s2 + $0x82] ss:$0 sm:$0xff]  ;;  %v14064_v51 = vld [vmem:[%s20935_s2 + $0x83] ss:$0 sm:$0xff] }
0x26b8   :  { %16605 = vmatprep.subr.bf16.mxu1 %v17526_v17 }
0x26b9   :  { %v11212_v57 = vadd.f32 %v11210_v48, %v11208_v55  ;;  %v11234_v60 = vmul.f32 %v13961_v20, %v11213_v40  ;;  %v17385_v55 = vld [vmem:[%s20934_s1 + $0x1300] sm:$0xff]   ;;  %v17387_v40 = vld [vmem:[%s20934_s1 + $0x1308] sm:$0xff]  }
0x26bb   :  { %16606 = vmatpush3.bf16.msra.mxu1 %v17363_v31  ;;  %v11233_v53 = vmul.f32 %v13961_v20, %v11212_v57  ;;  %v11241_v62 = vadd.f32 %v13962_v27, %v11234_v60  ;;  %v17391_v57 = vld [vmem:[%s20934_s1 + $0x1318] sm:$0xff]   ;;  %v17393_v60 = vld [vmem:[%s20934_s1 + $0x1320] sm:$0xff]  }
0x26bc   :  { %16607 = vmatprep.subr.bf16.mxu1 %v17526_v17 }
0x26bd   :  { %v11240_v45 = vadd.f32 %v13962_v27, %v11233_v53  ;;  %v11262_v0 = vpack.c.bf16 %v11241_v62, %v11241_v62  ;;  %v17389_v27 = vld [vmem:[%s20934_s1 + $0x1310] sm:$0xff]   ;;  %v17395_v53 = vld [vmem:[%s20934_s1 + $0x1328] sm:$0xff]  }
0x26be   :  { %v17396_v62 = vld [vmem:[%s20934_s1 + $0x12f0] sm:$0xff]  }
0x26bf   :  { %16608 = vmatpush3.bf16.msra.mxu1 %v17365_v61  ;;  %v11261_v21 = vpack.c.bf16 %v11240_v45, %v11240_v45  ;;  %v11283_v56 = vunpack.c.l.b16 %v11262_v0  ;;  %v17394_v61 = vld [vmem:[%s20934_s1 + $0x12e8] sm:$0xff]   ;;  %v17397_v45 = vld [vmem:[%s20934_s1 + $0x1330] sm:$0xff]   ;;  %v17398_v0 = vld [vmem:[%s20934_s1 + $0x12f8] sm:$0xff]  }
0x26c0   :  { %16633 = vmatprep.subr.bf16.mxu1 %v17526_v17 }
0x26c1   :  { %v11282_v44 = vunpack.c.l.b16 %v11261_v21  ;;  %v11284_v59 = vrot.slane %v11283_v56, 7  ;;  %v17399_v21 = vld [vmem:[%s20934_s1 + $0x1338] sm:$0xff]  }
0x26c2   :  { %16610 = vmatmul.mubr.bf16.vlgmr.msra.gmra.mrb[144].mxu1 %v20688_v5  ;;  %v17379_v5 = vld [vmem:[%s20934_s1 + $0x1298] sm:$0xff]  }
0x26c3   :  { %v11285_v30 = vsel %vm2925_vm1, %v11284_v59, %v11282_v44  ;;  %16649 = vmatprep.mubr.msk.bf16.mxu1 %vm17527_vm15, %v17526_v17  ;;  %16634 = vmatpush3.bf16.msra.mxu1 %v17384_v3  ;;  %v14011_v56 = vld [vmem:[%s20935_s2 + $0x7e] ss:$0 sm:$0xff]  ;;  %v14012_v59 = vld [vmem:[%s20935_s2 + $0x7f] ss:$0 sm:$0xff] }
0x26c4   :  { %v11286_v19 = vpack.c.b16 %v11285_v30, %v11285_v30  ;;  %16635 = vmatprep.subr.bf16.mxu1 %v17526_v17 }
0x26c6   :  { %16550 = vmatmul.mubr.bf16.vlgmr.msra.gmra.mrb[116].mxu0 %v11286_v19 }
0x26c7   :  { %16574 = vmatpush3.bf16.msra.mxu0 %v17368_v18  ;;  %16589 = vmatprep.mubr.msk.bf16.mxu0 %vm17527_vm15, %v17526_v17  ;;  %v14013_v18 = vld [vmem:[%s20935_s2 + $0x80] ss:$0 sm:$0xff] }
0x26c8   :  { %16575 = vmatprep.subr.bf16.mxu0 %v17526_v17  ;;  %16636 = vmatpush3.bf16.msra.mxu1 %v17386_v42 }
0x26c9   :  { %16637 = vmatprep.subr.bf16.mxu1 %v17526_v17 }
0x26cb   :  { %16576 = vmatpush3.bf16.msra.mxu0 %v17369_v26  ;;  %v14090_v26 = vld [vmem:[%s20935_s2 + $0x85] ss:$0 sm:$0xff] }
0x26cc   :  { %16577 = vmatprep.subr.bf16.mxu0 %v17526_v17  ;;  %16638 = vmatpush3.bf16.msra.mxu1 %v17388_v47 }
0x26cd   :  { %16639 = vmatprep.subr.bf16.mxu1 %v17526_v17 }
0x26cf   :  { %16578 = vmatpush3.bf16.msra.mxu0 %v17370_v63 }
0x26d0   :  { %16579 = vmatprep.subr.bf16.mxu0 %v17526_v17  ;;  %16640 = vmatpush3.bf16.msra.mxu1 %v17390_v22 }
0x26d1   :  { %16641 = vmatprep.subr.bf16.mxu1 %v17526_v17 }
0x26d3   :  { %16580 = vmatpush3.bf16.msra.mxu0 %v17371_v28 }
0x26d4   :  { %16581 = vmatprep.subr.bf16.mxu0 %v17526_v17  ;;  %16642 = vmatpush3.bf16.msra.mxu1 %v17392_v33 }
0x26d5   :  { %16643 = vmatprep.subr.bf16.mxu1 %v17526_v17 }
0x26d7   :  { %16582 = vmatpush3.bf16.msra.mxu0 %v17372_v29  ;;  %v14091_v29 = vld [vmem:[%s20935_s2 + $0x86] ss:$0 sm:$0xff] }
0x26d8   :  { %16583 = vmatprep.subr.bf16.mxu0 %v17526_v17  ;;  %16644 = vmatpush3.bf16.msra.mxu1 %v17394_v61 }
0x26d9   :  { %16645 = vmatprep.subr.bf16.mxu1 %v17526_v17 }
0x26db   :  { %16584 = vmatpush3.bf16.msra.mxu0 %v17373_v36 }
0x26dc   :  { %16585 = vmatprep.subr.bf16.mxu0 %v17526_v17  ;;  %16646 = vmatpush3.bf16.msra.mxu1 %v17396_v62 }
0x26dd   :  { %16647 = vmatprep.subr.bf16.mxu1 %v17526_v17 }
0x26df   :  { %16586 = vmatpush3.bf16.msra.mxu0 %v17374_v4 }
0x26e0   :  { %16587 = vmatprep.subr.bf16.mxu0 %v17526_v17  ;;  %16648 = vmatpush3.bf16.msra.mxu1 %v17398_v0 }
0x26e3   :  { %16588 = vmatpush3.bf16.msra.mxu0 %v17375_v8 }
0x26e4   :  { %16613 = vmatprep.subr.bf16.mxu0 %v17526_v17 }
0x26e6   :  { %16590 = vmatmul.mubr.bf16.vlgmr.msra.gmra.mrb[120].mxu0 %v11286_v19 }
0x26e7   :  { %16629 = vmatprep.mubr.msk.bf16.mxu0 %vm17527_vm15, %v17526_v17  ;;  %16614 = vmatpush3.bf16.msra.mxu0 %v17376_v34 }
0x26e8   :  { %16615 = vmatprep.subr.bf16.mxu0 %v17526_v17 }
0x26eb   :  { %16616 = vmatpush3.bf16.msra.mxu0 %v17377_v37 }
0x26ec   :  { %16617 = vmatprep.subr.bf16.mxu0 %v17526_v17 }
0x26ef   :  { %16618 = vmatpush3.bf16.msra.mxu0 %v17378_v49 }
0x26f0   :  { %16619 = vmatprep.subr.bf16.mxu0 %v17526_v17 }
0x26f3   :  { %16620 = vmatpush3.bf16.msra.mxu0 %v17379_v5 }
0x26f4   :  { %16621 = vmatprep.subr.bf16.mxu0 %v17526_v17 }
0x26f7   :  { %16622 = vmatpush3.bf16.msra.mxu0 %v17380_v38 }
0x26f8   :  { %16623 = vmatprep.subr.bf16.mxu0 %v17526_v17 }
0x26fb   :  { %16624 = vmatpush3.bf16.msra.mxu0 %v17381_v25 }
0x26fc   :  { %16625 = vmatprep.subr.bf16.mxu0 %v17526_v17 }
0x26ff   :  { %16626 = vmatpush3.bf16.msra.mxu0 %v17382_v9 }
0x2700   :  { %16627 = vmatprep.subr.bf16.mxu0 %v17526_v17 }
0x2703   :  { %16628 = vmatpush3.bf16.msra.mxu0 %v17383_v54 }
0x2704   :  { %16653 = vmatprep.subr.bf16.mxu0 %v17526_v17 }
0x2775   :  { %v11466_v43 = vpop.f32.mrb[140].mxu1 }
0x2776   :  { %v16571_v58 = vpop.f32.mrb[141].mxu1 }
0x2777   :  { %v11469_v41 = vpop.f32.mrb[142].mxu1 }
0x2778   :  { %v16572_v10 = vpop.f32.mrb[143].mxu1 }
0x2795   :  { %v11694_v11 = vpop.f32.mrb[144].mxu1 }
0x2796   :  { %v16611_v15 = vpop.f32.mrb[145].mxu1 }
0x2797   :  { %v11697_v39 = vpop.f32.mrb[146].mxu1 }
0x2798   :  { %v16612_v46 = vpop.f32.mrb[147].mxu1 }
0x2799   :  { %v11370_v2 = vpop.f32.mrb[116].mxu0 }
0x279a   :  { %v11467_v7 = vadd.f32 %v11466_v43, %v11370_v2  ;;  %v16551_v13 = vpop.f32.mrb[117].mxu0 }
0x279b   :  { %v11373_v35 = vpop.f32.mrb[118].mxu0 }
0x279c   :  { %v16552_v12 = vpop.f32.mrb[119].mxu0  ;;  %v11477_v44 = vadd.f32 %v14011_v56, %v11467_v7 }
0x279e   :  { %v11483_v30 = vmul.f32 %v14012_v59, %v11477_v44 }
0x27a0   :  { %v11489_v4 = vadd.f32 %v14013_v18, %v11483_v30 }
0x27a2   :  { %v11842_v49 = vmul.f32 0.75, %v11489_v4 }
0x27b9   :  { %v11606_v6 = vpop.f32.mrb[120].mxu0 }
0x27ba   :  { %v11695_v24 = vadd.f32 %v11694_v11, %v11606_v6  ;;  %v16591_v52 = vpop.f32.mrb[121].mxu0 }
0x27bb   :  { %v11609_v14 = vpop.f32.mrb[122].mxu0 }
0x27bc   :  { %v11705_v1 = vadd.f32 %v14062_v23, %v11695_v24  ;;  %v16592_v50 = vpop.f32.mrb[123].mxu0 }
0x27be   :  { %v11706_v32 = vmax.f32 %v11705_v1, 0.0 }
0x27c0   :  { %v11712_v20 = vmul.f32 %v14063_v16, %v11706_v32 }
0x27c2   :  { %v11718_v31 = vadd.f32 %v14064_v51, %v11712_v20 }
0x27c4   :  { %v11719_v48 = vpack.c.bf16 %v11718_v31, %v11718_v31 }
0x27c6   :  { %16630 = vmatmul.mubr.bf16.vlgmr.msra.gmra.mrb[124].mxu0 %v11719_v48 }
0x27c7   :  { %16654 = vmatpush3.bf16.msra.mxu0 %v17385_v55  ;;  %16669 = vmatprep.mubr.msk.bf16.mxu0 %vm17527_vm15, %v17526_v17 }
0x27c8   :  { %16655 = vmatprep.subr.bf16.mxu0 %v17526_v17 }
0x27cb   :  { %16656 = vmatpush3.bf16.msra.mxu0 %v17387_v40 }
0x27cc   :  { %16657 = vmatprep.subr.bf16.mxu0 %v17526_v17 }
0x27cf   :  { %16658 = vmatpush3.bf16.msra.mxu0 %v17389_v27 }
0x27d0   :  { %16659 = vmatprep.subr.bf16.mxu0 %v17526_v17 }
0x27d3   :  { %16660 = vmatpush3.bf16.msra.mxu0 %v17391_v57 }
0x27d4   :  { %16661 = vmatprep.subr.bf16.mxu0 %v17526_v17 }
0x27d7   :  { %16662 = vmatpush3.bf16.msra.mxu0 %v17393_v60 }
0x27d8   :  { %16663 = vmatprep.subr.bf16.mxu0 %v17526_v17 }
0x27db   :  { %16664 = vmatpush3.bf16.msra.mxu0 %v17395_v53 }
0x27dc   :  { %16665 = vmatprep.subr.bf16.mxu0 %v17526_v17 }
0x27df   :  { %16666 = vmatpush3.bf16.msra.mxu0 %v17397_v45 }
0x27e0   :  { %16667 = vmatprep.subr.bf16.mxu0 %v17526_v17  ;;  %v14081_v17 = vld [vmem:[%s20935_s2 + $0x84] ss:$0 sm:$0xff] }
0x27e3   :  { %16668 = vmatpush3.bf16.msra.mxu0 %v17399_v21 }
0x2899   :  { %v11824_v19 = vpop.f32.mrb[124].mxu0 }
0x289a   :  { %v11825_v63 = vadd.f32 %v14081_v17, %v11824_v19  ;;  %v16631_v28 = vpop.f32.mrb[125].mxu0 }
0x289b   :  { %v11827_v36 = vpop.f32.mrb[126].mxu0 }
0x289c   :  { %v11835_v8 = vmul.f32 %v14090_v26, %v11825_v63  ;;  %v16632_v34 = vpop.f32.mrb[127].mxu0 }
0x289e   :  { %v11841_v37 = vadd.f32 %v14091_v29, %v11835_v8 }
0x28a0   :  { %v11843_v5 = vmul.f32 0.25, %v11841_v37 }
0x28a2   :  { %v11844_v38 = vadd.f32 %v11843_v5, %v11842_v49 }
0x28a4   :  { %12093 = vst [vmem:[#allocation4] sm:$0x3] %v11844_v38  ;;  %v11845_v25 = vpack.c.bf16 %v11844_v38, %v11844_v38 }
0x28a6   :  { %16650 = vmatmul.mubr.bf16.vlgmr.msra.gmra.mrb[148].mxu1 %v11845_v25  ;;  %16670 = vmatmul.mubr.bf16.vlgmr.msra.gmra.mrb[128].mxu0 %v11845_v25 }
0x28a7   :  { %17489 = shalt.err (!%p17486_p4)
}
0x28a8   :  { %s17490_s20 = scalar_lea.hbm %s20937_s4, 32 }
0x28a9   :  { %p17491_p5 = scmp.ne.s32.totalorder %s20937_s4, %s17490_s20  ;;  %p17494_p6 = scmp.lt.u32.totalorder %s17490_s20, %s20937_s4 }
0x28ab   :  { %p17496_p7 = pnand %p17494_p6, %p17491_p5 }
0x28ad   :  { %17499 = shalt.err (!%p17496_p7)
}
0x28ae   :  { %12114 = dma.vmem_to_hbm [thread:$0]  %s12112_s16, 32, %s20937_s4, [#allocation5]   ;;  %v14108_v9 = vld [vmem:[%s20935_s2 + $0x87] ss:$0 sm:$0xff]  ;;  %v14135_v54 = vld [vmem:[%s20935_s2 + $0x8a] ss:$0 sm:$0xff] }
0x28af   :  { %v14117_v42 = vld [vmem:[%s20935_s2 + $0x88] ss:$0 sm:$0xff]  ;;  %v14144_v22 = vld [vmem:[%s20935_s2 + $0x8b] ss:$0 sm:$0xff]  ;;  %v14118_v15 = vld [vmem:[%s20935_s2 + $0x89] ss:$0 sm:$0xff] }
0x28b0   :  { %v14145_v39 = vld [vmem:[%s20935_s2 + $0x8c] ss:$0 sm:$0xff]  ;;  %s17530_s11 = smov [#allocation2]  }
0x28b1   :  { %s12101_s1 = sshll.u32 %s17530_s11, 4  ;;  %s12102_s1 = int_to_ptr.vmem [resolvable:$true] %s12101_s1 }
0x28b2   :  { %s17500_s12 = scalar_lea.vmem %s12102_s1, 32  ;;  %p17505_p9 = scmp.lt.s32.totalorder %s12102_s1, %s12102_s1 }
0x28b3   :  { %p17501_p8 = scmp.ne.s32.totalorder %s12102_s1, %s17500_s12  ;;  %p17506_p10 = scmp.lt.s32.totalorder %s17500_s12, %s17500_s12 }
0x28b5   :  { %p17507_p11 = por %p17506_p10, %p17505_p9 }
0x28b7   :  { %p17508_p12 = pnand %p17507_p11, %p17501_p8 }
0x2979   :  { %v11950_v3 = vpop.f32.mrb[148].mxu1  ;;  %v12073_v47 = vpop.f32.mrb[128].mxu0 }
0x297a   :  { %v11951_v33 = vadd.f32 %v14108_v9, %v11950_v3  ;;  %v12074_v43 = vadd.f32 %v14135_v54, %v12073_v47  ;;  %v16651_v58 = vpop.f32.mrb[149].mxu1  ;;  %v16671_v41 = vpop.f32.mrb[129].mxu0 }
0x297b   :  { %v11953_v10 = vpop.f32.mrb[150].mxu1  ;;  %v12076_v11 = vpop.f32.mrb[130].mxu0 }
0x297c   :  { %v11961_v46 = vmul.f32 %v14117_v42, %v11951_v33  ;;  %v12084_v2 = vmul.f32 %v14144_v22, %v12074_v43  ;;  %v16652_v7 = vpop.f32.mrb[151].mxu1  ;;  %v16672_v13 = vpop.f32.mrb[131].mxu0 }
0x297e   :  { %v11967_v35 = vadd.f32 %v14118_v15, %v11961_v46  ;;  %v12090_v12 = vadd.f32 %v14145_v39, %v12084_v2 }
0x2980   :  { %v11968_v6 = vmul.f32 0.75, %v11967_v35  ;;  %v12091_v23 = vmul.f32 0.25, %v12090_v12 }
0x2982   :  { %v12092_v24 = vadd.f32 %v12091_v23, %v11968_v6 }
0x2984   :  { %12094 = vst [vmem:[#allocation2] sm:$0x3] %v12092_v24 }
0x2985   :  { %17511 = shalt.err (!%p17508_p12)
}
0x2986   :  { %s17512_s14 = scalar_lea.hbm %s20936_s3, 32 }
0x2987   :  { %p17513_p13 = scmp.ne.s32.totalorder %s20936_s3, %s17512_s14  ;;  %p17516_p0 = scmp.lt.u32.totalorder %s17512_s14, %s20936_s3 }
0x2989   :  { %p17518_p1 = pnand %p17516_p0, %p17513_p13 }
0x298b   :  { %17521 = shalt.err (!%p17518_p1)
}
0x298c   :  { %12104 = dma.vmem_to_hbm [thread:$0]  %s12102_s1, 32, %s20936_s3, [#allocation3]  }
0x298d   :  { %17522 = dma.done.wait [#allocation3], 32  }
0x298e   :  { %17523 = vsyncadd [#allocation3], 4294967264 }
0x298f   :  { %17524 = dma.done.wait [#allocation5], 32  }
0x2990   :  { %17525 = vsyncadd [#allocation5], 4294967264 }
0x2991   :  { %12121 = vsyncpa [#allocation3], 1 }
0x2992   :  { %12122 = vsyncpa [#allocation5], 1 }

</bundles_post_ra>
